<compile_context>
chip_gen: v7x
topology: tpu7x:2x2x1
jax: 0.10.0
libtpu: 0.0.40
codegen_flags: <defaults>
</compile_context>

<pallas_src>
import jax
import jax.numpy as jnp
from jax.experimental import pallas as pl
from jax.experimental.pallas import tpu as pltpu

M_DIM = 500      # self.M
L_DIM = 128      # self.L
BRANCHES = 1     # self.ATTENTION_BRANCHES
C1 = 20          # conv1 out channels
C2 = 50          # conv2 out channels
KSIZE = 5

VMEM_LIMIT = 32 * 1024 * 1024   # explicit scoped-VMEM limit (safe on v5e/v6e/v7x)


# ---------------------------------------------------------------------------
# Kernel 1: conv1 (matmul) + bias + ReLU + 2x2 max-pool, phase-major rows
# ---------------------------------------------------------------------------
def _conv1_pool_kernel(p_ref, w_ref, b_ref, o_ref):
    # p_ref: (4, T, 25) bf16 -- phase ph=(a,b) major, rows (k, io, jo) within.
    w = w_ref[...]
    m = jnp.dot(p_ref[0], w, preferred_element_type=jnp.float32)
    for ph in range(1, 4):
        m = jnp.maximum(m, jnp.dot(p_ref[ph], w, preferred_element_type=jnp.float32))
    # relu(max_ph(x@w) + b) == maxpool(relu(conv + b)):  +b and relu are monotone.
    o_ref[...] = jnp.maximum(m + b_ref[...], 0.0).astype(o_ref.dtype)


def conv1_pool(p1, w1, b1):
    phases, rows, cols = p1.shape              # (4, K*144, 25)
    c_out = w1.shape[1]
    n_tiles = 2 if rows % 32 == 0 else 1       # 2 row tiles -> both TCs on v7x
    tile = rows // n_tiles
    return pl.pallas_call(
        _conv1_pool_kernel,
        grid=(n_tiles,),
        out_shape=jax.ShapeDtypeStruct((rows, c_out), jnp.bfloat16),
        in_specs=[
            pl.BlockSpec((phases, tile, cols), lambda i: (0, i, 0)),
            pl.BlockSpec((cols, c_out), lambda i: (0, 0)),
            pl.BlockSpec((1, c_out), lambda i: (0, 0)),
        ],
        out_specs=pl.BlockSpec((tile, c_out), lambda i: (i, 0)),
        compiler_params=pltpu.CompilerParams(
            dimension_semantics=("parallel",),
            vmem_limit_bytes=VMEM_LIMIT),
    )(p1, w1, b1)


# ---------------------------------------------------------------------------
# Kernel 2: conv2 + pool + fc1 + ReLU + attention + softmax + pool + classifier
# ---------------------------------------------------------------------------
def _make_tail_kernel(k):
    def kernel(p2_ref, w2_ref, b2_ref, w1r_ref, b1_ref, wa_ref, ba_ref,
               w2a_ref, b2a_ref, wc_ref, bc_ref, yprob_ref, a_ref):
        # ---- conv2 (matmul) + bias + ReLU + 2x2 max-pool (phase-major rows)
        w2 = w2_ref[...]
        m = jnp.dot(p2_ref[0], w2, preferred_element_type=jnp.float32)
        for ph in range(1, 4):
            m = jnp.maximum(m, jnp.dot(p2_ref[ph], w2,
                                       preferred_element_type=jnp.float32))
        pooled = jnp.maximum(m + b2_ref[...], 0.0)          # (16k, C2) rows (po,qo,k)

        # ---- fc1 (Linear 800 -> 500) as 16 spatial-position matmuls + ReLU
        h = jnp.dot(pooled[0:k].astype(jnp.bfloat16), w1r_ref[0],
                    preferred_element_type=jnp.float32)
        for p in range(1, 16):
            h = h + jnp.dot(pooled[p * k:(p + 1) * k].astype(jnp.bfloat16),
                            w1r_ref[p], preferred_element_type=jnp.float32)
        H = jnp.maximum(h + b1_ref[...], 0.0)               # (k, M)

        # ---- attention: tanh(H @ Wa + ba), lane-dense scores, softmax over bag
        t = jnp.tanh(jnp.dot(H.astype(jnp.bfloat16), wa_ref[...],
                             preferred_element_type=jnp.float32) + ba_ref[...])
        s = jnp.dot(w2a_ref[...], t.T,
                    preferred_element_type=jnp.float32) + b2a_ref[...]    # (1, k)
        s = s - jnp.max(s, axis=-1, keepdims=True)
        e = jnp.exp(s)
        a_row = e * pl.reciprocal(jnp.sum(e, axis=-1, keepdims=True), approx=True)

        # ---- attention pooling + classifier + sigmoid
        z = jnp.dot(a_row, H, preferred_element_type=jnp.float32)         # (1, M)
        y = jnp.sum(z * wc_ref[...], axis=-1, keepdims=True) + bc_ref[...]
        yprob_ref[...] = jax.nn.sigmoid(y)
        a_ref[...] = a_row                                                 # (1, k)
    return kernel


def fused_tail(p2, w2, b2, w1r, b1, wa, ba, w2a, b2a, wc, bc):
    phases, rows, p2cols = p2.shape          # (4, 16*K, 500)
    k = rows // 16
    c2 = w2.shape[1]
    m_dim = wa.shape[0]
    l_dim = wa.shape[1]
    return pl.pallas_call(
        _make_tail_kernel(k),
        grid=(1,),
        out_shape=(jax.ShapeDtypeStruct((1, 1), jnp.float32),
                   jax.ShapeDtypeStruct((1, k), jnp.float32)),
        in_specs=[
            pl.BlockSpec((phases, rows, p2cols), lambda i: (0, 0, 0)),
            pl.BlockSpec((p2cols, c2), lambda i: (0, 0)),
            pl.BlockSpec((1, c2), lambda i: (0, 0)),
            pl.BlockSpec((16, c2, m_dim), lambda i: (0, 0, 0)),
            pl.BlockSpec((1, m_dim), lambda i: (0, 0)),
            pl.BlockSpec((m_dim, l_dim), lambda i: (0, 0)),
            pl.BlockSpec((1, l_dim), lambda i: (0, 0)),
            pl.BlockSpec((1, l_dim), lambda i: (0, 0)),
            pl.BlockSpec((1, 1), lambda i: (0, 0)),
            pl.BlockSpec((1, m_dim), lambda i: (0, 0)),
            pl.BlockSpec((1, 1), lambda i: (0, 0)),
        ],
        out_specs=(pl.BlockSpec((1, 1), lambda i: (0, 0)),
                   pl.BlockSpec((1, k), lambda i: (0, 0))),
        compiler_params=pltpu.CompilerParams(
            dimension_semantics=("arbitrary",),
            vmem_limit_bytes=VMEM_LIMIT),
    )(p2, w2, b2, w1r, b1, wa, ba, w2a, b2a, wc, bc)


# ---------------------------------------------------------------------------
# Parameters (PyTorch layouts) + one-time relayout to kernel-friendly layouts
# ---------------------------------------------------------------------------
def init_params(key):
    ks = jax.random.split(key, 8)
    s = 0.05
    return {
        "conv1_w": s * jax.random.normal(ks[0], (C1, 1, KSIZE, KSIZE), jnp.float32),
        "conv1_b": jnp.zeros((C1,), jnp.float32),
        "conv2_w": s * jax.random.normal(ks[1], (C2, C1, KSIZE, KSIZE), jnp.float32),
        "conv2_b": jnp.zeros((C2,), jnp.float32),
        "fc1_w": s * jax.random.normal(ks[2], (C2 * 4 * 4, M_DIM), jnp.float32),
        "fc1_b": jnp.zeros((M_DIM,), jnp.float32),
        "attn_w1": s * jax.random.normal(ks[3], (M_DIM, L_DIM), jnp.float32),
        "attn_b1": jnp.zeros((L_DIM,), jnp.float32),
        "attn_w2": s * jax.random.normal(ks[4], (L_DIM, BRANCHES), jnp.float32),
        "attn_b2": jnp.zeros((BRANCHES,), jnp.float32),
        "clf_w": s * jax.random.normal(ks[5], (M_DIM * BRANCHES, 1), jnp.float32),
        "clf_b": jnp.zeros((1,), jnp.float32),
    }


def prepare_params(p):
    """One-time relayout/cast of PyTorch-layout params into kernel layouts."""
    bf16, f32 = jnp.bfloat16, jnp.float32
    # conv1 weight: (20,1,5,5) -> (25, 20), row order (di, dj)
    w1 = p["conv1_w"].reshape(C1, KSIZE * KSIZE).T
    # conv2 weight: (50,20,5,5) -> (500, 50), row order (di, dj, cin)
    w2 = p["conv2_w"].transpose(2, 3, 1, 0).reshape(KSIZE * KSIZE * C1, C2)
    # fc1 weight regrouped per spatial position of the 4x4 pooled map,
    # channels-last: w1r[h*4+w, c, :] == fc1_w[c*16 + h*4 + w, :]
    w1r = p["fc1_w"].reshape(C2, 4, 4, M_DIM).transpose(1, 2, 0, 3).reshape(16, C2, M_DIM)
    return {
        "w1": w1.astype(bf16), "b1": p["conv1_b"].reshape(1, C1).astype(f32),
        "w2": w2.astype(bf16), "b2": p["conv2_b"].reshape(1, C2).astype(f32),
        "w1r": w1r.astype(bf16), "b1fc": p["fc1_b"].reshape(1, M_DIM).astype(f32),
        "wa": p["attn_w1"].astype(bf16), "ba": p["attn_b1"].reshape(1, L_DIM).astype(f32),
        "w2a": p["attn_w2"].T.astype(f32),          # (1, L) lane-dense row
        "b2a": p["attn_b2"].reshape(1, 1).astype(f32),
        "wc": p["clf_w"].T.astype(f32),             # (1, M) lane-dense row
        "bc": p["clf_b"].reshape(1, 1).astype(f32),
    }


# ---------------------------------------------------------------------------
# Forward pass
# ---------------------------------------------------------------------------
@jax.jit
def forward(prep, x):
    # x: (1, K, 1, 28, 28) -> (K, 28, 28)   (Cin == 1)
    k = x.shape[1]
    x3 = x.reshape(k, 28, 28).astype(jnp.bfloat16)

    # TODO(synk): the sliding-window im2col gathers below stay in XLA glue; a
    # data-dependent window gather is not expressible as a Pallas BlockSpec.

    # phase-major im2col for conv1:
    #   p1[a*2+b, kk*144 + io*12 + jo, di*5+dj] = x[kk, 2*io+a+di, 2*jo+b+dj]
    sh1 = jnp.stack([x3[:, di:di + 24, dj:dj + 24]
                     for di in range(KSIZE) for dj in range(KSIZE)], axis=-1)   # (K,24,24,25)
    sh1 = sh1.reshape(k, 12, 2, 12, 2, KSIZE * KSIZE)
    p1 = sh1.transpose(2, 4, 0, 1, 3, 5).reshape(4, k * 144, KSIZE * KSIZE)

    pooled1 = conv1_pool(p1, prep["w1"], prep["b1"])        # (K*144, 20) bf16, rows (k,io,jo)
    pooled1 = pooled1.reshape(k, 12, 12, C1)                # channels-last

    # phase-major im2col for conv2, within-phase rows ordered (po, qo, k):
    sh2 = jnp.stack([pooled1[:, di:di + 8, dj:dj + 8, :]
                     for di in range(KSIZE) for dj in range(KSIZE)], axis=3)    # (K,8,8,25,20)
    sh2 = sh2.reshape(k, 4, 2, 4, 2, KSIZE * KSIZE, C1)
    p2 = sh2.transpose(2, 4, 1, 3, 0, 5, 6).reshape(4, 16 * k, KSIZE * KSIZE * C1)

    y_prob, A = fused_tail(p2, prep["w2"], prep["b2"], prep["w1r"], prep["b1fc"],
                           prep["wa"], prep["ba"], prep["w2a"], prep["b2a"],
                           prep["wc"], prep["bc"])
    y_hat = (y_prob >= 0.5).astype(jnp.float32)
    return y_prob, y_hat, A


if __name__ == "__main__":
    key = jax.random.PRNGKey(0)
    kp, kx = jax.random.split(key)
    params = init_params(kp)
    prep = prepare_params(params)

    # bag of K=8 instances of 1x28x28 images (28x28 required by the 50*4*4 flatten)
    x = jax.random.normal(kx, (1, 8, 1, 28, 28), jnp.float32)

    y_prob, y_hat, A = forward(prep, x)
    jax.block_until_ready((y_prob, y_hat, A))

    assert y_prob.shape == (1, 1)
    assert y_hat.shape == (1, 1)
    assert A.shape == (1, 8)
    # softmax over the bag sums to ~1 (approx reciprocal on the EUP -> loose tol)
    assert abs(float(A.sum()) - 1.0) < 2e-3

    print("KERNEL_OK")
</pallas_src>

<mosaic_0001>
module attributes {stable_mosaic.version = 11 : i64} {
  func.func @_conv1_pool_kernel(%arg0: i32, %arg1: memref<4x576x25xbf16, #tpu.memory_space<vmem>>, %arg2: memref<25x20xbf16, #tpu.memory_space<vmem>>, %arg3: memref<1x20xf32, #tpu.memory_space<vmem>>, %arg4: memref<576x20xbf16, #tpu.memory_space<vmem>>) attributes {dimension_semantics = [#tpu.dimension_semantics<parallel>], iteration_bounds = array<i64: 2>, scalar_prefetch = 0 : i64, scratch_operands = 0 : i64, tpu.core_type = #tpu.core_type<tc>, window_params = [{transform_indices = @transform_0, window_bounds = array<i64: 4, 576, 25>}, {pipeline_mode = #tpu.pipeline_mode<synchronous>, transform_indices = @transform_1, window_bounds = array<i64: 25, 20>}, {pipeline_mode = #tpu.pipeline_mode<synchronous>, transform_indices = @transform_2, window_bounds = array<i64: 1, 20>}, {transform_indices = @transform_3, window_bounds = array<i64: 576, 20>}]} {
    %c0 = arith.constant 0 : index
    %c0_0 = arith.constant 0 : index
    %0 = vector.load %arg2[%c0, %c0_0] : memref<25x20xbf16, #tpu.memory_space<vmem>>, vector<25x20xbf16>
    %c0_1 = arith.constant 0 : index
    %c0_2 = arith.constant 0 : index
    %c0_3 = arith.constant 0 : index
    %1 = vector.load %arg1[%c0_1, %c0_2, %c0_3] : memref<4x576x25xbf16, #tpu.memory_space<vmem>>, vector<1x576x25xbf16>
    %2 = vector.shape_cast %1 : vector<1x576x25xbf16> to vector<576x25xbf16>
    %cst = arith.constant dense<0.000000e+00> : vector<576x20xf32>
    %3 = tpu.matmul %2, %0, %cst {dimension_numbers = #tpu.dot_dimension_numbers<[1], [0], [0], [1], [0, 0, 1, 1], [], []>} : vector<576x25xbf16>, vector<25x20xbf16>, vector<576x20xf32> -> vector<576x20xf32>
    %c1 = arith.constant 1 : index
    %c0_4 = arith.constant 0 : index
    %c0_5 = arith.constant 0 : index
    %4 = vector.load %arg1[%c1, %c0_4, %c0_5] : memref<4x576x25xbf16, #tpu.memory_space<vmem>>, vector<1x576x25xbf16>
    %5 = vector.shape_cast %4 : vector<1x576x25xbf16> to vector<576x25xbf16>
    %cst_6 = arith.constant dense<0.000000e+00> : vector<576x20xf32>
    %6 = tpu.matmul %5, %0, %cst_6 {dimension_numbers = #tpu.dot_dimension_numbers<[1], [0], [0], [1], [0, 0, 1, 1], [], []>} : vector<576x25xbf16>, vector<25x20xbf16>, vector<576x20xf32> -> vector<576x20xf32>
    %7 = arith.maximumf %3, %6 : vector<576x20xf32>
    %c2 = arith.constant 2 : index
    %c0_7 = arith.constant 0 : index
    %c0_8 = arith.constant 0 : index
    %8 = vector.load %arg1[%c2, %c0_7, %c0_8] : memref<4x576x25xbf16, #tpu.memory_space<vmem>>, vector<1x576x25xbf16>
    %9 = vector.shape_cast %8 : vector<1x576x25xbf16> to vector<576x25xbf16>
    %cst_9 = arith.constant dense<0.000000e+00> : vector<576x20xf32>
    %10 = tpu.matmul %9, %0, %cst_9 {dimension_numbers = #tpu.dot_dimension_numbers<[1], [0], [0], [1], [0, 0, 1, 1], [], []>} : vector<576x25xbf16>, vector<25x20xbf16>, vector<576x20xf32> -> vector<576x20xf32>
    %11 = arith.maximumf %7, %10 : vector<576x20xf32>
    %c3 = arith.constant 3 : index
    %c0_10 = arith.constant 0 : index
    %c0_11 = arith.constant 0 : index
    %12 = vector.load %arg1[%c3, %c0_10, %c0_11] : memref<4x576x25xbf16, #tpu.memory_space<vmem>>, vector<1x576x25xbf16>
    %13 = vector.shape_cast %12 : vector<1x576x25xbf16> to vector<576x25xbf16>
    %cst_12 = arith.constant dense<0.000000e+00> : vector<576x20xf32>
    %14 = tpu.matmul %13, %0, %cst_12 {dimension_numbers = #tpu.dot_dimension_numbers<[1], [0], [0], [1], [0, 0, 1, 1], [], []>} : vector<576x25xbf16>, vector<25x20xbf16>, vector<576x20xf32> -> vector<576x20xf32>
    %15 = arith.maximumf %11, %14 : vector<576x20xf32>
    %c0_13 = arith.constant 0 : index
    %c0_14 = arith.constant 0 : index
    %16 = vector.load %arg3[%c0_13, %c0_14] : memref<1x20xf32, #tpu.memory_space<vmem>>, vector<1x20xf32>
    %17 = vector.broadcast %16 : vector<1x20xf32> to vector<576x20xf32>
    %18 = arith.addf %15, %17 : vector<576x20xf32>
    %cst_15 = arith.constant 0.000000e+00 : f32
    %19 = vector.broadcast %cst_15 : f32 to vector<576x20xf32>
    %20 = arith.maximumf %18, %19 : vector<576x20xf32>
    %21 = arith.truncf %20 : vector<576x20xf32> to vector<576x20xbf16>
    %c0_16 = arith.constant 0 : index
    %c0_17 = arith.constant 0 : index
    %22 = vector.load %arg4[%c0_16, %c0_17] : memref<576x20xbf16, #tpu.memory_space<vmem>>, vector<576x20xbf16>
    tpu.vector_store %arg4[%c0_16, %c0_17], %21 {strides = array<i32>} : memref<576x20xbf16, #tpu.memory_space<vmem>>, vector<576x20xbf16>,
    return
  }
  func.func @transform_0(%arg0: i32) -> (i32, i32, i32) {
    %c0_i32 = arith.constant 0 : i32
    %c0_i32_0 = arith.constant 0 : i32
    %c0_i32_1 = arith.constant 0 : i32
    return %c0_i32, %arg0, %c0_i32_0 : i32, i32, i32
  }
  func.func @transform_1(%arg0: i32) -> (i32, i32) {
    %c0_i32 = arith.constant 0 : i32
    %c0_i32_0 = arith.constant 0 : i32
    %c0_i32_1 = arith.constant 0 : i32
    return %c0_i32, %c0_i32_0 : i32, i32
  }
  func.func @transform_2(%arg0: i32) -> (i32, i32) {
    %c0_i32 = arith.constant 0 : i32
    %c0_i32_0 = arith.constant 0 : i32
    %c0_i32_1 = arith.constant 0 : i32
    return %c0_i32, %c0_i32_0 : i32, i32
  }
  func.func @transform_3(%arg0: i32) -> (i32, i32) {
    %c0_i32 = arith.constant 0 : i32
    %c0_i32_0 = arith.constant 0 : i32
    return %arg0, %c0_i32 : i32, i32
  }
}

module attributes {stable_mosaic.version = 11 : i64} {
  func.func @kernel(%arg0: i32, %arg1: memref<4x128x500xbf16, #tpu.memory_space<vmem>>, %arg2: memref<500x50xbf16, #tpu.memory_space<vmem>>, %arg3: memref<1x50xf32, #tpu.memory_space<vmem>>, %arg4: memref<16x50x500xbf16, #tpu.memory_space<vmem>>, %arg5: memref<1x500xf32, #tpu.memory_space<vmem>>, %arg6: memref<500x128xbf16, #tpu.memory_space<vmem>>, %arg7: memref<1x128xf32, #tpu.memory_space<vmem>>, %arg8: memref<1x128xf32, #tpu.memory_space<vmem>>, %arg9: memref<1x1xf32, #tpu.memory_space<vmem>>, %arg10: memref<1x500xf32, #tpu.memory_space<vmem>>, %arg11: memref<1x1xf32, #tpu.memory_space<vmem>>, %arg12: memref<1x1xf32, #tpu.memory_space<vmem>>, %arg13: memref<1x8xf32, #tpu.memory_space<vmem>>) attributes {dimension_semantics = [#tpu.dimension_semantics<arbitrary>], iteration_bounds = array<i64: 1>, scalar_prefetch = 0 : i64, scratch_operands = 0 : i64, tpu.core_type = #tpu.core_type<tc>, window_params = [{pipeline_mode = #tpu.pipeline_mode<synchronous>, transform_indices = @transform_0, window_bounds = array<i64: 4, 128, 500>}, {pipeline_mode = #tpu.pipeline_mode<synchronous>, transform_indices = @transform_1, window_bounds = array<i64: 500, 50>}, {pipeline_mode = #tpu.pipeline_mode<synchronous>, transform_indices = @transform_2, window_bounds = array<i64: 1, 50>}, {pipeline_mode = #tpu.pipeline_mode<synchronous>, transform_indices = @transform_3, window_bounds = array<i64: 16, 50, 500>}, {pipeline_mode = #tpu.pipeline_mode<synchronous>, transform_indices = @transform_4, window_bounds = array<i64: 1, 500>}, {pipeline_mode = #tpu.pipeline_mode<synchronous>, transform_indices = @transform_5, window_bounds = array<i64: 500, 128>}, {pipeline_mode = #tpu.pipeline_mode<synchronous>, transform_indices = @transform_6, window_bounds = array<i64: 1, 128>}, {pipeline_mode = #tpu.pipeline_mode<synchronous>, transform_indices = @transform_7, window_bounds = array<i64: 1, 128>}, {pipeline_mode = #tpu.pipeline_mode<synchronous>, transform_indices = @transform_8, window_bounds = array<i64: 1, 1>}, {pipeline_mode = #tpu.pipeline_mode<synchronous>, transform_indices = @transform_9, window_bounds = array<i64: 1, 500>}, {pipeline_mode = #tpu.pipeline_mode<synchronous>, transform_indices = @transform_10, window_bounds = array<i64: 1, 1>}, {pipeline_mode = #tpu.pipeline_mode<synchronous>, transform_indices = @transform_11, window_bounds = array<i64: 1, 1>}, {pipeline_mode = #tpu.pipeline_mode<synchronous>, transform_indices = @transform_12, window_bounds = array<i64: 1, 8>}]} {
    %c0 = arith.constant 0 : index
    %c0_0 = arith.constant 0 : index
    %0 = vector.load %arg2[%c0, %c0_0] : memref<500x50xbf16, #tpu.memory_space<vmem>>, vector<500x50xbf16>
    %c0_1 = arith.constant 0 : index
    %c0_2 = arith.constant 0 : index
    %c0_3 = arith.constant 0 : index
    %1 = vector.load %arg1[%c0_1, %c0_2, %c0_3] : memref<4x128x500xbf16, #tpu.memory_space<vmem>>, vector<1x128x500xbf16>
    %2 = vector.shape_cast %1 : vector<1x128x500xbf16> to vector<128x500xbf16>
    %cst = arith.constant dense<0.000000e+00> : vector<128x50xf32>
    %3 = tpu.matmul %2, %0, %cst {dimension_numbers = #tpu.dot_dimension_numbers<[1], [0], [0], [1], [0, 0, 1, 1], [], []>} : vector<128x500xbf16>, vector<500x50xbf16>, vector<128x50xf32> -> vector<128x50xf32>
    %c1 = arith.constant 1 : index
    %c0_4 = arith.constant 0 : index
    %c0_5 = arith.constant 0 : index
    %4 = vector.load %arg1[%c1, %c0_4, %c0_5] : memref<4x128x500xbf16, #tpu.memory_space<vmem>>, vector<1x128x500xbf16>
    %5 = vector.shape_cast %4 : vector<1x128x500xbf16> to vector<128x500xbf16>
    %cst_6 = arith.constant dense<0.000000e+00> : vector<128x50xf32>
    %6 = tpu.matmul %5, %0, %cst_6 {dimension_numbers = #tpu.dot_dimension_numbers<[1], [0], [0], [1], [0, 0, 1, 1], [], []>} : vector<128x500xbf16>, vector<500x50xbf16>, vector<128x50xf32> -> vector<128x50xf32>
    %7 = arith.maximumf %3, %6 : vector<128x50xf32>
    %c2 = arith.constant 2 : index
    %c0_7 = arith.constant 0 : index
    %c0_8 = arith.constant 0 : index
    %8 = vector.load %arg1[%c2, %c0_7, %c0_8] : memref<4x128x500xbf16, #tpu.memory_space<vmem>>, vector<1x128x500xbf16>
    %9 = vector.shape_cast %8 : vector<1x128x500xbf16> to vector<128x500xbf16>
    %cst_9 = arith.constant dense<0.000000e+00> : vector<128x50xf32>
    %10 = tpu.matmul %9, %0, %cst_9 {dimension_numbers = #tpu.dot_dimension_numbers<[1], [0], [0], [1], [0, 0, 1, 1], [], []>} : vector<128x500xbf16>, vector<500x50xbf16>, vector<128x50xf32> -> vector<128x50xf32>
    %11 = arith.maximumf %7, %10 : vector<128x50xf32>
    %c3 = arith.constant 3 : index
    %c0_10 = arith.constant 0 : index
    %c0_11 = arith.constant 0 : index
    %12 = vector.load %arg1[%c3, %c0_10, %c0_11] : memref<4x128x500xbf16, #tpu.memory_space<vmem>>, vector<1x128x500xbf16>
    %13 = vector.shape_cast %12 : vector<1x128x500xbf16> to vector<128x500xbf16>
    %cst_12 = arith.constant dense<0.000000e+00> : vector<128x50xf32>
    %14 = tpu.matmul %13, %0, %cst_12 {dimension_numbers = #tpu.dot_dimension_numbers<[1], [0], [0], [1], [0, 0, 1, 1], [], []>} : vector<128x500xbf16>, vector<500x50xbf16>, vector<128x50xf32> -> vector<128x50xf32>
    %15 = arith.maximumf %11, %14 : vector<128x50xf32>
    %c0_13 = arith.constant 0 : index
    %c0_14 = arith.constant 0 : index
    %16 = vector.load %arg3[%c0_13, %c0_14] : memref<1x50xf32, #tpu.memory_space<vmem>>, vector<1x50xf32>
    %17 = vector.broadcast %16 : vector<1x50xf32> to vector<128x50xf32>
    %18 = arith.addf %15, %17 : vector<128x50xf32>
    %cst_15 = arith.constant 0.000000e+00 : f32
    %19 = vector.broadcast %cst_15 : f32 to vector<128x50xf32>
    %20 = arith.maximumf %18, %19 : vector<128x50xf32>
    %21 = vector.extract_strided_slice %20 {offsets = [0, 0], sizes = [8, 50], strides = [1, 1]} : vector<128x50xf32> to vector<8x50xf32>
    %22 = arith.truncf %21 : vector<8x50xf32> to vector<8x50xbf16>
    %c0_16 = arith.constant 0 : index
    %c0_17 = arith.constant 0 : index
    %c0_18 = arith.constant 0 : index
    %23 = vector.load %arg4[%c0_16, %c0_17, %c0_18] : memref<16x50x500xbf16, #tpu.memory_space<vmem>>, vector<1x50x500xbf16>
    %24 = vector.shape_cast %23 : vector<1x50x500xbf16> to vector<50x500xbf16>
    %cst_19 = arith.constant dense<0.000000e+00> : vector<8x500xf32>
    %25 = tpu.matmul %22, %24, %cst_19 {dimension_numbers = #tpu.dot_dimension_numbers<[1], [0], [0], [1], [0, 0, 1, 1], [], []>} : vector<8x50xbf16>, vector<50x500xbf16>, vector<8x500xf32> -> vector<8x500xf32>
    %26 = vector.extract_strided_slice %20 {offsets = [8, 0], sizes = [8, 50], strides = [1, 1]} : vector<128x50xf32> to vector<8x50xf32>
    %27 = arith.truncf %26 : vector<8x50xf32> to vector<8x50xbf16>
    %c1_20 = arith.constant 1 : index
    %c0_21 = arith.constant 0 : index
    %c0_22 = arith.constant 0 : index
    %28 = vector.load %arg4[%c1_20, %c0_21, %c0_22] : memref<16x50x500xbf16, #tpu.memory_space<vmem>>, vector<1x50x500xbf16>
    %29 = vector.shape_cast %28 : vector<1x50x500xbf16> to vector<50x500xbf16>
    %cst_23 = arith.constant dense<0.000000e+00> : vector<8x500xf32>
    %30 = tpu.matmul %27, %29, %cst_23 {dimension_numbers = #tpu.dot_dimension_numbers<[1], [0], [0], [1], [0, 0, 1, 1], [], []>} : vector<8x50xbf16>, vector<50x500xbf16>, vector<8x500xf32> -> vector<8x500xf32>
    %31 = arith.addf %25, %30 : vector<8x500xf32>
    %32 = vector.extract_strided_slice %20 {offsets = [16, 0], sizes = [8, 50], strides = [1, 1]} : vector<128x50xf32> to vector<8x50xf32>
    %33 = arith.truncf %32 : vector<8x50xf32> to vector<8x50xbf16>
    %c2_24 = arith.constant 2 : index
    %c0_25 = arith.constant 0 : index
    %c0_26 = arith.constant 0 : index
    %34 = vector.load %arg4[%c2_24, %c0_25, %c0_26] : memref<16x50x500xbf16, #tpu.memory_space<vmem>>, vector<1x50x500xbf16>
    %35 = vector.shape_cast %34 : vector<1x50x500xbf16> to vector<50x500xbf16>
    %cst_27 = arith.constant dense<0.000000e+00> : vector<8x500xf32>
    %36 = tpu.matmul %33, %35, %cst_27 {dimension_numbers = #tpu.dot_dimension_numbers<[1], [0], [0], [1], [0, 0, 1, 1], [], []>} : vector<8x50xbf16>, vector<50x500xbf16>, vector<8x500xf32> -> vector<8x500xf32>
    %37 = arith.addf %31, %36 : vector<8x500xf32>
    %38 = vector.extract_strided_slice %20 {offsets = [24, 0], sizes = [8, 50], strides = [1, 1]} : vector<128x50xf32> to vector<8x50xf32>
    %39 = arith.truncf %38 : vector<8x50xf32> to vector<8x50xbf16>
    %c3_28 = arith.constant 3 : index
    %c0_29 = arith.constant 0 : index
    %c0_30 = arith.constant 0 : index
    %40 = vector.load %arg4[%c3_28, %c0_29, %c0_30] : memref<16x50x500xbf16, #tpu.memory_space<vmem>>, vector<1x50x500xbf16>
    %41 = vector.shape_cast %40 : vector<1x50x500xbf16> to vector<50x500xbf16>
    %cst_31 = arith.constant dense<0.000000e+00> : vector<8x500xf32>
    %42 = tpu.matmul %39, %41, %cst_31 {dimension_numbers = #tpu.dot_dimension_numbers<[1], [0], [0], [1], [0, 0, 1, 1], [], []>} : vector<8x50xbf16>, vector<50x500xbf16>, vector<8x500xf32> -> vector<8x500xf32>
    %43 = arith.addf %37, %42 : vector<8x500xf32>
    %44 = vector.extract_strided_slice %20 {offsets = [32, 0], sizes = [8, 50], strides = [1, 1]} : vector<128x50xf32> to vector<8x50xf32>
    %45 = arith.truncf %44 : vector<8x50xf32> to vector<8x50xbf16>
    %c4 = arith.constant 4 : index
    %c0_32 = arith.constant 0 : index
    %c0_33 = arith.constant 0 : index
    %46 = vector.load %arg4[%c4, %c0_32, %c0_33] : memref<16x50x500xbf16, #tpu.memory_space<vmem>>, vector<1x50x500xbf16>
    %47 = vector.shape_cast %46 : vector<1x50x500xbf16> to vector<50x500xbf16>
    %cst_34 = arith.constant dense<0.000000e+00> : vector<8x500xf32>
    %48 = tpu.matmul %45, %47, %cst_34 {dimension_numbers = #tpu.dot_dimension_numbers<[1], [0], [0], [1], [0, 0, 1, 1], [], []>} : vector<8x50xbf16>, vector<50x500xbf16>, vector<8x500xf32> -> vector<8x500xf32>
    %49 = arith.addf %43, %48 : vector<8x500xf32>
    %50 = vector.extract_strided_slice %20 {offsets = [40, 0], sizes = [8, 50], strides = [1, 1]} : vector<128x50xf32> to vector<8x50xf32>
    %51 = arith.truncf %50 : vector<8x50xf32> to vector<8x50xbf16>
    %c5 = arith.constant 5 : index
    %c0_35 = arith.constant 0 : index
    %c0_36 = arith.constant 0 : index
    %52 = vector.load %arg4[%c5, %c0_35, %c0_36] : memref<16x50x500xbf16, #tpu.memory_space<vmem>>, vector<1x50x500xbf16>
    %53 = vector.shape_cast %52 : vector<1x50x500xbf16> to vector<50x500xbf16>
    %cst_37 = arith.constant dense<0.000000e+00> : vector<8x500xf32>
    %54 = tpu.matmul %51, %53, %cst_37 {dimension_numbers = #tpu.dot_dimension_numbers<[1], [0], [0], [1], [0, 0, 1, 1], [], []>} : vector<8x50xbf16>, vector<50x500xbf16>, vector<8x500xf32> -> vector<8x500xf32>
    %55 = arith.addf %49, %54 : vector<8x500xf32>
    %56 = vector.extract_strided_slice %20 {offsets = [48, 0], sizes = [8, 50], strides = [1, 1]} : vector<128x50xf32> to vector<8x50xf32>
    %57 = arith.truncf %56 : vector<8x50xf32> to vector<8x50xbf16>
    %c6 = arith.constant 6 : index
    %c0_38 = arith.constant 0 : index
    %c0_39 = arith.constant 0 : index
    %58 = vector.load %arg4[%c6, %c0_38, %c0_39] : memref<16x50x500xbf16, #tpu.memory_space<vmem>>, vector<1x50x500xbf16>
    %59 = vector.shape_cast %58 : vector<1x50x500xbf16> to vector<50x500xbf16>
    %cst_40 = arith.constant dense<0.000000e+00> : vector<8x500xf32>
    %60 = tpu.matmul %57, %59, %cst_40 {dimension_numbers = #tpu.dot_dimension_numbers<[1], [0], [0], [1], [0, 0, 1, 1], [], []>} : vector<8x50xbf16>, vector<50x500xbf16>, vector<8x500xf32> -> vector<8x500xf32>
    %61 = arith.addf %55, %60 : vector<8x500xf32>
    %62 = vector.extract_strided_slice %20 {offsets = [56, 0], sizes = [8, 50], strides = [1, 1]} : vector<128x50xf32> to vector<8x50xf32>
    %63 = arith.truncf %62 : vector<8x50xf32> to vector<8x50xbf16>
    %c7 = arith.constant 7 : index
    %c0_41 = arith.constant 0 : index
    %c0_42 = arith.constant 0 : index
    %64 = vector.load %arg4[%c7, %c0_41, %c0_42] : memref<16x50x500xbf16, #tpu.memory_space<vmem>>, vector<1x50x500xbf16>
    %65 = vector.shape_cast %64 : vector<1x50x500xbf16> to vector<50x500xbf16>
    %cst_43 = arith.constant dense<0.000000e+00> : vector<8x500xf32>
    %66 = tpu.matmul %63, %65, %cst_43 {dimension_numbers = #tpu.dot_dimension_numbers<[1], [0], [0], [1], [0, 0, 1, 1], [], []>} : vector<8x50xbf16>, vector<50x500xbf16>, vector<8x500xf32> -> vector<8x500xf32>
    %67 = arith.addf %61, %66 : vector<8x500xf32>
    %68 = vector.extract_strided_slice %20 {offsets = [64, 0], sizes = [8, 50], strides = [1, 1]} : vector<128x50xf32> to vector<8x50xf32>
    %69 = arith.truncf %68 : vector<8x50xf32> to vector<8x50xbf16>
    %c8 = arith.constant 8 : index
    %c0_44 = arith.constant 0 : index
    %c0_45 = arith.constant 0 : index
    %70 = vector.load %arg4[%c8, %c0_44, %c0_45] : memref<16x50x500xbf16, #tpu.memory_space<vmem>>, vector<1x50x500xbf16>
    %71 = vector.shape_cast %70 : vector<1x50x500xbf16> to vector<50x500xbf16>
    %cst_46 = arith.constant dense<0.000000e+00> : vector<8x500xf32>
    %72 = tpu.matmul %69, %71, %cst_46 {dimension_numbers = #tpu.dot_dimension_numbers<[1], [0], [0], [1], [0, 0, 1, 1], [], []>} : vector<8x50xbf16>, vector<50x500xbf16>, vector<8x500xf32> -> vector<8x500xf32>
    %73 = arith.addf %67, %72 : vector<8x500xf32>
    %74 = vector.extract_strided_slice %20 {offsets = [72, 0], sizes = [8, 50], strides = [1, 1]} : vector<128x50xf32> to vector<8x50xf32>
    %75 = arith.truncf %74 : vector<8x50xf32> to vector<8x50xbf16>
    %c9 = arith.constant 9 : index
    %c0_47 = arith.constant 0 : index
    %c0_48 = arith.constant 0 : index
    %76 = vector.load %arg4[%c9, %c0_47, %c0_48] : memref<16x50x500xbf16, #tpu.memory_space<vmem>>, vector<1x50x500xbf16>
    %77 = vector.shape_cast %76 : vector<1x50x500xbf16> to vector<50x500xbf16>
    %cst_49 = arith.constant dense<0.000000e+00> : vector<8x500xf32>
    %78 = tpu.matmul %75, %77, %cst_49 {dimension_numbers = #tpu.dot_dimension_numbers<[1], [0], [0], [1], [0, 0, 1, 1], [], []>} : vector<8x50xbf16>, vector<50x500xbf16>, vector<8x500xf32> -> vector<8x500xf32>
    %79 = arith.addf %73, %78 : vector<8x500xf32>
    %80 = vector.extract_strided_slice %20 {offsets = [80, 0], sizes = [8, 50], strides = [1, 1]} : vector<128x50xf32> to vector<8x50xf32>
    %81 = arith.truncf %80 : vector<8x50xf32> to vector<8x50xbf16>
    %c10 = arith.constant 10 : index
    %c0_50 = arith.constant 0 : index
    %c0_51 = arith.constant 0 : index
    %82 = vector.load %arg4[%c10, %c0_50, %c0_51] : memref<16x50x500xbf16, #tpu.memory_space<vmem>>, vector<1x50x500xbf16>
    %83 = vector.shape_cast %82 : vector<1x50x500xbf16> to vector<50x500xbf16>
    %cst_52 = arith.constant dense<0.000000e+00> : vector<8x500xf32>
    %84 = tpu.matmul %81, %83, %cst_52 {dimension_numbers = #tpu.dot_dimension_numbers<[1], [0], [0], [1], [0, 0, 1, 1], [], []>} : vector<8x50xbf16>, vector<50x500xbf16>, vector<8x500xf32> -> vector<8x500xf32>
    %85 = arith.addf %79, %84 : vector<8x500xf32>
    %86 = vector.extract_strided_slice %20 {offsets = [88, 0], sizes = [8, 50], strides = [1, 1]} : vector<128x50xf32> to vector<8x50xf32>
    %87 = arith.truncf %86 : vector<8x50xf32> to vector<8x50xbf16>
    %c11 = arith.constant 11 : index
    %c0_53 = arith.constant 0 : index
    %c0_54 = arith.constant 0 : index
    %88 = vector.load %arg4[%c11, %c0_53, %c0_54] : memref<16x50x500xbf16, #tpu.memory_space<vmem>>, vector<1x50x500xbf16>
    %89 = vector.shape_cast %88 : vector<1x50x500xbf16> to vector<50x500xbf16>
    %cst_55 = arith.constant dense<0.000000e+00> : vector<8x500xf32>
    %90 = tpu.matmul %87, %89, %cst_55 {dimension_numbers = #tpu.dot_dimension_numbers<[1], [0], [0], [1], [0, 0, 1, 1], [], []>} : vector<8x50xbf16>, vector<50x500xbf16>, vector<8x500xf32> -> vector<8x500xf32>
    %91 = arith.addf %85, %90 : vector<8x500xf32>
    %92 = vector.extract_strided_slice %20 {offsets = [96, 0], sizes = [8, 50], strides = [1, 1]} : vector<128x50xf32> to vector<8x50xf32>
    %93 = arith.truncf %92 : vector<8x50xf32> to vector<8x50xbf16>
    %c12 = arith.constant 12 : index
    %c0_56 = arith.constant 0 : index
    %c0_57 = arith.constant 0 : index
    %94 = vector.load %arg4[%c12, %c0_56, %c0_57] : memref<16x50x500xbf16, #tpu.memory_space<vmem>>, vector<1x50x500xbf16>
    %95 = vector.shape_cast %94 : vector<1x50x500xbf16> to vector<50x500xbf16>
    %cst_58 = arith.constant dense<0.000000e+00> : vector<8x500xf32>
    %96 = tpu.matmul %93, %95, %cst_58 {dimension_numbers = #tpu.dot_dimension_numbers<[1], [0], [0], [1], [0, 0, 1, 1], [], []>} : vector<8x50xbf16>, vector<50x500xbf16>, vector<8x500xf32> -> vector<8x500xf32>
    %97 = arith.addf %91, %96 : vector<8x500xf32>
    %98 = vector.extract_strided_slice %20 {offsets = [104, 0], sizes = [8, 50], strides = [1, 1]} : vector<128x50xf32> to vector<8x50xf32>
    %99 = arith.truncf %98 : vector<8x50xf32> to vector<8x50xbf16>
    %c13 = arith.constant 13 : index
    %c0_59 = arith.constant 0 : index
    %c0_60 = arith.constant 0 : index
    %100 = vector.load %arg4[%c13, %c0_59, %c0_60] : memref<16x50x500xbf16, #tpu.memory_space<vmem>>, vector<1x50x500xbf16>
    %101 = vector.shape_cast %100 : vector<1x50x500xbf16> to vector<50x500xbf16>
    %cst_61 = arith.constant dense<0.000000e+00> : vector<8x500xf32>
    %102 = tpu.matmul %99, %101, %cst_61 {dimension_numbers = #tpu.dot_dimension_numbers<[1], [0], [0], [1], [0, 0, 1, 1], [], []>} : vector<8x50xbf16>, vector<50x500xbf16>, vector<8x500xf32> -> vector<8x500xf32>
    %103 = arith.addf %97, %102 : vector<8x500xf32>
    %104 = vector.extract_strided_slice %20 {offsets = [112, 0], sizes = [8, 50], strides = [1, 1]} : vector<128x50xf32> to vector<8x50xf32>
    %105 = arith.truncf %104 : vector<8x50xf32> to vector<8x50xbf16>
    %c14 = arith.constant 14 : index
    %c0_62 = arith.constant 0 : index
    %c0_63 = arith.constant 0 : index
    %106 = vector.load %arg4[%c14, %c0_62, %c0_63] : memref<16x50x500xbf16, #tpu.memory_space<vmem>>, vector<1x50x500xbf16>
    %107 = vector.shape_cast %106 : vector<1x50x500xbf16> to vector<50x500xbf16>
    %cst_64 = arith.constant dense<0.000000e+00> : vector<8x500xf32>
    %108 = tpu.matmul %105, %107, %cst_64 {dimension_numbers = #tpu.dot_dimension_numbers<[1], [0], [0], [1], [0, 0, 1, 1], [], []>} : vector<8x50xbf16>, vector<50x500xbf16>, vector<8x500xf32> -> vector<8x500xf32>
    %109 = arith.addf %103, %108 : vector<8x500xf32>
    %110 = vector.extract_strided_slice %20 {offsets = [120, 0], sizes = [8, 50], strides = [1, 1]} : vector<128x50xf32> to vector<8x50xf32>
    %111 = arith.truncf %110 : vector<8x50xf32> to vector<8x50xbf16>
    %c15 = arith.constant 15 : index
    %c0_65 = arith.constant 0 : index
    %c0_66 = arith.constant 0 : index
    %112 = vector.load %arg4[%c15, %c0_65, %c0_66] : memref<16x50x500xbf16, #tpu.memory_space<vmem>>, vector<1x50x500xbf16>
    %113 = vector.shape_cast %112 : vector<1x50x500xbf16> to vector<50x500xbf16>
    %cst_67 = arith.constant dense<0.000000e+00> : vector<8x500xf32>
    %114 = tpu.matmul %111, %113, %cst_67 {dimension_numbers = #tpu.dot_dimension_numbers<[1], [0], [0], [1], [0, 0, 1, 1], [], []>} : vector<8x50xbf16>, vector<50x500xbf16>, vector<8x500xf32> -> vector<8x500xf32>
    %115 = arith.addf %109, %114 : vector<8x500xf32>
    %c0_68 = arith.constant 0 : index
    %c0_69 = arith.constant 0 : index
    %116 = vector.load %arg5[%c0_68, %c0_69] : memref<1x500xf32, #tpu.memory_space<vmem>>, vector<1x500xf32>
    %117 = vector.broadcast %116 : vector<1x500xf32> to vector<8x500xf32>
    %118 = arith.addf %115, %117 : vector<8x500xf32>
    %cst_70 = arith.constant 0.000000e+00 : f32
    %119 = vector.broadcast %cst_70 : f32 to vector<8x500xf32>
    %120 = arith.maximumf %118, %119 : vector<8x500xf32>
    %121 = arith.truncf %120 : vector<8x500xf32> to vector<8x500xbf16>
    %c0_71 = arith.constant 0 : index
    %c0_72 = arith.constant 0 : index
    %122 = vector.load %arg6[%c0_71, %c0_72] : memref<500x128xbf16, #tpu.memory_space<vmem>>, vector<500x128xbf16>
    %cst_73 = arith.constant dense<0.000000e+00> : vector<8x128xf32>
    %123 = tpu.matmul %121, %122, %cst_73 {dimension_numbers = #tpu.dot_dimension_numbers<[1], [0], [0], [1], [0, 0, 1, 1], [], []>} : vector<8x500xbf16>, vector<500x128xbf16>, vector<8x128xf32> -> vector<8x128xf32>
    %c0_74 = arith.constant 0 : index
    %c0_75 = arith.constant 0 : index
    %124 = vector.load %arg7[%c0_74, %c0_75] : memref<1x128xf32, #tpu.memory_space<vmem>>, vector<1x128xf32>
    %125 = vector.broadcast %124 : vector<1x128xf32> to vector<8x128xf32>
    %126 = arith.addf %123, %125 : vector<8x128xf32>
    %127 = math.tanh %126 : vector<8x128xf32>
    %c0_76 = arith.constant 0 : index
    %c0_77 = arith.constant 0 : index
    %128 = vector.load %arg8[%c0_76, %c0_77] : memref<1x128xf32, #tpu.memory_space<vmem>>, vector<1x128xf32>
    %129 = tpu.transpose %127, [1, 0] : vector<8x128xf32> -> vector<128x8xf32>
    %cst_78 = arith.constant dense<0.000000e+00> : vector<1x8xf32>
    %130 = tpu.matmul %128, %129, %cst_78 {dimension_numbers = #tpu.dot_dimension_numbers<[1], [0], [0], [1], [0, 0, 1, 1], [], []>} : vector<1x128xf32>, vector<128x8xf32>, vector<1x8xf32> -> vector<1x8xf32>
    %c0_79 = arith.constant 0 : index
    %c0_80 = arith.constant 0 : index
    %131 = vector.load %arg9[%c0_79, %c0_80] : memref<1x1xf32, #tpu.memory_space<vmem>>, vector<1x1xf32>
    %132 = vector.broadcast %131 : vector<1x1xf32> to vector<1x8xf32>
    %133 = arith.addf %130, %132 : vector<1x8xf32>
    %cst_81 = arith.constant dense<0xFF800000> : vector<1xf32>
    %134 = vector.multi_reduction <maximumf>, %133, %cst_81 [1] : vector<1x8xf32> to vector<1xf32>
    %135 = vector.shape_cast %134 : vector<1xf32> to vector<1x1xf32>
    %136 = vector.broadcast %135 : vector<1x1xf32> to vector<1x8xf32>
    %137 = arith.subf %133, %136 : vector<1x8xf32>
    %138 = math.exp %137 : vector<1x8xf32>
    %cst_82 = arith.constant dense<0.000000e+00> : vector<1xf32>
    %139 = vector.multi_reduction <add>, %138, %cst_82 [1] : vector<1x8xf32> to vector<1xf32>
    %140 = vector.shape_cast %139 : vector<1xf32> to vector<1x1xf32>
    %141 = tpu.reciprocal %140 {approx = true} : vector<1x1xf32> -> vector<1x1xf32>
    %142 = vector.broadcast %141 : vector<1x1xf32> to vector<1x8xf32>
    %143 = arith.mulf %138, %142 : vector<1x8xf32>
    %cst_83 = arith.constant dense<0.000000e+00> : vector<1x500xf32>
    %144 = tpu.matmul %143, %120, %cst_83 {dimension_numbers = #tpu.dot_dimension_numbers<[1], [0], [0], [1], [0, 0, 1, 1], [], []>} : vector<1x8xf32>, vector<8x500xf32>, vector<1x500xf32> -> vector<1x500xf32>
    %c0_84 = arith.constant 0 : index
    %c0_85 = arith.constant 0 : index
    %145 = vector.load %arg10[%c0_84, %c0_85] : memref<1x500xf32, #tpu.memory_space<vmem>>, vector<1x500xf32>
    %146 = arith.mulf %144, %145 : vector<1x500xf32>
    %cst_86 = arith.constant dense<0.000000e+00> : vector<1xf32>
    %147 = vector.multi_reduction <add>, %146, %cst_86 [1] : vector<1x500xf32> to vector<1xf32>
    %148 = vector.shape_cast %147 : vector<1xf32> to vector<1x1xf32>
    %c0_87 = arith.constant 0 : index
    %c0_88 = arith.constant 0 : index
    %149 = vector.load %arg11[%c0_87, %c0_88] : memref<1x1xf32, #tpu.memory_space<vmem>>, vector<1x1xf32>
    %150 = arith.addf %148, %149 : vector<1x1xf32>
    %151 = arith.negf %150 : vector<1x1xf32>
    %152 = math.exp %151 : vector<1x1xf32>
    %cst_89 = arith.constant 1.000000e+00 : f32
    %153 = vector.broadcast %cst_89 : f32 to vector<1x1xf32>
    %154 = arith.addf %153, %152 : vector<1x1xf32>
    %155 = arith.divf %153, %154 : vector<1x1xf32>
    %c0_90 = arith.constant 0 : index
    %c0_91 = arith.constant 0 : index
    %156 = vector.load %arg12[%c0_90, %c0_91] : memref<1x1xf32, #tpu.memory_space<vmem>>, vector<1x1xf32>
    tpu.vector_store %arg12[%c0_90, %c0_91], %155 {strides = array<i32>} : memref<1x1xf32, #tpu.memory_space<vmem>>, vector<1x1xf32>,
    %c0_92 = arith.constant 0 : index
    %c0_93 = arith.constant 0 : index
    %157 = vector.load %arg13[%c0_92, %c0_93] : memref<1x8xf32, #tpu.memory_space<vmem>>, vector<1x8xf32>
    tpu.vector_store %arg13[%c0_92, %c0_93], %143 {strides = array<i32>} : memref<1x8xf32, #tpu.memory_space<vmem>>, vector<1x8xf32>,
    return
  }
  func.func @transform_0(%arg0: i32) -> (i32, i32, i32) {
    %c0_i32 = arith.constant 0 : i32
    %c0_i32_0 = arith.constant 0 : i32
    %c0_i32_1 = arith.constant 0 : i32
    %c0_i32_2 = arith.constant 0 : i32
    return %c0_i32, %c0_i32_0, %c0_i32_1 : i32, i32, i32
  }
  func.func @transform_1(%arg0: i32) -> (i32, i32) {
    %c0_i32 = arith.constant 0 : i32
    %c0_i32_0 = arith.constant 0 : i32
    %c0_i32_1 = arith.constant 0 : i32
    return %c0_i32, %c0_i32_0 : i32, i32
  }
  func.func @transform_2(%arg0: i32) -> (i32, i32) {
    %c0_i32 = arith.constant 0 : i32
    %c0_i32_0 = arith.constant 0 : i32
    %c0_i32_1 = arith.constant 0 : i32
    return %c0_i32, %c0_i32_0 : i32, i32
  }
  func.func @transform_3(%arg0: i32) -> (i32, i32, i32) {
    %c0_i32 = arith.constant 0 : i32
    %c0_i32_0 = arith.constant 0 : i32
    %c0_i32_1 = arith.constant 0 : i32
    %c0_i32_2 = arith.constant 0 : i32
    return %c0_i32, %c0_i32_0, %c0_i32_1 : i32, i32, i32
  }
  func.func @transform_4(%arg0: i32) -> (i32, i32) {
    %c0_i32 = arith.constant 0 : i32
    %c0_i32_0 = arith.constant 0 : i32
    %c0_i32_1 = arith.constant 0 : i32
    return %c0_i32, %c0_i32_0 : i32, i32
  }
  func.func @transform_5(%arg0: i32) -> (i32, i32) {
    %c0_i32 = arith.constant 0 : i32
    %c0_i32_0 = arith.constant 0 : i32
    %c0_i32_1 = arith.constant 0 : i32
    return %c0_i32, %c0_i32_0 : i32, i32
  }
  func.func @transform_6(%arg0: i32) -> (i32, i32) {
    %c0_i32 = arith.constant 0 : i32
    %c0_i32_0 = arith.constant 0 : i32
    %c0_i32_1 = arith.constant 0 : i32
    return %c0_i32, %c0_i32_0 : i32, i32
  }
  func.func @transform_7(%arg0: i32) -> (i32, i32) {
    %c0_i32 = arith.constant 0 : i32
    %c0_i32_0 = arith.constant 0 : i32
    %c0_i32_1 = arith.constant 0 : i32
    return %c0_i32, %c0_i32_0 : i32, i32
  }
  func.func @transform_8(%arg0: i32) -> (i32, i32) {
    %c0_i32 = arith.constant 0 : i32
    %c0_i32_0 = arith.constant 0 : i32
    %c0_i32_1 = arith.constant 0 : i32
    return %c0_i32, %c0_i32_0 : i32, i32
  }
  func.func @transform_9(%arg0: i32) -> (i32, i32) {
    %c0_i32 = arith.constant 0 : i32
    %c0_i32_0 = arith.constant 0 : i32
    %c0_i32_1 = arith.constant 0 : i32
    return %c0_i32, %c0_i32_0 : i32, i32
  }
  func.func @transform_10(%arg0: i32) -> (i32, i32) {
    %c0_i32 = arith.constant 0 : i32
    %c0_i32_0 = arith.constant 0 : i32
    %c0_i32_1 = arith.constant 0 : i32
    return %c0_i32, %c0_i32_0 : i32, i32
  }
  func.func @transform_11(%arg0: i32) -> (i32, i32) {
    %c0_i32 = arith.constant 0 : i32
    %c0_i32_0 = arith.constant 0 : i32
    %c0_i32_1 = arith.constant 0 : i32
    return %c0_i32, %c0_i32_0 : i32, i32
  }
  func.func @transform_12(%arg0: i32) -> (i32, i32) {
    %c0_i32 = arith.constant 0 : i32
    %c0_i32_0 = arith.constant 0 : i32
    %c0_i32_1 = arith.constant 0 : i32
    return %c0_i32, %c0_i32_0 : i32, i32
  }
}

</mosaic_0001>

<bundles_post_ra>
// kernel: forward.2
= control target key start
LH: loop header
LB: loop body
LE: loop exit
PB: predicated region body
PF: predicated region fallthrough
CT: control target
= control target key end

     0   :  { %s6240_s12 = smov 0   ;;  %s6242_s13 = smov 0   ;;  %s7746_s0 = inlined_call_operand.vmem [shape: bf16[4,1152,25], index: 0, kind: input, shape index: {}]   ;;  %s7747_s1 = inlined_call_operand.vmem [shape: bf16[25,20], index: 1, kind: input, shape index: {}]   ;;  %s7748_s2 = inlined_call_operand.vmem [shape: f32[1,20], index: 2, kind: input, shape index: {}]   ;;  %s7749_s3 = inlined_call_operand.vmem [shape: bf16[1152,20], index: 3, kind: output, shape index: {}]  }
   0x1   :  { %s6244_s14 = smov 0  }
   0x2 LB: > { %s4904_s15 = sadd.s32 4294967295, %s6217_s14   ;;  %s6257_s16 = sadd.s32 1, %s6217_s14   ;;  %s6217_s14 = sphi %s6244_s14, %s8115_s14   ;;  %s6213_s13 = sphi %s6242_s13, %s8114_s13   ;;  %s6209_s12 = sphi %s6240_s12, %s8113_s12  }
   0x3   : > { %s17_s17 = ssub.s32 %s6217_s14, %s6257_s16  ;;  %s20_s18 = sadd.s32 1, %s6213_s13 }
   0x4   : > { %p18_p0 = scmp.eq.s32.totalorder %s17_s17, 0  ;;  %p27_p1 = scmp.ne.s32.totalorder %s6213_s13, %s6209_s12 }
   0x5   : > { %p28_p2 = scmp.eq.s32.totalorder %s6217_s14, 0  ;;  %p4907_p4 = scmp.ge.s32.totalorder %s6217_s14, 2 }
   0x6   : > { %s6266_s19 = scalar_select %p18_p0, %s6213_s13, %s20_s18  }
   0x7   : > { %p29_p3 = por %p28_p2, %p27_p1  ;;  %127 = sbr.rel (%p4907_p4) target bundleno = 91 (0x5b), region = 24 }
   0xe   : > { %130 = sbr.rel (!%p29_p3) target bundleno = 91 (0x5b), region = 28  ;;  %s132_s20 = sand.u32 (%p29_p3), 1, %s6213_s13  }
   0xf   : > { %s5492_s21 = smul.u32 (%p29_p3), 288, %s6217_s14 }
  0x10   : > { %s6021_s22 = smul.u32 (%p29_p3), 1152, %s132_s20 }
  0x11   : > { %s6274_s25 = scalar_lea.vmem (%p29_p3), %s7746_s0, %s5492_s21 }
  0x12   : > { %v153_v0 = vld [vmem:[%s6274_s25] sm:$0xff] (%p29_p3)   ;;  %v157_v1 = vld [vmem:[%s6274_s25 + $0x8] sm:$0xff] (%p29_p3)   ;;  %v161_v2 = vld [vmem:[%s6274_s25 + $0x10] sm:$0xff] (%p29_p3)   ;;  %s6279_s26 = scalar_lea.vmem (%p29_p3), [#allocation2], %s6021_s22 }
  0x13   : > { %154 = vst [vmem:[%s6279_s26] sm:$0xff] (%p29_p3), %v153_v0   ;;  %158 = vst [vmem:[%s6279_s26 + $0x8] sm:$0xff] (%p29_p3), %v157_v1   ;;  %v165_v3 = vld [vmem:[%s6274_s25 + $0x18] sm:$0xff] (%p29_p3)   ;;  %v169_v4 = vld [vmem:[%s6274_s25 + $0x20] sm:$0xff] (%p29_p3)  }
  0x14   : > { %162 = vst [vmem:[%s6279_s26 + $0x10] sm:$0xff] (%p29_p3), %v161_v2   ;;  %v173_v5 = vld [vmem:[%s6274_s25 + $0x28] sm:$0xff] (%p29_p3)   ;;  %166 = vst [vmem:[%s6279_s26 + $0x18] sm:$0xff] (%p29_p3), %v165_v3   ;;  %v177_v6 = vld [vmem:[%s6274_s25 + $0x30] sm:$0xff] (%p29_p3)  }
  0x15   : > { %170 = vst [vmem:[%s6279_s26 + $0x20] sm:$0xff] %v169_v4   ;;  %174 = vst [vmem:[%s6279_s26 + $0x28] sm:$0xff] %v173_v5   ;;  %v181_v7 = vld [vmem:[%s6274_s25 + $0x38] sm:$0xff]   ;;  %v185_v8 = vld [vmem:[%s6274_s25 + $0x40] sm:$0xff]  }
  0x16   : > { %178 = vst [vmem:[%s6279_s26 + $0x30] sm:$0xff] %v177_v6   ;;  %182 = vst [vmem:[%s6279_s26 + $0x38] sm:$0xff] %v181_v7   ;;  %v189_v9 = vld [vmem:[%s6274_s25 + $0x48] sm:$0xff]   ;;  %v193_v10 = vld [vmem:[%s6274_s25 + $0x50] sm:$0xff]  }
  0x17   : > { %186 = vst [vmem:[%s6279_s26 + $0x40] sm:$0xff] %v185_v8   ;;  %v197_v11 = vld [vmem:[%s6274_s25 + $0x58] sm:$0xff]   ;;  %190 = vst [vmem:[%s6279_s26 + $0x48] sm:$0xff] %v189_v9   ;;  %v201_v12 = vld [vmem:[%s6274_s25 + $0x60] sm:$0xff]  }
  0x18   : > { %194 = vst [vmem:[%s6279_s26 + $0x50] sm:$0xff] %v193_v10   ;;  %198 = vst [vmem:[%s6279_s26 + $0x58] sm:$0xff] %v197_v11   ;;  %v205_v13 = vld [vmem:[%s6274_s25 + $0x68] sm:$0xff]   ;;  %v209_v14 = vld [vmem:[%s6274_s25 + $0x70] sm:$0xff]  }
  0x19   : > { %202 = vst [vmem:[%s6279_s26 + $0x60] sm:$0xff] %v201_v12   ;;  %206 = vst [vmem:[%s6279_s26 + $0x68] sm:$0xff] %v205_v13   ;;  %v213_v15 = vld [vmem:[%s6274_s25 + $0x78] sm:$0xff]   ;;  %v217_v16 = vld [vmem:[%s6274_s25 + $0x80] sm:$0xff]  }
  0x1a   : > { %210 = vst [vmem:[%s6279_s26 + $0x70] sm:$0xff] %v209_v14   ;;  %v221_v17 = vld [vmem:[%s6274_s25 + $0x88] sm:$0xff]   ;;  %214 = vst [vmem:[%s6279_s26 + $0x78] sm:$0xff] %v213_v15   ;;  %v225_v18 = vld [vmem:[%s6274_s25 + $0x90] sm:$0xff]  }
  0x1b   : > { %218 = vst [vmem:[%s6279_s26 + $0x80] sm:$0xff] %v217_v16   ;;  %222 = vst [vmem:[%s6279_s26 + $0x88] sm:$0xff] %v221_v17   ;;  %v229_v19 = vld [vmem:[%s6274_s25 + $0x98] sm:$0xff]   ;;  %v233_v20 = vld [vmem:[%s6274_s25 + $0xa0] sm:$0xff]  }
  0x1c   : > { %226 = vst [vmem:[%s6279_s26 + $0x90] sm:$0xff] %v225_v18   ;;  %230 = vst [vmem:[%s6279_s26 + $0x98] sm:$0xff] %v229_v19   ;;  %v237_v21 = vld [vmem:[%s6274_s25 + $0xa8] sm:$0xff]   ;;  %v241_v22 = vld [vmem:[%s6274_s25 + $0xb0] sm:$0xff]  }
  0x1d   : > { %234 = vst [vmem:[%s6279_s26 + $0xa0] sm:$0xff] %v233_v20   ;;  %v245_v23 = vld [vmem:[%s6274_s25 + $0xb8] sm:$0xff]   ;;  %238 = vst [vmem:[%s6279_s26 + $0xa8] sm:$0xff] %v237_v21   ;;  %v249_v24 = vld [vmem:[%s6274_s25 + $0xc0] sm:$0xff]  }
  0x1e   : > { %242 = vst [vmem:[%s6279_s26 + $0xb0] sm:$0xff] %v241_v22   ;;  %246 = vst [vmem:[%s6279_s26 + $0xb8] sm:$0xff] %v245_v23   ;;  %v253_v25 = vld [vmem:[%s6274_s25 + $0xc8] sm:$0xff]   ;;  %v257_v26 = vld [vmem:[%s6274_s25 + $0xd0] sm:$0xff]  }
  0x1f   : > { %250 = vst [vmem:[%s6279_s26 + $0xc0] sm:$0xff] %v249_v24   ;;  %254 = vst [vmem:[%s6279_s26 + $0xc8] sm:$0xff] %v253_v25   ;;  %v261_v27 = vld [vmem:[%s6274_s25 + $0xd8] sm:$0xff]   ;;  %v265_v28 = vld [vmem:[%s6274_s25 + $0xe0] sm:$0xff]  }
  0x20   : > { %258 = vst [vmem:[%s6279_s26 + $0xd0] sm:$0xff] %v257_v26   ;;  %v269_v29 = vld [vmem:[%s6274_s25 + $0xe8] sm:$0xff]   ;;  %262 = vst [vmem:[%s6279_s26 + $0xd8] sm:$0xff] %v261_v27   ;;  %v273_v30 = vld [vmem:[%s6274_s25 + $0xf0] sm:$0xff]  }
  0x21   : > { %266 = vst [vmem:[%s6279_s26 + $0xe0] sm:$0xff] %v265_v28   ;;  %270 = vst [vmem:[%s6279_s26 + $0xe8] sm:$0xff] %v269_v29   ;;  %v277_v31 = vld [vmem:[%s6274_s25 + $0xf8] sm:$0xff]   ;;  %v281_v32 = vld [vmem:[%s6274_s25 + $0x100] sm:$0xff]  }
  0x22   : > { %274 = vst [vmem:[%s6279_s26 + $0xf0] sm:$0xff] %v273_v30   ;;  %278 = vst [vmem:[%s6279_s26 + $0xf8] sm:$0xff] %v277_v31   ;;  %v285_v33 = vld [vmem:[%s6274_s25 + $0x108] sm:$0xff]   ;;  %v289_v34 = vld [vmem:[%s6274_s25 + $0x110] sm:$0xff]  }
  0x23   : > { %282 = vst [vmem:[%s6279_s26 + $0x100] sm:$0xff] %v281_v32   ;;  %v293_v35 = vld [vmem:[%s6274_s25 + $0x118] sm:$0xff]   ;;  %286 = vst [vmem:[%s6279_s26 + $0x108] sm:$0xff] %v285_v33   ;;  %v297_v36 = vld [vmem:[%s6274_s25 + $0x240] sm:$0xff]  }
  0x24   : > { %290 = vst [vmem:[%s6279_s26 + $0x110] sm:$0xff] %v289_v34   ;;  %294 = vst [vmem:[%s6279_s26 + $0x118] sm:$0xff] %v293_v35   ;;  %v301_v37 = vld [vmem:[%s6274_s25 + $0x248] sm:$0xff]   ;;  %v305_v38 = vld [vmem:[%s6274_s25 + $0x250] sm:$0xff]  }
  0x25   : > { %298 = vst [vmem:[%s6279_s26 + $0x120] sm:$0xff] %v297_v36   ;;  %302 = vst [vmem:[%s6279_s26 + $0x128] sm:$0xff] %v301_v37   ;;  %v309_v39 = vld [vmem:[%s6274_s25 + $0x258] sm:$0xff]   ;;  %v313_v40 = vld [vmem:[%s6274_s25 + $0x260] sm:$0xff]  }
  0x26   : > { %306 = vst [vmem:[%s6279_s26 + $0x130] sm:$0xff] %v305_v38   ;;  %v317_v41 = vld [vmem:[%s6274_s25 + $0x268] sm:$0xff]   ;;  %310 = vst [vmem:[%s6279_s26 + $0x138] sm:$0xff] %v309_v39   ;;  %v321_v42 = vld [vmem:[%s6274_s25 + $0x270] sm:$0xff]  }
  0x27   : > { %314 = vst [vmem:[%s6279_s26 + $0x140] sm:$0xff] %v313_v40   ;;  %318 = vst [vmem:[%s6279_s26 + $0x148] sm:$0xff] %v317_v41   ;;  %v325_v43 = vld [vmem:[%s6274_s25 + $0x278] sm:$0xff]   ;;  %v329_v44 = vld [vmem:[%s6274_s25 + $0x280] sm:$0xff]  }
  0x28   : > { %322 = vst [vmem:[%s6279_s26 + $0x150] sm:$0xff] %v321_v42   ;;  %326 = vst [vmem:[%s6279_s26 + $0x158] sm:$0xff] %v325_v43   ;;  %v333_v45 = vld [vmem:[%s6274_s25 + $0x288] sm:$0xff]   ;;  %v337_v46 = vld [vmem:[%s6274_s25 + $0x290] sm:$0xff]  }
  0x29   : > { %330 = vst [vmem:[%s6279_s26 + $0x160] sm:$0xff] %v329_v44   ;;  %v341_v47 = vld [vmem:[%s6274_s25 + $0x298] sm:$0xff]   ;;  %334 = vst [vmem:[%s6279_s26 + $0x168] sm:$0xff] %v333_v45   ;;  %v345_v48 = vld [vmem:[%s6274_s25 + $0x2a0] sm:$0xff]  }
  0x2a   : > { %338 = vst [vmem:[%s6279_s26 + $0x170] sm:$0xff] %v337_v46   ;;  %342 = vst [vmem:[%s6279_s26 + $0x178] sm:$0xff] %v341_v47   ;;  %v349_v49 = vld [vmem:[%s6274_s25 + $0x2a8] sm:$0xff]   ;;  %v353_v50 = vld [vmem:[%s6274_s25 + $0x2b0] sm:$0xff]  }
  0x2b   : > { %346 = vst [vmem:[%s6279_s26 + $0x180] sm:$0xff] %v345_v48   ;;  %350 = vst [vmem:[%s6279_s26 + $0x188] sm:$0xff] %v349_v49   ;;  %v357_v51 = vld [vmem:[%s6274_s25 + $0x2b8] sm:$0xff]   ;;  %v361_v52 = vld [vmem:[%s6274_s25 + $0x2c0] sm:$0xff]  }
  0x2c   : > { %354 = vst [vmem:[%s6279_s26 + $0x190] sm:$0xff] %v353_v50   ;;  %v365_v53 = vld [vmem:[%s6274_s25 + $0x2c8] sm:$0xff]   ;;  %358 = vst [vmem:[%s6279_s26 + $0x198] sm:$0xff] %v357_v51   ;;  %v369_v54 = vld [vmem:[%s6274_s25 + $0x2d0] sm:$0xff]  }
  0x2d   : > { %362 = vst [vmem:[%s6279_s26 + $0x1a0] sm:$0xff] %v361_v52   ;;  %366 = vst [vmem:[%s6279_s26 + $0x1a8] sm:$0xff] %v365_v53   ;;  %v373_v55 = vld [vmem:[%s6274_s25 + $0x2d8] sm:$0xff]   ;;  %v377_v56 = vld [vmem:[%s6274_s25 + $0x2e0] sm:$0xff]  }
  0x2e   : > { %370 = vst [vmem:[%s6279_s26 + $0x1b0] sm:$0xff] %v369_v54   ;;  %374 = vst [vmem:[%s6279_s26 + $0x1b8] sm:$0xff] %v373_v55   ;;  %v381_v57 = vld [vmem:[%s6274_s25 + $0x2e8] sm:$0xff]   ;;  %v385_v58 = vld [vmem:[%s6274_s25 + $0x2f0] sm:$0xff]  }
  0x2f   : > { %378 = vst [vmem:[%s6279_s26 + $0x1c0] sm:$0xff] %v377_v56   ;;  %v389_v59 = vld [vmem:[%s6274_s25 + $0x2f8] sm:$0xff]   ;;  %382 = vst [vmem:[%s6279_s26 + $0x1c8] sm:$0xff] %v381_v57   ;;  %v393_v60 = vld [vmem:[%s6274_s25 + $0x300] sm:$0xff]  }
  0x30   : > { %386 = vst [vmem:[%s6279_s26 + $0x1d0] sm:$0xff] %v385_v58   ;;  %390 = vst [vmem:[%s6279_s26 + $0x1d8] sm:$0xff] %v389_v59   ;;  %v397_v61 = vld [vmem:[%s6274_s25 + $0x308] sm:$0xff]   ;;  %v401_v62 = vld [vmem:[%s6274_s25 + $0x310] sm:$0xff]  }
  0x31   : > { %394 = vst [vmem:[%s6279_s26 + $0x1e0] sm:$0xff] %v393_v60   ;;  %398 = vst [vmem:[%s6279_s26 + $0x1e8] sm:$0xff] %v397_v61   ;;  %v405_v63 = vld [vmem:[%s6274_s25 + $0x318] sm:$0xff]   ;;  %v409_v0 = vld [vmem:[%s6274_s25 + $0x320] sm:$0xff]  }
  0x32   : > { %402 = vst [vmem:[%s6279_s26 + $0x1f0] sm:$0xff] %v401_v62   ;;  %v413_v1 = vld [vmem:[%s6274_s25 + $0x328] sm:$0xff]   ;;  %406 = vst [vmem:[%s6279_s26 + $0x1f8] sm:$0xff] %v405_v63   ;;  %v417_v2 = vld [vmem:[%s6274_s25 + $0x330] sm:$0xff]  }
  0x33   : > { %410 = vst [vmem:[%s6279_s26 + $0x200] sm:$0xff] %v409_v0   ;;  %414 = vst [vmem:[%s6279_s26 + $0x208] sm:$0xff] %v413_v1   ;;  %v421_v3 = vld [vmem:[%s6274_s25 + $0x338] sm:$0xff]   ;;  %v425_v4 = vld [vmem:[%s6274_s25 + $0x340] sm:$0xff]  }
  0x34   : > { %418 = vst [vmem:[%s6279_s26 + $0x210] sm:$0xff] %v417_v2   ;;  %422 = vst [vmem:[%s6279_s26 + $0x218] sm:$0xff] %v421_v3   ;;  %v429_v5 = vld [vmem:[%s6274_s25 + $0x348] sm:$0xff]   ;;  %v433_v6 = vld [vmem:[%s6274_s25 + $0x350] sm:$0xff]  }
  0x35   : > { %426 = vst [vmem:[%s6279_s26 + $0x220] sm:$0xff] %v425_v4   ;;  %v437_v7 = vld [vmem:[%s6274_s25 + $0x358] sm:$0xff]   ;;  %430 = vst [vmem:[%s6279_s26 + $0x228] sm:$0xff] %v429_v5   ;;  %v441_v8 = vld [vmem:[%s6274_s25 + $0x480] sm:$0xff]  }
  0x36   : > { %434 = vst [vmem:[%s6279_s26 + $0x230] sm:$0xff] %v433_v6   ;;  %438 = vst [vmem:[%s6279_s26 + $0x238] sm:$0xff] %v437_v7   ;;  %v445_v9 = vld [vmem:[%s6274_s25 + $0x488] sm:$0xff]   ;;  %v449_v10 = vld [vmem:[%s6274_s25 + $0x490] sm:$0xff]  }
  0x37   : > { %442 = vst [vmem:[%s6279_s26 + $0x240] sm:$0xff] %v441_v8   ;;  %446 = vst [vmem:[%s6279_s26 + $0x248] sm:$0xff] %v445_v9   ;;  %v453_v11 = vld [vmem:[%s6274_s25 + $0x498] sm:$0xff]   ;;  %v457_v12 = vld [vmem:[%s6274_s25 + $0x4a0] sm:$0xff]  }
  0x38   : > { %450 = vst [vmem:[%s6279_s26 + $0x250] sm:$0xff] %v449_v10   ;;  %v461_v13 = vld [vmem:[%s6274_s25 + $0x4a8] sm:$0xff]   ;;  %454 = vst [vmem:[%s6279_s26 + $0x258] sm:$0xff] %v453_v11   ;;  %v465_v14 = vld [vmem:[%s6274_s25 + $0x4b0] sm:$0xff]  }
  0x39   : > { %458 = vst [vmem:[%s6279_s26 + $0x260] sm:$0xff] %v457_v12   ;;  %462 = vst [vmem:[%s6279_s26 + $0x268] sm:$0xff] %v461_v13   ;;  %v469_v15 = vld [vmem:[%s6274_s25 + $0x4b8] sm:$0xff]   ;;  %v473_v16 = vld [vmem:[%s6274_s25 + $0x4c0] sm:$0xff]  }
  0x3a   : > { %466 = vst [vmem:[%s6279_s26 + $0x270] sm:$0xff] %v465_v14   ;;  %470 = vst [vmem:[%s6279_s26 + $0x278] sm:$0xff] %v469_v15   ;;  %v477_v17 = vld [vmem:[%s6274_s25 + $0x4c8] sm:$0xff]   ;;  %v481_v18 = vld [vmem:[%s6274_s25 + $0x4d0] sm:$0xff]  }
  0x3b   : > { %474 = vst [vmem:[%s6279_s26 + $0x280] sm:$0xff] %v473_v16   ;;  %v485_v19 = vld [vmem:[%s6274_s25 + $0x4d8] sm:$0xff]   ;;  %478 = vst [vmem:[%s6279_s26 + $0x288] sm:$0xff] %v477_v17   ;;  %v489_v20 = vld [vmem:[%s6274_s25 + $0x4e0] sm:$0xff]  }
  0x3c   : > { %482 = vst [vmem:[%s6279_s26 + $0x290] sm:$0xff] %v481_v18   ;;  %486 = vst [vmem:[%s6279_s26 + $0x298] sm:$0xff] %v485_v19   ;;  %v493_v21 = vld [vmem:[%s6274_s25 + $0x4e8] sm:$0xff]   ;;  %v497_v22 = vld [vmem:[%s6274_s25 + $0x4f0] sm:$0xff]  }
  0x3d   : > { %490 = vst [vmem:[%s6279_s26 + $0x2a0] sm:$0xff] %v489_v20   ;;  %494 = vst [vmem:[%s6279_s26 + $0x2a8] sm:$0xff] %v493_v21   ;;  %v501_v23 = vld [vmem:[%s6274_s25 + $0x4f8] sm:$0xff]   ;;  %v505_v24 = vld [vmem:[%s6274_s25 + $0x500] sm:$0xff]  }
  0x3e   : > { %498 = vst [vmem:[%s6279_s26 + $0x2b0] sm:$0xff] %v497_v22   ;;  %v509_v25 = vld [vmem:[%s6274_s25 + $0x508] sm:$0xff]   ;;  %502 = vst [vmem:[%s6279_s26 + $0x2b8] sm:$0xff] %v501_v23   ;;  %v513_v26 = vld [vmem:[%s6274_s25 + $0x510] sm:$0xff]  }
  0x3f   : > { %506 = vst [vmem:[%s6279_s26 + $0x2c0] sm:$0xff] %v505_v24   ;;  %510 = vst [vmem:[%s6279_s26 + $0x2c8] sm:$0xff] %v509_v25   ;;  %v517_v27 = vld [vmem:[%s6274_s25 + $0x518] sm:$0xff]   ;;  %v521_v28 = vld [vmem:[%s6274_s25 + $0x520] sm:$0xff]  }
  0x40   : > { %514 = vst [vmem:[%s6279_s26 + $0x2d0] sm:$0xff] %v513_v26   ;;  %518 = vst [vmem:[%s6279_s26 + $0x2d8] sm:$0xff] %v517_v27   ;;  %v525_v29 = vld [vmem:[%s6274_s25 + $0x528] sm:$0xff]   ;;  %v529_v30 = vld [vmem:[%s6274_s25 + $0x530] sm:$0xff]  }
  0x41   : > { %522 = vst [vmem:[%s6279_s26 + $0x2e0] sm:$0xff] %v521_v28   ;;  %v533_v31 = vld [vmem:[%s6274_s25 + $0x538] sm:$0xff]   ;;  %526 = vst [vmem:[%s6279_s26 + $0x2e8] sm:$0xff] %v525_v29   ;;  %v537_v32 = vld [vmem:[%s6274_s25 + $0x540] sm:$0xff]  }
  0x42   : > { %530 = vst [vmem:[%s6279_s26 + $0x2f0] sm:$0xff] %v529_v30   ;;  %534 = vst [vmem:[%s6279_s26 + $0x2f8] sm:$0xff] %v533_v31   ;;  %v541_v33 = vld [vmem:[%s6274_s25 + $0x548] sm:$0xff]   ;;  %v545_v34 = vld [vmem:[%s6274_s25 + $0x550] sm:$0xff]  }
  0x43   : > { %538 = vst [vmem:[%s6279_s26 + $0x300] sm:$0xff] %v537_v32   ;;  %542 = vst [vmem:[%s6279_s26 + $0x308] sm:$0xff] %v541_v33   ;;  %v549_v35 = vld [vmem:[%s6274_s25 + $0x558] sm:$0xff]   ;;  %v553_v36 = vld [vmem:[%s6274_s25 + $0x560] sm:$0xff]  }
  0x44   : > { %546 = vst [vmem:[%s6279_s26 + $0x310] sm:$0xff] %v545_v34   ;;  %v557_v37 = vld [vmem:[%s6274_s25 + $0x568] sm:$0xff]   ;;  %550 = vst [vmem:[%s6279_s26 + $0x318] sm:$0xff] %v549_v35   ;;  %v561_v38 = vld [vmem:[%s6274_s25 + $0x570] sm:$0xff]  }
  0x45   : > { %554 = vst [vmem:[%s6279_s26 + $0x320] sm:$0xff] %v553_v36   ;;  %558 = vst [vmem:[%s6279_s26 + $0x328] sm:$0xff] %v557_v37   ;;  %v565_v39 = vld [vmem:[%s6274_s25 + $0x578] sm:$0xff]   ;;  %v569_v40 = vld [vmem:[%s6274_s25 + $0x580] sm:$0xff]  }
  0x46   : > { %562 = vst [vmem:[%s6279_s26 + $0x330] sm:$0xff] %v561_v38   ;;  %566 = vst [vmem:[%s6279_s26 + $0x338] sm:$0xff] %v565_v39   ;;  %v573_v41 = vld [vmem:[%s6274_s25 + $0x588] sm:$0xff]   ;;  %v577_v42 = vld [vmem:[%s6274_s25 + $0x590] sm:$0xff]  }
  0x47   : > { %570 = vst [vmem:[%s6279_s26 + $0x340] sm:$0xff] %v569_v40   ;;  %v581_v43 = vld [vmem:[%s6274_s25 + $0x598] sm:$0xff]   ;;  %574 = vst [vmem:[%s6279_s26 + $0x348] sm:$0xff] %v573_v41   ;;  %v585_v44 = vld [vmem:[%s6274_s25 + $0x6c0] sm:$0xff]  }
  0x48   : > { %578 = vst [vmem:[%s6279_s26 + $0x350] sm:$0xff] %v577_v42   ;;  %582 = vst [vmem:[%s6279_s26 + $0x358] sm:$0xff] %v581_v43   ;;  %v589_v45 = vld [vmem:[%s6274_s25 + $0x6c8] sm:$0xff]   ;;  %v593_v46 = vld [vmem:[%s6274_s25 + $0x6d0] sm:$0xff]  }
  0x49   : > { %586 = vst [vmem:[%s6279_s26 + $0x360] sm:$0xff] %v585_v44   ;;  %590 = vst [vmem:[%s6279_s26 + $0x368] sm:$0xff] %v589_v45   ;;  %v597_v47 = vld [vmem:[%s6274_s25 + $0x6d8] sm:$0xff]   ;;  %v601_v48 = vld [vmem:[%s6274_s25 + $0x6e0] sm:$0xff]  }
  0x4a   : > { %594 = vst [vmem:[%s6279_s26 + $0x370] sm:$0xff] %v593_v46   ;;  %v605_v49 = vld [vmem:[%s6274_s25 + $0x6e8] sm:$0xff]   ;;  %598 = vst [vmem:[%s6279_s26 + $0x378] sm:$0xff] %v597_v47   ;;  %v609_v50 = vld [vmem:[%s6274_s25 + $0x6f0] sm:$0xff]  }
  0x4b   : > { %602 = vst [vmem:[%s6279_s26 + $0x380] sm:$0xff] %v601_v48   ;;  %606 = vst [vmem:[%s6279_s26 + $0x388] sm:$0xff] %v605_v49   ;;  %v613_v51 = vld [vmem:[%s6274_s25 + $0x6f8] sm:$0xff]   ;;  %v617_v52 = vld [vmem:[%s6274_s25 + $0x700] sm:$0xff]  }
  0x4c   : > { %610 = vst [vmem:[%s6279_s26 + $0x390] sm:$0xff] %v609_v50   ;;  %614 = vst [vmem:[%s6279_s26 + $0x398] sm:$0xff] %v613_v51   ;;  %v621_v53 = vld [vmem:[%s6274_s25 + $0x708] sm:$0xff]   ;;  %v625_v54 = vld [vmem:[%s6274_s25 + $0x710] sm:$0xff]  }
  0x4d   : > { %618 = vst [vmem:[%s6279_s26 + $0x3a0] sm:$0xff] %v617_v52   ;;  %v629_v55 = vld [vmem:[%s6274_s25 + $0x718] sm:$0xff]   ;;  %622 = vst [vmem:[%s6279_s26 + $0x3a8] sm:$0xff] %v621_v53   ;;  %v633_v56 = vld [vmem:[%s6274_s25 + $0x720] sm:$0xff]  }
  0x4e   : > { %626 = vst [vmem:[%s6279_s26 + $0x3b0] sm:$0xff] %v625_v54   ;;  %630 = vst [vmem:[%s6279_s26 + $0x3b8] sm:$0xff] %v629_v55   ;;  %v637_v57 = vld [vmem:[%s6274_s25 + $0x728] sm:$0xff]   ;;  %v641_v58 = vld [vmem:[%s6274_s25 + $0x730] sm:$0xff]  }
  0x4f   : > { %634 = vst [vmem:[%s6279_s26 + $0x3c0] sm:$0xff] %v633_v56   ;;  %638 = vst [vmem:[%s6279_s26 + $0x3c8] sm:$0xff] %v637_v57   ;;  %v645_v59 = vld [vmem:[%s6274_s25 + $0x738] sm:$0xff]   ;;  %v649_v60 = vld [vmem:[%s6274_s25 + $0x740] sm:$0xff]  }
  0x50   : > { %642 = vst [vmem:[%s6279_s26 + $0x3d0] sm:$0xff] %v641_v58   ;;  %v653_v61 = vld [vmem:[%s6274_s25 + $0x748] sm:$0xff]   ;;  %646 = vst [vmem:[%s6279_s26 + $0x3d8] sm:$0xff] %v645_v59   ;;  %v657_v62 = vld [vmem:[%s6274_s25 + $0x750] sm:$0xff]  }
  0x51   : > { %650 = vst [vmem:[%s6279_s26 + $0x3e0] sm:$0xff] %v649_v60   ;;  %654 = vst [vmem:[%s6279_s26 + $0x3e8] sm:$0xff] %v653_v61   ;;  %v661_v63 = vld [vmem:[%s6274_s25 + $0x758] sm:$0xff]   ;;  %v665_v0 = vld [vmem:[%s6274_s25 + $0x760] sm:$0xff]  }
  0x52   : > { %658 = vst [vmem:[%s6279_s26 + $0x3f0] sm:$0xff] %v657_v62   ;;  %662 = vst [vmem:[%s6279_s26 + $0x3f8] sm:$0xff] %v661_v63   ;;  %v669_v1 = vld [vmem:[%s6274_s25 + $0x768] sm:$0xff]   ;;  %v673_v2 = vld [vmem:[%s6274_s25 + $0x770] sm:$0xff]  }
  0x53   : > { %666 = vst [vmem:[%s6279_s26 + $0x400] sm:$0xff] %v665_v0   ;;  %v677_v3 = vld [vmem:[%s6274_s25 + $0x778] sm:$0xff]   ;;  %670 = vst [vmem:[%s6279_s26 + $0x408] sm:$0xff] %v669_v1   ;;  %v681_v4 = vld [vmem:[%s6274_s25 + $0x780] sm:$0xff]  }
  0x54   : > { %674 = vst [vmem:[%s6279_s26 + $0x410] sm:$0xff] %v673_v2   ;;  %678 = vst [vmem:[%s6279_s26 + $0x418] sm:$0xff] %v677_v3   ;;  %v685_v5 = vld [vmem:[%s6274_s25 + $0x788] sm:$0xff]   ;;  %v689_v6 = vld [vmem:[%s6274_s25 + $0x790] sm:$0xff]  }
  0x55   : > { %682 = vst [vmem:[%s6279_s26 + $0x420] sm:$0xff] %v681_v4   ;;  %686 = vst [vmem:[%s6279_s26 + $0x428] sm:$0xff] %v685_v5   ;;  %v693_v7 = vld [vmem:[%s6274_s25 + $0x798] sm:$0xff]   ;;  %v697_v8 = vld [vmem:[%s6274_s25 + $0x7a0] sm:$0xff]  }
  0x56   : > { %690 = vst [vmem:[%s6279_s26 + $0x430] sm:$0xff] %v689_v6   ;;  %v701_v9 = vld [vmem:[%s6274_s25 + $0x7a8] sm:$0xff]   ;;  %694 = vst [vmem:[%s6279_s26 + $0x438] sm:$0xff] %v693_v7   ;;  %v705_v10 = vld [vmem:[%s6274_s25 + $0x7b0] sm:$0xff]  }
  0x57   : > { %698 = vst [vmem:[%s6279_s26 + $0x440] sm:$0xff] %v697_v8   ;;  %702 = vst [vmem:[%s6279_s26 + $0x448] sm:$0xff] %v701_v9   ;;  %v709_v11 = vld [vmem:[%s6274_s25 + $0x7b8] sm:$0xff]   ;;  %v713_v12 = vld [vmem:[%s6274_s25 + $0x7c0] sm:$0xff]  }
  0x58   : > { %706 = vst [vmem:[%s6279_s26 + $0x450] sm:$0xff] %v705_v10   ;;  %710 = vst [vmem:[%s6279_s26 + $0x458] sm:$0xff] %v709_v11   ;;  %v717_v13 = vld [vmem:[%s6274_s25 + $0x7c8] sm:$0xff]   ;;  %v721_v14 = vld [vmem:[%s6274_s25 + $0x7d0] sm:$0xff]  }
  0x59   : > { %714 = vst [vmem:[%s6279_s26 + $0x460] sm:$0xff] %v713_v12   ;;  %v725_v15 = vld [vmem:[%s6274_s25 + $0x7d8] sm:$0xff]   ;;  %718 = vst [vmem:[%s6279_s26 + $0x468] sm:$0xff] %v717_v13  }
  0x5a   : > { %722 = vst [vmem:[%s6279_s26 + $0x470] sm:$0xff] %v721_v14   ;;  %726 = vst [vmem:[%s6279_s26 + $0x478] sm:$0xff] %v725_v15  }
  0x5b PF: > { %p4909_p5 = scmp.ge.s32.totalorder %s6217_s14, 1  ;;  %p1326_p6 = scmp.lt.s32.totalorder %s6217_s14, 3 }
  0x5d   : > { %p1327_p7 = pnand %p4909_p5, %p1326_p6 }
  0x5f   : > { %1330 = sbr.rel (%p1327_p7) target bundleno = 618 (0x26a), region = 69 }
  0x66   : > { %v6048_v16 = vld [vmem:[%s7747_s1] sm:$0xff]   ;;  %vm1740_vm0 = vcmask 1043456   ;;  %v6049_v17 = vld [vmem:[%s7747_s1 + $0x8] sm:$0x1f]   ;;  %vm1741_vm1 = vcmask 1044480   ;;  %s1333_s4 = sand.u32 1, %s6209_s12  }
  0x67   : > { %5717 = vmatprep.subr.bf16.mxu0 %v6048_v16  ;;  %5793 = vmatprep.subr.bf16.mxu1 %v6048_v16  ;;  %v6219_v18 = vmov 65535   ;;  %s6022_s5 = smul.u32 1152, %s1333_s4  ;;  %vm1631_vm2 = vcmask 203776   ;;  %vm4769_vm3 = vcmask 158720  }
  0x68   : > { %5718 = vmatpush3.bf16.msra.mxu0 %v6048_v16  ;;  %5794 = vmatpush3.bf16.msra.mxu1 %v6048_v16  ;;  %v1742_v19 = vsel %vm1740_vm0, 4294967295, %v6219_v18  ;;  %s1357_s7 = smul.u32 72, %s4904_s15 }
  0x69   : > { %v1743_v20 = vsel %vm1741_vm1, %v1742_v19, 0  ;;  %s6575_s6 = scalar_lea.vmem [#allocation2], %s6022_s5 }
  0x6a   : > { %v1745_v21 = vand.u32 %v6049_v17, %v1743_v20  ;;  %v6050_v22 = vld [vmem:[%s6575_s6] sm:$0xff]   ;;  %v6052_v24 = vld [vmem:[%s6575_s6 + $0x8] sm:$0xff]   ;;  %v6054_v26 = vld [vmem:[%s6575_s6 + $0x10] sm:$0xff]   ;;  %p1358_p8 = scmp.lt.s32.totalorder %s1357_s7, 143 }
  0x6b   : > { %v6051_v23 = vld [vmem:[%s6575_s6 + $0x120] sm:$0xff]   ;;  %5721 = vmatprep.mubr.msk.bf16.mxu0 %vm1631_vm2, %v6050_v22  ;;  %v6053_v25 = vld [vmem:[%s6575_s6 + $0x128] sm:$0xff]   ;;  %v6055_v27 = vld [vmem:[%s6575_s6 + $0x130] sm:$0xff]  }
  0x6c   : > { %5719 = vmatprep.subr.bf16.mxu0 %v1745_v21  ;;  %5795 = vmatprep.subr.bf16.mxu1 %v1745_v21  ;;  %v6056_v28 = vld [vmem:[%s6575_s6 + $0x18] sm:$0xff]   ;;  %v6058_v30 = vld [vmem:[%s6575_s6 + $0x20] sm:$0xff]   ;;  %v6060_v32 = vld [vmem:[%s6575_s6 + $0x28] sm:$0xff]   ;;  %s8117_s7 = smov (!%p1358_p8, %s1357_s7), 143 }
  0x6d   : > { %5720 = vmatpush3.bf16.msra.mxu0 %v1745_v21  ;;  %5796 = vmatpush3.bf16.msra.mxu1 %v1745_v21  ;;  %v6057_v29 = vld [vmem:[%s6575_s6 + $0x138] sm:$0xff]   ;;  %v6059_v31 = vld [vmem:[%s6575_s6 + $0x140] sm:$0xff]   ;;  %v6061_v33 = vld [vmem:[%s6575_s6 + $0x148] sm:$0xff]   ;;  %s4910_s10 = sshll.u32 %s8117_s7, 2 }
  0x6e   : > { %5797 = vmatprep.mubr.msk.bf16.mxu1 %vm1631_vm2, %v6051_v23  ;;  %5869 = vmatprep.subr.bf16.mxu0 %v6048_v16  ;;  %v6062_v34 = vld [vmem:[%s6575_s6 + $0x30] sm:$0xff]   ;;  %v6064_v36 = vld [vmem:[%s6575_s6 + $0x38] sm:$0xff]   ;;  %v6066_v38 = vld [vmem:[%s6575_s6 + $0x40] sm:$0xff]   ;;  %s7322_s14 = scalar_lea.vmem %s7749_s3, %s4910_s10 }
  0x6f   : > { %5945 = vmatprep.subr.bf16.mxu1 %v6048_v16  ;;  %v6063_v35 = vld [vmem:[%s6575_s6 + $0x150] sm:$0xff]   ;;  %v6065_v37 = vld [vmem:[%s6575_s6 + $0x158] sm:$0xff]   ;;  %v6067_v39 = vld [vmem:[%s6575_s6 + $0x160] sm:$0xff]  }
  0x70   : > { %5722 = vmatmul.mubr.msk.bf16.vlgmr.msra.gmra.mrb[0].mxu0 %vm1631_vm2, %v6052_v24  ;;  %5798 = vmatmul.mubr.msk.bf16.vlgmr.msra.gmra.mrb[0].mxu1 %vm1631_vm2, %v6053_v25  ;;  %v6068_v40 = vld [vmem:[%s6575_s6 + $0x48] sm:$0xff]   ;;  %v6070_v42 = vld [vmem:[%s6575_s6 + $0x50] sm:$0xff]   ;;  %v6072_v44 = vld [vmem:[%s6575_s6 + $0x58] sm:$0xff]  }
  0x71   : > { %5870 = vmatpush3.bf16.msra.mxu0 %v6048_v16  ;;  %5946 = vmatpush3.bf16.msra.mxu1 %v6048_v16  ;;  %v6069_v41 = vld [vmem:[%s6575_s6 + $0x168] sm:$0xff]   ;;  %v6071_v43 = vld [vmem:[%s6575_s6 + $0x170] sm:$0xff]   ;;  %v6073_v45 = vld [vmem:[%s6575_s6 + $0x178] sm:$0xff]  }
  0x72   : > { %5725 = vmatprep.mubr.msk.bf16.mxu0 %vm1631_vm2, %v6054_v26  ;;  %5801 = vmatprep.mubr.msk.bf16.mxu1 %vm1631_vm2, %v6055_v27  ;;  %v6074_v46 = vld [vmem:[%s6575_s6 + $0x60] sm:$0xff]   ;;  %v6076_v48 = vld [vmem:[%s6575_s6 + $0x68] sm:$0xff]   ;;  %v6078_v50 = vld [vmem:[%s6575_s6 + $0x70] sm:$0xff]  }
  0x73   : > { %5871 = vmatprep.subr.bf16.mxu0 %v1745_v21  ;;  %5947 = vmatprep.subr.bf16.mxu1 %v1745_v21  ;;  %v6075_v47 = vld [vmem:[%s6575_s6 + $0x180] sm:$0xff]   ;;  %v6077_v49 = vld [vmem:[%s6575_s6 + $0x188] sm:$0xff]   ;;  %v6079_v51 = vld [vmem:[%s6575_s6 + $0x190] sm:$0xff]  }
  0x74   : > { %v6080_v52 = vld [vmem:[%s6575_s6 + $0x78] sm:$0xff]   ;;  %v6082_v54 = vld [vmem:[%s6575_s6 + $0x80] sm:$0xff]   ;;  %v6084_v56 = vld [vmem:[%s6575_s6 + $0x88] sm:$0xff]  }
  0x75   : > { %5872 = vmatpush3.bf16.msra.mxu0 %v1745_v21  ;;  %5948 = vmatpush3.bf16.msra.mxu1 %v1745_v21  ;;  %v6081_v53 = vld [vmem:[%s6575_s6 + $0x198] sm:$0xff]   ;;  %v6083_v55 = vld [vmem:[%s6575_s6 + $0x1a0] sm:$0xff]   ;;  %v6085_v57 = vld [vmem:[%s6575_s6 + $0x1a8] sm:$0xff]  }
  0x76   : > { %v6086_v58 = vld [vmem:[%s6575_s6 + $0x90] sm:$0xff]   ;;  %v6088_v60 = vld [vmem:[%s6575_s6 + $0x98] sm:$0xff]   ;;  %v6090_v62 = vld [vmem:[%s6575_s6 + $0xa0] sm:$0xff]  }
  0x77   : > { %v6087_v59 = vld [vmem:[%s6575_s6 + $0x1b0] sm:$0xff]   ;;  %v6089_v61 = vld [vmem:[%s6575_s6 + $0x1b8] sm:$0xff]   ;;  %v6091_v63 = vld [vmem:[%s6575_s6 + $0x1c0] sm:$0xff]  }
  0x78   : > { %5726 = vmatmul.mubr.msk.bf16.gmra.mrb[4].mxu0 %vm1631_vm2, %v6056_v28  ;;  %5802 = vmatmul.mubr.msk.bf16.gmra.mrb[4].mxu1 %vm1631_vm2, %v6057_v29  ;;  %v6092_v0 = vld [vmem:[%s6575_s6 + $0xa8] sm:$0xff]   ;;  %v6094_v2 = vld [vmem:[%s6575_s6 + $0xb0] sm:$0xff]   ;;  %v6096_v4 = vld [vmem:[%s6575_s6 + $0xb8] sm:$0xff]  }
  0x79   : > { %5729 = vmatprep.mubr.msk.bf16.mxu0 %vm1631_vm2, %v6058_v30  ;;  %5805 = vmatprep.mubr.msk.bf16.mxu1 %vm1631_vm2, %v6059_v31  ;;  %v6093_v1 = vld [vmem:[%s6575_s6 + $0x1c8] sm:$0xff]   ;;  %v6095_v3 = vld [vmem:[%s6575_s6 + $0x1d0] sm:$0xff]   ;;  %v6097_v5 = vld [vmem:[%s6575_s6 + $0x1d8] sm:$0xff]  }
  0x7a   : > { %v6098_v6 = vld [vmem:[%s6575_s6 + $0xc0] sm:$0xff]   ;;  %v6100_v8 = vld [vmem:[%s6575_s6 + $0xc8] sm:$0xff]   ;;  %v6102_v10 = vld [vmem:[%s6575_s6 + $0xd0] sm:$0xff]  }
  0x7b   : > { %v6099_v7 = vld [vmem:[%s6575_s6 + $0x1e0] sm:$0xff]   ;;  %v6101_v9 = vld [vmem:[%s6575_s6 + $0x1e8] sm:$0xff]   ;;  %v6103_v11 = vld [vmem:[%s6575_s6 + $0x1f0] sm:$0xff]  }
  0x7c   : > { %v6104_v12 = vld [vmem:[%s6575_s6 + $0xd8] sm:$0xff]   ;;  %v6106_v14 = vld [vmem:[%s6575_s6 + $0xe0] sm:$0xff]   ;;  %v6108_v16 = vld [vmem:[%s6575_s6 + $0xe8] sm:$0xff]  }
  0x7d   : > { %v6105_v13 = vld [vmem:[%s6575_s6 + $0x1f8] sm:$0xff]   ;;  %v6107_v15 = vld [vmem:[%s6575_s6 + $0x200] sm:$0xff]   ;;  %v6109_v17 = vld [vmem:[%s6575_s6 + $0x208] sm:$0xff]  }
  0x7e   : > { %v6110_v18 = vld [vmem:[%s6575_s6 + $0xf0] sm:$0xff]   ;;  %v6112_v20 = vld [vmem:[%s6575_s6 + $0xf8] sm:$0xff]   ;;  %v6114_v22 = vld [vmem:[%s6575_s6 + $0x100] sm:$0xff]  }
  0x7f   : > { %v6111_v19 = vld [vmem:[%s6575_s6 + $0x210] sm:$0xff]   ;;  %v6113_v21 = vld [vmem:[%s6575_s6 + $0x218] sm:$0xff]   ;;  %v6115_v23 = vld [vmem:[%s6575_s6 + $0x220] sm:$0xff]  }
  0x80   : > { %5730 = vmatmul.mubr.msk.bf16.gmra.mrb[8].mxu0 %vm1631_vm2, %v6060_v32  ;;  %5806 = vmatmul.mubr.msk.bf16.gmra.mrb[8].mxu1 %vm1631_vm2, %v6061_v33  ;;  %v6116_v24 = vld [vmem:[%s6575_s6 + $0x108] sm:$0xff]   ;;  %v6118_v26 = vld [vmem:[%s6575_s6 + $0x110] sm:$0xff]   ;;  %v6120_v28 = vld [vmem:[%s6575_s6 + $0x118] sm:$0xff]  }
  0x81   : > { %5733 = vmatprep.mubr.msk.bf16.mxu0 %vm1631_vm2, %v6062_v34  ;;  %5809 = vmatprep.mubr.msk.bf16.mxu1 %vm1631_vm2, %v6063_v35  ;;  %v6117_v25 = vld [vmem:[%s6575_s6 + $0x228] sm:$0xff]   ;;  %v6119_v27 = vld [vmem:[%s6575_s6 + $0x230] sm:$0xff]   ;;  %v6121_v29 = vld [vmem:[%s6575_s6 + $0x238] sm:$0xff]  }
  0x82   : > { %v6122_v30 = vld [vmem:[%s6575_s6 + $0x240] sm:$0xff]   ;;  %v6124_v32 = vld [vmem:[%s6575_s6 + $0x248] sm:$0xff]   ;;  %v6126_v34 = vld [vmem:[%s6575_s6 + $0x250] sm:$0xff]  }
  0x83   : > { %v6123_v31 = vld [vmem:[%s6575_s6 + $0x360] sm:$0xff]   ;;  %v6125_v33 = vld [vmem:[%s6575_s6 + $0x368] sm:$0xff]   ;;  %v6127_v35 = vld [vmem:[%s6575_s6 + $0x370] sm:$0xff]  }
  0x88   : > { %5734 = vmatmul.mubr.msk.bf16.gmra.mrb[12].mxu0 %vm1631_vm2, %v6064_v36  ;;  %5810 = vmatmul.mubr.msk.bf16.gmra.mrb[12].mxu1 %vm1631_vm2, %v6065_v37  ;;  %v6128_v36 = vld [vmem:[%s6575_s6 + $0x258] sm:$0xff]  }
  0x89   : > { %5737 = vmatprep.mubr.msk.bf16.mxu0 %vm1631_vm2, %v6066_v38  ;;  %5813 = vmatprep.mubr.msk.bf16.mxu1 %vm1631_vm2, %v6067_v39  ;;  %v6129_v37 = vld [vmem:[%s6575_s6 + $0x378] sm:$0xff]   ;;  %v6130_v38 = vld [vmem:[%s6575_s6 + $0x260] sm:$0xff]  }
  0x8a   : > { %v6131_v39 = vld [vmem:[%s6575_s6 + $0x380] sm:$0xff]  }
  0x90   : > { %5738 = vmatmul.mubr.msk.bf16.gmra.mrb[16].mxu0 %vm1631_vm2, %v6068_v40  ;;  %5814 = vmatmul.mubr.msk.bf16.gmra.mrb[16].mxu1 %vm1631_vm2, %v6069_v41  ;;  %v6132_v40 = vld [vmem:[%s6575_s6 + $0x268] sm:$0xff]  }
  0x91   : > { %5741 = vmatprep.mubr.msk.bf16.mxu0 %vm1631_vm2, %v6070_v42  ;;  %5817 = vmatprep.mubr.msk.bf16.mxu1 %vm1631_vm2, %v6071_v43  ;;  %v6133_v41 = vld [vmem:[%s6575_s6 + $0x388] sm:$0xff]   ;;  %v6134_v42 = vld [vmem:[%s6575_s6 + $0x270] sm:$0xff]  }
  0x92   : > { %v6135_v43 = vld [vmem:[%s6575_s6 + $0x390] sm:$0xff]  }
  0x98   : > { %5742 = vmatmul.mubr.msk.bf16.gmra.mrb[20].mxu0 %vm1631_vm2, %v6072_v44  ;;  %5818 = vmatmul.mubr.msk.bf16.gmra.mrb[20].mxu1 %vm1631_vm2, %v6073_v45  ;;  %v6136_v44 = vld [vmem:[%s6575_s6 + $0x278] sm:$0xff]  }
  0x99   : > { %5745 = vmatprep.mubr.msk.bf16.mxu0 %vm1631_vm2, %v6074_v46  ;;  %5821 = vmatprep.mubr.msk.bf16.mxu1 %vm1631_vm2, %v6075_v47  ;;  %v6137_v45 = vld [vmem:[%s6575_s6 + $0x398] sm:$0xff]   ;;  %v6138_v46 = vld [vmem:[%s6575_s6 + $0x280] sm:$0xff]  }
  0x9a   : > { %v6139_v47 = vld [vmem:[%s6575_s6 + $0x3a0] sm:$0xff]  }
  0xa0   : > { %5746 = vmatmul.mubr.msk.bf16.gmra.mrb[24].mxu0 %vm1631_vm2, %v6076_v48  ;;  %5822 = vmatmul.mubr.msk.bf16.gmra.mrb[24].mxu1 %vm1631_vm2, %v6077_v49  ;;  %v6140_v48 = vld [vmem:[%s6575_s6 + $0x288] sm:$0xff]  }
  0xa1   : > { %5749 = vmatprep.mubr.msk.bf16.mxu0 %vm1631_vm2, %v6078_v50  ;;  %5825 = vmatprep.mubr.msk.bf16.mxu1 %vm1631_vm2, %v6079_v51  ;;  %v6141_v49 = vld [vmem:[%s6575_s6 + $0x3a8] sm:$0xff]   ;;  %v6142_v50 = vld [vmem:[%s6575_s6 + $0x290] sm:$0xff]  }
  0xa2   : > { %v6143_v51 = vld [vmem:[%s6575_s6 + $0x3b0] sm:$0xff]  }
  0xa8   : > { %5750 = vmatmul.mubr.msk.bf16.gmra.mrb[28].mxu0 %vm1631_vm2, %v6080_v52  ;;  %5826 = vmatmul.mubr.msk.bf16.gmra.mrb[28].mxu1 %vm1631_vm2, %v6081_v53  ;;  %v6144_v52 = vld [vmem:[%s6575_s6 + $0x298] sm:$0xff]  }
  0xa9   : > { %5753 = vmatprep.mubr.msk.bf16.mxu0 %vm1631_vm2, %v6082_v54  ;;  %5829 = vmatprep.mubr.msk.bf16.mxu1 %vm1631_vm2, %v6083_v55  ;;  %v6145_v53 = vld [vmem:[%s6575_s6 + $0x3b8] sm:$0xff]   ;;  %v6146_v54 = vld [vmem:[%s6575_s6 + $0x2a0] sm:$0xff]  }
  0xaa   : > { %v6147_v55 = vld [vmem:[%s6575_s6 + $0x3c0] sm:$0xff]  }
  0xb0   : > { %5754 = vmatmul.mubr.msk.bf16.gmra.mrb[32].mxu0 %vm1631_vm2, %v6084_v56  ;;  %5830 = vmatmul.mubr.msk.bf16.gmra.mrb[32].mxu1 %vm1631_vm2, %v6085_v57  ;;  %v6148_v56 = vld [vmem:[%s6575_s6 + $0x2a8] sm:$0xff]  }
  0xb1   : > { %5757 = vmatprep.mubr.msk.bf16.mxu0 %vm1631_vm2, %v6086_v58  ;;  %5833 = vmatprep.mubr.msk.bf16.mxu1 %vm1631_vm2, %v6087_v59  ;;  %v6149_v57 = vld [vmem:[%s6575_s6 + $0x3c8] sm:$0xff]   ;;  %v6150_v58 = vld [vmem:[%s6575_s6 + $0x2b0] sm:$0xff]  }
  0xb2   : > { %v6151_v59 = vld [vmem:[%s6575_s6 + $0x3d0] sm:$0xff]  }
  0xb8   : > { %5758 = vmatmul.mubr.msk.bf16.gmra.mrb[36].mxu0 %vm1631_vm2, %v6088_v60  ;;  %5834 = vmatmul.mubr.msk.bf16.gmra.mrb[36].mxu1 %vm1631_vm2, %v6089_v61  ;;  %v6152_v60 = vld [vmem:[%s6575_s6 + $0x2b8] sm:$0xff]  }
  0xb9   : > { %5761 = vmatprep.mubr.msk.bf16.mxu0 %vm1631_vm2, %v6090_v62  ;;  %5837 = vmatprep.mubr.msk.bf16.mxu1 %vm1631_vm2, %v6091_v63  ;;  %v6153_v61 = vld [vmem:[%s6575_s6 + $0x3d8] sm:$0xff]   ;;  %v6154_v62 = vld [vmem:[%s6575_s6 + $0x2c0] sm:$0xff]  }
  0xba   : > { %v6155_v63 = vld [vmem:[%s6575_s6 + $0x3e0] sm:$0xff]  }
  0xc0   : > { %5762 = vmatmul.mubr.msk.bf16.gmra.mrb[40].mxu0 %vm1631_vm2, %v6092_v0  ;;  %5838 = vmatmul.mubr.msk.bf16.gmra.mrb[40].mxu1 %vm1631_vm2, %v6093_v1  ;;  %v6156_v0 = vld [vmem:[%s6575_s6 + $0x2c8] sm:$0xff]  }
  0xc1   : > { %5765 = vmatprep.mubr.msk.bf16.mxu0 %vm1631_vm2, %v6094_v2  ;;  %5841 = vmatprep.mubr.msk.bf16.mxu1 %vm1631_vm2, %v6095_v3  ;;  %v6157_v1 = vld [vmem:[%s6575_s6 + $0x3e8] sm:$0xff]   ;;  %v6158_v2 = vld [vmem:[%s6575_s6 + $0x2d0] sm:$0xff]  }
  0xc2   : > { %v6159_v3 = vld [vmem:[%s6575_s6 + $0x3f0] sm:$0xff]  }
  0xc8   : > { %5766 = vmatmul.mubr.msk.bf16.gmra.mrb[44].mxu0 %vm1631_vm2, %v6096_v4  ;;  %5842 = vmatmul.mubr.msk.bf16.gmra.mrb[44].mxu1 %vm1631_vm2, %v6097_v5 }
  0xc9   : > { %5769 = vmatprep.mubr.msk.bf16.mxu0 %vm1631_vm2, %v6098_v6  ;;  %5845 = vmatprep.mubr.msk.bf16.mxu1 %vm1631_vm2, %v6099_v7 }
  0xd0   : > { %5770 = vmatmul.mubr.msk.bf16.gmra.mrb[48].mxu0 %vm1631_vm2, %v6100_v8  ;;  %5846 = vmatmul.mubr.msk.bf16.gmra.mrb[48].mxu1 %vm1631_vm2, %v6101_v9  ;;  %v6160_v9 = vld [vmem:[%s6575_s6 + $0x2d8] sm:$0xff]  }
  0xd1   : > { %5773 = vmatprep.mubr.msk.bf16.mxu0 %vm1631_vm2, %v6102_v10  ;;  %5849 = vmatprep.mubr.msk.bf16.mxu1 %vm1631_vm2, %v6103_v11  ;;  %v6161_v10 = vld [vmem:[%s6575_s6 + $0x3f8] sm:$0xff]   ;;  %v6188_v11 = vld [vmem:[%s6575_s6 + $0x348] sm:$0xff]  }
  0xd8   : > { %5774 = vmatmul.mubr.msk.bf16.gmra.mrb[52].mxu0 %vm1631_vm2, %v6104_v12  ;;  %5850 = vmatmul.mubr.msk.bf16.gmra.mrb[52].mxu1 %vm1631_vm2, %v6105_v13 }
  0xd9   : > { %5777 = vmatprep.mubr.msk.bf16.mxu0 %vm1631_vm2, %v6106_v14  ;;  %5853 = vmatprep.mubr.msk.bf16.mxu1 %vm1631_vm2, %v6107_v15  ;;  %v6162_v14 = vld [vmem:[%s6575_s6 + $0x2e0] sm:$0xff]  }
  0xda   : > { %v6163_v15 = vld [vmem:[%s6575_s6 + $0x400] sm:$0xff]  }
  0xe0   : > { %5778 = vmatmul.mubr.msk.bf16.gmra.mrb[56].mxu0 %vm1631_vm2, %v6108_v16  ;;  %5854 = vmatmul.mubr.msk.bf16.gmra.mrb[56].mxu1 %vm1631_vm2, %v6109_v17 }
  0xe1   : > { %5781 = vmatprep.mubr.msk.bf16.mxu0 %vm1631_vm2, %v6110_v18  ;;  %5857 = vmatprep.mubr.msk.bf16.mxu1 %vm1631_vm2, %v6111_v19 }
  0xe8   : > { %5782 = vmatmul.mubr.msk.bf16.gmra.mrb[60].mxu0 %vm1631_vm2, %v6112_v20  ;;  %5858 = vmatmul.mubr.msk.bf16.gmra.mrb[60].mxu1 %vm1631_vm2, %v6113_v21 }
  0xe9   : > { %5785 = vmatprep.mubr.msk.bf16.mxu0 %vm1631_vm2, %v6114_v22  ;;  %5861 = vmatprep.mubr.msk.bf16.mxu1 %vm1631_vm2, %v6115_v23  ;;  %v6187_v22 = vld [vmem:[%s6575_s6 + $0x460] sm:$0xff]  }
  0xf0   : > { %5786 = vmatmul.mubr.msk.bf16.gmra.mrb[64].mxu0 %vm1631_vm2, %v6116_v24  ;;  %5862 = vmatmul.mubr.msk.bf16.gmra.mrb[64].mxu1 %vm1631_vm2, %v6117_v25  ;;  %v6164_v25 = vld [vmem:[%s6575_s6 + $0x2e8] sm:$0xff]  }
  0xf1   : > { %5789 = vmatprep.mubr.msk.bf16.mxu0 %vm1631_vm2, %v6118_v26  ;;  %5865 = vmatprep.mubr.msk.bf16.mxu1 %vm1631_vm2, %v6119_v27  ;;  %v6165_v26 = vld [vmem:[%s6575_s6 + $0x408] sm:$0xff]   ;;  %v6185_v27 = vld [vmem:[%s6575_s6 + $0x458] sm:$0xff]  }
  0xf8   : > { %5790 = vmatmul.mubr.msk.bf16.gmra.mrb[68].mxu0 %vm1631_vm2, %v6120_v28  ;;  %5866 = vmatmul.mubr.msk.bf16.gmra.mrb[68].mxu1 %vm1631_vm2, %v6121_v29 }
  0xf9   : > { %5873 = vmatprep.mubr.msk.bf16.mxu0 %vm1631_vm2, %v6122_v30  ;;  %5949 = vmatprep.mubr.msk.bf16.mxu1 %vm1631_vm2, %v6123_v31  ;;  %v6166_v30 = vld [vmem:[%s6575_s6 + $0x2f0] sm:$0xff]  }
  0xfa   : > { %v6167_v31 = vld [vmem:[%s6575_s6 + $0x410] sm:$0xff]  }
 0x100   : > { %5874 = vmatmul.mubr.msk.bf16.vlgmr.msra.gmra.mrb[72].mxu0 %vm1631_vm2, %v6124_v32  ;;  %5950 = vmatmul.mubr.msk.bf16.vlgmr.msra.gmra.mrb[72].mxu1 %vm1631_vm2, %v6125_v33 }
 0x101   : > { %5877 = vmatprep.mubr.msk.bf16.mxu0 %vm1631_vm2, %v6126_v34  ;;  %5953 = vmatprep.mubr.msk.bf16.mxu1 %vm1631_vm2, %v6127_v35 }
 0x108   : > { %5878 = vmatmul.mubr.msk.bf16.gmra.mrb[76].mxu0 %vm1631_vm2, %v6128_v36  ;;  %5954 = vmatmul.mubr.msk.bf16.gmra.mrb[76].mxu1 %vm1631_vm2, %v6129_v37 }
 0x109   : > { %5881 = vmatprep.mubr.msk.bf16.mxu0 %vm1631_vm2, %v6130_v38  ;;  %5957 = vmatprep.mubr.msk.bf16.mxu1 %vm1631_vm2, %v6131_v39 }
 0x110   : > { %5882 = vmatmul.mubr.msk.bf16.gmra.mrb[80].mxu0 %vm1631_vm2, %v6132_v40  ;;  %5958 = vmatmul.mubr.msk.bf16.gmra.mrb[80].mxu1 %vm1631_vm2, %v6133_v41  ;;  %v6168_v41 = vld [vmem:[%s6575_s6 + $0x2f8] sm:$0xff]  }
 0x111   : > { %5885 = vmatprep.mubr.msk.bf16.mxu0 %vm1631_vm2, %v6134_v42  ;;  %5961 = vmatprep.mubr.msk.bf16.mxu1 %vm1631_vm2, %v6135_v43  ;;  %v6169_v42 = vld [vmem:[%s6575_s6 + $0x418] sm:$0xff]  }
 0x112   : > { %v6184_v43 = vld [vmem:[%s6575_s6 + $0x338] sm:$0xff]  }
 0x118   : > { %5886 = vmatmul.mubr.msk.bf16.gmra.mrb[84].mxu0 %vm1631_vm2, %v6136_v44  ;;  %5962 = vmatmul.mubr.msk.bf16.gmra.mrb[84].mxu1 %vm1631_vm2, %v6137_v45 }
 0x119   : > { %5889 = vmatprep.mubr.msk.bf16.mxu0 %vm1631_vm2, %v6138_v46  ;;  %5965 = vmatprep.mubr.msk.bf16.mxu1 %vm1631_vm2, %v6139_v47  ;;  %v6170_v46 = vld [vmem:[%s6575_s6 + $0x300] sm:$0xff]  }
 0x11a   : > { %v6171_v47 = vld [vmem:[%s6575_s6 + $0x420] sm:$0xff]  }
 0x120   : > { %5890 = vmatmul.mubr.msk.bf16.gmra.mrb[88].mxu0 %vm1631_vm2, %v6140_v48  ;;  %5966 = vmatmul.mubr.msk.bf16.gmra.mrb[88].mxu1 %vm1631_vm2, %v6141_v49 }
 0x121   : > { %5893 = vmatprep.mubr.msk.bf16.mxu0 %vm1631_vm2, %v6142_v50  ;;  %5969 = vmatprep.mubr.msk.bf16.mxu1 %vm1631_vm2, %v6143_v51 }
 0x128   : > { %5894 = vmatmul.mubr.msk.bf16.gmra.mrb[92].mxu0 %vm1631_vm2, %v6144_v52  ;;  %5970 = vmatmul.mubr.msk.bf16.gmra.mrb[92].mxu1 %vm1631_vm2, %v6145_v53 }
 0x129   : > { %5897 = vmatprep.mubr.msk.bf16.mxu0 %vm1631_vm2, %v6146_v54  ;;  %5973 = vmatprep.mubr.msk.bf16.mxu1 %vm1631_vm2, %v6147_v55  ;;  %v6183_v54 = vld [vmem:[%s6575_s6 + $0x450] sm:$0xff]  }
 0x130   : > { %5898 = vmatmul.mubr.msk.bf16.gmra.mrb[96].mxu0 %vm1631_vm2, %v6148_v56  ;;  %5974 = vmatmul.mubr.msk.bf16.gmra.mrb[96].mxu1 %vm1631_vm2, %v6149_v57  ;;  %v6172_v57 = vld [vmem:[%s6575_s6 + $0x308] sm:$0xff]  }
 0x131   : > { %5901 = vmatprep.mubr.msk.bf16.mxu0 %vm1631_vm2, %v6150_v58  ;;  %5977 = vmatprep.mubr.msk.bf16.mxu1 %vm1631_vm2, %v6151_v59  ;;  %v6173_v58 = vld [vmem:[%s6575_s6 + $0x428] sm:$0xff]  }
 0x132   : > { %v6181_v59 = vld [vmem:[%s6575_s6 + $0x448] sm:$0xff]  }
 0x138   : > { %5902 = vmatmul.mubr.msk.bf16.gmra.mrb[100].mxu0 %vm1631_vm2, %v6152_v60  ;;  %5978 = vmatmul.mubr.msk.bf16.gmra.mrb[100].mxu1 %vm1631_vm2, %v6153_v61 }
 0x139   : > { %5905 = vmatprep.mubr.msk.bf16.mxu0 %vm1631_vm2, %v6154_v62  ;;  %5981 = vmatprep.mubr.msk.bf16.mxu1 %vm1631_vm2, %v6155_v63  ;;  %v6174_v62 = vld [vmem:[%s6575_s6 + $0x310] sm:$0xff]  }
 0x13a   : > { %v6175_v63 = vld [vmem:[%s6575_s6 + $0x430] sm:$0xff]  }
 0x140   : > { %5906 = vmatmul.mubr.msk.bf16.gmra.mrb[104].mxu0 %vm1631_vm2, %v6156_v0  ;;  %5982 = vmatmul.mubr.msk.bf16.gmra.mrb[104].mxu1 %vm1631_vm2, %v6157_v1 }
 0x141   : > { %5909 = vmatprep.mubr.msk.bf16.mxu0 %vm1631_vm2, %v6158_v2  ;;  %5985 = vmatprep.mubr.msk.bf16.mxu1 %vm1631_vm2, %v6159_v3 }
 0x143   : > { %v6797_v4 = vpop.f32.mrb[0].mxu0  ;;  %v6799_v5 = vpop.f32.mrb[0].mxu1 }
 0x144   : > { %v6803_v7 = vpop.f32.mrb[1].mxu0  ;;  %v6805_v8 = vpop.f32.mrb[1].mxu1 }
 0x145   : > { %v6811_v12 = vpop.f32.mrb[2].mxu0  ;;  %v6813_v13 = vpop.f32.mrb[2].mxu1 }
 0x146   : > { %v6819_v17 = vpop.f32.mrb[3].mxu0  ;;  %v6821_v18 = vpop.f32.mrb[3].mxu1 }
 0x148   : > { %5910 = vmatmul.mubr.msk.bf16.gmra.mrb[108].mxu0 %vm1631_vm2, %v6160_v9  ;;  %5986 = vmatmul.mubr.msk.bf16.gmra.mrb[108].mxu1 %vm1631_vm2, %v6161_v10 }
 0x149   : > { %5913 = vmatprep.mubr.msk.bf16.mxu0 %vm1631_vm2, %v6162_v14  ;;  %5989 = vmatprep.mubr.msk.bf16.mxu1 %vm1631_vm2, %v6163_v15 }
 0x14b   : > { %v6829_v20 = vpop.f32.mrb[4].mxu0  ;;  %v6831_v21 = vpop.f32.mrb[4].mxu1 }
 0x14c   : > { %v6835_v23 = vpop.f32.mrb[5].mxu0  ;;  %v6837_v24 = vpop.f32.mrb[5].mxu1 }
 0x14d   : > { %v6843_v28 = vpop.f32.mrb[6].mxu0  ;;  %v6845_v29 = vpop.f32.mrb[6].mxu1 }
 0x14e   : > { %v6851_v33 = vpop.f32.mrb[7].mxu0  ;;  %v6853_v34 = vpop.f32.mrb[7].mxu1 }
 0x150   : > { %5914 = vmatmul.mubr.msk.bf16.gmra.mrb[112].mxu0 %vm1631_vm2, %v6164_v25  ;;  %5990 = vmatmul.mubr.msk.bf16.gmra.mrb[112].mxu1 %vm1631_vm2, %v6165_v26  ;;  %v6176_v26 = vld [vmem:[%s6575_s6 + $0x318] sm:$0xff]  }
 0x151   : > { %5917 = vmatprep.mubr.msk.bf16.mxu0 %vm1631_vm2, %v6166_v30  ;;  %5993 = vmatprep.mubr.msk.bf16.mxu1 %vm1631_vm2, %v6167_v31  ;;  %v6177_v30 = vld [vmem:[%s6575_s6 + $0x438] sm:$0xff]  }
 0x153   : > { %v6861_v36 = vpop.f32.mrb[8].mxu0  ;;  %v6863_v37 = vpop.f32.mrb[8].mxu1 }
 0x154   : > { %v6867_v39 = vpop.f32.mrb[9].mxu0  ;;  %v6869_v40 = vpop.f32.mrb[9].mxu1 }
 0x155   : > { %v6875_v44 = vpop.f32.mrb[10].mxu0  ;;  %v6877_v45 = vpop.f32.mrb[10].mxu1 }
 0x156   : > { %v6883_v49 = vpop.f32.mrb[11].mxu0  ;;  %v6885_v50 = vpop.f32.mrb[11].mxu1 }
 0x158   : > { %5918 = vmatmul.mubr.msk.bf16.gmra.mrb[116].mxu0 %vm1631_vm2, %v6168_v41  ;;  %5994 = vmatmul.mubr.msk.bf16.gmra.mrb[116].mxu1 %vm1631_vm2, %v6169_v42 }
 0x159   : > { %5921 = vmatprep.mubr.msk.bf16.mxu0 %vm1631_vm2, %v6170_v46  ;;  %5997 = vmatprep.mubr.msk.bf16.mxu1 %vm1631_vm2, %v6171_v47  ;;  %v6178_v46 = vld [vmem:[%s6575_s6 + $0x320] sm:$0xff]  }
 0x15a   : > { %v6179_v47 = vld [vmem:[%s6575_s6 + $0x440] sm:$0xff]  }
 0x15b   : > { %v6893_v52 = vpop.f32.mrb[12].mxu0  ;;  %v6895_v53 = vpop.f32.mrb[12].mxu1 }
 0x15c   : > { %v6899_v55 = vpop.f32.mrb[13].mxu0  ;;  %v6901_v56 = vpop.f32.mrb[13].mxu1 }
 0x15d   : > { %v6907_v60 = vpop.f32.mrb[14].mxu0  ;;  %v6909_v61 = vpop.f32.mrb[14].mxu1 }
 0x15e   : > { %v6915_v1 = vpop.f32.mrb[15].mxu0  ;;  %v6917_v2 = vpop.f32.mrb[15].mxu1 }
 0x160   : > { %5922 = vmatmul.mubr.msk.bf16.gmra.mrb[120].mxu0 %vm1631_vm2, %v6172_v57  ;;  %5998 = vmatmul.mubr.msk.bf16.gmra.mrb[120].mxu1 %vm1631_vm2, %v6173_v58 }
 0x161   : > { %5925 = vmatprep.mubr.msk.bf16.mxu0 %vm1631_vm2, %v6174_v62  ;;  %6001 = vmatprep.mubr.msk.bf16.mxu1 %vm1631_vm2, %v6175_v63  ;;  %v6180_v63 = vld [vmem:[%s6575_s6 + $0x328] sm:$0xff]  }
 0x163   : > { %v6925_v9 = vpop.f32.mrb[16].mxu0  ;;  %v6927_v10 = vpop.f32.mrb[16].mxu1 }
 0x164   : > { %v6931_v15 = vpop.f32.mrb[17].mxu0  ;;  %v6933_v25 = vpop.f32.mrb[17].mxu1 }
 0x165   : > { %v6939_v41 = vpop.f32.mrb[18].mxu0  ;;  %v6941_v42 = vpop.f32.mrb[18].mxu1 }
 0x166   : > { %v6947_v58 = vpop.f32.mrb[19].mxu0  ;;  %v6949_v62 = vpop.f32.mrb[19].mxu1 }
 0x168   : > { %5926 = vmatmul.mubr.msk.bf16.gmra.mrb[124].mxu0 %vm1631_vm2, %v6176_v26  ;;  %6002 = vmatmul.mubr.msk.bf16.gmra.mrb[124].mxu1 %vm1631_vm2, %v6177_v30 }
 0x169   : > { %5929 = vmatprep.mubr.msk.bf16.mxu0 %vm1631_vm2, %v6178_v46  ;;  %6005 = vmatprep.mubr.msk.bf16.mxu1 %vm1631_vm2, %v6179_v47  ;;  %v6182_v47 = vld [vmem:[%s6575_s6 + $0x330] sm:$0xff]  }
 0x16b   : > { %v6957_v31 = vpop.f32.mrb[20].mxu0  ;;  %v6959_v57 = vpop.f32.mrb[20].mxu1 }
 0x16c   : > { %v6963_v3 = vpop.f32.mrb[21].mxu0  ;;  %v6965_v0 = vpop.f32.mrb[21].mxu1 }
 0x16d   : > { %v6971_v30 = vpop.f32.mrb[22].mxu0  ;;  %v6973_v46 = vpop.f32.mrb[22].mxu1 }
 0x16e   : > { %v6979_v51 = vpop.f32.mrb[23].mxu0  ;;  %v6981_v48 = vpop.f32.mrb[23].mxu1 }
 0x16f   : > { %7847 = vst [vmem:[#allocation3_spill] sm:$0xff] %v6981_v48 }
 0x170   : > { %5930 = vmatmul.mubr.msk.bf16.gmra.mrb[128].mxu0 %vm1631_vm2, %v6180_v63  ;;  %6006 = vmatmul.mubr.msk.bf16.gmra.mrb[128].mxu1 %vm1631_vm2, %v6181_v59 }
 0x171   : > { %5933 = vmatprep.mubr.msk.bf16.mxu0 %vm1631_vm2, %v6182_v47  ;;  %6009 = vmatprep.mubr.msk.bf16.mxu1 %vm1631_vm2, %v6183_v54  ;;  %v6186_v54 = vld [vmem:[%s6575_s6 + $0x340] sm:$0xff]  }
 0x173   : > { %v6989_v26 = vpop.f32.mrb[24].mxu0  ;;  %v6991_v14 = vpop.f32.mrb[24].mxu1 }
 0x174   : > { %7848 = vst [vmem:[#allocation4_spill] sm:$0xff] %v6989_v26  ;;  %7849 = vst [vmem:[#allocation5_spill] sm:$0xff] %v6991_v14  ;;  %v6995_v35 = vpop.f32.mrb[25].mxu0  ;;  %v6997_v32 = vpop.f32.mrb[25].mxu1 }
 0x175   : > { %7850 = vst [vmem:[#allocation6_spill] sm:$0xff] %v6995_v35  ;;  %7851 = vst [vmem:[#allocation7_spill] sm:$0xff] %v6997_v32  ;;  %v7003_v63 = vpop.f32.mrb[26].mxu0  ;;  %v7005_v47 = vpop.f32.mrb[26].mxu1  ;;  %v6192_v32 = vld [vmem:[%s6575_s6 + $0x358] sm:$0xff]   ;;  %v7947_v35 = vmax.f32 %v6819_v17, %v6821_v18 }
 0x176   : > { %7852 = vst [vmem:[#allocation8_spill] sm:$0xff] %v7003_v63  ;;  %7853 = vst [vmem:[#allocation9_spill] sm:$0xff] %v7005_v47  ;;  %v7011_v19 = vpop.f32.mrb[27].mxu0  ;;  %v7013_v16 = vpop.f32.mrb[27].mxu1 }
 0x177   : > { %7854 = vst [vmem:[#allocation10_spill] sm:$0xff] %v7011_v19  ;;  %7855 = vst [vmem:[#allocation11_spill] sm:$0xff] %v7013_v16  ;;  %v6189_v16 = vld [vmem:[%s6575_s6 + $0x468] sm:$0xff]   ;;  %v6191_v19 = vld [vmem:[%s6575_s6 + $0x470] sm:$0xff]  }
 0x178   : > { %5934 = vmatmul.mubr.msk.bf16.gmra.mrb[132].mxu0 %vm1631_vm2, %v6184_v43  ;;  %6010 = vmatmul.mubr.msk.bf16.gmra.mrb[132].mxu1 %vm1631_vm2, %v6185_v27 }
 0x179   : > { %5937 = vmatprep.mubr.msk.bf16.mxu0 %vm1631_vm2, %v6186_v54  ;;  %6013 = vmatprep.mubr.msk.bf16.mxu1 %vm1631_vm2, %v6187_v22  ;;  %v6190_v22 = vld [vmem:[%s6575_s6 + $0x350] sm:$0xff]  }
 0x17b   : > { %v7021_v59 = vpop.f32.mrb[28].mxu0  ;;  %v7023_v38 = vpop.f32.mrb[28].mxu1 }
 0x17c   : > { %7856 = vst [vmem:[#allocation12_spill] sm:$0xff] %v7021_v59  ;;  %7857 = vst [vmem:[#allocation13_spill] sm:$0xff] %v7023_v38  ;;  %v7027_v47 = vpop.f32.mrb[29].mxu0  ;;  %v7029_v63 = vpop.f32.mrb[29].mxu1 }
 0x17d   : > { %7858 = vst [vmem:[#allocation14_spill] sm:$0xff] %v7027_v47  ;;  %7859 = vst [vmem:[#allocation15_spill] sm:$0xff] %v7029_v63  ;;  %v7035_v43 = vpop.f32.mrb[30].mxu0  ;;  %v7037_v54 = vpop.f32.mrb[30].mxu1 }
 0x17e   : > { %7860 = vst [vmem:[#allocation16_spill] sm:$0xff] %v7035_v43  ;;  %7861 = vst [vmem:[#allocation17_spill] sm:$0xff] %v7037_v54  ;;  %v7043_v38 = vpop.f32.mrb[31].mxu0  ;;  %v7045_v59 = vpop.f32.mrb[31].mxu1 }
 0x17f   : > { %7862 = vst [vmem:[#allocation18_spill] sm:$0xff] %v7043_v38  ;;  %7863 = vst [vmem:[#allocation19_spill] sm:$0xff] %v7045_v59  ;;  %v6193_v59 = vld [vmem:[%s6575_s6 + $0x478] sm:$0xff]  }
 0x180   : > { %5938 = vmatmul.mubr.msk.bf16.gmra.mrb[136].mxu0 %vm1631_vm2, %v6188_v11  ;;  %6014 = vmatmul.mubr.msk.bf16.gmra.mrb[136].mxu1 %vm1631_vm2, %v6189_v16 }
 0x181   : > { %5941 = vmatprep.mubr.msk.bf16.mxu0 %vm1631_vm2, %v6190_v22  ;;  %6017 = vmatprep.mubr.msk.bf16.mxu1 %vm1631_vm2, %v6191_v19 }
 0x183   : > { %v7053_v27 = vpop.f32.mrb[32].mxu0  ;;  %v7055_v63 = vpop.f32.mrb[32].mxu1 }
 0x184   : > { %7864 = vst [vmem:[#allocation20_spill] sm:$0xff] %v7053_v27  ;;  %7865 = vst [vmem:[#allocation21_spill] sm:$0xff] %v7055_v63  ;;  %v7059_v54 = vpop.f32.mrb[33].mxu0  ;;  %v7061_v43 = vpop.f32.mrb[33].mxu1  ;;  %v7946_v27 = vmax.f32 %v6811_v12, %v6813_v13 }
 0x185   : > { %7866 = vst [vmem:[#allocation22_spill] sm:$0xff] %v7059_v54  ;;  %7867 = vst [vmem:[#allocation23_spill] sm:$0xff] %v7061_v43  ;;  %v7067_v16 = vpop.f32.mrb[34].mxu0  ;;  %v7069_v22 = vpop.f32.mrb[34].mxu1  ;;  %v7944_v43 = vmax.f32 %v6797_v4, %v6799_v5 }
 0x186   : > { %7868 = vst [vmem:[#allocation24_spill] sm:$0xff] %v7067_v16  ;;  %7869 = vst [vmem:[#allocation25_spill] sm:$0xff] %v7069_v22  ;;  %v7073_v38 = vpop.f32.mrb[35].mxu0  ;;  %v7075_v47 = vpop.f32.mrb[35].mxu1  ;;  %v7305_v22 = vld [vmem:[%s7748_s2] ss:$0 sm:$0xff] }
 0x187   : > { %7870 = vst [vmem:[#allocation26_spill] sm:$0xff] %v7073_v38  ;;  %7871 = vst [vmem:[#allocation27_spill] sm:$0xff] %v7075_v47 }
 0x188   : > { %5942 = vmatmul.mubr.msk.bf16.gmra.mrb[140].mxu0 %vm1631_vm2, %v6192_v32  ;;  %6018 = vmatmul.mubr.msk.bf16.gmra.mrb[140].mxu1 %vm1631_vm2, %v6193_v59 }
 0x18b   : > { %v7081_v63 = vpop.f32.mrb[36].mxu0  ;;  %v7083_v11 = vpop.f32.mrb[36].mxu1 }
 0x18c   : > { %7872 = vst [vmem:[#allocation28_spill] sm:$0xff] %v7081_v63  ;;  %7873 = vst [vmem:[#allocation29_spill] sm:$0xff] %v7083_v11  ;;  %v7087_v54 = vpop.f32.mrb[37].mxu0  ;;  %v7089_v19 = vpop.f32.mrb[37].mxu1 }
 0x18d   : > { %7874 = vst [vmem:[#allocation30_spill] sm:$0xff] %v7087_v54  ;;  %7875 = vst [vmem:[#allocation31_spill] sm:$0xff] %v7089_v19  ;;  %v7093_v16 = vpop.f32.mrb[38].mxu0  ;;  %v7095_v6 = vpop.f32.mrb[38].mxu1 }
 0x18e   : > { %7876 = vst [vmem:[#allocation32_spill] sm:$0xff] %v7093_v16  ;;  %7877 = vst [vmem:[#allocation33_spill] sm:$0xff] %v7095_v6  ;;  %v7099_v59 = vpop.f32.mrb[39].mxu0  ;;  %v7101_v47 = vpop.f32.mrb[39].mxu1 }
 0x18f   : > { %7878 = vst [vmem:[#allocation34_spill] sm:$0xff] %v7099_v59  ;;  %7879 = vst [vmem:[#allocation35_spill] sm:$0xff] %v7101_v47 }
 0x193   : > { %v7105_v11 = vpop.f32.mrb[40].mxu0  ;;  %v7107_v63 = vpop.f32.mrb[40].mxu1 }
 0x194   : > { %7880 = vst [vmem:[#allocation36_spill] sm:$0xff] %v7105_v11  ;;  %7881 = vst [vmem:[#allocation37_spill] sm:$0xff] %v7107_v63  ;;  %v7111_v19 = vpop.f32.mrb[41].mxu0  ;;  %v7113_v54 = vpop.f32.mrb[41].mxu1 }
 0x195   : > { %7882 = vst [vmem:[#allocation38_spill] sm:$0xff] %v7111_v19  ;;  %7883 = vst [vmem:[#allocation39_spill] sm:$0xff] %v7113_v54  ;;  %v7117_v6 = vpop.f32.mrb[42].mxu0  ;;  %v7119_v16 = vpop.f32.mrb[42].mxu1 }
 0x196   : > { %7884 = vst [vmem:[#allocation40_spill] sm:$0xff] %v7117_v6  ;;  %7885 = vst [vmem:[#allocation41_spill] sm:$0xff] %v7119_v16  ;;  %v7123_v47 = vpop.f32.mrb[43].mxu0  ;;  %v7125_v59 = vpop.f32.mrb[43].mxu1 }
 0x197   : > { %7886 = vst [vmem:[#allocation42_spill] sm:$0xff] %v7123_v47  ;;  %7887 = vst [vmem:[#allocation43_spill] sm:$0xff] %v7125_v59 }
 0x19b   : > { %v7129_v63 = vpop.f32.mrb[44].mxu0  ;;  %v7131_v11 = vpop.f32.mrb[44].mxu1 }
 0x19c   : > { %7888 = vst [vmem:[#allocation44_spill] sm:$0xff] %v7129_v63  ;;  %7889 = vst [vmem:[#allocation45_spill] sm:$0xff] %v7131_v11  ;;  %v7135_v54 = vpop.f32.mrb[45].mxu0  ;;  %v7137_v19 = vpop.f32.mrb[45].mxu1 }
 0x19d   : > { %7890 = vst [vmem:[#allocation46_spill] sm:$0xff] %v7135_v54  ;;  %7891 = vst [vmem:[#allocation47_spill] sm:$0xff] %v7137_v19  ;;  %v7141_v16 = vpop.f32.mrb[46].mxu0  ;;  %v7143_v6 = vpop.f32.mrb[46].mxu1 }
 0x19e   : > { %7892 = vst [vmem:[#allocation48_spill] sm:$0xff] %v7141_v16  ;;  %7893 = vst [vmem:[#allocation49_spill] sm:$0xff] %v7143_v6  ;;  %v7147_v59 = vpop.f32.mrb[47].mxu0  ;;  %v7149_v47 = vpop.f32.mrb[47].mxu1 }
 0x19f   : > { %7894 = vst [vmem:[#allocation50_spill] sm:$0xff] %v7147_v59  ;;  %7895 = vst [vmem:[#allocation51_spill] sm:$0xff] %v7149_v47 }
 0x1a3   : > { %v7153_v11 = vpop.f32.mrb[48].mxu0  ;;  %v7155_v63 = vpop.f32.mrb[48].mxu1 }
 0x1a4   : > { %7896 = vst [vmem:[#allocation52_spill] sm:$0xff] %v7153_v11  ;;  %7897 = vst [vmem:[#allocation53_spill] sm:$0xff] %v7155_v63  ;;  %v7159_v19 = vpop.f32.mrb[49].mxu0  ;;  %v7161_v54 = vpop.f32.mrb[49].mxu1 }
 0x1a5   : > { %7898 = vst [vmem:[#allocation54_spill] sm:$0xff] %v7159_v19  ;;  %7899 = vst [vmem:[#allocation55_spill] sm:$0xff] %v7161_v54  ;;  %v7165_v6 = vpop.f32.mrb[50].mxu0  ;;  %v7167_v16 = vpop.f32.mrb[50].mxu1 }
 0x1a6   : > { %7900 = vst [vmem:[#allocation56_spill] sm:$0xff] %v7165_v6  ;;  %7901 = vst [vmem:[#allocation57_spill] sm:$0xff] %v7167_v16  ;;  %v7171_v47 = vpop.f32.mrb[51].mxu0  ;;  %v7173_v59 = vpop.f32.mrb[51].mxu1 }
 0x1a7   : > { %7902 = vst [vmem:[#allocation58_spill] sm:$0xff] %v7171_v47  ;;  %7903 = vst [vmem:[#allocation59_spill] sm:$0xff] %v7173_v59 }
 0x1ab   : > { %v7177_v63 = vpop.f32.mrb[52].mxu0  ;;  %v7179_v11 = vpop.f32.mrb[52].mxu1 }
 0x1ac   : > { %7904 = vst [vmem:[#allocation60_spill] sm:$0xff] %v7177_v63  ;;  %7905 = vst [vmem:[#allocation61_spill] sm:$0xff] %v7179_v11  ;;  %v7183_v54 = vpop.f32.mrb[53].mxu0  ;;  %v7185_v19 = vpop.f32.mrb[53].mxu1 }
 0x1ad   : > { %7906 = vst [vmem:[#allocation62_spill] sm:$0xff] %v7183_v54  ;;  %7907 = vst [vmem:[#allocation63_spill] sm:$0xff] %v7185_v19  ;;  %v7189_v16 = vpop.f32.mrb[54].mxu0  ;;  %v7191_v6 = vpop.f32.mrb[54].mxu1 }
 0x1ae   : > { %7908 = vst [vmem:[#allocation64_spill] sm:$0xff] %v7189_v16  ;;  %7909 = vst [vmem:[#allocation65_spill] sm:$0xff] %v7191_v6  ;;  %v7195_v59 = vpop.f32.mrb[55].mxu0  ;;  %v7197_v47 = vpop.f32.mrb[55].mxu1 }
 0x1af   : > { %7910 = vst [vmem:[#allocation66_spill] sm:$0xff] %v7195_v59  ;;  %7911 = vst [vmem:[#allocation67_spill] sm:$0xff] %v7197_v47 }
 0x1b3   : > { %v7201_v11 = vpop.f32.mrb[56].mxu0  ;;  %v7203_v63 = vpop.f32.mrb[56].mxu1 }
 0x1b4   : > { %7912 = vst [vmem:[#allocation68_spill] sm:$0xff] %v7201_v11  ;;  %7913 = vst [vmem:[#allocation69_spill] sm:$0xff] %v7203_v63  ;;  %v7207_v19 = vpop.f32.mrb[57].mxu0  ;;  %v7209_v54 = vpop.f32.mrb[57].mxu1 }
 0x1b5   : > { %7914 = vst [vmem:[#allocation70_spill] sm:$0xff] %v7207_v19  ;;  %7915 = vst [vmem:[#allocation71_spill] sm:$0xff] %v7209_v54  ;;  %v7213_v6 = vpop.f32.mrb[58].mxu0  ;;  %v7215_v16 = vpop.f32.mrb[58].mxu1 }
 0x1b6   : > { %7916 = vst [vmem:[#allocation72_spill] sm:$0xff] %v7213_v6  ;;  %7917 = vst [vmem:[#allocation73_spill] sm:$0xff] %v7215_v16  ;;  %v7219_v47 = vpop.f32.mrb[59].mxu0  ;;  %v7221_v59 = vpop.f32.mrb[59].mxu1 }
 0x1b7   : > { %7918 = vst [vmem:[#allocation74_spill] sm:$0xff] %v7219_v47  ;;  %7919 = vst [vmem:[#allocation75_spill] sm:$0xff] %v7221_v59 }
 0x1bb   : > { %v7225_v63 = vpop.f32.mrb[60].mxu0  ;;  %v7227_v11 = vpop.f32.mrb[60].mxu1 }
 0x1bc   : > { %7920 = vst [vmem:[#allocation76_spill] sm:$0xff] %v7225_v63  ;;  %7921 = vst [vmem:[#allocation77_spill] sm:$0xff] %v7227_v11  ;;  %v7231_v54 = vpop.f32.mrb[61].mxu0  ;;  %v7233_v19 = vpop.f32.mrb[61].mxu1 }
 0x1bd   : > { %7922 = vst [vmem:[#allocation78_spill] sm:$0xff] %v7231_v54  ;;  %7923 = vst [vmem:[#allocation79_spill] sm:$0xff] %v7233_v19  ;;  %v7237_v16 = vpop.f32.mrb[62].mxu0  ;;  %v7239_v6 = vpop.f32.mrb[62].mxu1 }
 0x1be   : > { %7924 = vst [vmem:[#allocation80_spill] sm:$0xff] %v7237_v16  ;;  %7925 = vst [vmem:[#allocation81_spill] sm:$0xff] %v7239_v6  ;;  %v7243_v59 = vpop.f32.mrb[63].mxu0  ;;  %v7245_v47 = vpop.f32.mrb[63].mxu1 }
 0x1bf   : > { %7926 = vst [vmem:[#allocation82_spill] sm:$0xff] %v7243_v59  ;;  %7927 = vst [vmem:[#allocation83_spill] sm:$0xff] %v7245_v47 }
 0x1c3   : > { %v7249_v11 = vpop.f32.mrb[64].mxu0  ;;  %v7251_v63 = vpop.f32.mrb[64].mxu1 }
 0x1c4   : > { %7928 = vst [vmem:[#allocation84_spill] sm:$0xff] %v7249_v11  ;;  %7929 = vst [vmem:[#allocation85_spill] sm:$0xff] %v7251_v63  ;;  %v7255_v19 = vpop.f32.mrb[65].mxu0  ;;  %v7257_v54 = vpop.f32.mrb[65].mxu1 }
 0x1c5   : > { %7930 = vst [vmem:[#allocation86_spill] sm:$0xff] %v7255_v19  ;;  %7931 = vst [vmem:[#allocation87_spill] sm:$0xff] %v7257_v54  ;;  %v7261_v6 = vpop.f32.mrb[66].mxu0  ;;  %v7263_v16 = vpop.f32.mrb[66].mxu1 }
 0x1c6   : > { %7932 = vst [vmem:[#allocation88_spill] sm:$0xff] %v7261_v6  ;;  %7933 = vst [vmem:[#allocation89_spill] sm:$0xff] %v7263_v16  ;;  %v7267_v47 = vpop.f32.mrb[67].mxu0  ;;  %v7269_v59 = vpop.f32.mrb[67].mxu1 }
 0x1c7   : > { %7934 = vst [vmem:[#allocation90_spill] sm:$0xff] %v7267_v47  ;;  %7935 = vst [vmem:[#allocation91_spill] sm:$0xff] %v7269_v59 }
 0x1cb   : > { %v7273_v63 = vpop.f32.mrb[68].mxu0  ;;  %v7275_v11 = vpop.f32.mrb[68].mxu1 }
 0x1cc   : > { %7936 = vst [vmem:[#allocation92_spill] sm:$0xff] %v7273_v63  ;;  %7937 = vst [vmem:[#allocation93_spill] sm:$0xff] %v7275_v11  ;;  %v7279_v54 = vpop.f32.mrb[69].mxu0  ;;  %v7281_v19 = vpop.f32.mrb[69].mxu1 }
 0x1cd   : > { %7938 = vst [vmem:[#allocation94_spill] sm:$0xff] %v7279_v54  ;;  %7939 = vst [vmem:[#allocation95_spill] sm:$0xff] %v7281_v19  ;;  %v7287_v16 = vpop.f32.mrb[70].mxu0  ;;  %v7289_v6 = vpop.f32.mrb[70].mxu1 }
 0x1ce   : > { %7940 = vst [vmem:[#allocation96_spill] sm:$0xff] %v7287_v16  ;;  %7941 = vst [vmem:[#allocation97_spill] sm:$0xff] %v7289_v6  ;;  %v7293_v59 = vpop.f32.mrb[71].mxu0  ;;  %v7295_v47 = vpop.f32.mrb[71].mxu1  ;;  %v7945_v6 = vmax.f32 %v6803_v7, %v6805_v8 }
 0x1cf   : > { %7942 = vst [vmem:[#allocation98_spill] sm:$0xff] %v7293_v59  ;;  %7943 = vst [vmem:[#allocation99_spill] sm:$0xff] %v7295_v47 }
 0x1d3   : > { %v5875_v11 = vpop.f32.mrb[72].mxu0  ;;  %v5951_v63 = vpop.f32.mrb[72].mxu1 }
 0x1d4   : > { %v3506_v19 = vmax.f32 %v7944_v43, %v5875_v11  ;;  %v3217_v54 = vpop.f32.mrb[73].mxu0  ;;  %v3971_v38 = vpop.f32.mrb[73].mxu1 }
 0x1d5   : > { %v3504_v16 = vmax.f32 %v7945_v6, %v3217_v54  ;;  %v5876_v32 = vpop.f32.mrb[74].mxu0  ;;  %v5952_v47 = vpop.f32.mrb[74].mxu1 }
 0x1d6   : > { %v4260_v59 = vmax.f32 %v3506_v19, %v5951_v63  ;;  %v3507_v4 = vmax.f32 %v7946_v27, %v5876_v32  ;;  %v3220_v5 = vpop.f32.mrb[75].mxu0  ;;  %v3974_v43 = vpop.f32.mrb[75].mxu1 }
 0x1d7   : > { %v4258_v11 = vmax.f32 %v3504_v16, %v3971_v38  ;;  %v3505_v14 = vmax.f32 %v7947_v35, %v3220_v5  ;;  %v7949_v16 = vmax.f32 %v6835_v23, %v6837_v24  ;;  %v7951_v23 = vmax.f32 %v6851_v33, %v6853_v34 }
 0x1d8   : > { %v4339_v26 = vadd.f32 %v7305_v22, %v4260_v59  ;;  %v4261_v48 = vmax.f32 %v3507_v4, %v5952_v47 }
 0x1d9   : > { %v4337_v6 = vadd.f32 %v7305_v22, %v4258_v11  ;;  %v4259_v7 = vmax.f32 %v3505_v14, %v3974_v43  ;;  %v7948_v14 = vmax.f32 %v6829_v20, %v6831_v21  ;;  %v7950_v20 = vmax.f32 %v6843_v28, %v6845_v29 }
 0x1da   : > { %v4411_v8 = vmax.f32 %v4339_v26, 0.0  ;;  %v4340_v63 = vadd.f32 %v7305_v22, %v4261_v48 }
 0x1db   : > { %v4409_v12 = vmax.f32 %v4337_v6, 0.0  ;;  %v4338_v13 = vadd.f32 %v7305_v22, %v4259_v7  ;;  %v5879_v17 = vpop.f32.mrb[76].mxu0  ;;  %v5955_v18 = vpop.f32.mrb[76].mxu1 }
 0x1dc   : > { %v5495_v35 = vpack.c.bf16 %v4411_v8, %v4411_v8  ;;  %v4412_v38 = vmax.f32 %v4340_v63, 0.0  ;;  %v3510_v26 = vmax.f32 %v7948_v14, %v5879_v17  ;;  %v3233_v48 = vpop.f32.mrb[77].mxu0  ;;  %v3987_v47 = vpop.f32.mrb[77].mxu1  ;;  %v7952_v14 = vmax.f32 %v6861_v36, %v6863_v37 }
 0x1dd   : > { %v5493_v27 = vpack.c.bf16 %v4409_v12, %v4409_v12  ;;  %v4410_v54 = vmax.f32 %v4338_v13, 0.0  ;;  %v3508_v19 = vmax.f32 %v7949_v16, %v3233_v48  ;;  %v5880_v32 = vpop.f32.mrb[78].mxu0  ;;  %v5956_v59 = vpop.f32.mrb[78].mxu1  ;;  %v7953_v16 = vmax.f32 %v6867_v39, %v6869_v40 }
 0x1de   : > { %4772 = vst.msk [vmem:[%s7322_s14 + $0x8] sm:$0xf] %vm4769_vm3, %v5495_v35  ;;  %v5496_v4 = vpack.c.bf16 %v4412_v38, %v4412_v38  ;;  %v4264_v5 = vmax.f32 %v3510_v26, %v5955_v18  ;;  %v3511_v21 = vmax.f32 %v7950_v20, %v5880_v32  ;;  %v3236_v43 = vpop.f32.mrb[79].mxu0  ;;  %v3990_v11 = vpop.f32.mrb[79].mxu1  ;;  %v7954_v36 = vmax.f32 %v6875_v44, %v6877_v45 }
 0x1df   : > { %4770 = vst.msk [vmem:[%s7322_s14] sm:$0xf] %vm4769_vm3, %v5493_v27  ;;  %v5494_v6 = vpack.c.bf16 %v4410_v54, %v4410_v54  ;;  %v4262_v7 = vmax.f32 %v3508_v19, %v3987_v47  ;;  %v3509_v24 = vmax.f32 %v7951_v23, %v3236_v43  ;;  %v7955_v39 = vmax.f32 %v6883_v49, %v6885_v50 }
 0x1e0   : > { %4773 = vst.msk [vmem:[%s7322_s14 + $0xc] sm:$0xf] %vm4769_vm3, %v5496_v4  ;;  %v4343_v8 = vadd.f32 %v7305_v22, %v4264_v5  ;;  %v4265_v63 = vmax.f32 %v3511_v21, %v5956_v59 }
 0x1e1   : > { %4771 = vst.msk [vmem:[%s7322_s14 + $0x4] sm:$0xf] %vm4769_vm3, %v5494_v6  ;;  %v4341_v28 = vadd.f32 %v7305_v22, %v4262_v7  ;;  %v4263_v29 = vmax.f32 %v3509_v24, %v3990_v11 }
 0x1e2   : > { %v4415_v12 = vmax.f32 %v4343_v8, 0.0  ;;  %v4344_v13 = vadd.f32 %v7305_v22, %v4265_v63 }
 0x1e3   : > { %v4413_v17 = vmax.f32 %v4341_v28, 0.0  ;;  %v4342_v18 = vadd.f32 %v7305_v22, %v4263_v29  ;;  %v5883_v35 = vpop.f32.mrb[80].mxu0  ;;  %v5959_v33 = vpop.f32.mrb[80].mxu1 }
 0x1e4   : > { %v5499_v34 = vpack.c.bf16 %v4415_v12, %v4415_v12  ;;  %v4416_v38 = vmax.f32 %v4344_v13, 0.0  ;;  %v3514_v26 = vmax.f32 %v7952_v14, %v5883_v35  ;;  %v3249_v48 = vpop.f32.mrb[81].mxu0  ;;  %v4003_v47 = vpop.f32.mrb[81].mxu1  ;;  %v7956_v12 = vmax.f32 %v6893_v52, %v6895_v53 }
 0x1e5   : > { %v5497_v27 = vpack.c.bf16 %v4413_v17, %v4413_v17  ;;  %v4414_v54 = vmax.f32 %v4342_v18, 0.0  ;;  %v3512_v19 = vmax.f32 %v7953_v16, %v3249_v48  ;;  %v5884_v32 = vpop.f32.mrb[82].mxu0  ;;  %v5960_v59 = vpop.f32.mrb[82].mxu1  ;;  %v7958_v52 = vmax.f32 %v6907_v60, %v6909_v61 }
 0x1e6   : > { %4776 = vst.msk [vmem:[%s7322_s14 + $0x18] sm:$0xf] %vm4769_vm3, %v5499_v34  ;;  %v5500_v4 = vpack.c.bf16 %v4416_v38, %v4416_v38  ;;  %v4268_v5 = vmax.f32 %v3514_v26, %v5959_v33  ;;  %v3515_v37 = vmax.f32 %v7954_v36, %v5884_v32  ;;  %v3252_v20 = vpop.f32.mrb[83].mxu0  ;;  %v4006_v21 = vpop.f32.mrb[83].mxu1  ;;  %v7957_v34 = vmax.f32 %v6899_v55, %v6901_v56 }
 0x1e7   : > { %4774 = vst.msk [vmem:[%s7322_s14 + $0x10] sm:$0xf] %vm4769_vm3, %v5497_v27  ;;  %v5498_v43 = vpack.c.bf16 %v4414_v54, %v4414_v54  ;;  %v4266_v11 = vmax.f32 %v3512_v19, %v4003_v47  ;;  %v3513_v40 = vmax.f32 %v7955_v39, %v3252_v20  ;;  %v7959_v55 = vmax.f32 %v6915_v1, %v6917_v2 }
 0x1e8   : > { %4777 = vst.msk [vmem:[%s7322_s14 + $0x1c] sm:$0xf] %vm4769_vm3, %v5500_v4  ;;  %v4347_v6 = vadd.f32 %v7305_v22, %v4268_v5  ;;  %v4269_v7 = vmax.f32 %v3515_v37, %v5960_v59 }
 0x1e9   : > { %4775 = vst.msk [vmem:[%s7322_s14 + $0x14] sm:$0xf] %vm4769_vm3, %v5498_v43  ;;  %v4345_v44 = vadd.f32 %v7305_v22, %v4266_v11  ;;  %v4267_v45 = vmax.f32 %v3513_v40, %v4006_v21  ;;  %v7960_v43 = vmax.f32 %v6925_v9, %v6927_v10  ;;  %v7962_v9 = vmax.f32 %v6939_v41, %v6941_v42 }
 0x1ea   : > { %v4419_v23 = vmax.f32 %v4347_v6, 0.0  ;;  %v4348_v24 = vadd.f32 %v7305_v22, %v4269_v7 }
 0x1eb   : > { %v4417_v8 = vmax.f32 %v4345_v44, 0.0  ;;  %v4346_v63 = vadd.f32 %v7305_v22, %v4267_v45  ;;  %v5887_v28 = vpop.f32.mrb[84].mxu0  ;;  %v5963_v49 = vpop.f32.mrb[84].mxu1  ;;  %v7961_v44 = vmax.f32 %v6931_v15, %v6933_v25  ;;  %v7963_v15 = vmax.f32 %v6947_v58, %v6949_v62 }
 0x1ec   : > { %v5503_v50 = vpack.c.bf16 %v4419_v23, %v4419_v23  ;;  %v4420_v29 = vmax.f32 %v4348_v24, 0.0  ;;  %v3518_v13 = vmax.f32 %v7956_v12, %v5887_v28  ;;  %v3265_v17 = vpop.f32.mrb[85].mxu0  ;;  %v4019_v18 = vpop.f32.mrb[85].mxu1 }
 0x1ed   : > { %v5501_v35 = vpack.c.bf16 %v4417_v8, %v4417_v8  ;;  %v4418_v33 = vmax.f32 %v4346_v63, 0.0  ;;  %v3516_v38 = vmax.f32 %v7957_v34, %v3265_v17  ;;  %v5888_v14 = vpop.f32.mrb[86].mxu0  ;;  %v5964_v26 = vpop.f32.mrb[86].mxu1 }
 0x1ee   : > { %4780 = vst.msk [vmem:[%s7322_s14 + $0x28] sm:$0xf] %vm4769_vm3, %v5503_v50  ;;  %v5504_v48 = vpack.c.bf16 %v4420_v29, %v4420_v29  ;;  %v4272_v47 = vmax.f32 %v3518_v13, %v5963_v49  ;;  %v3519_v53 = vmax.f32 %v7958_v52, %v5888_v14  ;;  %v3268_v27 = vpop.f32.mrb[87].mxu0  ;;  %v4022_v54 = vpop.f32.mrb[87].mxu1  ;;  %v7964_v14 = vmax.f32 %v6957_v31, %v6959_v57 }
 0x1ef   : > { %4778 = vst.msk [vmem:[%s7322_s14 + $0x20] sm:$0xf] %vm4769_vm3, %v5501_v35  ;;  %v5502_v16 = vpack.c.bf16 %v4418_v33, %v4418_v33  ;;  %v4270_v19 = vmax.f32 %v3516_v38, %v4019_v18  ;;  %v3517_v56 = vmax.f32 %v7959_v55, %v3268_v27  ;;  %v7965_v27 = vmax.f32 %v6963_v3, %v6965_v0  ;;  %v7967_v0 = vld [vmem:[#allocation3_spill] sm:$0xff] }
 0x1f0   : > { %4781 = vst.msk [vmem:[%s7322_s14 + $0x2c] sm:$0xf] %vm4769_vm3, %v5504_v48  ;;  %v4351_v32 = vadd.f32 %v7305_v22, %v4272_v47  ;;  %v4273_v59 = vmax.f32 %v3519_v53, %v5964_v26  ;;  %v7966_v31 = vmax.f32 %v6971_v30, %v6973_v46  ;;  %v7968_v3 = vmax.f32 %v6979_v51, %v7967_v0  ;;  %v7984_v0 = vld [vmem:[#allocation14_spill] sm:$0xff] }
 0x1f1   : > { %4779 = vst.msk [vmem:[%s7322_s14 + $0x24] sm:$0xf] %vm4769_vm3, %v5502_v16  ;;  %v4349_v60 = vadd.f32 %v7305_v22, %v4270_v19  ;;  %v4271_v61 = vmax.f32 %v3517_v56, %v4022_v54 }
 0x1f2   : > { %v4423_v4 = vmax.f32 %v4351_v32, 0.0  ;;  %v4352_v5 = vadd.f32 %v7305_v22, %v4273_v59 }
 0x1f3   : > { %v4421_v36 = vmax.f32 %v4349_v60, 0.0  ;;  %v4350_v37 = vadd.f32 %v7305_v22, %v4271_v61  ;;  %v5891_v20 = vpop.f32.mrb[88].mxu0  ;;  %v5967_v1 = vpop.f32.mrb[88].mxu1 }
 0x1f4   : > { %v5507_v2 = vpack.c.bf16 %v4423_v4, %v4423_v4  ;;  %v4424_v21 = vmax.f32 %v4352_v5, 0.0  ;;  %v3522_v11 = vmax.f32 %v7960_v43, %v5891_v20  ;;  %v3281_v39 = vpop.f32.mrb[89].mxu0  ;;  %v4035_v40 = vpop.f32.mrb[89].mxu1 }
 0x1f5   : > { %v5505_v6 = vpack.c.bf16 %v4421_v36, %v4421_v36  ;;  %v4422_v7 = vmax.f32 %v4350_v37, 0.0  ;;  %v3520_v45 = vmax.f32 %v7961_v44, %v3281_v39  ;;  %v5892_v23 = vpop.f32.mrb[90].mxu0  ;;  %v5968_v24 = vpop.f32.mrb[90].mxu1  ;;  %v7969_v39 = vld [vmem:[#allocation4_spill] sm:$0xff] }
 0x1f6   : > { %4784 = vst.msk [vmem:[%s7322_s14 + $0x38] sm:$0xf] %vm4769_vm3, %v5507_v2  ;;  %v5508_v8 = vpack.c.bf16 %v4424_v21, %v4424_v21  ;;  %v4276_v63 = vmax.f32 %v3522_v11, %v5967_v1  ;;  %v3523_v10 = vmax.f32 %v7962_v9, %v5892_v23  ;;  %v3284_v28 = vpop.f32.mrb[91].mxu0  ;;  %v4038_v49 = vpop.f32.mrb[91].mxu1 }
 0x1f7   : > { %4782 = vst.msk [vmem:[%s7322_s14 + $0x30] sm:$0xf] %vm4769_vm3, %v5505_v6  ;;  %v5506_v50 = vpack.c.bf16 %v4422_v7, %v4422_v7  ;;  %v4274_v29 = vmax.f32 %v3520_v45, %v4035_v40  ;;  %v3521_v25 = vmax.f32 %v7963_v15, %v3284_v28  ;;  %v7970_v40 = vld [vmem:[#allocation5_spill] sm:$0xff]  ;;  %v7975_v15 = vld [vmem:[#allocation8_spill] sm:$0xff] }
 0x1f8   : > { %4785 = vst.msk [vmem:[%s7322_s14 + $0x3c] sm:$0xf] %vm4769_vm3, %v5508_v8  ;;  %v4355_v12 = vadd.f32 %v7305_v22, %v4276_v63  ;;  %v4277_v13 = vmax.f32 %v3523_v10, %v5968_v24  ;;  %v7971_v6 = vmax.f32 %v7969_v39, %v7970_v40  ;;  %v7972_v8 = vld [vmem:[#allocation6_spill] sm:$0xff]  ;;  %v7973_v63 = vld [vmem:[#allocation7_spill] sm:$0xff] }
 0x1f9   : > { %4783 = vst.msk [vmem:[%s7322_s14 + $0x34] sm:$0xf] %vm4769_vm3, %v5506_v50  ;;  %v4353_v41 = vadd.f32 %v7305_v22, %v4274_v29  ;;  %v4275_v42 = vmax.f32 %v3521_v25, %v4038_v49  ;;  %v7974_v9 = vmax.f32 %v7972_v8, %v7973_v63  ;;  %v7976_v25 = vld [vmem:[#allocation9_spill] sm:$0xff]  ;;  %v7990_v40 = vld [vmem:[#allocation18_spill] sm:$0xff] }
 0x1fa   : > { %v4427_v17 = vmax.f32 %v4355_v12, 0.0  ;;  %v4356_v18 = vadd.f32 %v7305_v22, %v4277_v13  ;;  %v7977_v12 = vmax.f32 %v7975_v15, %v7976_v25  ;;  %v7993_v25 = vld [vmem:[#allocation20_spill] sm:$0xff] }
 0x1fb   : > { %v4425_v35 = vmax.f32 %v4353_v41, 0.0  ;;  %v4354_v33 = vadd.f32 %v7305_v22, %v4275_v42  ;;  %v5895_v34 = vpop.f32.mrb[92].mxu0  ;;  %v5971_v58 = vpop.f32.mrb[92].mxu1 }
 0x1fc   : > { %v5511_v62 = vpack.c.bf16 %v4427_v17, %v4427_v17  ;;  %v4428_v38 = vmax.f32 %v4356_v18, 0.0  ;;  %v3526_v26 = vmax.f32 %v7964_v14, %v5895_v34  ;;  %v3297_v48 = vpop.f32.mrb[93].mxu0  ;;  %v4051_v47 = vpop.f32.mrb[93].mxu1 }
 0x1fd   : > { %v5509_v52 = vpack.c.bf16 %v4425_v35, %v4425_v35  ;;  %v4426_v53 = vmax.f32 %v4354_v33, 0.0  ;;  %v3524_v54 = vmax.f32 %v7965_v27, %v3297_v48  ;;  %v5896_v16 = vpop.f32.mrb[94].mxu0  ;;  %v5972_v19 = vpop.f32.mrb[94].mxu1  ;;  %v7978_v35 = vld [vmem:[#allocation10_spill] sm:$0xff]  ;;  %v7979_v33 = vld [vmem:[#allocation11_spill] sm:$0xff] }
 0x1fe   : > { %4788 = vst.msk [vmem:[%s7322_s14 + $0x48] sm:$0xf] %vm4769_vm3, %v5511_v62  ;;  %v5512_v55 = vpack.c.bf16 %v4428_v38, %v4428_v38  ;;  %v4280_v56 = vmax.f32 %v3526_v26, %v5971_v58  ;;  %v3527_v57 = vmax.f32 %v7966_v31, %v5896_v16  ;;  %v3300_v32 = vpop.f32.mrb[95].mxu0  ;;  %v4054_v59 = vpop.f32.mrb[95].mxu1  ;;  %v7980_v34 = vmax.f32 %v7978_v35, %v7979_v33  ;;  %v7996_v33 = vld [vmem:[#allocation22_spill] sm:$0xff] }
 0x1ff   : > { %4786 = vst.msk [vmem:[%s7322_s14 + $0x40] sm:$0xf] %vm4769_vm3, %v5509_v52  ;;  %v5510_v60 = vpack.c.bf16 %v4426_v53, %v4426_v53  ;;  %v4278_v61 = vmax.f32 %v3524_v54, %v4051_v47  ;;  %v3525_v4 = vmax.f32 %v7968_v3, %v3300_v32  ;;  %v7985_v3 = vld [vmem:[#allocation15_spill] sm:$0xff] }
 0x200   : > { %4789 = vst.msk [vmem:[%s7322_s14 + $0x4c] sm:$0xf] %vm4769_vm3, %v5512_v55  ;;  %v4359_v5 = vadd.f32 %v7305_v22, %v4280_v56  ;;  %v4281_v36 = vmax.f32 %v3527_v57, %v5972_v19  ;;  %v7981_v55 = vld [vmem:[#allocation12_spill] sm:$0xff]  ;;  %v7982_v56 = vld [vmem:[#allocation13_spill] sm:$0xff] }
 0x201   : > { %4787 = vst.msk [vmem:[%s7322_s14 + $0x44] sm:$0xf] %vm4769_vm3, %v5510_v60  ;;  %v4357_v30 = vadd.f32 %v7305_v22, %v4278_v61  ;;  %v4279_v46 = vmax.f32 %v3525_v4, %v4054_v59  ;;  %v7983_v31 = vmax.f32 %v7981_v55, %v7982_v56  ;;  %v7986_v4 = vmax.f32 %v7984_v0, %v7985_v3  ;;  %v8002_v56 = vld [vmem:[#allocation26_spill] sm:$0xff] }
 0x202   : > { %v4431_v37 = vmax.f32 %v4359_v5, 0.0  ;;  %v4360_v20 = vadd.f32 %v7305_v22, %v4281_v36 }
 0x203   : > { %v4429_v1 = vmax.f32 %v4357_v30, 0.0  ;;  %v4358_v2 = vadd.f32 %v7305_v22, %v4279_v46  ;;  %v5899_v21 = vpop.f32.mrb[96].mxu0  ;;  %v5975_v51 = vpop.f32.mrb[96].mxu1 }
 0x204   : > { %v5515_v43 = vpack.c.bf16 %v4431_v37, %v4431_v37  ;;  %v4432_v11 = vmax.f32 %v4360_v20, 0.0  ;;  %v3530_v7 = vmax.f32 %v7971_v6, %v5899_v21  ;;  %v3313_v44 = vpop.f32.mrb[97].mxu0  ;;  %v4067_v45 = vpop.f32.mrb[97].mxu1  ;;  %v7987_v20 = vld [vmem:[#allocation16_spill] sm:$0xff]  ;;  %v7991_v6 = vld [vmem:[#allocation19_spill] sm:$0xff] }
 0x205   : > { %v5513_v23 = vpack.c.bf16 %v4429_v1, %v4429_v1  ;;  %v4430_v24 = vmax.f32 %v4358_v2, 0.0  ;;  %v3528_v10 = vmax.f32 %v7974_v9, %v3313_v44  ;;  %v5900_v28 = vpop.f32.mrb[98].mxu0  ;;  %v5976_v49 = vpop.f32.mrb[98].mxu1  ;;  %v7988_v1 = vld [vmem:[#allocation17_spill] sm:$0xff] }
 0x206   : > { %4792 = vst.msk [vmem:[%s7322_s14 + $0x58] sm:$0xf] %vm4769_vm3, %v5515_v43  ;;  %v5516_v50 = vpack.c.bf16 %v4432_v11, %v4432_v11  ;;  %v4284_v29 = vmax.f32 %v3530_v7, %v5975_v51  ;;  %v3531_v13 = vmax.f32 %v7977_v12, %v5900_v28  ;;  %v3316_v41 = vpop.f32.mrb[99].mxu0  ;;  %v4070_v42 = vpop.f32.mrb[99].mxu1  ;;  %v7989_v2 = vmax.f32 %v7987_v20, %v7988_v1  ;;  %v7994_v12 = vld [vmem:[#allocation21_spill] sm:$0xff]  ;;  %v8005_v1 = vld [vmem:[#allocation28_spill] sm:$0xff] }
 0x207   : > { %4790 = vst.msk [vmem:[%s7322_s14 + $0x50] sm:$0xf] %vm4769_vm3, %v5513_v23  ;;  %v5514_v17 = vpack.c.bf16 %v4430_v24, %v4430_v24  ;;  %v4282_v18 = vmax.f32 %v3528_v10, %v4067_v45  ;;  %v3529_v58 = vmax.f32 %v7980_v34, %v3316_v41  ;;  %v7992_v7 = vmax.f32 %v7990_v40, %v7991_v6  ;;  %v7997_v34 = vld [vmem:[#allocation23_spill] sm:$0xff]  ;;  %v8008_v6 = vld [vmem:[#allocation30_spill] sm:$0xff] }
 0x208   : > { %4793 = vst.msk [vmem:[%s7322_s14 + $0x5c] sm:$0xf] %vm4769_vm3, %v5516_v50  ;;  %v4363_v62 = vadd.f32 %v7305_v22, %v4284_v29  ;;  %v4285_v38 = vmax.f32 %v3531_v13, %v5976_v49  ;;  %v7995_v13 = vmax.f32 %v7993_v25, %v7994_v12  ;;  %v8014_v12 = vld [vmem:[#allocation34_spill] sm:$0xff] }
 0x209   : > { %4791 = vst.msk [vmem:[%s7322_s14 + $0x54] sm:$0xf] %vm4769_vm3, %v5514_v17  ;;  %v4361_v14 = vadd.f32 %v7305_v22, %v4282_v18  ;;  %v4283_v26 = vmax.f32 %v3529_v58, %v4070_v42  ;;  %v7998_v58 = vmax.f32 %v7996_v33, %v7997_v34 }
 0x20a   : > { %v4435_v48 = vmax.f32 %v4363_v62, 0.0  ;;  %v4364_v47 = vadd.f32 %v7305_v22, %v4285_v38 }
 0x20b   : > { %v4433_v52 = vmax.f32 %v4361_v14, 0.0  ;;  %v4362_v53 = vadd.f32 %v7305_v22, %v4283_v26  ;;  %v5903_v27 = vpop.f32.mrb[100].mxu0  ;;  %v5979_v54 = vpop.f32.mrb[100].mxu1 }
 0x20c   : > { %v5519_v16 = vpack.c.bf16 %v4435_v48, %v4435_v48  ;;  %v4436_v19 = vmax.f32 %v4364_v47, 0.0  ;;  %v3534_v57 = vmax.f32 %v7983_v31, %v5903_v27  ;;  %v3329_v32 = vpop.f32.mrb[101].mxu0  ;;  %v4083_v59 = vpop.f32.mrb[101].mxu1  ;;  %v7999_v47 = vld [vmem:[#allocation24_spill] sm:$0xff]  ;;  %v8003_v31 = vld [vmem:[#allocation27_spill] sm:$0xff] }
 0x20d   : > { %v5517_v60 = vpack.c.bf16 %v4433_v52, %v4433_v52  ;;  %v4434_v61 = vmax.f32 %v4362_v53, 0.0  ;;  %v3532_v5 = vmax.f32 %v7986_v4, %v3329_v32  ;;  %v5904_v36 = vpop.f32.mrb[102].mxu0  ;;  %v5980_v30 = vpop.f32.mrb[102].mxu1  ;;  %v8000_v52 = vld [vmem:[#allocation25_spill] sm:$0xff] }
 0x20e   : > { %4796 = vst.msk [vmem:[%s7322_s14 + $0x68] sm:$0xf] %vm4769_vm3, %v5519_v16  ;;  %v5520_v46 = vpack.c.bf16 %v4436_v19, %v4436_v19  ;;  %v4288_v37 = vmax.f32 %v3534_v57, %v5979_v54  ;;  %v3535_v21 = vmax.f32 %v7989_v2, %v5904_v36  ;;  %v3332_v51 = vpop.f32.mrb[103].mxu0  ;;  %v4086_v43 = vpop.f32.mrb[103].mxu1  ;;  %v8001_v53 = vmax.f32 %v7999_v47, %v8000_v52  ;;  %v8006_v2 = vld [vmem:[#allocation29_spill] sm:$0xff]  ;;  %v8017_v52 = vld [vmem:[#allocation36_spill] sm:$0xff] }
 0x20f   : > { %4794 = vst.msk [vmem:[%s7322_s14 + $0x60] sm:$0xf] %vm4769_vm3, %v5517_v60  ;;  %v5518_v11 = vpack.c.bf16 %v4434_v61, %v4434_v61  ;;  %v4286_v39 = vmax.f32 %v3532_v5, %v4083_v59  ;;  %v3533_v44 = vmax.f32 %v7992_v7, %v3332_v51  ;;  %v8004_v57 = vmax.f32 %v8002_v56, %v8003_v31  ;;  %v8009_v7 = vld [vmem:[#allocation31_spill] sm:$0xff]  ;;  %v8020_v31 = vld [vmem:[#allocation38_spill] sm:$0xff] }
 0x210   : > { %4797 = vst.msk [vmem:[%s7322_s14 + $0x6c] sm:$0xf] %vm4769_vm3, %v5520_v46  ;;  %v4367_v45 = vadd.f32 %v7305_v22, %v4288_v37  ;;  %v4289_v23 = vmax.f32 %v3535_v21, %v5980_v30  ;;  %v8007_v21 = vmax.f32 %v8005_v1, %v8006_v2  ;;  %v8026_v2 = vld [vmem:[#allocation42_spill] sm:$0xff] }
 0x211   : > { %4795 = vst.msk [vmem:[%s7322_s14 + $0x64] sm:$0xf] %vm4769_vm3, %v5518_v11  ;;  %v4365_v24 = vadd.f32 %v7305_v22, %v4286_v39  ;;  %v4287_v8 = vmax.f32 %v3533_v44, %v4086_v43  ;;  %v8010_v44 = vmax.f32 %v8008_v6, %v8009_v7 }
 0x212   : > { %v4439_v63 = vmax.f32 %v4367_v45, 0.0  ;;  %v4368_v9 = vadd.f32 %v7305_v22, %v4289_v23 }
 0x213   : > { %v4437_v10 = vmax.f32 %v4365_v24, 0.0  ;;  %v4366_v28 = vadd.f32 %v7305_v22, %v4287_v8  ;;  %v5907_v49 = vpop.f32.mrb[104].mxu0  ;;  %v5983_v50 = vpop.f32.mrb[104].mxu1 }
 0x214   : > { %v5523_v29 = vpack.c.bf16 %v4439_v63, %v4439_v63  ;;  %v4440_v15 = vmax.f32 %v4368_v9, 0.0  ;;  %v3538_v41 = vmax.f32 %v7995_v13, %v5907_v49  ;;  %v3345_v42 = vpop.f32.mrb[105].mxu0  ;;  %v4099_v17 = vpop.f32.mrb[105].mxu1  ;;  %v8011_v9 = vld [vmem:[#allocation32_spill] sm:$0xff]  ;;  %v8015_v13 = vld [vmem:[#allocation35_spill] sm:$0xff] }
 0x215   : > { %v5521_v18 = vpack.c.bf16 %v4437_v10, %v4437_v10  ;;  %v4438_v35 = vmax.f32 %v4366_v28, 0.0  ;;  %v3536_v62 = vmax.f32 %v7998_v58, %v3345_v42  ;;  %v5908_v38 = vpop.f32.mrb[106].mxu0  ;;  %v5984_v14 = vpop.f32.mrb[106].mxu1  ;;  %v8012_v10 = vld [vmem:[#allocation33_spill] sm:$0xff] }
 0x216   : > { %4800 = vst.msk [vmem:[%s7322_s14 + $0x78] sm:$0xf] %vm4769_vm3, %v5523_v29  ;;  %v5524_v26 = vpack.c.bf16 %v4440_v15, %v4440_v15  ;;  %v4292_v48 = vmax.f32 %v3538_v41, %v5983_v50  ;;  %v3539_v27 = vmax.f32 %v8001_v53, %v5908_v38  ;;  %v3348_v54 = vpop.f32.mrb[107].mxu0  ;;  %v4102_v16 = vpop.f32.mrb[107].mxu1  ;;  %v8013_v28 = vmax.f32 %v8011_v9, %v8012_v10  ;;  %v8018_v53 = vld [vmem:[#allocation37_spill] sm:$0xff]  ;;  %v8029_v10 = vld [vmem:[#allocation44_spill] sm:$0xff] }
 0x217   : > { %4798 = vst.msk [vmem:[%s7322_s14 + $0x70] sm:$0xf] %vm4769_vm3, %v5521_v18  ;;  %v5522_v19 = vpack.c.bf16 %v4438_v35, %v4438_v35  ;;  %v4290_v55 = vmax.f32 %v3536_v62, %v4099_v17  ;;  %v3537_v32 = vmax.f32 %v8004_v57, %v3348_v54  ;;  %v8016_v41 = vmax.f32 %v8014_v12, %v8015_v13  ;;  %v8021_v57 = vld [vmem:[#allocation39_spill] sm:$0xff]  ;;  %v8032_v13 = vld [vmem:[#allocation46_spill] sm:$0xff] }
 0x218   : > { %4801 = vst.msk [vmem:[%s7322_s14 + $0x7c] sm:$0xf] %vm4769_vm3, %v5524_v26  ;;  %v4371_v59 = vadd.f32 %v7305_v22, %v4292_v48  ;;  %v4293_v60 = vmax.f32 %v3539_v27, %v5984_v14  ;;  %v8019_v27 = vmax.f32 %v8017_v52, %v8018_v53  ;;  %v8038_v53 = vld [vmem:[#allocation50_spill] sm:$0xff] }
 0x219   : > { %4799 = vst.msk [vmem:[%s7322_s14 + $0x74] sm:$0xf] %vm4769_vm3, %v5522_v19  ;;  %v4369_v61 = vadd.f32 %v7305_v22, %v4290_v55  ;;  %v4291_v0 = vmax.f32 %v3537_v32, %v4102_v16  ;;  %v8022_v32 = vmax.f32 %v8020_v31, %v8021_v57 }
 0x21a   : > { %v4443_v3 = vmax.f32 %v4371_v59, 0.0  ;;  %v4372_v4 = vadd.f32 %v7305_v22, %v4293_v60 }
 0x21b   : > { %v4441_v5 = vmax.f32 %v4369_v61, 0.0  ;;  %v4370_v36 = vadd.f32 %v7305_v22, %v4291_v0  ;;  %v5911_v30 = vpop.f32.mrb[108].mxu0  ;;  %v5987_v46 = vpop.f32.mrb[108].mxu1 }
 0x21c   : > { %v5527_v37 = vpack.c.bf16 %v4443_v3, %v4443_v3  ;;  %v4444_v20 = vmax.f32 %v4372_v4, 0.0  ;;  %v3542_v51 = vmax.f32 %v8007_v21, %v5911_v30  ;;  %v3361_v43 = vpop.f32.mrb[109].mxu0  ;;  %v4115_v11 = vpop.f32.mrb[109].mxu1  ;;  %v8023_v4 = vld [vmem:[#allocation40_spill] sm:$0xff]  ;;  %v8027_v21 = vld [vmem:[#allocation43_spill] sm:$0xff] }
 0x21d   : > { %v5525_v39 = vpack.c.bf16 %v4441_v5, %v4441_v5  ;;  %v4442_v40 = vmax.f32 %v4370_v36, 0.0  ;;  %v3540_v45 = vmax.f32 %v8010_v44, %v3361_v43  ;;  %v5912_v23 = vpop.f32.mrb[110].mxu0  ;;  %v5988_v24 = vpop.f32.mrb[110].mxu1  ;;  %v8024_v5 = vld [vmem:[#allocation41_spill] sm:$0xff] }
 0x21e   : > { %4804 = vst.msk [vmem:[%s7322_s14 + $0x88] sm:$0xf] %vm4769_vm3, %v5527_v37  ;;  %v5528_v8 = vpack.c.bf16 %v4444_v20, %v4444_v20  ;;  %v4296_v63 = vmax.f32 %v3542_v51, %v5987_v46  ;;  %v3543_v49 = vmax.f32 %v8013_v28, %v5912_v23  ;;  %v3364_v50 = vpop.f32.mrb[111].mxu0  ;;  %v4118_v29 = vpop.f32.mrb[111].mxu1  ;;  %v8025_v36 = vmax.f32 %v8023_v4, %v8024_v5  ;;  %v8030_v28 = vld [vmem:[#allocation45_spill] sm:$0xff]  ;;  %v8041_v5 = vld [vmem:[#allocation52_spill] sm:$0xff] }
 0x21f   : > { %4802 = vst.msk [vmem:[%s7322_s14 + $0x80] sm:$0xf] %vm4769_vm3, %v5525_v39  ;;  %v5526_v15 = vpack.c.bf16 %v4442_v40, %v4442_v40  ;;  %v4294_v25 = vmax.f32 %v3540_v45, %v4115_v11  ;;  %v3541_v42 = vmax.f32 %v8016_v41, %v3364_v50  ;;  %v8028_v51 = vmax.f32 %v8026_v2, %v8027_v21  ;;  %v8033_v41 = vld [vmem:[#allocation47_spill] sm:$0xff]  ;;  %v8044_v21 = vld [vmem:[#allocation54_spill] sm:$0xff] }
 0x220   : > { %4805 = vst.msk [vmem:[%s7322_s14 + $0x8c] sm:$0xf] %vm4769_vm3, %v5528_v8  ;;  %v4375_v17 = vadd.f32 %v7305_v22, %v4296_v63  ;;  %v4297_v18 = vmax.f32 %v3543_v49, %v5988_v24  ;;  %v8031_v49 = vmax.f32 %v8029_v10, %v8030_v28  ;;  %v8050_v28 = vld [vmem:[#allocation58_spill] sm:$0xff] }
 0x221   : > { %4803 = vst.msk [vmem:[%s7322_s14 + $0x84] sm:$0xf] %vm4769_vm3, %v5526_v15  ;;  %v4373_v35 = vadd.f32 %v7305_v22, %v4294_v25  ;;  %v4295_v33 = vmax.f32 %v3541_v42, %v4118_v29  ;;  %v8034_v42 = vmax.f32 %v8032_v13, %v8033_v41 }
 0x222   : > { %v4447_v34 = vmax.f32 %v4375_v17, 0.0  ;;  %v4376_v58 = vadd.f32 %v7305_v22, %v4297_v18 }
 0x223   : > { %v4445_v62 = vmax.f32 %v4373_v35, 0.0  ;;  %v4374_v38 = vadd.f32 %v7305_v22, %v4295_v33  ;;  %v5915_v14 = vpop.f32.mrb[112].mxu0  ;;  %v5991_v26 = vpop.f32.mrb[112].mxu1 }
 0x224   : > { %v5531_v48 = vpack.c.bf16 %v4447_v34, %v4447_v34  ;;  %v4448_v47 = vmax.f32 %v4376_v58, 0.0  ;;  %v3546_v54 = vmax.f32 %v8019_v27, %v5915_v14  ;;  %v3377_v16 = vpop.f32.mrb[113].mxu0  ;;  %v4131_v19 = vpop.f32.mrb[113].mxu1  ;;  %v8035_v58 = vld [vmem:[#allocation48_spill] sm:$0xff]  ;;  %v8039_v27 = vld [vmem:[#allocation51_spill] sm:$0xff] }
 0x225   : > { %v5529_v55 = vpack.c.bf16 %v4445_v62, %v4445_v62  ;;  %v4446_v56 = vmax.f32 %v4374_v38, 0.0  ;;  %v3544_v59 = vmax.f32 %v8022_v32, %v3377_v16  ;;  %v5916_v60 = vpop.f32.mrb[114].mxu0  ;;  %v5992_v61 = vpop.f32.mrb[114].mxu1  ;;  %v8036_v62 = vld [vmem:[#allocation49_spill] sm:$0xff] }
 0x226   : > { %4808 = vst.msk [vmem:[%s7322_s14 + $0x98] sm:$0xf] %vm4769_vm3, %v5531_v48  ;;  %v5532_v0 = vpack.c.bf16 %v4448_v47, %v4448_v47  ;;  %v4300_v3 = vmax.f32 %v3546_v54, %v5991_v26  ;;  %v3547_v30 = vmax.f32 %v8025_v36, %v5916_v60  ;;  %v3380_v46 = vpop.f32.mrb[115].mxu0  ;;  %v4134_v37 = vpop.f32.mrb[115].mxu1  ;;  %v8037_v38 = vmax.f32 %v8035_v58, %v8036_v62  ;;  %v8042_v36 = vld [vmem:[#allocation53_spill] sm:$0xff]  ;;  %v8053_v62 = vld [vmem:[#allocation60_spill] sm:$0xff] }
 0x227   : > { %4806 = vst.msk [vmem:[%s7322_s14 + $0x90] sm:$0xf] %vm4769_vm3, %v5529_v55  ;;  %v5530_v20 = vpack.c.bf16 %v4446_v56, %v4446_v56  ;;  %v4298_v1 = vmax.f32 %v3544_v59, %v4131_v19  ;;  %v3545_v43 = vmax.f32 %v8028_v51, %v3380_v46  ;;  %v8040_v54 = vmax.f32 %v8038_v53, %v8039_v27  ;;  %v8045_v51 = vld [vmem:[#allocation55_spill] sm:$0xff]  ;;  %v8056_v27 = vld [vmem:[#allocation62_spill] sm:$0xff] }
 0x228   : > { %4809 = vst.msk [vmem:[%s7322_s14 + $0x9c] sm:$0xf] %vm4769_vm3, %v5532_v0  ;;  %v4379_v11 = vadd.f32 %v7305_v22, %v4300_v3  ;;  %v4301_v39 = vmax.f32 %v3547_v30, %v5992_v61  ;;  %v8043_v30 = vmax.f32 %v8041_v5, %v8042_v36  ;;  %v8062_v36 = vld [vmem:[#allocation66_spill] sm:$0xff] }
 0x229   : > { %4807 = vst.msk [vmem:[%s7322_s14 + $0x94] sm:$0xf] %vm4769_vm3, %v5530_v20  ;;  %v4377_v40 = vadd.f32 %v7305_v22, %v4298_v1  ;;  %v4299_v6 = vmax.f32 %v3545_v43, %v4134_v37  ;;  %v8046_v43 = vmax.f32 %v8044_v21, %v8045_v51 }
 0x22a   : > { %v4451_v7 = vmax.f32 %v4379_v11, 0.0  ;;  %v4380_v44 = vadd.f32 %v7305_v22, %v4301_v39 }
 0x22b   : > { %v4449_v45 = vmax.f32 %v4377_v40, 0.0  ;;  %v4378_v23 = vadd.f32 %v7305_v22, %v4299_v6  ;;  %v5919_v24 = vpop.f32.mrb[116].mxu0  ;;  %v5995_v8 = vpop.f32.mrb[116].mxu1 }
 0x22c   : > { %v5535_v63 = vpack.c.bf16 %v4451_v7, %v4451_v7  ;;  %v4452_v9 = vmax.f32 %v4380_v44, 0.0  ;;  %v3550_v50 = vmax.f32 %v8031_v49, %v5919_v24  ;;  %v3393_v29 = vpop.f32.mrb[117].mxu0  ;;  %v4147_v15 = vpop.f32.mrb[117].mxu1  ;;  %v8047_v44 = vld [vmem:[#allocation56_spill] sm:$0xff]  ;;  %v8051_v49 = vld [vmem:[#allocation59_spill] sm:$0xff] }
 0x22d   : > { %v5533_v25 = vpack.c.bf16 %v4449_v45, %v4449_v45  ;;  %v4450_v12 = vmax.f32 %v4378_v23, 0.0  ;;  %v3548_v17 = vmax.f32 %v8034_v42, %v3393_v29  ;;  %v5920_v18 = vpop.f32.mrb[118].mxu0  ;;  %v5996_v35 = vpop.f32.mrb[118].mxu1  ;;  %v8048_v45 = vld [vmem:[#allocation57_spill] sm:$0xff] }
 0x22e   : > { %4812 = vst.msk [vmem:[%s7322_s14 + $0xa8] sm:$0xf] %vm4769_vm3, %v5535_v63  ;;  %v5536_v33 = vpack.c.bf16 %v4452_v9, %v4452_v9  ;;  %v4304_v34 = vmax.f32 %v3550_v50, %v5995_v8  ;;  %v3551_v14 = vmax.f32 %v8037_v38, %v5920_v18  ;;  %v3396_v26 = vpop.f32.mrb[119].mxu0  ;;  %v4150_v48 = vpop.f32.mrb[119].mxu1  ;;  %v8049_v23 = vmax.f32 %v8047_v44, %v8048_v45  ;;  %v8054_v38 = vld [vmem:[#allocation61_spill] sm:$0xff]  ;;  %v8065_v45 = vld [vmem:[#allocation68_spill] sm:$0xff] }
 0x22f   : > { %4810 = vst.msk [vmem:[%s7322_s14 + $0xa0] sm:$0xf] %vm4769_vm3, %v5533_v25  ;;  %v5534_v47 = vpack.c.bf16 %v4450_v12, %v4450_v12  ;;  %v4302_v52 = vmax.f32 %v3548_v17, %v4147_v15  ;;  %v3549_v16 = vmax.f32 %v8040_v54, %v3396_v26  ;;  %v8052_v50 = vmax.f32 %v8050_v28, %v8051_v49  ;;  %v8057_v54 = vld [vmem:[#allocation63_spill] sm:$0xff]  ;;  %v8068_v49 = vld [vmem:[#allocation70_spill] sm:$0xff] }
 0x230   : > { %4813 = vst.msk [vmem:[%s7322_s14 + $0xac] sm:$0xf] %vm4769_vm3, %v5536_v33  ;;  %v4383_v19 = vadd.f32 %v7305_v22, %v4304_v34  ;;  %v4305_v55 = vmax.f32 %v3551_v14, %v5996_v35  ;;  %v8055_v14 = vmax.f32 %v8053_v62, %v8054_v38  ;;  %v8074_v38 = vld [vmem:[#allocation74_spill] sm:$0xff] }
 0x231   : > { %4811 = vst.msk [vmem:[%s7322_s14 + $0xa4] sm:$0xf] %vm4769_vm3, %v5534_v47  ;;  %v4381_v56 = vadd.f32 %v7305_v22, %v4302_v52  ;;  %v4303_v31 = vmax.f32 %v3549_v16, %v4150_v48  ;;  %v8058_v16 = vmax.f32 %v8056_v27, %v8057_v54 }
 0x232   : > { %v4455_v57 = vmax.f32 %v4383_v19, 0.0  ;;  %v4384_v32 = vadd.f32 %v7305_v22, %v4305_v55 }
 0x233   : > { %v4453_v59 = vmax.f32 %v4381_v56, 0.0  ;;  %v4382_v60 = vadd.f32 %v7305_v22, %v4303_v31  ;;  %v5923_v61 = vpop.f32.mrb[120].mxu0  ;;  %v5999_v0 = vpop.f32.mrb[120].mxu1 }
 0x234   : > { %v5539_v3 = vpack.c.bf16 %v4455_v57, %v4455_v57  ;;  %v4456_v4 = vmax.f32 %v4384_v32, 0.0  ;;  %v3554_v46 = vmax.f32 %v8043_v30, %v5923_v61  ;;  %v3409_v37 = vpop.f32.mrb[121].mxu0  ;;  %v4163_v20 = vpop.f32.mrb[121].mxu1  ;;  %v8059_v32 = vld [vmem:[#allocation64_spill] sm:$0xff]  ;;  %v8063_v30 = vld [vmem:[#allocation67_spill] sm:$0xff] }
 0x235   : > { %v5537_v1 = vpack.c.bf16 %v4453_v59, %v4453_v59  ;;  %v4454_v2 = vmax.f32 %v4382_v60, 0.0  ;;  %v3552_v11 = vmax.f32 %v8046_v43, %v3409_v37  ;;  %v5924_v39 = vpop.f32.mrb[122].mxu0  ;;  %v6000_v40 = vpop.f32.mrb[122].mxu1  ;;  %v8060_v59 = vld [vmem:[#allocation65_spill] sm:$0xff] }
 0x236   : > { %4816 = vst.msk [vmem:[%s7322_s14 + $0xb8] sm:$0xf] %vm4769_vm3, %v5539_v3  ;;  %v5540_v6 = vpack.c.bf16 %v4456_v4, %v4456_v4  ;;  %v4308_v7 = vmax.f32 %v3554_v46, %v5999_v0  ;;  %v3555_v24 = vmax.f32 %v8049_v23, %v5924_v39  ;;  %v3412_v8 = vpop.f32.mrb[123].mxu0  ;;  %v4166_v63 = vpop.f32.mrb[123].mxu1  ;;  %v8061_v60 = vmax.f32 %v8059_v32, %v8060_v59  ;;  %v8066_v23 = vld [vmem:[#allocation69_spill] sm:$0xff]  ;;  %v8077_v59 = vld [vmem:[#allocation76_spill] sm:$0xff] }
 0x237   : > { %4814 = vst.msk [vmem:[%s7322_s14 + $0xb0] sm:$0xf] %vm4769_vm3, %v5537_v1  ;;  %v5538_v9 = vpack.c.bf16 %v4454_v2, %v4454_v2  ;;  %v4306_v10 = vmax.f32 %v3552_v11, %v4163_v20  ;;  %v3553_v29 = vmax.f32 %v8052_v50, %v3412_v8  ;;  %v8064_v46 = vmax.f32 %v8062_v36, %v8063_v30  ;;  %v8069_v50 = vld [vmem:[#allocation71_spill] sm:$0xff]  ;;  %v8080_v30 = vld [vmem:[#allocation78_spill] sm:$0xff] }
 0x238   : > { %4817 = vst.msk [vmem:[%s7322_s14 + $0xbc] sm:$0xf] %vm4769_vm3, %v5540_v6  ;;  %v4387_v15 = vadd.f32 %v7305_v22, %v4308_v7  ;;  %v4309_v25 = vmax.f32 %v3555_v24, %v6000_v40  ;;  %v8067_v24 = vmax.f32 %v8065_v45, %v8066_v23  ;;  %v8086_v23 = vld [vmem:[#allocation82_spill] sm:$0xff] }
 0x239   : > { %4815 = vst.msk [vmem:[%s7322_s14 + $0xb4] sm:$0xf] %vm4769_vm3, %v5538_v9  ;;  %v4385_v12 = vadd.f32 %v7305_v22, %v4306_v10  ;;  %v4307_v13 = vmax.f32 %v3553_v29, %v4166_v63  ;;  %v8070_v29 = vmax.f32 %v8068_v49, %v8069_v50 }
 0x23a   : > { %v4459_v41 = vmax.f32 %v4387_v15, 0.0  ;;  %v4388_v42 = vadd.f32 %v7305_v22, %v4309_v25 }
 0x23b   : > { %v4457_v17 = vmax.f32 %v4385_v12, 0.0  ;;  %v4386_v18 = vadd.f32 %v7305_v22, %v4307_v13  ;;  %v5927_v35 = vpop.f32.mrb[124].mxu0  ;;  %v6003_v33 = vpop.f32.mrb[124].mxu1 }
 0x23c   : > { %v5543_v34 = vpack.c.bf16 %v4459_v41, %v4459_v41  ;;  %v4460_v58 = vmax.f32 %v4388_v42, 0.0  ;;  %v3558_v26 = vmax.f32 %v8055_v14, %v5927_v35  ;;  %v3425_v48 = vpop.f32.mrb[125].mxu0  ;;  %v4179_v47 = vpop.f32.mrb[125].mxu1  ;;  %v8071_v42 = vld [vmem:[#allocation72_spill] sm:$0xff]  ;;  %v8075_v14 = vld [vmem:[#allocation75_spill] sm:$0xff] }
 0x23d   : > { %v5541_v52 = vpack.c.bf16 %v4457_v17, %v4457_v17  ;;  %v4458_v53 = vmax.f32 %v4386_v18, 0.0  ;;  %v3556_v19 = vmax.f32 %v8058_v16, %v3425_v48  ;;  %v5928_v55 = vpop.f32.mrb[126].mxu0  ;;  %v6004_v56 = vpop.f32.mrb[126].mxu1  ;;  %v8072_v17 = vld [vmem:[#allocation73_spill] sm:$0xff] }
 0x23e   : > { %4820 = vst.msk [vmem:[%s7322_s14 + $0xc8] sm:$0xf] %vm4769_vm3, %v5543_v34  ;;  %v5544_v31 = vpack.c.bf16 %v4460_v58, %v4460_v58  ;;  %v4312_v57 = vmax.f32 %v3558_v26, %v6003_v33  ;;  %v3559_v61 = vmax.f32 %v8061_v60, %v5928_v55  ;;  %v3428_v0 = vpop.f32.mrb[127].mxu0  ;;  %v4182_v3 = vpop.f32.mrb[127].mxu1  ;;  %v8073_v18 = vmax.f32 %v8071_v42, %v8072_v17  ;;  %v8078_v60 = vld [vmem:[#allocation77_spill] sm:$0xff]  ;;  %v8089_v17 = vld [vmem:[#allocation84_spill] sm:$0xff] }
 0x23f   : > { %4818 = vst.msk [vmem:[%s7322_s14 + $0xc0] sm:$0xf] %vm4769_vm3, %v5541_v52  ;;  %v5542_v4 = vpack.c.bf16 %v4458_v53, %v4458_v53  ;;  %v4310_v5 = vmax.f32 %v3556_v19, %v4179_v47  ;;  %v3557_v37 = vmax.f32 %v8064_v46, %v3428_v0  ;;  %v8076_v26 = vmax.f32 %v8074_v38, %v8075_v14  ;;  %v8081_v46 = vld [vmem:[#allocation79_spill] sm:$0xff]  ;;  %v8092_v14 = vld [vmem:[#allocation86_spill] sm:$0xff] }
 0x240   : > { %4821 = vst.msk [vmem:[%s7322_s14 + $0xcc] sm:$0xf] %vm4769_vm3, %v5544_v31  ;;  %v4391_v20 = vadd.f32 %v7305_v22, %v4312_v57  ;;  %v4313_v1 = vmax.f32 %v3559_v61, %v6004_v56  ;;  %v8079_v61 = vmax.f32 %v8077_v59, %v8078_v60  ;;  %v8098_v59 = vld [vmem:[#allocation90_spill] sm:$0xff]  ;;  %v8099_v60 = vld [vmem:[#allocation91_spill] sm:$0xff] }
 0x241   : > { %4819 = vst.msk [vmem:[%s7322_s14 + $0xc4] sm:$0xf] %vm4769_vm3, %v5542_v4  ;;  %v4389_v2 = vadd.f32 %v7305_v22, %v4310_v5  ;;  %v4311_v21 = vmax.f32 %v3557_v37, %v4182_v3  ;;  %v8082_v37 = vmax.f32 %v8080_v30, %v8081_v46 }
 0x242   : > { %v4463_v51 = vmax.f32 %v4391_v20, 0.0  ;;  %v4392_v43 = vadd.f32 %v7305_v22, %v4313_v1 }
 0x243   : > { %v4461_v11 = vmax.f32 %v4389_v2, 0.0  ;;  %v4390_v39 = vadd.f32 %v7305_v22, %v4311_v21  ;;  %v5931_v40 = vpop.f32.mrb[128].mxu0  ;;  %v6007_v6 = vpop.f32.mrb[128].mxu1 }
 0x244   : > { %v5547_v7 = vpack.c.bf16 %v4463_v51, %v4463_v51  ;;  %v4464_v44 = vmax.f32 %v4392_v43, 0.0  ;;  %v3562_v8 = vmax.f32 %v8067_v24, %v5931_v40  ;;  %v3441_v63 = vpop.f32.mrb[129].mxu0  ;;  %v4195_v9 = vpop.f32.mrb[129].mxu1  ;;  %v8083_v43 = vld [vmem:[#allocation80_spill] sm:$0xff]  ;;  %v8087_v24 = vld [vmem:[#allocation83_spill] sm:$0xff] }
 0x245   : > { %v5545_v10 = vpack.c.bf16 %v4461_v11, %v4461_v11  ;;  %v4462_v28 = vmax.f32 %v4390_v39, 0.0  ;;  %v3560_v15 = vmax.f32 %v8070_v29, %v3441_v63  ;;  %v5932_v25 = vpop.f32.mrb[130].mxu0  ;;  %v6008_v12 = vpop.f32.mrb[130].mxu1  ;;  %v8084_v11 = vld [vmem:[#allocation81_spill] sm:$0xff] }
 0x246   : > { %4824 = vst.msk [vmem:[%s7322_s14 + $0xd8] sm:$0xf] %vm4769_vm3, %v5547_v7  ;;  %v5548_v13 = vpack.c.bf16 %v4464_v44, %v4464_v44  ;;  %v4316_v41 = vmax.f32 %v3562_v8, %v6007_v6  ;;  %v3563_v35 = vmax.f32 %v8073_v18, %v5932_v25  ;;  %v3444_v33 = vpop.f32.mrb[131].mxu0  ;;  %v4198_v34 = vpop.f32.mrb[131].mxu1  ;;  %v8085_v39 = vmax.f32 %v8083_v43, %v8084_v11  ;;  %v8090_v18 = vld [vmem:[#allocation85_spill] sm:$0xff]  ;;  %v8101_v11 = vld [vmem:[#allocation92_spill] sm:$0xff] }
 0x247   : > { %4822 = vst.msk [vmem:[%s7322_s14 + $0xd0] sm:$0xf] %vm4769_vm3, %v5545_v10  ;;  %v5546_v58 = vpack.c.bf16 %v4462_v28, %v4462_v28  ;;  %v4314_v62 = vmax.f32 %v3560_v15, %v4195_v9  ;;  %v3561_v48 = vmax.f32 %v8076_v26, %v3444_v33  ;;  %v8088_v8 = vmax.f32 %v8086_v23, %v8087_v24  ;;  %v8093_v26 = vld [vmem:[#allocation87_spill] sm:$0xff]  ;;  %v8104_v24 = vld [vmem:[#allocation94_spill] sm:$0xff] }
 0x248   : > { %4825 = vst.msk [vmem:[%s7322_s14 + $0xdc] sm:$0xf] %vm4769_vm3, %v5548_v13  ;;  %v4395_v47 = vadd.f32 %v7305_v22, %v4316_v41  ;;  %v4317_v52 = vmax.f32 %v3563_v35, %v6008_v12  ;;  %v8091_v35 = vmax.f32 %v8089_v17, %v8090_v18  ;;  %v8110_v18 = vld [vmem:[#allocation98_spill] sm:$0xff] }
 0x249   : > { %4823 = vst.msk [vmem:[%s7322_s14 + $0xd4] sm:$0xf] %vm4769_vm3, %v5546_v58  ;;  %v4393_v53 = vadd.f32 %v7305_v22, %v4314_v62  ;;  %v4315_v27 = vmax.f32 %v3561_v48, %v4198_v34  ;;  %v8094_v48 = vmax.f32 %v8092_v14, %v8093_v26 }
 0x24a   : > { %v4467_v54 = vmax.f32 %v4395_v47, 0.0  ;;  %v4396_v16 = vadd.f32 %v7305_v22, %v4317_v52 }
 0x24b   : > { %v4465_v19 = vmax.f32 %v4393_v53, 0.0  ;;  %v4394_v55 = vadd.f32 %v7305_v22, %v4315_v27  ;;  %v5935_v56 = vpop.f32.mrb[132].mxu0  ;;  %v6011_v31 = vpop.f32.mrb[132].mxu1 }
 0x24c   : > { %v5551_v57 = vpack.c.bf16 %v4467_v54, %v4467_v54  ;;  %v4468_v32 = vmax.f32 %v4396_v16, 0.0  ;;  %v3566_v0 = vmax.f32 %v8079_v61, %v5935_v56  ;;  %v3457_v3 = vpop.f32.mrb[133].mxu0  ;;  %v4211_v4 = vpop.f32.mrb[133].mxu1  ;;  %v8095_v54 = vld [vmem:[#allocation88_spill] sm:$0xff]  ;;  %v8096_v16 = vld [vmem:[#allocation89_spill] sm:$0xff]  ;;  %v8100_v61 = vmax.f32 %v8098_v59, %v8099_v60 }
 0x24d   : > { %v5549_v5 = vpack.c.bf16 %v4465_v19, %v4465_v19  ;;  %v4466_v36 = vmax.f32 %v4394_v55, 0.0  ;;  %v3564_v20 = vmax.f32 %v8082_v37, %v3457_v3  ;;  %v5936_v1 = vpop.f32.mrb[134].mxu0  ;;  %v6012_v2 = vpop.f32.mrb[134].mxu1  ;;  %v8097_v19 = vmax.f32 %v8095_v54, %v8096_v16  ;;  %v6194_v3 = vld [vmem:[%s7748_s2] ss:$0 sm:$0xff] }
 0x24e   : > { %4828 = vst.msk [vmem:[%s7322_s14 + $0xe8] sm:$0xf] %vm4769_vm3, %v5551_v57  ;;  %v5552_v21 = vpack.c.bf16 %v4468_v32, %v4468_v32  ;;  %v4320_v51 = vmax.f32 %v3566_v0, %v6011_v31  ;;  %v3567_v40 = vmax.f32 %v8085_v39, %v5936_v1  ;;  %v3460_v6 = vpop.f32.mrb[135].mxu0  ;;  %v4214_v7 = vpop.f32.mrb[135].mxu1  ;;  %v8102_v39 = vld [vmem:[#allocation93_spill] sm:$0xff] }
 0x24f   : > { %4826 = vst.msk [vmem:[%s7322_s14 + $0xe0] sm:$0xf] %vm4769_vm3, %v5549_v5  ;;  %v5550_v44 = vpack.c.bf16 %v4466_v36, %v4466_v36  ;;  %v4318_v45 = vmax.f32 %v3564_v20, %v4211_v4  ;;  %v3565_v63 = vmax.f32 %v8088_v8, %v3460_v6  ;;  %v8105_v8 = vld [vmem:[#allocation95_spill] sm:$0xff] }
 0x250   : > { %4829 = vst.msk [vmem:[%s7322_s14 + $0xec] sm:$0xf] %vm4769_vm3, %v5552_v21  ;;  %v4399_v9 = vadd.f32 %v7305_v22, %v4320_v51  ;;  %v4321_v10 = vmax.f32 %v3567_v40, %v6012_v2  ;;  %v8103_v40 = vmax.f32 %v8101_v11, %v8102_v39 }
 0x251   : > { %4827 = vst.msk [vmem:[%s7322_s14 + $0xe4] sm:$0xf] %vm4769_vm3, %v5550_v44  ;;  %v4397_v28 = vadd.f32 %v7305_v22, %v4318_v45  ;;  %v4319_v49 = vmax.f32 %v3565_v63, %v4214_v7  ;;  %v8106_v63 = vmax.f32 %v8104_v24, %v8105_v8 }
 0x252   : > { %v4471_v50 = vmax.f32 %v4399_v9, 0.0  ;;  %v4400_v29 = vadd.f32 %v7305_v22, %v4321_v10 }
 0x253   : > { %v4469_v15 = vmax.f32 %v4397_v28, 0.0  ;;  %v4398_v25 = vadd.f32 %v7305_v22, %v4319_v49  ;;  %v5939_v12 = vpop.f32.mrb[136].mxu0  ;;  %v6015_v13 = vpop.f32.mrb[136].mxu1 }
 0x254   : > { %v5555_v41 = vpack.c.bf16 %v4471_v50, %v4471_v50  ;;  %v4472_v42 = vmax.f32 %v4400_v29, 0.0  ;;  %v3570_v33 = vmax.f32 %v8091_v35, %v5939_v12  ;;  %v3473_v34 = vpop.f32.mrb[137].mxu0  ;;  %v4227_v58 = vpop.f32.mrb[137].mxu1  ;;  %v8107_v29 = vld [vmem:[#allocation96_spill] sm:$0xff]  ;;  %v8111_v35 = vld [vmem:[#allocation99_spill] sm:$0xff] }
 0x255   : > { %v5553_v62 = vpack.c.bf16 %v4469_v15, %v4469_v15  ;;  %v4470_v38 = vmax.f32 %v4398_v25, 0.0  ;;  %v3568_v47 = vmax.f32 %v8094_v48, %v3473_v34  ;;  %v5940_v52 = vpop.f32.mrb[138].mxu0  ;;  %v6016_v22 = vpop.f32.mrb[138].mxu1  ;;  %v8108_v15 = vld [vmem:[#allocation97_spill] sm:$0xff] }
 0x256   : > { %4832 = vst.msk [vmem:[%s7322_s14 + $0xf8] sm:$0xf] %vm4769_vm3, %v5555_v41  ;;  %v5556_v53 = vpack.c.bf16 %v4472_v42, %v4472_v42  ;;  %v4324_v27 = vmax.f32 %v3570_v33, %v6015_v13  ;;  %v3571_v55 = vmax.f32 %v8097_v19, %v5940_v52  ;;  %v3476_v56 = vpop.f32.mrb[139].mxu0  ;;  %v4230_v31 = vpop.f32.mrb[139].mxu1  ;;  %v8109_v25 = vmax.f32 %v8107_v29, %v8108_v15 }
 0x257   : > { %4830 = vst.msk [vmem:[%s7322_s14 + $0xf0] sm:$0xf] %vm4769_vm3, %v5553_v62  ;;  %v5554_v57 = vpack.c.bf16 %v4470_v38, %v4470_v38  ;;  %v4322_v32 = vmax.f32 %v3568_v47, %v4227_v58  ;;  %v3569_v0 = vmax.f32 %v8100_v61, %v3476_v56  ;;  %v8112_v33 = vmax.f32 %v8110_v18, %v8111_v35 }
 0x258   : > { %4833 = vst.msk [vmem:[%s7322_s14 + $0xfc] sm:$0xf] %vm4769_vm3, %v5556_v53  ;;  %v4403_v4 = vadd.f32 %v6194_v3, %v4324_v27  ;;  %v4325_v5 = vmax.f32 %v3571_v55, %v6016_v22 }
 0x259   : > { %4831 = vst.msk [vmem:[%s7322_s14 + $0xf4] sm:$0xf] %vm4769_vm3, %v5554_v57  ;;  %v4401_v36 = vadd.f32 %v6194_v3, %v4322_v32  ;;  %v4323_v30 = vmax.f32 %v3569_v0, %v4230_v31 }
 0x25a   : > { %v4475_v46 = vmax.f32 %v4403_v4, 0.0  ;;  %v4404_v37 = vadd.f32 %v6194_v3, %v4325_v5 }
 0x25b   : > { %v4473_v20 = vmax.f32 %v4401_v36, 0.0  ;;  %v4402_v1 = vadd.f32 %v6194_v3, %v4323_v30  ;;  %v5943_v2 = vpop.f32.mrb[140].mxu0  ;;  %v6019_v21 = vpop.f32.mrb[140].mxu1 }
 0x25c   : > { %v5559_v51 = vpack.c.bf16 %v4475_v46, %v4475_v46  ;;  %v4476_v43 = vmax.f32 %v4404_v37, 0.0  ;;  %v3574_v6 = vmax.f32 %v8103_v40, %v5943_v2  ;;  %v3489_v7 = vpop.f32.mrb[141].mxu0  ;;  %v4243_v44 = vpop.f32.mrb[141].mxu1 }
 0x25d   : > { %v5557_v45 = vpack.c.bf16 %v4473_v20, %v4473_v20  ;;  %v4474_v23 = vmax.f32 %v4402_v1, 0.0  ;;  %v3572_v9 = vmax.f32 %v8106_v63, %v3489_v7  ;;  %v5944_v10 = vpop.f32.mrb[142].mxu0  ;;  %v6020_v28 = vpop.f32.mrb[142].mxu1 }
 0x25e   : > { %4836 = vst.msk [vmem:[%s7322_s14 + $0x108] sm:$0xf] %vm4769_vm3, %v5559_v51  ;;  %v5560_v49 = vpack.c.bf16 %v4476_v43, %v4476_v43  ;;  %v4328_v50 = vmax.f32 %v3574_v6, %v6019_v21  ;;  %v3575_v12 = vmax.f32 %v8109_v25, %v5944_v10  ;;  %v3492_v13 = vpop.f32.mrb[143].mxu0  ;;  %v4246_v41 = vpop.f32.mrb[143].mxu1 }
 0x25f   : > { %4834 = vst.msk [vmem:[%s7322_s14 + $0x100] sm:$0xf] %vm4769_vm3, %v5557_v45  ;;  %v5558_v42 = vpack.c.bf16 %v4474_v23, %v4474_v23  ;;  %v4326_v17 = vmax.f32 %v3572_v9, %v4243_v44  ;;  %v3573_v34 = vmax.f32 %v8112_v33, %v3492_v13 }
 0x260   : > { %4837 = vst.msk [vmem:[%s7322_s14 + $0x10c] sm:$0xf] %vm4769_vm3, %v5560_v49  ;;  %v4407_v58 = vadd.f32 %v6194_v3, %v4328_v50  ;;  %v4329_v62 = vmax.f32 %v3575_v12, %v6020_v28 }
 0x261   : > { %4835 = vst.msk [vmem:[%s7322_s14 + $0x104] sm:$0xf] %vm4769_vm3, %v5558_v42  ;;  %v4405_v38 = vadd.f32 %v6194_v3, %v4326_v17  ;;  %v4327_v14 = vmax.f32 %v3573_v34, %v4246_v41 }
 0x262   : > { %v4479_v26 = vmax.f32 %v4407_v58, 0.0  ;;  %v4408_v48 = vadd.f32 %v6194_v3, %v4329_v62 }
 0x263   : > { %v4477_v47 = vmax.f32 %v4405_v38, 0.0  ;;  %v4406_v52 = vadd.f32 %v6194_v3, %v4327_v14 }
 0x264   : > { %v5563_v22 = vpack.c.bf16 %v4479_v26, %v4479_v26  ;;  %v4480_v53 = vmax.f32 %v4408_v48, 0.0 }
 0x265   : > { %v5561_v27 = vpack.c.bf16 %v4477_v47, %v4477_v47  ;;  %v4478_v54 = vmax.f32 %v4406_v52, 0.0 }
 0x266   : > { %4840 = vst.msk [vmem:[%s7322_s14 + $0x118] sm:$0xf] %vm4769_vm3, %v5563_v22  ;;  %v5564_v16 = vpack.c.bf16 %v4480_v53, %v4480_v53 }
 0x267   : > { %4838 = vst.msk [vmem:[%s7322_s14 + $0x110] sm:$0xf] %vm4769_vm3, %v5561_v27  ;;  %v5562_v19 = vpack.c.bf16 %v4478_v54, %v4478_v54 }
 0x268   : > { %4841 = vst.msk [vmem:[%s7322_s14 + $0x11c] sm:$0xf] %vm4769_vm3, %v5564_v16 }
 0x269   : > { %4839 = vst.msk [vmem:[%s7322_s14 + $0x114] sm:$0xf] %vm4769_vm3, %v5562_v19 }
 0x26a PF: > { %p10_p9 = scmp.ge.s32.totalorder %s6257_s16, 4   ;;  %s8113_s12 = smov %s6213_s13 }
 0x26b   : > { %s8114_s13 = smov %s6266_s19  ;;  %s8115_s14 = smov %s6257_s16 }
 0x26c   :  { %12 = sbr.rel (!%p10_p9) target bundleno = 2 (0x2), region = 111 }

// kernel: forward.3
= control target key start
LH: loop header
LB: loop body
LE: loop exit
PB: predicated region body
PF: predicated region fallthrough
CT: control target
= control target key end

     0   :  { %s9882_s0 = inlined_call_operand.vmem [shape: bf16[4,128,500], index: 0, kind: input, shape index: {}]   ;;  %s9883_s1 = inlined_call_operand.vmem [shape: bf16[500,50], index: 1, kind: input, shape index: {}]   ;;  %s9884_s2 = inlined_call_operand.vmem [shape: f32[1,50], index: 2, kind: input, shape index: {}]   ;;  %s9885_s3 = inlined_call_operand.vmem [shape: bf16[16,50,500], index: 3, kind: input, shape index: {}]   ;;  %s9886_s4 = inlined_call_operand.vmem [shape: f32[1,500], index: 4, kind: input, shape index: {}]   ;;  %s9887_s5 = inlined_call_operand.vmem [shape: bf16[500,128], index: 5, kind: input, shape index: {}]   ;;  %s9888_s6 = inlined_call_operand.vmem [shape: f32[1,128], index: 6, kind: input, shape index: {}]   ;;  %s9889_s7 = inlined_call_operand.vmem [shape: f32[1,128], index: 7, kind: input, shape index: {}]   ;;  %s9890_s8 = inlined_call_operand.<no memory space> [shape: f32[1,1], index: 8, kind: input, shape index: {}]   ;;  %s9891_s9 = inlined_call_operand.vmem [shape: f32[1,500], index: 9, kind: input, shape index: {}]   ;;  %s9892_s11 = inlined_call_operand.hbm [shape: f32[1,1], index: 11, kind: output, shape index: {0}]   ;;  %s9893_s12 = inlined_call_operand.hbm [shape: f32[1,8], index: 12, kind: output, shape index: {1}]   ;;  %s9894_s10 = inlined_call_operand.<no memory space> [shape: f32[1,1], index: 10, kind: input, shape index: {}]  }
   0x1   :  { %v18_v0 = vstv %s9890_s8  ;;  %v20_v1 = vstv %s9894_s10 }
   0x2   :  { %19 = vst [vmem:[#allocation2] sm:$0x1] %v18_v0  ;;  %21 = vst [vmem:[#allocation3] sm:$0x1] %v20_v1 }
   0x3   :  { %22 = vsyncpa [#allocation5], 0  ;;  %v7886_v2 = vld [vmem:[%s9883_s1 + $0x40] sm:$0xff]   ;;  %v7909_v6 = vld [vmem:[%s9883_s1 + $0x48] sm:$0xff]   ;;  %vm508_vm0 = vcmask 1041408   ;;  %vm483_vm1 = vcmask 949248  }
   0x4   :  { %v7891_v3 = vld [vmem:[%s9883_s1 + $0xc0] sm:$0xff]   ;;  %6537 = vmatprep.subr.bf16.mxu0 %v7886_v2  ;;  %v7915_v7 = vld [vmem:[%s9883_s1 + $0xc8] sm:$0xff]   ;;  %v7933_v10 = vld [vmem:[%s9883_s1 + $0x50] sm:$0xff]  }
   0x5   :  { %v7897_v4 = vld [vmem:[%s9883_s1] sm:$0xff]   ;;  %6601 = vmatprep.subr.bf16.mxu1 %v7891_v3  ;;  %v7921_v8 = vld [vmem:[%s9883_s1 + $0x8] sm:$0xff]   ;;  %v7939_v11 = vld [vmem:[%s9883_s1 + $0xd0] sm:$0xff]  }
   0x6   :  { %v7903_v5 = vld [vmem:[%s9883_s1 + $0x80] sm:$0xff]   ;;  %6538 = vmatpush3.bf16.msra.mxu0 %v7897_v4  ;;  %v7927_v9 = vld [vmem:[%s9883_s1 + $0x88] sm:$0xff]   ;;  %v7945_v12 = vld [vmem:[%s9883_s1 + $0x10] sm:$0xff]  }
   0x7   :  { %6602 = vmatpush3.bf16.msra.mxu1 %v7903_v5  ;;  %6539 = vmatprep.subr.bf16.mxu0 %v7909_v6  ;;  %v7951_v13 = vld [vmem:[%s9883_s1 + $0x90] sm:$0xff]   ;;  %v7957_v14 = vld [vmem:[%s9883_s1 + $0x58] sm:$0xff]   ;;  %v7981_v18 = vld [vmem:[%s9883_s1 + $0x60] sm:$0xff]  }
   0x8   :  { %6603 = vmatprep.subr.bf16.mxu1 %v7915_v7  ;;  %v7963_v15 = vld [vmem:[%s9883_s1 + $0xd8] sm:$0xff]   ;;  %v7987_v19 = vld [vmem:[%s9883_s1 + $0xe0] sm:$0xff]   ;;  %v8005_v22 = vld [vmem:[%s9883_s1 + $0x68] sm:$0xff]  }
   0x9   :  { %v7969_v16 = vld [vmem:[%s9883_s1 + $0x18] sm:$0xff]   ;;  %v7993_v20 = vld [vmem:[%s9883_s1 + $0x20] sm:$0xff]   ;;  %v8011_v23 = vld [vmem:[%s9883_s1 + $0xe8] sm:$0xff]  }
   0xa   :  { %6540 = vmatpush3.bf16.msra.mxu0 %v7921_v8  ;;  %v7975_v17 = vld [vmem:[%s9883_s1 + $0x98] sm:$0xff]   ;;  %v7999_v21 = vld [vmem:[%s9883_s1 + $0xa0] sm:$0xff]   ;;  %v8017_v24 = vld [vmem:[%s9883_s1 + $0x28] sm:$0xff]  }
   0xb   :  { %6604 = vmatpush3.bf16.msra.mxu1 %v7927_v9  ;;  %6541 = vmatprep.subr.bf16.mxu0 %v7933_v10  ;;  %v8023_v25 = vld [vmem:[%s9883_s1 + $0xa8] sm:$0xff]   ;;  %v8029_v26 = vld [vmem:[%s9883_s1 + $0x70] sm:$0xff]   ;;  %v8053_v30 = vld [vmem:[%s9883_s1 + $0x78] sm:$0xff]  }
   0xc   :  { %6605 = vmatprep.subr.bf16.mxu1 %v7939_v11  ;;  %v8035_v27 = vld [vmem:[%s9883_s1 + $0xf0] sm:$0xff]   ;;  %v8059_v31 = vld [vmem:[%s9883_s1 + $0xf8] ss:$0 sps:$4 sm:$0x33]   ;;  %v7148_v37 = vld [vmem:[%s9882_s0 + $0xc] ss:$16 sps:$4 sm:$0xff]  }
   0xd   :  { %v8041_v28 = vld [vmem:[%s9883_s1 + $0x30] sm:$0xff]   ;;  %v8064_v32 = vld [vmem:[%s9883_s1 + $0x38] sm:$0xff]   ;;  %5745 = vmatprep.mubr.msk.bf16.mxu1 %vm483_vm1, %v7148_v37 }
   0xe   :  { %6542 = vmatpush3.bf16.msra.mxu0 %v7945_v12  ;;  %v8047_v29 = vld [vmem:[%s9883_s1 + $0xb0] sm:$0xff]   ;;  %v8072_v33 = vld [vmem:[%s9883_s1 + $0xb8] sm:$0xff]  }
   0xf   :  { %6606 = vmatpush3.bf16.msra.mxu1 %v7951_v13  ;;  %6543 = vmatprep.subr.bf16.mxu0 %v7957_v14  ;;  %v7143_v34 = vld [vmem:[%s9882_s0] ss:$16 sps:$4 sm:$0xff]   ;;  %v7145_v35 = vld [vmem:[%s9882_s0 + $0x4] ss:$16 sps:$4 sm:$0xff]   ;;  %v7146_v36 = vld [vmem:[%s9882_s0 + $0x8] ss:$16 sps:$4 sm:$0xff]  }
  0x10   :  { %6607 = vmatprep.subr.bf16.mxu1 %v7963_v15  ;;  %544 = vmatprep.mubr.bf16.mxu0 %v7145_v35  ;;  %v7149_v38 = vld [vmem:[%s9882_s0 + $0x24] ss:$16 sps:$4 sm:$0xff]   ;;  %v7151_v39 = vld [vmem:[%s9882_s0 + $0x2c] ss:$16 sps:$4 sm:$0xff]   ;;  %v7153_v40 = vld [vmem:[%s9882_s0 + $0x20] ss:$16 sps:$4 sm:$0xff]  }
  0x11   :  { %v7155_v41 = vld [vmem:[%s9882_s0 + $0x44] ss:$16 sps:$4 sm:$0xff]   ;;  %v7154_v42 = vld [vmem:[%s9882_s0 + $0x28] ss:$16 sps:$4 sm:$0xff]   ;;  %v7157_v43 = vld [vmem:[%s9882_s0 + $0x4c] ss:$16 sps:$4 sm:$0xff]  }
  0x12   :  { %6544 = vmatpush3.bf16.msra.mxu0 %v7969_v16  ;;  %v7159_v44 = vld [vmem:[%s9882_s0 + $0x40] ss:$16 sps:$4 sm:$0xff]   ;;  %v7161_v45 = vld [vmem:[%s9882_s0 + $0x64] ss:$16 sps:$4 sm:$0xff]   ;;  %v7160_v46 = vld [vmem:[%s9882_s0 + $0x48] ss:$16 sps:$4 sm:$0xff]  }
  0x13   :  { %6608 = vmatpush3.bf16.msra.mxu1 %v7975_v17  ;;  %6545 = vmatprep.subr.bf16.mxu0 %v7981_v18  ;;  %v7163_v47 = vld [vmem:[%s9882_s0 + $0x6c] ss:$16 sps:$4 sm:$0xff]   ;;  %v7165_v48 = vld [vmem:[%s9882_s0 + $0x60] ss:$16 sps:$4 sm:$0xff]   ;;  %v7167_v49 = vld [vmem:[%s9882_s0 + $0x84] ss:$16 sps:$4 sm:$0xff]  }
  0x14   :  { %6609 = vmatprep.subr.bf16.mxu1 %v7987_v19  ;;  %v7166_v50 = vld [vmem:[%s9882_s0 + $0x68] ss:$16 sps:$4 sm:$0xff]   ;;  %v7169_v51 = vld [vmem:[%s9882_s0 + $0x8c] ss:$16 sps:$4 sm:$0xff]   ;;  %v7171_v52 = vld [vmem:[%s9882_s0 + $0x80] ss:$16 sps:$4 sm:$0xff]  }
  0x15   :  { %v7173_v53 = vld [vmem:[%s9882_s0 + $0xa4] ss:$16 sps:$4 sm:$0xff]   ;;  %v7172_v54 = vld [vmem:[%s9882_s0 + $0x88] ss:$16 sps:$4 sm:$0xff]   ;;  %v7175_v55 = vld [vmem:[%s9882_s0 + $0xac] ss:$16 sps:$4 sm:$0xff]  }
  0x16   :  { %6546 = vmatpush3.bf16.msra.mxu0 %v7993_v20  ;;  %v7177_v56 = vld [vmem:[%s9882_s0 + $0xa0] ss:$16 sps:$4 sm:$0xff]   ;;  %v7179_v57 = vld [vmem:[%s9882_s0 + $0xc4] ss:$16 sps:$4 sm:$0xff]   ;;  %v7178_v58 = vld [vmem:[%s9882_s0 + $0xa8] ss:$16 sps:$4 sm:$0xff]  }
  0x17   :  { %6610 = vmatpush3.bf16.msra.mxu1 %v7999_v21  ;;  %6547 = vmatprep.subr.bf16.mxu0 %v8005_v22  ;;  %v7181_v59 = vld [vmem:[%s9882_s0 + $0xcc] ss:$16 sps:$4 sm:$0xff]   ;;  %v7183_v60 = vld [vmem:[%s9882_s0 + $0xc0] ss:$16 sps:$4 sm:$0xff]   ;;  %v7185_v61 = vld [vmem:[%s9882_s0 + $0xe4] ss:$16 sps:$4 sm:$0xff]  }
  0x18   :  { %6611 = vmatprep.subr.bf16.mxu1 %v8011_v23  ;;  %v7184_v62 = vld [vmem:[%s9882_s0 + $0xc8] ss:$16 sps:$4 sm:$0xff]   ;;  %v7187_v63 = vld [vmem:[%s9882_s0 + $0xec] ss:$16 sps:$4 sm:$0xff]   ;;  %v7189_v0 = vld [vmem:[%s9882_s0 + $0xe0] ss:$16 sps:$4 sm:$0xff]  }
  0x19   :  { %v7193_v1 = vld [vmem:[%s9882_s0 + $0x104] ss:$16 sps:$4 sm:$0xff]   ;;  %v7196_v35 = vld [vmem:[%s9882_s0 + $0x10c] ss:$16 sps:$4 sm:$0xff]  }
  0x1a   :  { %6548 = vmatpush3.bf16.msra.mxu0 %v8017_v24  ;;  %v7197_v37 = vld [vmem:[%s9882_s0 + $0x124] ss:$16 sps:$4 sm:$0xff]  }
  0x1b   :  { %6612 = vmatpush3.bf16.msra.mxu1 %v8023_v25  ;;  %6549 = vmatprep.subr.bf16.mxu0 %v8029_v26 }
  0x1c   :  { %6613 = vmatprep.subr.bf16.mxu1 %v8035_v27 }
  0x1e   :  { %6550 = vmatpush3.bf16.msra.mxu0 %v8041_v28 }
  0x1f   :  { %6614 = vmatpush3.bf16.msra.mxu1 %v8047_v29  ;;  %6551 = vmatprep.subr.bf16.mxu0 %v8053_v30 }
  0x20   :  { %7100 = vmatprep.subr.msk.bf16.mxu1 %vm508_vm0, %v8059_v31 }
  0x22   :  { %6552 = vmatpush3.bf16.msra.mxu0 %v8064_v32 }
  0x23   :  { %6616 = vmatpush3.bf16.msra.mxu1 %v8072_v33  ;;  %6665 = vmatprep.subr.bf16.mxu0 %v7886_v2 }
  0x24   :  { %6729 = vmatprep.subr.bf16.mxu1 %v7891_v3 }
  0x25   :  { %545 = vmatmul.mubr.bf16.vlgmr.msra.gmra.mrb[0].mxu0 %v7143_v34  ;;  %v7190_v34 = vld [vmem:[%s9882_s0 + $0xe8] ss:$16 sps:$4 sm:$0xff]  }
  0x26   :  { %6666 = vmatpush3.bf16.msra.mxu0 %v7897_v4  ;;  %642 = vmatmul.mubr.bf16.vlgmr.msra.gmra.mrb[0].mxu1 %v7146_v36  ;;  %v7191_v36 = vld [vmem:[%s9882_s0 + $0x100] ss:$16 sps:$4 sm:$0xff]  }
  0x27   :  { %552 = vmatprep.mubr.bf16.mxu0 %v7149_v38  ;;  %6730 = vmatpush3.bf16.msra.mxu1 %v7903_v5  ;;  %v7194_v38 = vld [vmem:[%s9882_s0 + $0x108] ss:$16 sps:$4 sm:$0xff]  }
  0x28   :  { %5746 = vmatprep.mubr.msk.bf16.mxu1 %vm483_vm1, %v7151_v39  ;;  %6667 = vmatprep.subr.bf16.mxu0 %v7909_v6  ;;  %v7199_v39 = vld [vmem:[%s9882_s0 + $0x12c] ss:$16 sps:$4 sm:$0xff]  }
  0x29   :  { %6731 = vmatprep.subr.bf16.mxu1 %v7915_v7 }
  0x2a   :  { %6668 = vmatpush3.bf16.msra.mxu0 %v7921_v8 }
  0x2b   :  { %6669 = vmatprep.subr.bf16.mxu0 %v7933_v10  ;;  %6732 = vmatpush3.bf16.msra.mxu1 %v7927_v9 }
  0x2c   :  { %6733 = vmatprep.subr.bf16.mxu1 %v7939_v11 }
  0x2d   :  { %553 = vmatmul.mubr.bf16.gmra.mrb[4].mxu0 %v7153_v40  ;;  %v7201_v40 = vld [vmem:[%s9882_s0 + $0x120] ss:$16 sps:$4 sm:$0xff]  }
  0x2e   :  { %560 = vmatprep.mubr.bf16.mxu0 %v7155_v41  ;;  %6670 = vmatpush3.bf16.msra.mxu0 %v7945_v12  ;;  %v7203_v41 = vld [vmem:[%s9882_s0 + $0x144] ss:$16 sps:$4 sm:$0xff]  }
  0x2f   :  { %650 = vmatmul.mubr.bf16.gmra.mrb[4].mxu1 %v7154_v42  ;;  %6671 = vmatprep.subr.bf16.mxu0 %v7957_v14  ;;  %v7730_v42 = vld [vmem:[%s9883_s1 + $0x48] sm:$0xff]  }
  0x30   :  { %5747 = vmatprep.mubr.msk.bf16.mxu1 %vm483_vm1, %v7157_v43  ;;  %6734 = vmatpush3.bf16.msra.mxu1 %v7951_v13  ;;  %v7731_v43 = vld [vmem:[%s9883_s1 + $0x80] sm:$0xff]  }
  0x31   :  { %6735 = vmatprep.subr.bf16.mxu1 %v7963_v15 }
  0x32   :  { %6672 = vmatpush3.bf16.msra.mxu0 %v7969_v16 }
  0x33   :  { %6673 = vmatprep.subr.bf16.mxu0 %v7981_v18 }
  0x34   :  { %6736 = vmatpush3.bf16.msra.mxu1 %v7975_v17 }
  0x35   :  { %561 = vmatmul.mubr.bf16.gmra.mrb[8].mxu0 %v7159_v44  ;;  %6737 = vmatprep.subr.bf16.mxu1 %v7987_v19  ;;  %v7251_v44 = vld [vmem:[%s9882_s0 + $0x244] ss:$16 sps:$4 sm:$0xff]  }
  0x36   :  { %568 = vmatprep.mubr.bf16.mxu0 %v7161_v45  ;;  %6674 = vmatpush3.bf16.msra.mxu0 %v7993_v20  ;;  %v7250_v45 = vld [vmem:[%s9882_s0 + $0x228] ss:$16 sps:$4 sm:$0xff]  }
  0x37   :  { %658 = vmatmul.mubr.bf16.gmra.mrb[8].mxu1 %v7160_v46  ;;  %6675 = vmatprep.subr.bf16.mxu0 %v8005_v22  ;;  %v7732_v46 = vld [vmem:[%s9883_s1 + $0xc8] sm:$0xff]  }
  0x38   :  { %5748 = vmatprep.mubr.msk.bf16.mxu1 %vm483_vm1, %v7163_v47  ;;  %6738 = vmatpush3.bf16.msra.mxu1 %v7999_v21  ;;  %v7733_v47 = vld [vmem:[%s9883_s1 + $0x8] sm:$0xff]  }
  0x39   :  { %6739 = vmatprep.subr.bf16.mxu1 %v8011_v23 }
  0x3a   :  { %6676 = vmatpush3.bf16.msra.mxu0 %v8017_v24 }
  0x3b   :  { %6677 = vmatprep.subr.bf16.mxu0 %v8029_v26 }
  0x3c   :  { %6740 = vmatpush3.bf16.msra.mxu1 %v8023_v25 }
  0x3d   :  { %569 = vmatmul.mubr.bf16.gmra.mrb[12].mxu0 %v7165_v48  ;;  %6741 = vmatprep.subr.bf16.mxu1 %v8035_v27  ;;  %v7253_v48 = vld [vmem:[%s9882_s0 + $0x24c] ss:$16 sps:$4 sm:$0xff]  }
  0x3e   :  { %576 = vmatprep.mubr.bf16.mxu0 %v7167_v49  ;;  %6678 = vmatpush3.bf16.msra.mxu0 %v8041_v28  ;;  %v7734_v49 = vld [vmem:[%s9883_s1 + $0x50] sm:$0xff]  }
  0x3f   :  { %666 = vmatmul.mubr.bf16.gmra.mrb[12].mxu1 %v7166_v50  ;;  %6679 = vmatprep.subr.bf16.mxu0 %v8053_v30  ;;  %v7735_v50 = vld [vmem:[%s9883_s1 + $0x88] sm:$0xff]  }
  0x40   :  { %5749 = vmatprep.mubr.msk.bf16.mxu1 %vm483_vm1, %v7169_v51  ;;  %6742 = vmatpush3.bf16.msra.mxu1 %v8047_v29  ;;  %v7736_v51 = vld [vmem:[%s9883_s1 + $0xd0] sm:$0xff]  }
  0x41   :  { %7101 = vmatprep.subr.msk.bf16.mxu1 %vm508_vm0, %v8059_v31 }
  0x42   :  { %6680 = vmatpush3.bf16.msra.mxu0 %v8064_v32 }
  0x43   :  { %6793 = vmatprep.subr.bf16.mxu0 %v7886_v2 }
  0x44   :  { %6744 = vmatpush3.bf16.msra.mxu1 %v8072_v33 }
  0x45   :  { %577 = vmatmul.mubr.bf16.gmra.mrb[16].mxu0 %v7171_v52  ;;  %6857 = vmatprep.subr.bf16.mxu1 %v7891_v3  ;;  %v7737_v52 = vld [vmem:[%s9883_s1 + $0x10] sm:$0xff]  }
  0x46   :  { %584 = vmatprep.mubr.bf16.mxu0 %v7173_v53  ;;  %v7255_v53 = vld [vmem:[%s9882_s0 + $0x240] ss:$16 sps:$4 sm:$0xff]  }
  0x47   :  { %674 = vmatmul.mubr.bf16.gmra.mrb[16].mxu1 %v7172_v54  ;;  %v7738_v54 = vld [vmem:[%s9883_s1 + $0x58] sm:$0xff]  }
  0x48   :  { %5750 = vmatprep.mubr.msk.bf16.mxu1 %vm483_vm1, %v7175_v55  ;;  %v7739_v55 = vld [vmem:[%s9883_s1 + $0x90] sm:$0xff]  }
  0x4d   :  { %585 = vmatmul.mubr.bf16.gmra.mrb[20].mxu0 %v7177_v56  ;;  %v7257_v56 = vld [vmem:[%s9882_s0 + $0x264] ss:$16 sps:$4 sm:$0xff]  }
  0x4e   :  { %592 = vmatprep.mubr.bf16.mxu0 %v7179_v57  ;;  %v7256_v57 = vld [vmem:[%s9882_s0 + $0x248] ss:$16 sps:$4 sm:$0xff]  }
  0x4f   :  { %682 = vmatmul.mubr.bf16.gmra.mrb[20].mxu1 %v7178_v58  ;;  %v7740_v58 = vld [vmem:[%s9883_s1 + $0xd8] sm:$0xff]  }
  0x50   :  { %5751 = vmatprep.mubr.msk.bf16.mxu1 %vm483_vm1, %v7181_v59  ;;  %v7259_v59 = vld [vmem:[%s9882_s0 + $0x26c] ss:$16 sps:$4 sm:$0xff]  }
  0x55   :  { %593 = vmatmul.mubr.bf16.gmra.mrb[24].mxu0 %v7183_v60  ;;  %v7741_v60 = vld [vmem:[%s9883_s1 + $0x18] sm:$0xff]  }
  0x56   :  { %600 = vmatprep.mubr.bf16.mxu0 %v7185_v61  ;;  %v7742_v61 = vld [vmem:[%s9883_s1 + $0x60] sm:$0xff]  }
  0x57   :  { %690 = vmatmul.mubr.bf16.gmra.mrb[24].mxu1 %v7184_v62  ;;  %v7743_v62 = vld [vmem:[%s9883_s1 + $0x98] sm:$0xff]  }
  0x58   :  { %5752 = vmatprep.mubr.msk.bf16.mxu1 %vm483_vm1, %v7187_v63  ;;  %v7744_v63 = vld [vmem:[%s9883_s1 + $0xe0] sm:$0xff]  }
  0x5d   :  { %601 = vmatmul.mubr.bf16.gmra.mrb[28].mxu0 %v7189_v0  ;;  %v7745_v0 = vld [vmem:[%s9883_s1 + $0x20] sm:$0xff]  }
  0x5e   :  { %947 = vmatprep.mubr.bf16.mxu0 %v7193_v1  ;;  %v7261_v1 = vld [vmem:[%s9882_s0 + $0x260] ss:$16 sps:$4 sm:$0xff]  }
  0x5f   :  { %698 = vmatmul.mubr.bf16.gmra.mrb[28].mxu1 %v7190_v34  ;;  %v7746_v34 = vld [vmem:[%s9883_s1 + $0x68] sm:$0xff]  }
  0x60   :  { %5817 = vmatprep.mubr.msk.bf16.mxu1 %vm483_vm1, %v7196_v35  ;;  %v7263_v35 = vld [vmem:[%s9882_s0 + $0x284] ss:$16 sps:$4 sm:$0xff]  }
  0x65   :  { %948 = vmatmul.mubr.bf16.vlgmr.msra.gmra.mrb[32].mxu0 %v7191_v36  ;;  %v7747_v36 = vld [vmem:[%s9883_s1 + $0xa0] sm:$0xff]  }
  0x66   :  { %6794 = vmatpush3.bf16.msra.mxu0 %v7897_v4  ;;  %955 = vmatprep.mubr.bf16.mxu0 %v7197_v37  ;;  %v7202_v4 = vld [vmem:[%s9882_s0 + $0x128] ss:$16 sps:$4 sm:$0xff]  }
  0x67   :  { %1045 = vmatmul.mubr.bf16.vlgmr.msra.gmra.mrb[32].mxu1 %v7194_v38  ;;  %6795 = vmatprep.subr.bf16.mxu0 %v7909_v6  ;;  %v7205_v6 = vld [vmem:[%s9882_s0 + $0x14c] ss:$16 sps:$4 sm:$0xff]   ;;  %v7262_v37 = vld [vmem:[%s9882_s0 + $0x268] ss:$16 sps:$4 sm:$0xff]  }
  0x68   :  { %6858 = vmatpush3.bf16.msra.mxu1 %v7903_v5  ;;  %5818 = vmatprep.mubr.msk.bf16.mxu1 %vm483_vm1, %v7199_v39  ;;  %v7207_v5 = vld [vmem:[%s9882_s0 + $0x140] ss:$16 sps:$4 sm:$0xff]   ;;  %v7748_v38 = vld [vmem:[%s9883_s1 + $0xe8] sm:$0xff]  }
  0x69   :  { %6859 = vmatprep.subr.bf16.mxu1 %v7915_v7  ;;  %v7209_v7 = vld [vmem:[%s9882_s0 + $0x164] ss:$16 sps:$4 sm:$0xff]   ;;  %v7265_v39 = vld [vmem:[%s9882_s0 + $0x28c] ss:$16 sps:$4 sm:$0xff]  }
  0x6a   :  { %6796 = vmatpush3.bf16.msra.mxu0 %v7921_v8  ;;  %v7208_v8 = vld [vmem:[%s9882_s0 + $0x148] ss:$16 sps:$4 sm:$0xff]  }
  0x6b   :  { %6797 = vmatprep.subr.bf16.mxu0 %v7933_v10  ;;  %v7213_v10 = vld [vmem:[%s9882_s0 + $0x160] ss:$16 sps:$4 sm:$0xff]  }
  0x6c   :  { %6860 = vmatpush3.bf16.msra.mxu1 %v7927_v9  ;;  %v7211_v9 = vld [vmem:[%s9882_s0 + $0x16c] ss:$16 sps:$4 sm:$0xff]  }
  0x6d   :  { %956 = vmatmul.mubr.bf16.gmra.mrb[36].mxu0 %v7201_v40  ;;  %6861 = vmatprep.subr.bf16.mxu1 %v7939_v11  ;;  %v7215_v11 = vld [vmem:[%s9882_s0 + $0x184] ss:$16 sps:$4 sm:$0xff]   ;;  %v7749_v40 = vld [vmem:[%s9883_s1 + $0x28] sm:$0xff]  }
  0x6e   :  { %963 = vmatprep.mubr.bf16.mxu0 %v7203_v41  ;;  %6798 = vmatpush3.bf16.msra.mxu0 %v7945_v12  ;;  %v7214_v12 = vld [vmem:[%s9882_s0 + $0x168] ss:$16 sps:$4 sm:$0xff]   ;;  %v7750_v41 = vld [vmem:[%s9883_s1 + $0x70] sm:$0xff]  }
  0x6f   :  { %1053 = vmatmul.mubr.bf16.gmra.mrb[36].mxu1 %v7202_v4  ;;  %6799 = vmatprep.subr.bf16.mxu0 %v7957_v14  ;;  %v7219_v14 = vld [vmem:[%s9882_s0 + $0x180] ss:$16 sps:$4 sm:$0xff]   ;;  %v7751_v4 = vld [vmem:[%s9883_s1 + $0xa8] sm:$0xff]  }
  0x70   :  { %5819 = vmatprep.mubr.msk.bf16.mxu1 %vm483_vm1, %v7205_v6  ;;  %6862 = vmatpush3.bf16.msra.mxu1 %v7951_v13  ;;  %v7217_v13 = vld [vmem:[%s9882_s0 + $0x18c] ss:$16 sps:$4 sm:$0xff]   ;;  %v7752_v6 = vld [vmem:[%s9883_s1 + $0xf0] sm:$0xff]  }
  0x71   :  { %6863 = vmatprep.subr.bf16.mxu1 %v7963_v15  ;;  %v7221_v15 = vld [vmem:[%s9882_s0 + $0x1a4] ss:$16 sps:$4 sm:$0xff]  }
  0x72   :  { %6800 = vmatpush3.bf16.msra.mxu0 %v7969_v16  ;;  %v7220_v16 = vld [vmem:[%s9882_s0 + $0x188] ss:$16 sps:$4 sm:$0xff]  }
  0x73   :  { %6801 = vmatprep.subr.bf16.mxu0 %v7981_v18  ;;  %v7225_v18 = vld [vmem:[%s9882_s0 + $0x1a0] ss:$16 sps:$4 sm:$0xff]  }
  0x74   :  { %6864 = vmatpush3.bf16.msra.mxu1 %v7975_v17  ;;  %v7223_v17 = vld [vmem:[%s9882_s0 + $0x1ac] ss:$16 sps:$4 sm:$0xff]  }
  0x75   :  { %964 = vmatmul.mubr.bf16.gmra.mrb[40].mxu0 %v7207_v5  ;;  %6865 = vmatprep.subr.bf16.mxu1 %v7987_v19  ;;  %v7226_v19 = vld [vmem:[%s9882_s0 + $0x1a8] ss:$16 sps:$4 sm:$0xff]   ;;  %v7753_v5 = vld [vmem:[%s9883_s1 + $0x30] sm:$0xff]  }
  0x76   :  { %971 = vmatprep.mubr.bf16.mxu0 %v7209_v7  ;;  %6802 = vmatpush3.bf16.msra.mxu0 %v7993_v20  ;;  %v7231_v20 = vld [vmem:[%s9882_s0 + $0x1c0] ss:$16 sps:$4 sm:$0xff]  }
  0x77   :  { %1061 = vmatmul.mubr.bf16.gmra.mrb[40].mxu1 %v7208_v8  ;;  %6803 = vmatprep.subr.bf16.mxu0 %v8005_v22  ;;  %v7232_v22 = vld [vmem:[%s9882_s0 + $0x1c8] ss:$16 sps:$4 sm:$0xff]   ;;  %v7267_v7 = vld [vmem:[%s9882_s0 + $0x280] ss:$16 sps:$4 sm:$0xff]  }
  0x78   :  { %5820 = vmatprep.mubr.msk.bf16.mxu1 %vm483_vm1, %v7211_v9  ;;  %6866 = vmatpush3.bf16.msra.mxu1 %v7999_v21  ;;  %v7233_v21 = vld [vmem:[%s9882_s0 + $0x1e4] ss:$16 sps:$4 sm:$0xff]   ;;  %v7754_v8 = vld [vmem:[%s9883_s1 + $0x78] sm:$0xff]  }
  0x79   :  { %6867 = vmatprep.subr.bf16.mxu1 %v8011_v23  ;;  %v7235_v23 = vld [vmem:[%s9882_s0 + $0x1ec] ss:$16 sps:$4 sm:$0xff]   ;;  %v7269_v9 = vld [vmem:[%s9882_s0 + $0x2a4] ss:$16 sps:$4 sm:$0xff]  }
  0x7a   :  { %6804 = vmatpush3.bf16.msra.mxu0 %v8017_v24  ;;  %v7237_v24 = vld [vmem:[%s9882_s0 + $0x1e0] ss:$16 sps:$4 sm:$0xff]  }
  0x7b   :  { %6805 = vmatprep.subr.bf16.mxu0 %v8029_v26  ;;  %v7238_v26 = vld [vmem:[%s9882_s0 + $0x1e8] ss:$16 sps:$4 sm:$0xff]  }
  0x7c   :  { %6868 = vmatpush3.bf16.msra.mxu1 %v8023_v25  ;;  %v7241_v25 = vld [vmem:[%s9882_s0 + $0x204] ss:$16 sps:$4 sm:$0xff]  }
  0x7d   :  { %972 = vmatmul.mubr.bf16.gmra.mrb[44].mxu0 %v7213_v10  ;;  %6869 = vmatprep.subr.bf16.mxu1 %v8035_v27  ;;  %v7244_v27 = vld [vmem:[%s9882_s0 + $0x20c] ss:$16 sps:$4 sm:$0xff]   ;;  %v7755_v10 = vld [vmem:[%s9883_s1 + $0xb0] sm:$0xff]  }
  0x7e   :  { %979 = vmatprep.mubr.bf16.mxu0 %v7215_v11  ;;  %6806 = vmatpush3.bf16.msra.mxu0 %v8041_v28  ;;  %v7239_v28 = vld [vmem:[%s9882_s0 + $0x200] ss:$16 sps:$4 sm:$0xff]   ;;  %v7268_v11 = vld [vmem:[%s9882_s0 + $0x288] ss:$16 sps:$4 sm:$0xff]  }
  0x7f   :  { %1069 = vmatmul.mubr.bf16.gmra.mrb[44].mxu1 %v7214_v12  ;;  %6807 = vmatprep.subr.bf16.mxu0 %v8053_v30  ;;  %v7242_v30 = vld [vmem:[%s9882_s0 + $0x208] ss:$16 sps:$4 sm:$0xff]  }
  0x80   :  { %5821 = vmatprep.mubr.msk.bf16.mxu1 %vm483_vm1, %v7217_v13  ;;  %6870 = vmatpush3.bf16.msra.mxu1 %v8047_v29  ;;  %v7245_v29 = vld [vmem:[%s9882_s0 + $0x224] ss:$16 sps:$4 sm:$0xff]   ;;  %v7756_v12 = vld [vmem:[%s9883_s1 + $0xf8] ss:$0 sps:$4 sm:$0x33]  }
  0x81   :  { %7102 = vmatprep.subr.msk.bf16.mxu1 %vm508_vm0, %v8059_v31  ;;  %v7247_v31 = vld [vmem:[%s9882_s0 + $0x22c] ss:$16 sps:$4 sm:$0xff]  }
  0x82   :  { %6808 = vmatpush3.bf16.msra.mxu0 %v8064_v32  ;;  %v7729_v32 = vld [vmem:[%s9883_s1] sm:$0xff]   ;;  %v7271_v13 = vld [vmem:[%s9882_s0 + $0x2ac] ss:$16 sps:$4 sm:$0xff]  }
  0x83   :  { %6921 = vmatprep.subr.bf16.mxu0 %v7886_v2  ;;  %v7227_v2 = vld [vmem:[%s9882_s0 + $0x1c4] ss:$16 sps:$4 sm:$0xff]  }
  0x84   :  { %6872 = vmatpush3.bf16.msra.mxu1 %v8072_v33  ;;  %v7249_v33 = vld [vmem:[%s9882_s0 + $0x220] ss:$16 sps:$4 sm:$0xff]  }
  0x85   :  { %980 = vmatmul.mubr.bf16.gmra.mrb[48].mxu0 %v7219_v14  ;;  %6985 = vmatprep.subr.bf16.mxu1 %v7891_v3  ;;  %v7229_v3 = vld [vmem:[%s9882_s0 + $0x1cc] ss:$16 sps:$4 sm:$0xff]  }
  0x86   :  { %987 = vmatprep.mubr.bf16.mxu0 %v7221_v15  ;;  %v7757_v14 = vld [vmem:[%s9883_s1 + $0x38] sm:$0xff]  }
  0x87   :  { %1077 = vmatmul.mubr.bf16.gmra.mrb[48].mxu1 %v7220_v16  ;;  %v7758_v15 = vld [vmem:[%s9883_s1 + $0xb8] sm:$0xff]   ;;  %v7273_v16 = vld [vmem:[%s9882_s0 + $0x2a0] ss:$16 sps:$4 sm:$0xff]  }
  0x88   :  { %5822 = vmatprep.mubr.msk.bf16.mxu1 %vm483_vm1, %v7223_v17  ;;  %v7275_v17 = vld [vmem:[%s9882_s0 + $0x2c4] ss:$16 sps:$4 sm:$0xff]  }
  0x8d   :  { %988 = vmatmul.mubr.bf16.gmra.mrb[52].mxu0 %v7225_v18  ;;  %v7274_v18 = vld [vmem:[%s9882_s0 + $0x2a8] ss:$16 sps:$4 sm:$0xff]  }
  0x8e   :  { %995 = vmatprep.mubr.bf16.mxu0 %v7227_v2  ;;  %v7277_v2 = vld [vmem:[%s9882_s0 + $0x2cc] ss:$16 sps:$4 sm:$0xff]  }
  0x8f   :  { %1085 = vmatmul.mubr.bf16.gmra.mrb[52].mxu1 %v7226_v19 }
  0x90   :  { %5823 = vmatprep.mubr.msk.bf16.mxu1 %vm483_vm1, %v7229_v3 }
  0x95   :  { %996 = vmatmul.mubr.bf16.gmra.mrb[56].mxu0 %v7231_v20 }
  0x96   :  { %1003 = vmatprep.mubr.bf16.mxu0 %v7233_v21 }
  0x97   :  { %1093 = vmatmul.mubr.bf16.gmra.mrb[56].mxu1 %v7232_v22 }
  0x98   :  { %5824 = vmatprep.mubr.msk.bf16.mxu1 %vm483_vm1, %v7235_v23 }
  0x9d   :  { %1004 = vmatmul.mubr.bf16.gmra.mrb[60].mxu0 %v7237_v24 }
  0x9e   :  { %1366 = vmatprep.mubr.bf16.mxu0 %v7241_v25 }
  0x9f   :  { %1101 = vmatmul.mubr.bf16.gmra.mrb[60].mxu1 %v7238_v26 }
  0xa0   :  { %5889 = vmatprep.mubr.msk.bf16.mxu1 %vm483_vm1, %v7244_v27 }
  0xa5   :  { %1367 = vmatmul.mubr.bf16.vlgmr.msra.gmra.mrb[64].mxu0 %v7239_v28 }
  0xa6   :  { %6922 = vmatpush3.bf16.msra.mxu0 %v7729_v32  ;;  %1374 = vmatprep.mubr.bf16.mxu0 %v7245_v29 }
  0xa7   :  { %1464 = vmatmul.mubr.bf16.vlgmr.msra.gmra.mrb[64].mxu1 %v7242_v30  ;;  %6923 = vmatprep.subr.bf16.mxu0 %v7730_v42 }
  0xa8   :  { %6986 = vmatpush3.bf16.msra.mxu1 %v7731_v43  ;;  %5890 = vmatprep.mubr.msk.bf16.mxu1 %vm483_vm1, %v7247_v31 }
  0xa9   :  { %6987 = vmatprep.subr.bf16.mxu1 %v7732_v46 }
  0xaa   :  { %6924 = vmatpush3.bf16.msra.mxu0 %v7733_v47 }
  0xab   :  { %6925 = vmatprep.subr.bf16.mxu0 %v7734_v49 }
  0xac   :  { %6988 = vmatpush3.bf16.msra.mxu1 %v7735_v50 }
  0xad   :  { %1375 = vmatmul.mubr.bf16.gmra.mrb[68].mxu0 %v7249_v33  ;;  %6989 = vmatprep.subr.bf16.mxu1 %v7736_v51 }
  0xae   :  { %1382 = vmatprep.mubr.bf16.mxu0 %v7251_v44  ;;  %6926 = vmatpush3.bf16.msra.mxu0 %v7737_v52 }
  0xaf   :  { %1472 = vmatmul.mubr.bf16.gmra.mrb[68].mxu1 %v7250_v45  ;;  %6927 = vmatprep.subr.bf16.mxu0 %v7738_v54 }
  0xb0   :  { %5891 = vmatprep.mubr.msk.bf16.mxu1 %vm483_vm1, %v7253_v48  ;;  %6990 = vmatpush3.bf16.msra.mxu1 %v7739_v55 }
  0xb1   :  { %6991 = vmatprep.subr.bf16.mxu1 %v7740_v58 }
  0xb2   :  { %6928 = vmatpush3.bf16.msra.mxu0 %v7741_v60 }
  0xb3   :  { %6929 = vmatprep.subr.bf16.mxu0 %v7742_v61 }
  0xb4   :  { %6992 = vmatpush3.bf16.msra.mxu1 %v7743_v62 }
  0xb5   :  { %1383 = vmatmul.mubr.bf16.gmra.mrb[72].mxu0 %v7255_v53  ;;  %6993 = vmatprep.subr.bf16.mxu1 %v7744_v63 }
  0xb6   :  { %1390 = vmatprep.mubr.bf16.mxu0 %v7257_v56  ;;  %6930 = vmatpush3.bf16.msra.mxu0 %v7745_v0 }
  0xb7   :  { %1480 = vmatmul.mubr.bf16.gmra.mrb[72].mxu1 %v7256_v57  ;;  %6931 = vmatprep.subr.bf16.mxu0 %v7746_v34 }
  0xb8   :  { %5892 = vmatprep.mubr.msk.bf16.mxu1 %vm483_vm1, %v7259_v59  ;;  %6994 = vmatpush3.bf16.msra.mxu1 %v7747_v36 }
  0xb9   :  { %6995 = vmatprep.subr.bf16.mxu1 %v7748_v38 }
  0xba   :  { %6932 = vmatpush3.bf16.msra.mxu0 %v7749_v40 }
  0xbb   :  { %6933 = vmatprep.subr.bf16.mxu0 %v7750_v41 }
  0xbc   :  { %6996 = vmatpush3.bf16.msra.mxu1 %v7751_v4 }
  0xbd   :  { %1391 = vmatmul.mubr.bf16.gmra.mrb[76].mxu0 %v7261_v1  ;;  %6997 = vmatprep.subr.bf16.mxu1 %v7752_v6 }
  0xbe   :  { %1398 = vmatprep.mubr.bf16.mxu0 %v7263_v35  ;;  %6934 = vmatpush3.bf16.msra.mxu0 %v7753_v5 }
  0xbf   :  { %1488 = vmatmul.mubr.bf16.gmra.mrb[76].mxu1 %v7262_v37  ;;  %6935 = vmatprep.subr.bf16.mxu0 %v7754_v8 }
  0xc0   :  { %5893 = vmatprep.mubr.msk.bf16.mxu1 %vm483_vm1, %v7265_v39  ;;  %6998 = vmatpush3.bf16.msra.mxu1 %v7755_v10 }
  0xc1   :  { %7103 = vmatprep.subr.msk.bf16.mxu1 %vm508_vm0, %v7756_v12 }
  0xc2   :  { %6936 = vmatpush3.bf16.msra.mxu0 %v7757_v14 }
  0xc4   :  { %7000 = vmatpush3.bf16.msra.mxu1 %v7758_v15 }
  0xc5   :  { %1399 = vmatmul.mubr.bf16.gmra.mrb[80].mxu0 %v7267_v7 }
  0xc6   :  { %1406 = vmatprep.mubr.bf16.mxu0 %v7269_v9 }
  0xc7   :  { %1496 = vmatmul.mubr.bf16.gmra.mrb[80].mxu1 %v7268_v11 }
  0xc8   :  { %5894 = vmatprep.mubr.msk.bf16.mxu1 %vm483_vm1, %v7271_v13 }
  0xc9   :  { %23 = vsyncpa [#allocation7], 0  ;;  %v7279_v19 = vld [vmem:[%s9882_s0 + $0x2c0] ss:$16 sps:$4 sm:$0xff]   ;;  %v7281_v3 = vld [vmem:[%s9882_s0 + $0x2e4] ss:$16 sps:$4 sm:$0xff]  }
  0xca   :  { %v7280_v20 = vld [vmem:[%s9882_s0 + $0x2c8] ss:$16 sps:$4 sm:$0xff]   ;;  %v7283_v21 = vld [vmem:[%s9882_s0 + $0x2ec] ss:$16 sps:$4 sm:$0xff]   ;;  %v7285_v22 = vld [vmem:[%s9882_s0 + $0x2e0] ss:$16 sps:$4 sm:$0xff]  }
  0xcb   :  { %v7289_v23 = vld [vmem:[%s9882_s0 + $0x304] ss:$16 sps:$4 sm:$0xff]   ;;  %v7286_v24 = vld [vmem:[%s9882_s0 + $0x2e8] ss:$16 sps:$4 sm:$0xff]   ;;  %v7292_v25 = vld [vmem:[%s9882_s0 + $0x30c] ss:$16 sps:$4 sm:$0xff]  }
  0xcc   :  { %v7287_v26 = vld [vmem:[%s9882_s0 + $0x300] ss:$16 sps:$4 sm:$0xff]   ;;  %v7293_v27 = vld [vmem:[%s9882_s0 + $0x324] ss:$16 sps:$4 sm:$0xff]   ;;  %v7290_v28 = vld [vmem:[%s9882_s0 + $0x308] ss:$16 sps:$4 sm:$0xff]  }
  0xcd   :  { %1407 = vmatmul.mubr.bf16.gmra.mrb[84].mxu0 %v7273_v16  ;;  %v7295_v29 = vld [vmem:[%s9882_s0 + $0x32c] ss:$16 sps:$4 sm:$0xff]   ;;  %v7297_v30 = vld [vmem:[%s9882_s0 + $0x320] ss:$16 sps:$4 sm:$0xff]   ;;  %v7299_v31 = vld [vmem:[%s9882_s0 + $0x344] ss:$16 sps:$4 sm:$0xff]  }
  0xce   :  { %1414 = vmatprep.mubr.bf16.mxu0 %v7275_v17  ;;  %v7298_v32 = vld [vmem:[%s9882_s0 + $0x328] ss:$16 sps:$4 sm:$0xff]   ;;  %v7301_v33 = vld [vmem:[%s9882_s0 + $0x34c] ss:$16 sps:$4 sm:$0xff]   ;;  %v7303_v42 = vld [vmem:[%s9882_s0 + $0x340] ss:$16 sps:$4 sm:$0xff]  }
  0xcf   :  { %1504 = vmatmul.mubr.bf16.gmra.mrb[84].mxu1 %v7274_v18  ;;  %v7305_v43 = vld [vmem:[%s9882_s0 + $0x364] ss:$16 sps:$4 sm:$0xff]   ;;  %v7304_v44 = vld [vmem:[%s9882_s0 + $0x348] ss:$16 sps:$4 sm:$0xff]   ;;  %v7307_v45 = vld [vmem:[%s9882_s0 + $0x36c] ss:$16 sps:$4 sm:$0xff]  }
  0xd0   :  { %5895 = vmatprep.mubr.msk.bf16.mxu1 %vm483_vm1, %v7277_v2  ;;  %v7309_v48 = vld [vmem:[%s9882_s0 + $0x360] ss:$16 sps:$4 sm:$0xff]   ;;  %v7311_v52 = vld [vmem:[%s9882_s0 + $0x384] ss:$16 sps:$4 sm:$0xff]   ;;  %v7310_v55 = vld [vmem:[%s9882_s0 + $0x368] ss:$16 sps:$4 sm:$0xff]  }
  0xd1   :  { %v7313_v59 = vld [vmem:[%s9882_s0 + $0x38c] ss:$16 sps:$4 sm:$0xff]   ;;  %v7315_v34 = vld [vmem:[%s9882_s0 + $0x380] ss:$16 sps:$4 sm:$0xff]   ;;  %v7317_v38 = vld [vmem:[%s9882_s0 + $0x3a4] ss:$16 sps:$4 sm:$0xff]  }
  0xd2   :  { %v7316_v41 = vld [vmem:[%s9882_s0 + $0x388] ss:$16 sps:$4 sm:$0xff]   ;;  %v7319_v7 = vld [vmem:[%s9882_s0 + $0x3ac] ss:$16 sps:$4 sm:$0xff]   ;;  %v7321_v14 = vld [vmem:[%s9882_s0 + $0x3a0] ss:$16 sps:$4 sm:$0xff]  }
  0xd3   :  { %v7323_v18 = vld [vmem:[%s9882_s0 + $0x3c4] ss:$16 sps:$4 sm:$0xff]   ;;  %vm2107_vm2 = vcmask 1040384   ;;  %vm2103_vm3 = vcmask 408576   ;;  %vm7809_vm4 = vmmov 0   ;;  %vm5448_vm5 = vcmask 57344  }
  0xd4   :  { %vm5460_vm6 = vcmask 64512   ;;  %vm5637_vm7 = vcmask 942080  }
  0xd5   :  { %1415 = vmatmul.mubr.bf16.gmra.mrb[88].mxu0 %v7279_v19 }
  0xd6   :  { %1422 = vmatprep.mubr.bf16.mxu0 %v7281_v3  ;;  %v7322_v3 = vld [vmem:[%s9882_s0 + $0x3a8] ss:$16 sps:$4 sm:$0xff]  }
  0xd7   :  { %1512 = vmatmul.mubr.bf16.gmra.mrb[88].mxu1 %v7280_v20 }
  0xd8   :  { %5896 = vmatprep.mubr.msk.bf16.mxu1 %vm483_vm1, %v7283_v21 }
  0xdd   :  { %1423 = vmatmul.mubr.bf16.gmra.mrb[92].mxu0 %v7285_v22 }
  0xde   :  { %1785 = vmatprep.mubr.bf16.mxu0 %v7289_v23  ;;  %v7325_v23 = vld [vmem:[%s9882_s0 + $0x3cc] ss:$16 sps:$4 sm:$0xff]  }
  0xdf   :  { %1520 = vmatmul.mubr.bf16.gmra.mrb[92].mxu1 %v7286_v24 }
  0xe0   :  { %5961 = vmatprep.mubr.msk.bf16.mxu1 %vm483_vm1, %v7292_v25 }
  0xe5   :  { %1786 = vmatmul.mubr.bf16.vlgmr.msra.gmra.mrb[96].mxu0 %v7287_v26 }
  0xe6   :  { %1793 = vmatprep.mubr.bf16.mxu0 %v7293_v27 }
  0xe7   :  { %1883 = vmatmul.mubr.bf16.vlgmr.msra.gmra.mrb[96].mxu1 %v7290_v28 }
  0xe8   :  { %5962 = vmatprep.mubr.msk.bf16.mxu1 %vm483_vm1, %v7295_v29 }
  0xed   :  { %1794 = vmatmul.mubr.bf16.gmra.mrb[100].mxu0 %v7297_v30  ;;  %v7327_v30 = vld [vmem:[%s9882_s0 + $0x3c0] ss:$16 sps:$4 sm:$0xff]  }
  0xee   :  { %1801 = vmatprep.mubr.bf16.mxu0 %v7299_v31  ;;  %v7329_v31 = vld [vmem:[%s9882_s0 + $0x3e4] ss:$16 sps:$4 sm:$0xff]  }
  0xef   :  { %1891 = vmatmul.mubr.bf16.gmra.mrb[100].mxu1 %v7298_v32 }
  0xf0   :  { %5963 = vmatprep.mubr.msk.bf16.mxu1 %vm483_vm1, %v7301_v33 }
  0xf5   :  { %1802 = vmatmul.mubr.bf16.gmra.mrb[104].mxu0 %v7303_v42 }
  0xf6   :  { %1809 = vmatprep.mubr.bf16.mxu0 %v7305_v43  ;;  %v7335_v43 = vld [vmem:[%s9885_s3 + $0x70] ss:$16 sps:$4 sm:$0xff]  }
  0xf7   :  { %1899 = vmatmul.mubr.bf16.gmra.mrb[104].mxu1 %v7304_v44  ;;  %v7337_v44 = vld [vmem:[%s9885_s3 + $0x74] ss:$16 sps:$4 sm:$0xff]  }
  0xf8   :  { %v6553_v46 = vpop.f32.mrb[0].mxu0  ;;  %5964 = vmatprep.mubr.msk.bf16.mxu1 %vm483_vm1, %v7307_v45  ;;  %2120 = vmatprep.subr.bf16.mxu0 %v7337_v44 }
  0xf9   :  { %v6554_v47 = vpop.f32.mrb[1].mxu0  ;;  %v6617_v49 = vpop.f32.mrb[0].mxu1  ;;  %2121 = vmatpush1.bf16.msra.mxu0 %v7335_v43 }
  0xfa   :  { %v6555_v50 = vadd.f32 %v6554_v47, %v6553_v46  ;;  %v6556_v51 = vpop.f32.mrb[2].mxu0  ;;  %v6618_v53 = vpop.f32.mrb[1].mxu1  ;;  %v7328_v47 = vld [vmem:[%s9882_s0 + $0x3c8] ss:$16 sps:$4 sm:$0xff]  }
  0xfb   :  { %v6557_v54 = vpop.f32.mrb[3].mxu0  ;;  %v6619_v56 = vadd.f32 %v6618_v53, %v6617_v49  ;;  %v6620_v57 = vpop.f32.mrb[2].mxu1  ;;  %v7338_v53 = vld [vmem:[%s9885_s3 + $0x78] ss:$16 sps:$4 sm:$0xff]  }
  0xfc   :  { %v6558_v58 = vadd.f32 %v6557_v54, %v6556_v51  ;;  %v6621_v60 = vpop.f32.mrb[3].mxu1 }
  0xfd   :  { %1810 = vmatmul.mubr.bf16.gmra.mrb[108].mxu0 %v7309_v48  ;;  %v8605_v61 = vadd.f32 %v6619_v56, %v6555_v50  ;;  %v6622_v62 = vadd.f32 %v6621_v60, %v6620_v57  ;;  %v7340_v48 = vld [vmem:[%s9885_s3 + $0x7c] ss:$16 sps:$4 sm:$0xff]   ;;  %v7333_v60 = vld [vmem:[%s9882_s0 + $0x3e0] ss:$16 sps:$4 sm:$0xff]  }
  0xfe   :  { %1817 = vmatprep.mubr.bf16.mxu0 %v7311_v52  ;;  %v7331_v52 = vld [vmem:[%s9882_s0 + $0x3ec] ss:$16 sps:$4 sm:$0xff]   ;;  %2161 = vmatprep.subr.bf16.mxu1 %v7340_v48 }
  0xff   :  { %1907 = vmatmul.mubr.bf16.gmra.mrb[108].mxu1 %v7310_v55  ;;  %v8607_v63 = vadd.f32 %v6622_v62, %v6558_v58 }
 0x100   :  { %v6559_v0 = vpop.f32.mrb[4].mxu0  ;;  %5965 = vmatprep.mubr.msk.bf16.mxu1 %vm483_vm1, %v7313_v59  ;;  %2162 = vmatpush1.bf16.msra.mxu1 %v7338_v53  ;;  %v7347_v53 = vld [vmem:[%s9885_s3 + $0xb0] ss:$16 sps:$4 sm:$0xff]  }
 0x101   :  { %v6560_v1 = vpop.f32.mrb[5].mxu0 }
 0x102   :  { %v6623_v35 = vpop.f32.mrb[4].mxu1  ;;  %v6561_v36 = vadd.f32 %v6560_v1, %v6559_v0  ;;  %v6562_v37 = vpop.f32.mrb[6].mxu0 }
 0x103   :  { %v6624_v39 = vpop.f32.mrb[5].mxu1  ;;  %v6563_v40 = vpop.f32.mrb[7].mxu0 }
 0x104   :  { %v6625_v4 = vadd.f32 %v6624_v39, %v6623_v35  ;;  %v6626_v6 = vpop.f32.mrb[6].mxu1  ;;  %v6564_v5 = vadd.f32 %v6563_v40, %v6562_v37 }
 0x105   :  { %v6627_v8 = vpop.f32.mrb[7].mxu1  ;;  %1818 = vmatmul.mubr.bf16.gmra.mrb[112].mxu0 %v7315_v34 }
 0x106   :  { %v8622_v9 = vadd.f32 %v6625_v4, %v6561_v36  ;;  %v6628_v10 = vadd.f32 %v6627_v8, %v6626_v6  ;;  %1825 = vmatprep.mubr.bf16.mxu0 %v7317_v38  ;;  %v7334_v36 = vld [vmem:[%s9882_s0 + $0x3e8] ss:$16 sps:$4 sm:$0xff]  }
 0x107   :  { %1915 = vmatmul.mubr.bf16.gmra.mrb[112].mxu1 %v7316_v41 }
 0x108   :  { %v8624_v11 = vadd.f32 %v6628_v10, %v6564_v5  ;;  %v6565_v12 = vpop.f32.mrb[8].mxu0  ;;  %5966 = vmatprep.mubr.msk.bf16.mxu1 %vm483_vm1, %v7319_v7 }
 0x109   :  { %v6566_v13 = vpop.f32.mrb[9].mxu0 }
 0x10a   :  { %v6629_v15 = vpop.f32.mrb[8].mxu1  ;;  %v6567_v16 = vadd.f32 %v6566_v13, %v6565_v12  ;;  %v6568_v17 = vpop.f32.mrb[10].mxu0  ;;  %v7341_v13 = vld [vmem:[%s9885_s3 + $0x90] ss:$16 sps:$4 sm:$0xff]  }
 0x10b   :  { %v6630_v2 = vpop.f32.mrb[9].mxu1  ;;  %v6569_v19 = vpop.f32.mrb[11].mxu0 }
 0x10c   :  { %v6631_v20 = vadd.f32 %v6630_v2, %v6629_v15  ;;  %v6632_v21 = vpop.f32.mrb[10].mxu1  ;;  %v6570_v22 = vadd.f32 %v6569_v19, %v6568_v17  ;;  %v7344_v17 = vld [vmem:[%s9885_s3 + $0x98] ss:$16 sps:$4 sm:$0xff]  }
 0x10d   :  { %v6633_v24 = vpop.f32.mrb[11].mxu1  ;;  %1826 = vmatmul.mubr.bf16.gmra.mrb[116].mxu0 %v7321_v14  ;;  %v7343_v14 = vld [vmem:[%s9885_s3 + $0x94] ss:$16 sps:$4 sm:$0xff]  }
 0x10e   :  { %v8639_v25 = vadd.f32 %v6631_v20, %v6567_v16  ;;  %v6634_v26 = vadd.f32 %v6633_v24, %v6632_v21  ;;  %1833 = vmatprep.mubr.bf16.mxu0 %v7323_v18  ;;  %v7346_v18 = vld [vmem:[%s9885_s3 + $0x9c] ss:$16 sps:$4 sm:$0xff]   ;;  %2122 = vmatprep.subr.bf16.mxu0 %v7343_v14 }
 0x10f   :  { %1923 = vmatmul.mubr.bf16.gmra.mrb[116].mxu1 %v7322_v3  ;;  %2123 = vmatpush1.bf16.msra.mxu0 %v7341_v13 }
 0x110   :  { %v8641_v27 = vadd.f32 %v6634_v26, %v6570_v22  ;;  %v6571_v28 = vpop.f32.mrb[12].mxu0  ;;  %5967 = vmatprep.mubr.msk.bf16.mxu1 %vm483_vm1, %v7325_v23  ;;  %2163 = vmatprep.subr.bf16.mxu1 %v7346_v18 }
 0x111   :  { %v6572_v29 = vpop.f32.mrb[13].mxu0  ;;  %2164 = vmatpush1.bf16.msra.mxu1 %v7344_v17 }
 0x112   :  { %v6635_v32 = vpop.f32.mrb[12].mxu1  ;;  %v6573_v33 = vadd.f32 %v6572_v29, %v6571_v28  ;;  %v6574_v42 = vpop.f32.mrb[14].mxu0 }
 0x113   :  { %v6636_v45 = vpop.f32.mrb[13].mxu1  ;;  %v6575_v46 = vpop.f32.mrb[15].mxu0 }
 0x114   :  { %v6637_v49 = vadd.f32 %v6636_v45, %v6635_v32  ;;  %v6638_v50 = vpop.f32.mrb[14].mxu1  ;;  %v6576_v51 = vadd.f32 %v6575_v46, %v6574_v42 }
 0x115   :  { %v6639_v54 = vpop.f32.mrb[15].mxu1  ;;  %1834 = vmatmul.mubr.bf16.gmra.mrb[120].mxu0 %v7327_v30 }
 0x116   :  { %v8668_v55 = vadd.f32 %v6637_v49, %v6573_v33  ;;  %v6640_v56 = vadd.f32 %v6639_v54, %v6638_v50  ;;  %1841 = vmatprep.mubr.bf16.mxu0 %v7329_v31  ;;  %v7349_v54 = vld [vmem:[%s9885_s3 + $0xb4] ss:$16 sps:$4 sm:$0xff]  }
 0x117   :  { %1931 = vmatmul.mubr.bf16.gmra.mrb[120].mxu1 %v7328_v47  ;;  %2124 = vmatprep.subr.bf16.mxu0 %v7349_v54  ;;  %v7362_v54 = vld [vmem:[%s9885_s3 + $0xc] ss:$16 sps:$4 sm:$0xff]  }
 0x118   :  { %v8670_v57 = vadd.f32 %v6640_v56, %v6576_v51  ;;  %v6577_v58 = vpop.f32.mrb[16].mxu0  ;;  %5968 = vmatprep.mubr.msk.bf16.mxu1 %vm483_vm1, %v7331_v52  ;;  %2125 = vmatpush1.bf16.msra.mxu0 %v7347_v53  ;;  %v7359_v53 = vld [vmem:[%s9885_s3 + $0x4] ss:$16 sps:$4 sm:$0xff]  }
 0x119   :  { %v6578_v59 = vpop.f32.mrb[17].mxu0 }
 0x11a   :  { %v6641_v62 = vpop.f32.mrb[16].mxu1  ;;  %v6579_v0 = vadd.f32 %v6578_v59, %v6577_v58  ;;  %v6580_v1 = vpop.f32.mrb[18].mxu0  ;;  %v7350_v59 = vld [vmem:[%s9885_s3 + $0xb8] ss:$16 sps:$4 sm:$0xff]  }
 0x11b   :  { %v6642_v34 = vpop.f32.mrb[17].mxu1  ;;  %v6581_v35 = vpop.f32.mrb[19].mxu0 }
 0x11c   :  { %v6643_v37 = vadd.f32 %v6642_v34, %v6641_v62  ;;  %v6644_v38 = vpop.f32.mrb[18].mxu1  ;;  %v6582_v39 = vadd.f32 %v6581_v35, %v6580_v1 }
 0x11d   :  { %v6645_v40 = vpop.f32.mrb[19].mxu1  ;;  %1842 = vmatmul.mubr.bf16.gmra.mrb[124].mxu0 %v7333_v60  ;;  %v7352_v60 = vld [vmem:[%s9885_s3 + $0xbc] ss:$16 sps:$4 sm:$0xff]  }
 0x11e   :  { %v8679_v41 = vadd.f32 %v6643_v37, %v6579_v0  ;;  %v6646_v4 = vadd.f32 %v6645_v40, %v6644_v38  ;;  %2165 = vmatprep.subr.bf16.mxu1 %v7352_v60 }
 0x11f   :  { %1939 = vmatmul.mubr.bf16.gmra.mrb[124].mxu1 %v7334_v36 }
 0x120   :  { %v8681_v6 = vadd.f32 %v6646_v4, %v6582_v39  ;;  %v6583_v5 = vpop.f32.mrb[20].mxu0  ;;  %2166 = vmatpush1.bf16.msra.mxu1 %v7350_v59 }
 0x121   :  { %v6584_v7 = vpop.f32.mrb[21].mxu0 }
 0x122   :  { %v6647_v8 = vpop.f32.mrb[20].mxu1  ;;  %v6585_v10 = vadd.f32 %v6584_v7, %v6583_v5  ;;  %v6586_v12 = vpop.f32.mrb[22].mxu0 }
 0x123   :  { %v6648_v15 = vpop.f32.mrb[21].mxu1  ;;  %v6587_v16 = vpop.f32.mrb[23].mxu0 }
 0x124   :  { %v6649_v2 = vadd.f32 %v6648_v15, %v6647_v8  ;;  %v6650_v19 = vpop.f32.mrb[22].mxu1  ;;  %v6588_v3 = vadd.f32 %v6587_v16, %v6586_v12 }
 0x125   :  { %v6651_v20 = vpop.f32.mrb[23].mxu1 }
 0x126   :  { %v8695_v21 = vadd.f32 %v6649_v2, %v6585_v10  ;;  %v6652_v22 = vadd.f32 %v6651_v20, %v6650_v19 }
 0x128   :  { %v8697_v23 = vadd.f32 %v6652_v22, %v6588_v3  ;;  %v6589_v24 = vpop.f32.mrb[24].mxu0 }
 0x129   :  { %v6590_v26 = vpop.f32.mrb[25].mxu0 }
 0x12a   :  { %v6653_v28 = vpop.f32.mrb[24].mxu1  ;;  %v6591_v29 = vadd.f32 %v6590_v26, %v6589_v24  ;;  %v6592_v30 = vpop.f32.mrb[26].mxu0  ;;  %v5982_v26 = vld [vmem:[%s9885_s3 + $0xd0] sm:$0x11] }
 0x12b   :  { %v6654_v31 = vpop.f32.mrb[25].mxu1  ;;  %v6593_v32 = vpop.f32.mrb[27].mxu0 }
 0x12c   :  { %v6655_v33 = vadd.f32 %v6654_v31, %v6653_v28  ;;  %v6656_v42 = vpop.f32.mrb[26].mxu1  ;;  %v6594_v43 = vadd.f32 %v6593_v32, %v6592_v30  ;;  %v5983_v28 = vld [vmem:[%s9885_s3 + $0xd8] sm:$0x11]  ;;  %v5997_v31 = vcombine.high %v5982_v26, %v5982_v26  ;;  %v5996_v32 = vcombine.low %v5982_v26, %v5982_v26 }
 0x12d   :  { %v6657_v44 = vpop.f32.mrb[27].mxu1 }
 0x12e   :  { %v8699_v45 = vadd.f32 %v6655_v33, %v6591_v29  ;;  %v6658_v46 = vadd.f32 %v6657_v44, %v6656_v42  ;;  %v5999_v33 = vcombine.high %v5983_v28, %v5983_v28  ;;  %v5998_v42 = vcombine.low %v5983_v28, %v5983_v28  ;;  %6000 = vmatprep.subr.msk.bf16.mxu0 %vm2107_vm2, %v5997_v31 }
 0x130   :  { %v8701_v47 = vadd.f32 %v6658_v46, %v6594_v43  ;;  %v6595_v48 = vpop.f32.mrb[28].mxu0  ;;  %6002 = vmatprep.subr.msk.bf16.mxu1 %vm2107_vm2, %v5999_v33 }
 0x131   :  { %v6596_v49 = vpop.f32.mrb[29].mxu0 }
 0x132   :  { %v6659_v50 = vpop.f32.mrb[28].mxu1  ;;  %v6597_v51 = vadd.f32 %v6596_v49, %v6595_v48  ;;  %v6598_v52 = vpop.f32.mrb[30].mxu0  ;;  %v2109_v49 = vsel %vm2107_vm2, %v5996_v32, 0 }
 0x133   :  { %v6660_v56 = vpop.f32.mrb[29].mxu1  ;;  %v6599_v58 = vpop.f32.mrb[31].mxu0  ;;  %2127 = vmatpush1.bf16.msra.mxu0 %v2109_v49 }
 0x134   :  { %v6661_v62 = vadd.f32 %v6660_v56, %v6659_v50  ;;  %v6662_v0 = vpop.f32.mrb[30].mxu1  ;;  %v6600_v1 = vadd.f32 %v6599_v58, %v6598_v52  ;;  %v2115_v50 = vsel %vm2107_vm2, %v5998_v42, 0  ;;  %2287 = vmatprep.subr.bf16.mxu0 %v7359_v53 }
 0x135   :  { %v6663_v34 = vpop.f32.mrb[31].mxu1  ;;  %2168 = vmatpush1.bf16.msra.mxu1 %v2115_v50 }
 0x136   :  { %v8715_v35 = vadd.f32 %v6661_v62, %v6597_v51  ;;  %v6664_v36 = vadd.f32 %v6663_v34, %v6662_v0  ;;  %v9895_v62 = vmov 0   ;;  %2328 = vmatprep.subr.bf16.mxu1 %v7362_v54 }
 0x137   :  { %2152 = vmatprep.mubr.bf16.mxu0 %v9895_v62  ;;  %2193 = vmatprep.mubr.bf16.mxu1 %v9895_v62 }
 0x138   :  { %v8717_v37 = vadd.f32 %v6664_v36, %v6600_v1  ;;  %v6681_v38 = vpop.f32.mrb[32].mxu0  ;;  %7110 = vset.pattern.permute.xlu0 %v9895_v62 }
 0x139   :  { %v6682_v39 = vpop.f32.mrb[33].mxu0 }
 0x13a   :  { %v6745_v40 = vpop.f32.mrb[32].mxu1  ;;  %v6683_v4 = vadd.f32 %v6682_v39, %v6681_v38  ;;  %v6684_v5 = vpop.f32.mrb[34].mxu0 }
 0x13b   :  { %v6746_v7 = vpop.f32.mrb[33].mxu1  ;;  %v6685_v8 = vpop.f32.mrb[35].mxu0 }
 0x13c   :  { %v6747_v10 = vadd.f32 %v6746_v7, %v6745_v40  ;;  %v6748_v12 = vpop.f32.mrb[34].mxu1  ;;  %v6686_v13 = vadd.f32 %v6685_v8, %v6684_v5 }
 0x13d   :  { %v6749_v14 = vpop.f32.mrb[35].mxu1 }
 0x13e   :  { %v8719_v15 = vadd.f32 %v6747_v10, %v6683_v4  ;;  %v6750_v16 = vadd.f32 %v6749_v14, %v6748_v12 }
 0x140   :  { %v1109_v17 = vmax.f32 %v8605_v61, %v8719_v15  ;;  %v8723_v18 = vadd.f32 %v6750_v16, %v6686_v13  ;;  %v6687_v2 = vpop.f32.mrb[36].mxu0 }
 0x141   :  { %v6688_v19 = vpop.f32.mrb[37].mxu0 }
 0x142   :  { %v1110_v3 = vmax.f32 %v8607_v63, %v8723_v18  ;;  %v6751_v20 = vpop.f32.mrb[36].mxu1  ;;  %v6689_v22 = vadd.f32 %v6688_v19, %v6687_v2  ;;  %v6690_v24 = vpop.f32.mrb[38].mxu0 }
 0x143   :  { %v6752_v29 = vpop.f32.mrb[37].mxu1  ;;  %v6691_v30 = vpop.f32.mrb[39].mxu0 }
 0x144   :  { %v6753_v43 = vadd.f32 %v6752_v29, %v6751_v20  ;;  %v6754_v44 = vpop.f32.mrb[38].mxu1  ;;  %v6692_v46 = vadd.f32 %v6691_v30, %v6690_v24 }
 0x145   :  { %v6755_v48 = vpop.f32.mrb[39].mxu1 }
 0x146   :  { %v8737_v51 = vadd.f32 %v6753_v43, %v6689_v22  ;;  %v6756_v52 = vadd.f32 %v6755_v48, %v6754_v44 }
 0x148   :  { %v1111_v56 = vmax.f32 %v8622_v9, %v8737_v51  ;;  %v8747_v58 = vadd.f32 %v6756_v52, %v6692_v46  ;;  %v6693_v59 = vpop.f32.mrb[40].mxu0 }
 0x149   :  { %v6694_v60 = vpop.f32.mrb[41].mxu0 }
 0x14a   :  { %v1112_v0 = vmax.f32 %v8624_v11, %v8747_v58  ;;  %v6757_v1 = vpop.f32.mrb[40].mxu1  ;;  %v6695_v34 = vadd.f32 %v6694_v60, %v6693_v59  ;;  %v6696_v36 = vpop.f32.mrb[42].mxu0 }
 0x14b   :  { %v6758_v38 = vpop.f32.mrb[41].mxu1  ;;  %v6697_v39 = vpop.f32.mrb[43].mxu0 }
 0x14c   :  { %v6759_v40 = vadd.f32 %v6758_v38, %v6757_v1  ;;  %v6760_v4 = vpop.f32.mrb[42].mxu1  ;;  %v6698_v5 = vadd.f32 %v6697_v39, %v6696_v36 }
 0x14d   :  { %v6761_v7 = vpop.f32.mrb[43].mxu1 }
 0x14e   :  { %v8754_v8 = vadd.f32 %v6759_v40, %v6695_v34  ;;  %v6762_v10 = vadd.f32 %v6761_v7, %v6760_v4 }
 0x150   :  { %v1113_v12 = vmax.f32 %v8639_v25, %v8754_v8  ;;  %v8758_v13 = vadd.f32 %v6762_v10, %v6698_v5  ;;  %v6699_v14 = vpop.f32.mrb[44].mxu0 }
 0x151   :  { %v6700_v16 = vpop.f32.mrb[45].mxu0 }
 0x152   :  { %v1114_v2 = vmax.f32 %v8641_v27, %v8758_v13  ;;  %v6763_v19 = vpop.f32.mrb[44].mxu1  ;;  %v6701_v20 = vadd.f32 %v6700_v16, %v6699_v14  ;;  %v6702_v22 = vpop.f32.mrb[46].mxu0 }
 0x153   :  { %v6764_v24 = vpop.f32.mrb[45].mxu1  ;;  %v6703_v26 = vpop.f32.mrb[47].mxu0 }
 0x154   :  { %v6765_v28 = vadd.f32 %v6764_v24, %v6763_v19  ;;  %v6766_v29 = vpop.f32.mrb[46].mxu1  ;;  %v6704_v30 = vadd.f32 %v6703_v26, %v6702_v22 }
 0x155   :  { %v6767_v31 = vpop.f32.mrb[47].mxu1 }
 0x156   :  { %v8762_v32 = vadd.f32 %v6765_v28, %v6701_v20  ;;  %v6768_v33 = vadd.f32 %v6767_v31, %v6766_v29 }
 0x158   :  { %v1115_v42 = vmax.f32 %v8668_v55, %v8762_v32  ;;  %v8766_v43 = vadd.f32 %v6768_v33, %v6704_v30  ;;  %v6705_v44 = vpop.f32.mrb[48].mxu0 }
 0x159   :  { %v6706_v46 = vpop.f32.mrb[49].mxu0 }
 0x15a   :  { %v1116_v48 = vmax.f32 %v8670_v57, %v8766_v43  ;;  %v6769_v49 = vpop.f32.mrb[48].mxu1  ;;  %v6707_v50 = vadd.f32 %v6706_v46, %v6705_v44  ;;  %v6708_v52 = vpop.f32.mrb[50].mxu0 }
 0x15b   :  { %v6770_v53 = vpop.f32.mrb[49].mxu1  ;;  %v6709_v54 = vpop.f32.mrb[51].mxu0 }
 0x15c   :  { %v6771_v59 = vadd.f32 %v6770_v53, %v6769_v49  ;;  %v6772_v60 = vpop.f32.mrb[50].mxu1  ;;  %v6710_v1 = vadd.f32 %v6709_v54, %v6708_v52 }
 0x15d   :  { %v6773_v34 = vpop.f32.mrb[51].mxu1 }
 0x15e   :  { %v8770_v36 = vadd.f32 %v6771_v59, %v6707_v50  ;;  %v6774_v38 = vadd.f32 %v6773_v34, %v6772_v60 }
 0x160   :  { %v1117_v39 = vmax.f32 %v8679_v41, %v8770_v36  ;;  %v8774_v40 = vadd.f32 %v6774_v38, %v6710_v1  ;;  %v6711_v4 = vpop.f32.mrb[52].mxu0 }
 0x161   :  { %v6712_v5 = vpop.f32.mrb[53].mxu0 }
 0x162   :  { %v1118_v7 = vmax.f32 %v8681_v6, %v8774_v40  ;;  %v6775_v10 = vpop.f32.mrb[52].mxu1  ;;  %v6713_v14 = vadd.f32 %v6712_v5, %v6711_v4  ;;  %v6714_v16 = vpop.f32.mrb[54].mxu0 }
 0x163   :  { %v6776_v19 = vpop.f32.mrb[53].mxu1  ;;  %v6715_v20 = vpop.f32.mrb[55].mxu0 }
 0x164   :  { %v6777_v22 = vadd.f32 %v6776_v19, %v6775_v10  ;;  %v6778_v24 = vpop.f32.mrb[54].mxu1  ;;  %v6716_v26 = vadd.f32 %v6715_v20, %v6714_v16 }
 0x165   :  { %v6779_v28 = vpop.f32.mrb[55].mxu1 }
 0x166   :  { %v8778_v29 = vadd.f32 %v6777_v22, %v6713_v14  ;;  %v6780_v30 = vadd.f32 %v6779_v28, %v6778_v24 }
 0x168   :  { %v1119_v31 = vmax.f32 %v8695_v21, %v8778_v29  ;;  %v8782_v33 = vadd.f32 %v6780_v30, %v6716_v26  ;;  %v6717_v44 = vpop.f32.mrb[56].mxu0 }
 0x169   :  { %v6718_v46 = vpop.f32.mrb[57].mxu0 }
 0x16a   :  { %v1120_v49 = vmax.f32 %v8697_v23, %v8782_v33  ;;  %v6781_v50 = vpop.f32.mrb[56].mxu1  ;;  %v6719_v52 = vadd.f32 %v6718_v46, %v6717_v44  ;;  %v6720_v53 = vpop.f32.mrb[58].mxu0 }
 0x16b   :  { %v6782_v54 = vpop.f32.mrb[57].mxu1  ;;  %v6721_v59 = vpop.f32.mrb[59].mxu0 }
 0x16c   :  { %v6783_v60 = vadd.f32 %v6782_v54, %v6781_v50  ;;  %v6784_v1 = vpop.f32.mrb[58].mxu1  ;;  %v6722_v34 = vadd.f32 %v6721_v59, %v6720_v53 }
 0x16d   :  { %v6785_v38 = vpop.f32.mrb[59].mxu1 }
 0x16e   :  { %v8786_v4 = vadd.f32 %v6783_v60, %v6719_v52  ;;  %v6786_v5 = vadd.f32 %v6785_v38, %v6784_v1 }
 0x170   :  { %v1121_v10 = vmax.f32 %v8699_v45, %v8786_v4  ;;  %v8790_v14 = vadd.f32 %v6786_v5, %v6722_v34  ;;  %v6723_v16 = vpop.f32.mrb[60].mxu0 }
 0x171   :  { %v6724_v19 = vpop.f32.mrb[61].mxu0 }
 0x172   :  { %v1122_v20 = vmax.f32 %v8701_v47, %v8790_v14  ;;  %v6787_v22 = vpop.f32.mrb[60].mxu1  ;;  %v6725_v24 = vadd.f32 %v6724_v19, %v6723_v16  ;;  %v6726_v26 = vpop.f32.mrb[62].mxu0 }
 0x173   :  { %v6788_v28 = vpop.f32.mrb[61].mxu1  ;;  %v6727_v30 = vpop.f32.mrb[63].mxu0 }
 0x174   :  { %v6789_v44 = vadd.f32 %v6788_v28, %v6787_v22  ;;  %v6790_v46 = vpop.f32.mrb[62].mxu1  ;;  %v6728_v50 = vadd.f32 %v6727_v30, %v6726_v26 }
 0x175   :  { %v6791_v52 = vpop.f32.mrb[63].mxu1 }
 0x176   :  { %v8794_v53 = vadd.f32 %v6789_v44, %v6725_v24  ;;  %v6792_v54 = vadd.f32 %v6791_v52, %v6790_v46 }
 0x178   :  { %v8798_v60 = vadd.f32 %v6792_v54, %v6728_v50  ;;  %v6809_v1 = vpop.f32.mrb[64].mxu0 }
 0x179   :  { %v6810_v34 = vpop.f32.mrb[65].mxu0 }
 0x17a   :  { %v1124_v38 = vmax.f32 %v8717_v37, %v8798_v60  ;;  %v6873_v5 = vpop.f32.mrb[64].mxu1  ;;  %v6811_v16 = vadd.f32 %v6810_v34, %v6809_v1  ;;  %v6812_v19 = vpop.f32.mrb[66].mxu0 }
 0x17b   :  { %v6874_v22 = vpop.f32.mrb[65].mxu1  ;;  %v6813_v28 = vpop.f32.mrb[67].mxu0 }
 0x17c   :  { %v6875_v26 = vadd.f32 %v6874_v22, %v6873_v5  ;;  %v6876_v30 = vpop.f32.mrb[66].mxu1  ;;  %v6814_v24 = vadd.f32 %v6813_v28, %v6812_v19 }
 0x17d   :  { %v6877_v44 = vpop.f32.mrb[67].mxu1 }
 0x17e   :  { %v1466_v46 = vadd.f32 %v6875_v26, %v6811_v16  ;;  %v6878_v52 = vadd.f32 %v6877_v44, %v6876_v30 }
 0x180   :  { %v8805_v50 = vmax.f32 %v1109_v17, %v1466_v46  ;;  %v1469_v54 = vadd.f32 %v6878_v52, %v6814_v24  ;;  %v6815_v62 = vpop.f32.mrb[68].mxu0 }
 0x181   :  { %v6816_v59 = vpop.f32.mrb[69].mxu0 }
 0x182   :  { %v8810_v1 = vmax.f32 %v1110_v3, %v1469_v54  ;;  %v6879_v34 = vpop.f32.mrb[68].mxu1  ;;  %v6817_v5 = vadd.f32 %v6816_v59, %v6815_v62  ;;  %v6818_v22 = vpop.f32.mrb[70].mxu0 }
 0x183   :  { %v6880_v19 = vpop.f32.mrb[69].mxu1  ;;  %v6819_v28 = vpop.f32.mrb[71].mxu0 }
 0x184   :  { %v6881_v16 = vadd.f32 %v6880_v19, %v6879_v34  ;;  %v6882_v26 = vpop.f32.mrb[70].mxu1  ;;  %v6820_v30 = vadd.f32 %v6819_v28, %v6818_v22 }
 0x185   :  { %v6883_v44 = vpop.f32.mrb[71].mxu1 }
 0x186   :  { %v1474_v61 = vadd.f32 %v6881_v16, %v6817_v5  ;;  %v6884_v15 = vadd.f32 %v6883_v44, %v6882_v26 }
 0x188   :  { %v8815_v17 = vmax.f32 %v1111_v56, %v1474_v61  ;;  %v1477_v24 = vadd.f32 %v6884_v15, %v6820_v30  ;;  %v6821_v63 = vpop.f32.mrb[72].mxu0 }
 0x189   :  { %v6822_v18 = vpop.f32.mrb[73].mxu0 }
 0x18a   :  { %v8820_v3 = vmax.f32 %v1112_v0, %v1477_v24  ;;  %v6885_v62 = vpop.f32.mrb[72].mxu1  ;;  %v6823_v59 = vadd.f32 %v6822_v18, %v6821_v63  ;;  %v6824_v46 = vpop.f32.mrb[74].mxu0 }
 0x18b   :  { %v6886_v52 = vpop.f32.mrb[73].mxu1  ;;  %v6825_v54 = vpop.f32.mrb[75].mxu0 }
 0x18c   :  { %v6887_v34 = vadd.f32 %v6886_v52, %v6885_v62  ;;  %v6888_v5 = vpop.f32.mrb[74].mxu1  ;;  %v6826_v22 = vadd.f32 %v6825_v54, %v6824_v46 }
 0x18d   :  { %v6889_v19 = vpop.f32.mrb[75].mxu1 }
 0x18e   :  { %v1482_v9 = vadd.f32 %v6887_v34, %v6823_v59  ;;  %v6890_v51 = vadd.f32 %v6889_v19, %v6888_v5 }
 0x190   :  { %v8825_v56 = vmax.f32 %v1113_v12, %v1482_v9  ;;  %v1485_v28 = vadd.f32 %v6890_v51, %v6826_v22  ;;  %v6827_v11 = vpop.f32.mrb[76].mxu0 }
 0x191   :  { %v6828_v58 = vpop.f32.mrb[77].mxu0 }
 0x192   :  { %v8830_v0 = vmax.f32 %v1114_v2, %v1485_v28  ;;  %v6891_v16 = vpop.f32.mrb[76].mxu1  ;;  %v6829_v26 = vadd.f32 %v6828_v58, %v6827_v11  ;;  %v6830_v30 = vpop.f32.mrb[78].mxu0 }
 0x193   :  { %v6892_v44 = vpop.f32.mrb[77].mxu1  ;;  %v6831_v61 = vpop.f32.mrb[79].mxu0 }
 0x194   :  { %v6893_v15 = vadd.f32 %v6892_v44, %v6891_v16  ;;  %v6894_v24 = vpop.f32.mrb[78].mxu1  ;;  %v6832_v63 = vadd.f32 %v6831_v61, %v6830_v30 }
 0x195   :  { %v6895_v18 = vpop.f32.mrb[79].mxu1 }
 0x196   :  { %v1490_v25 = vadd.f32 %v6893_v15, %v6829_v26  ;;  %v6896_v8 = vadd.f32 %v6895_v18, %v6894_v24 }
 0x198   :  { %v8835_v12 = vmax.f32 %v1115_v42, %v1490_v25  ;;  %v1493_v62 = vadd.f32 %v6896_v8, %v6832_v63  ;;  %v6833_v27 = vpop.f32.mrb[80].mxu0 }
 0x199   :  { %v6834_v13 = vpop.f32.mrb[81].mxu0 }
 0x19a   :  { %v8840_v2 = vmax.f32 %v1116_v48, %v1493_v62  ;;  %v6897_v59 = vpop.f32.mrb[80].mxu1  ;;  %v6835_v46 = vadd.f32 %v6834_v13, %v6833_v27  ;;  %v6836_v52 = vpop.f32.mrb[82].mxu0 }
 0x19b   :  { %v6898_v54 = vpop.f32.mrb[81].mxu1  ;;  %v6837_v34 = vpop.f32.mrb[83].mxu0 }
 0x19c   :  { %v6899_v5 = vadd.f32 %v6898_v54, %v6897_v59  ;;  %v6900_v22 = vpop.f32.mrb[82].mxu1  ;;  %v6838_v19 = vadd.f32 %v6837_v34, %v6836_v52 }
 0x19d   :  { %v6901_v9 = vpop.f32.mrb[83].mxu1 }
 0x19e   :  { %v1498_v55 = vadd.f32 %v6899_v5, %v6835_v46  ;;  %v6902_v32 = vadd.f32 %v6901_v9, %v6900_v22 }
 0x1a0   :  { %v8845_v42 = vmax.f32 %v1117_v39, %v1498_v55  ;;  %v1501_v51 = vadd.f32 %v6902_v32, %v6838_v19  ;;  %v6839_v57 = vpop.f32.mrb[84].mxu0 }
 0x1a1   :  { %v6840_v43 = vpop.f32.mrb[85].mxu0 }
 0x1a2   :  { %v8850_v48 = vmax.f32 %v1118_v7, %v1501_v51  ;;  %v6903_v28 = vpop.f32.mrb[84].mxu1  ;;  %v6841_v11 = vadd.f32 %v6840_v43, %v6839_v57  ;;  %v6842_v58 = vpop.f32.mrb[86].mxu0 }
 0x1a3   :  { %v6904_v16 = vpop.f32.mrb[85].mxu1  ;;  %v6843_v26 = vpop.f32.mrb[87].mxu0 }
 0x1a4   :  { %v6905_v30 = vadd.f32 %v6904_v16, %v6903_v28  ;;  %v6906_v44 = vpop.f32.mrb[86].mxu1  ;;  %v6844_v61 = vadd.f32 %v6843_v26, %v6842_v58 }
 0x1a5   :  { %v6907_v15 = vpop.f32.mrb[87].mxu1 }
 0x1a6   :  { %v1506_v41 = vadd.f32 %v6905_v30, %v6841_v11  ;;  %v6908_v36 = vadd.f32 %v6907_v15, %v6906_v44 }
 0x1a8   :  { %v8855_v39 = vmax.f32 %v1119_v31, %v1506_v41  ;;  %v1509_v24 = vadd.f32 %v6908_v36, %v6844_v61  ;;  %v6845_v6 = vpop.f32.mrb[88].mxu0 }
 0x1a9   :  { %v6846_v40 = vpop.f32.mrb[89].mxu0 }
 0x1aa   :  { %v8860_v7 = vmax.f32 %v1120_v49, %v1509_v24  ;;  %v6909_v63 = vpop.f32.mrb[88].mxu1  ;;  %v6847_v18 = vadd.f32 %v6846_v40, %v6845_v6  ;;  %v6848_v25 = vpop.f32.mrb[90].mxu0 }
 0x1ab   :  { %v6910_v8 = vpop.f32.mrb[89].mxu1  ;;  %v6849_v62 = vpop.f32.mrb[91].mxu0 }
 0x1ac   :  { %v6911_v27 = vadd.f32 %v6910_v8, %v6909_v63  ;;  %v6912_v13 = vpop.f32.mrb[90].mxu1  ;;  %v6850_v59 = vadd.f32 %v6849_v62, %v6848_v25  ;;  %v8890_v63 = vld [vmem:[%s9884_s2] ss:$0 sm:$0xff] }
 0x1ad   :  { %v6913_v46 = vpop.f32.mrb[91].mxu1 }
 0x1ae   :  { %v1514_v21 = vadd.f32 %v6911_v27, %v6847_v18  ;;  %v6914_v29 = vadd.f32 %v6913_v46, %v6912_v13 }
 0x1b0   :  { %v8865_v31 = vmax.f32 %v1121_v10, %v1514_v21  ;;  %v1517_v52 = vadd.f32 %v6914_v29, %v6850_v59  ;;  %v6851_v23 = vpop.f32.mrb[92].mxu0  ;;  %v9897_v10 = vmax.f32 %v8715_v35, %v8794_v53  ;;  %v7357_v29 = vld [vmem:[%s9885_s3] ss:$16 sps:$4 sm:$0xff]  }
 0x1b1   :  { %v6852_v33 = vpop.f32.mrb[93].mxu0 }
 0x1b2   :  { %v8870_v49 = vmax.f32 %v1122_v20, %v1517_v52  ;;  %v6915_v54 = vpop.f32.mrb[92].mxu1  ;;  %v6853_v34 = vadd.f32 %v6852_v33, %v6851_v23  ;;  %v6854_v5 = vpop.f32.mrb[94].mxu0  ;;  %v7360_v52 = vld [vmem:[%s9885_s3 + $0x8] ss:$16 sps:$4 sm:$0xff]  }
 0x1b3   :  { %v6916_v22 = vpop.f32.mrb[93].mxu1  ;;  %v6855_v19 = vpop.f32.mrb[95].mxu0 }
 0x1b4   :  { %v6917_v9 = vadd.f32 %v6916_v22, %v6915_v54  ;;  %v6918_v55 = vpop.f32.mrb[94].mxu1  ;;  %v6856_v32 = vadd.f32 %v6855_v19, %v6854_v5  ;;  %v7365_v5 = vld [vmem:[%s9885_s3 + $0x24] ss:$16 sps:$4 sm:$0xff]   ;;  %v7368_v22 = vld [vmem:[%s9885_s3 + $0x2c] ss:$16 sps:$4 sm:$0xff]  }
 0x1b5   :  { %v6919_v51 = vpop.f32.mrb[95].mxu1 }
 0x1b6   :  { %v1522_v45 = vadd.f32 %v6917_v9, %v6853_v34  ;;  %v6920_v4 = vadd.f32 %v6919_v51, %v6918_v55 }
 0x1b8   :  { %v8875_v57 = vmax.f32 %v9897_v10, %v1522_v45  ;;  %v1525_v43 = vadd.f32 %v6920_v4, %v6856_v32  ;;  %v6937_v47 = vpop.f32.mrb[96].mxu0  ;;  %v7363_v45 = vld [vmem:[%s9885_s3 + $0x20] ss:$16 sps:$4 sm:$0xff]   ;;  %v7366_v4 = vld [vmem:[%s9885_s3 + $0x28] ss:$16 sps:$4 sm:$0xff]  }
 0x1b9   :  { %v6938_v14 = vpop.f32.mrb[97].mxu0 }
 0x1ba   :  { %v8880_v20 = vmax.f32 %v1124_v38, %v1525_v43  ;;  %v7001_v28 = vpop.f32.mrb[96].mxu1  ;;  %v6939_v11 = vadd.f32 %v6938_v14, %v6937_v47  ;;  %v6940_v58 = vpop.f32.mrb[98].mxu0  ;;  %v7371_v47 = vld [vmem:[%s9885_s3 + $0x44] ss:$16 sps:$4 sm:$0xff]  }
 0x1bb   :  { %v7002_v16 = vpop.f32.mrb[97].mxu1  ;;  %v6941_v26 = vpop.f32.mrb[99].mxu0  ;;  %v2015_v14 = vld [vmem:[%s9885_s3 + $0x60] sm:$0x11] }
 0x1bc   :  { %v7003_v30 = vadd.f32 %v7002_v16, %v7001_v28  ;;  %v7004_v44 = vpop.f32.mrb[98].mxu1  ;;  %v6942_v61 = vadd.f32 %v6941_v26, %v6940_v58  ;;  %v7374_v16 = vld [vmem:[%s9885_s3 + $0x4c] ss:$16 sps:$4 sm:$0xff]  }
 0x1bd   :  { %v7005_v15 = vpop.f32.mrb[99].mxu1  ;;  %v2016_v26 = vld [vmem:[%s9885_s3 + $0x68] sm:$0x11] }
 0x1be   :  { %v8882_v35 = vadd.f32 %v7003_v30, %v6939_v11  ;;  %v7006_v53 = vadd.f32 %v7005_v15, %v7004_v44  ;;  %v9898_v44 = vmov 0  }
 0x1c0   :  { %v1947_v41 = vmax.f32 %v8805_v50, %v8882_v35  ;;  %v1888_v36 = vadd.f32 %v7006_v53, %v6942_v61  ;;  %v6943_v24 = vpop.f32.mrb[100].mxu0  ;;  %v6017_v53 = vcombine.high %v2015_v14, %v2015_v14 }
 0x1c1   :  { %v6944_v37 = vpop.f32.mrb[101].mxu0 }
 0x1c2   :  { %v1948_v60 = vmax.f32 %v8810_v1, %v1888_v36  ;;  %v7007_v38 = vpop.f32.mrb[100].mxu1  ;;  %v6945_v6 = vadd.f32 %v6944_v37, %v6943_v24  ;;  %v6946_v40 = vpop.f32.mrb[102].mxu0  ;;  %v7369_v36 = vld [vmem:[%s9885_s3 + $0x40] ss:$16 sps:$4 sm:$0xff]   ;;  %v7372_v24 = vld [vmem:[%s9885_s3 + $0x48] ss:$16 sps:$4 sm:$0xff]   ;;  %v6019_v37 = vcombine.high %v2016_v26, %v2016_v26 }
 0x1c3   :  { %v7008_v18 = vpop.f32.mrb[101].mxu1  ;;  %v6947_v25 = vpop.f32.mrb[103].mxu0 }
 0x1c4   :  { %v1971_v8 = vadd.f32 %v8890_v63, %v1948_v60  ;;  %v7009_v62 = vadd.f32 %v7008_v18, %v7007_v38  ;;  %v7010_v27 = vpop.f32.mrb[102].mxu1  ;;  %v6948_v13 = vadd.f32 %v6947_v25, %v6946_v40  ;;  %v6016_v60 = vcombine.low %v2015_v14, %v2015_v14  ;;  %v7390_v14 = vld [vmem:[%s9885_s3 + $0x10c] ss:$16 sps:$4 sm:$0xff]  }
 0x1c5   :  { %v7011_v59 = vpop.f32.mrb[103].mxu1  ;;  %v6018_v38 = vcombine.low %v2016_v26, %v2016_v26 }
 0x1c6   :  { %v1987_v46 = vmax.f32 %v1971_v8, 0.0  ;;  %v8893_v21 = vadd.f32 %v7009_v62, %v6945_v6  ;;  %v7012_v1 = vadd.f32 %v7011_v59, %v7010_v27  ;;  %v1970_v6 = vadd.f32 %v8890_v63, %v1947_v41 }
 0x1c7   :  { %v2276_v41 = vsel %vm2107_vm2, %v6016_v60, 0 }
 0x1c8   :  { %v2017_v23 = vpack.c.bf16 %v1987_v46, %v1987_v46  ;;  %v1949_v33 = vmax.f32 %v8815_v17, %v8893_v21  ;;  %v8903_v54 = vadd.f32 %v7012_v1, %v6948_v13  ;;  %v6949_v34 = vpop.f32.mrb[104].mxu0  ;;  %v1986_v1 = vmax.f32 %v1970_v6, 0.0  ;;  %v7396_v6 = vld [vmem:[%s9885_s3 + $0x12c] ss:$16 sps:$4 sm:$0xff]  }
 0x1c9   :  { %v6950_v19 = vpop.f32.mrb[105].mxu0 }
 0x1ca   :  { %v1950_v9 = vmax.f32 %v8820_v3, %v8903_v54  ;;  %v7013_v55 = vpop.f32.mrb[104].mxu1  ;;  %6001 = vmatmul.mubr.msk.bf16.vlgmr.msra.gmra.mrb[128].mxu0 %vm2103_vm3, %v2017_v23  ;;  %6003 = vmatmul.mubr.msk.bf16.vlgmr.msra.gmra.mrb[128].mxu1 %vm2103_vm3, %v2017_v23  ;;  %v6951_v32 = vadd.f32 %v6950_v19, %v6949_v34  ;;  %v6952_v51 = vpop.f32.mrb[106].mxu0 }
 0x1cb   :  { %2288 = vmatpush1.bf16.msra.mxu0 %v7357_v29  ;;  %2329 = vmatpush1.bf16.msra.mxu1 %v7360_v52  ;;  %v7014_v10 = vpop.f32.mrb[105].mxu1  ;;  %v6953_v43 = vpop.f32.mrb[107].mxu0 }
 0x1cc   :  { %v7015_v28 = vadd.f32 %v7014_v10, %v7013_v55  ;;  %v7016_v11 = vpop.f32.mrb[106].mxu1  ;;  %v6954_v58 = vadd.f32 %v6953_v43, %v6952_v51  ;;  %2289 = vmatprep.subr.bf16.mxu0 %v7365_v5  ;;  %2330 = vmatprep.subr.bf16.mxu1 %v7368_v22  ;;  %v7384_v5 = vld [vmem:[%s9885_s3 + $0xec] ss:$16 sps:$4 sm:$0xff]   ;;  %v7382_v51 = vld [vmem:[%s9885_s3 + $0xe8] ss:$16 sps:$4 sm:$0xff]  }
 0x1cd   :  { %v7017_v30 = vpop.f32.mrb[107].mxu1  ;;  %2319 = vmatprep.mubr.bf16.mxu0 %v9898_v44  ;;  %2360 = vmatprep.mubr.bf16.mxu1 %v9898_v44 }
 0x1ce   :  { %v1901_v61 = vadd.f32 %v7015_v28, %v6951_v32  ;;  %v7018_v15 = vadd.f32 %v7017_v30, %v7016_v11  ;;  %v7379_v32 = vld [vmem:[%s9885_s3 + $0xe0] ss:$16 sps:$4 sm:$0xff]  }
 0x1cf   :  { %2290 = vmatpush1.bf16.msra.mxu0 %v7363_v45  ;;  %2331 = vmatpush1.bf16.msra.mxu1 %v7366_v4  ;;  %v2002_v45 = vpack.c.bf16 %v1986_v1, %v1986_v1  ;;  %v7385_v30 = vld [vmem:[%s9885_s3 + $0x100] ss:$16 sps:$4 sm:$0xff]  }
 0x1d0   :  { %v1951_v40 = vmax.f32 %v8825_v56, %v1901_v61  ;;  %v1904_v18 = vadd.f32 %v7018_v15, %v6954_v58  ;;  %2291 = vmatprep.subr.bf16.mxu0 %v7371_v47  ;;  %2332 = vmatprep.subr.bf16.mxu1 %v7374_v16  ;;  %v6955_v25 = vpop.f32.mrb[108].mxu0  ;;  %v2282_v56 = vsel %vm2107_vm2, %v6018_v38, 0  ;;  %v7387_v47 = vld [vmem:[%s9885_s3 + $0x104] ss:$16 sps:$4 sm:$0xff]   ;;  %v7388_v61 = vld [vmem:[%s9885_s3 + $0x108] ss:$16 sps:$4 sm:$0xff]  }
 0x1d1   :  { %v6956_v8 = vpop.f32.mrb[109].mxu0 }
 0x1d2   :  { %v8947_v62 = vadd.f32 %v8890_v63, %v1951_v40  ;;  %v1952_v27 = vmax.f32 %v8830_v0, %v1904_v18  ;;  %v7019_v13 = vpop.f32.mrb[108].mxu1  ;;  %v6957_v59 = vadd.f32 %v6956_v8, %v6955_v25  ;;  %v6958_v46 = vpop.f32.mrb[110].mxu0  ;;  %v7381_v0 = vld [vmem:[%s9885_s3 + $0xe4] ss:$16 sps:$4 sm:$0xff]   ;;  %v6037_v40 = vld [vmem:[%s9885_s3 + $0x148] sm:$0x11] }
 0x1d3   :  { %2292 = vmatpush1.bf16.msra.mxu0 %v7369_v36  ;;  %2333 = vmatpush1.bf16.msra.mxu1 %v7372_v24  ;;  %v7020_v50 = vpop.f32.mrb[109].mxu1  ;;  %v6959_v35 = vpop.f32.mrb[111].mxu0  ;;  %v6036_v36 = vld [vmem:[%s9885_s3 + $0x140] sm:$0x11] }
 0x1d4   :  { %v8953_v29 = vadd.f32 %v8890_v63, %v1952_v27  ;;  %v7021_v52 = vadd.f32 %v7020_v50, %v7019_v13  ;;  %v7022_v23 = vpop.f32.mrb[110].mxu1  ;;  %v6960_v34 = vadd.f32 %v6959_v35, %v6958_v46  ;;  %6020 = vmatprep.subr.msk.bf16.mxu0 %vm2107_vm2, %v6017_v53  ;;  %6022 = vmatprep.subr.msk.bf16.mxu1 %vm2107_vm2, %v6019_v37  ;;  %v7391_v13 = vld [vmem:[%s9885_s3 + $0x120] ss:$16 sps:$4 sm:$0xff]  }
 0x1d5   :  { %v7023_v22 = vpop.f32.mrb[111].mxu1  ;;  %v6051_v27 = vcombine.high %v6036_v36, %v6036_v36  ;;  %v6053_v46 = vcombine.high %v6037_v40, %v6037_v40  ;;  %v6050_v50 = vcombine.low %v6036_v36, %v6036_v36  ;;  %v6052_v35 = vcombine.low %v6037_v40, %v6037_v40 }
 0x1d6   :  { %v1909_v19 = vadd.f32 %v7021_v52, %v6957_v59  ;;  %v7024_v55 = vadd.f32 %v7023_v22, %v7022_v23  ;;  %v7394_v59 = vld [vmem:[%s9885_s3 + $0x128] ss:$16 sps:$4 sm:$0xff]  }
 0x1d7   :  { %2294 = vmatpush1.bf16.msra.mxu0 %v2276_v41  ;;  %2335 = vmatpush1.bf16.msra.mxu1 %v2282_v56  ;;  %v1972_v41 = vadd.f32 %v8890_v63, %v1949_v33  ;;  %v2459_v33 = vsel %vm2107_vm2, %v6050_v50, 0  ;;  %v6071_v50 = vld [vmem:[%s9885_s3 + $0x1b8] sm:$0x11] }
 0x1d8   :  { %v1953_v4 = vmax.f32 %v8835_v12, %v1909_v19  ;;  %v1912_v10 = vadd.f32 %v7024_v55, %v6960_v34  ;;  %2470 = vmatprep.subr.bf16.mxu0 %v7381_v0  ;;  %2511 = vmatprep.subr.bf16.mxu1 %v7384_v5  ;;  %v6961_v43 = vpop.f32.mrb[112].mxu0 }
 0x1d9   :  { %v6962_v28 = vpop.f32.mrb[113].mxu0  ;;  %v1988_v55 = vmax.f32 %v1972_v41, 0.0 }
 0x1da   :  { %v8977_v11 = vadd.f32 %v8890_v63, %v1953_v4  ;;  %v1954_v58 = vmax.f32 %v8840_v2, %v1912_v10  ;;  %6021 = vmatmul.mubr.msk.bf16.vlgmr.msra.gmra.mrb[132].mxu0 %vm2103_vm3, %v2002_v45  ;;  %6023 = vmatmul.mubr.msk.bf16.vlgmr.msra.gmra.mrb[132].mxu1 %vm2103_vm3, %v2002_v45  ;;  %v7025_v12 = vpop.f32.mrb[112].mxu1  ;;  %v6963_v16 = vadd.f32 %v6962_v28, %v6961_v43  ;;  %v6964_v26 = vpop.f32.mrb[114].mxu0  ;;  %v7393_v2 = vld [vmem:[%s9885_s3 + $0x124] ss:$16 sps:$4 sm:$0xff]   ;;  %v7406_v10 = vld [vmem:[%s9885_s3 + $0x15c] ss:$16 sps:$4 sm:$0xff]  }
 0x1db   :  { %2471 = vmatpush1.bf16.msra.mxu0 %v7379_v32  ;;  %2512 = vmatpush1.bf16.msra.mxu1 %v7382_v51  ;;  %v7026_v15 = vpop.f32.mrb[113].mxu1  ;;  %v6965_v53 = vpop.f32.mrb[115].mxu0  ;;  %v7401_v28 = vld [vmem:[%s9885_s3 + $0x150] ss:$16 sps:$4 sm:$0xff]  }
 0x1dc   :  { %v8995_v24 = vadd.f32 %v8890_v63, %v1954_v58  ;;  %v7027_v37 = vadd.f32 %v7026_v15, %v7025_v12  ;;  %v7028_v60 = vpop.f32.mrb[114].mxu1  ;;  %v6966_v38 = vadd.f32 %v6965_v53, %v6964_v26  ;;  %2472 = vmatprep.subr.bf16.mxu0 %v7387_v47  ;;  %2513 = vmatprep.subr.bf16.mxu1 %v7390_v14  ;;  %v7404_v58 = vld [vmem:[%s9885_s3 + $0x158] ss:$16 sps:$4 sm:$0xff]   ;;  %v7412_v15 = vld [vmem:[%s9885_s3 + $0x17c] ss:$16 sps:$4 sm:$0xff]  }
 0x1dd   :  { %v7029_v18 = vpop.f32.mrb[115].mxu1  ;;  %2502 = vmatprep.mubr.bf16.mxu0 %v9898_v44  ;;  %2543 = vmatprep.mubr.bf16.mxu1 %v9898_v44  ;;  %v2369_v12 = vpack.c.bf16 %v1988_v55, %v1988_v55 }
 0x1de   :  { %v1917_v25 = vadd.f32 %v7027_v37, %v6963_v16  ;;  %v7030_v8 = vadd.f32 %v7029_v18, %v7028_v60 }
 0x1df   :  { %2473 = vmatpush1.bf16.msra.mxu0 %v7385_v30  ;;  %2514 = vmatpush1.bf16.msra.mxu1 %v7388_v61  ;;  %v7409_v61 = vld [vmem:[%s9885_s3 + $0x174] ss:$16 sps:$4 sm:$0xff]  }
 0x1e0   :  { %v1955_v56 = vmax.f32 %v8845_v42, %v1917_v25  ;;  %v1920_v1 = vadd.f32 %v7030_v8, %v6966_v38  ;;  %2474 = vmatprep.subr.bf16.mxu0 %v7393_v2  ;;  %2515 = vmatprep.subr.bf16.mxu1 %v7396_v6  ;;  %v6967_v52 = vpop.f32.mrb[116].mxu0  ;;  %v2465_v42 = vsel %vm2107_vm2, %v6052_v35, 0  ;;  %v7407_v38 = vld [vmem:[%s9885_s3 + $0x170] ss:$16 sps:$4 sm:$0xff]   ;;  %v7410_v6 = vld [vmem:[%s9885_s3 + $0x178] ss:$16 sps:$4 sm:$0xff]  }
 0x1e1   :  { %v6968_v23 = vpop.f32.mrb[117].mxu0  ;;  %v6070_v25 = vld [vmem:[%s9885_s3 + $0x1b0] sm:$0x11] }
 0x1e2   :  { %v9017_v34 = vadd.f32 %v8890_v63, %v1955_v56  ;;  %v1956_v0 = vmax.f32 %v8850_v48, %v1920_v1  ;;  %v7031_v5 = vpop.f32.mrb[116].mxu1  ;;  %v6969_v22 = vadd.f32 %v6968_v23, %v6967_v52  ;;  %v6970_v19 = vpop.f32.mrb[118].mxu0  ;;  %v7403_v48 = vld [vmem:[%s9885_s3 + $0x154] ss:$16 sps:$4 sm:$0xff]   ;;  %v6085_v1 = vcombine.high %v6070_v25, %v6070_v25  ;;  %v7413_v52 = vld [vmem:[%s9885_s3 + $0x190] ss:$16 sps:$4 sm:$0xff]  }
 0x1e3   :  { %2475 = vmatpush1.bf16.msra.mxu0 %v7391_v13  ;;  %2516 = vmatpush1.bf16.msra.mxu1 %v7394_v59  ;;  %v7032_v17 = vpop.f32.mrb[117].mxu1  ;;  %v6971_v21 = vpop.f32.mrb[119].mxu0  ;;  %v7416_v23 = vld [vmem:[%s9885_s3 + $0x198] ss:$16 sps:$4 sm:$0xff]  }
 0x1e4   :  { %v9023_v32 = vadd.f32 %v8890_v63, %v1956_v0  ;;  %v7033_v51 = vadd.f32 %v7032_v17, %v7031_v5  ;;  %v7034_v45 = vpop.f32.mrb[118].mxu1  ;;  %v6972_v4 = vadd.f32 %v6971_v21, %v6970_v19  ;;  %6054 = vmatprep.subr.msk.bf16.mxu0 %vm2107_vm2, %v6051_v27  ;;  %6056 = vmatprep.subr.msk.bf16.mxu1 %vm2107_vm2, %v6053_v46  ;;  %v7418_v46 = vld [vmem:[%s9885_s3 + $0x19c] ss:$16 sps:$4 sm:$0xff]  }
 0x1e5   :  { %v7035_v43 = vpop.f32.mrb[119].mxu1  ;;  %v6087_v0 = vcombine.high %v6071_v50, %v6071_v50  ;;  %v6084_v5 = vcombine.low %v6070_v25, %v6070_v25  ;;  %v1973_v19 = vadd.f32 %v8890_v63, %v1950_v9  ;;  %v6105_v25 = vld [vmem:[%s9885_s3 + $0x228] sm:$0x11] }
 0x1e6   :  { %v1925_v47 = vadd.f32 %v7033_v51, %v6969_v22  ;;  %v7036_v14 = vadd.f32 %v7035_v43, %v7034_v45  ;;  %v6086_v22 = vcombine.low %v6071_v50, %v6071_v50  ;;  %v6120_v50 = vcombine.low %v6105_v25, %v6105_v25 }
 0x1e7   :  { %2477 = vmatpush1.bf16.msra.mxu0 %v2459_v33  ;;  %2518 = vmatpush1.bf16.msra.mxu1 %v2465_v42  ;;  %v2646_v9 = vsel %vm2107_vm2, %v6084_v5, 0  ;;  %v7453_v5 = vld [vmem:[%s9885_s3 + $0x254] ss:$16 sps:$4 sm:$0xff]  }
 0x1e8   :  { %v1957_v16 = vmax.f32 %v8855_v39, %v1925_v47  ;;  %v1928_v26 = vadd.f32 %v7036_v14, %v6972_v4  ;;  %2657 = vmatprep.subr.bf16.mxu0 %v7403_v48  ;;  %2698 = vmatprep.subr.bf16.mxu1 %v7406_v10  ;;  %v6973_v30 = vpop.f32.mrb[120].mxu0  ;;  %v1989_v10 = vmax.f32 %v1973_v19, 0.0  ;;  %v7451_v19 = vld [vmem:[%s9885_s3 + $0x250] ss:$16 sps:$4 sm:$0xff]  }
 0x1e9   :  { %v6974_v53 = vpop.f32.mrb[121].mxu0 }
 0x1ea   :  { %v9047_v2 = vadd.f32 %v8890_v63, %v1957_v16  ;;  %v1958_v36 = vmax.f32 %v8860_v7, %v1928_v26  ;;  %6055 = vmatmul.mubr.msk.bf16.vlgmr.msra.gmra.mrb[136].mxu0 %vm2103_vm3, %v2369_v12  ;;  %6057 = vmatmul.mubr.msk.bf16.vlgmr.msra.gmra.mrb[136].mxu1 %vm2103_vm3, %v2369_v12  ;;  %v7037_v39 = vpop.f32.mrb[120].mxu1  ;;  %v6975_v37 = vadd.f32 %v6974_v53, %v6973_v30  ;;  %v6976_v60 = vpop.f32.mrb[122].mxu0  ;;  %v7415_v7 = vld [vmem:[%s9885_s3 + $0x194] ss:$16 sps:$4 sm:$0xff]   ;;  %v7423_v30 = vld [vmem:[%s9885_s3 + $0x1c0] ss:$16 sps:$4 sm:$0xff]  }
 0x1eb   :  { %2658 = vmatpush1.bf16.msra.mxu0 %v7401_v28  ;;  %2699 = vmatpush1.bf16.msra.mxu1 %v7404_v58  ;;  %v7038_v40 = vpop.f32.mrb[121].mxu1  ;;  %v6977_v18 = vpop.f32.mrb[123].mxu0  ;;  %v7428_v58 = vld [vmem:[%s9885_s3 + $0x1cc] ss:$16 sps:$4 sm:$0xff]  }
 0x1ec   :  { %v9065_v8 = vadd.f32 %v8890_v63, %v1958_v36  ;;  %v7039_v27 = vadd.f32 %v7038_v40, %v7037_v39  ;;  %v7040_v13 = vpop.f32.mrb[122].mxu1  ;;  %v6978_v59 = vadd.f32 %v6977_v18, %v6976_v60  ;;  %2659 = vmatprep.subr.bf16.mxu0 %v7409_v61  ;;  %2700 = vmatprep.subr.bf16.mxu1 %v7412_v15  ;;  %v7426_v61 = vld [vmem:[%s9885_s3 + $0x1c8] ss:$16 sps:$4 sm:$0xff]   ;;  %v7431_v39 = vld [vmem:[%s9885_s3 + $0x1e4] ss:$16 sps:$4 sm:$0xff]  }
 0x1ed   :  { %v7041_v35 = vpop.f32.mrb[123].mxu1  ;;  %2689 = vmatprep.mubr.bf16.mxu0 %v9898_v44  ;;  %2730 = vmatprep.mubr.bf16.mxu1 %v9898_v44  ;;  %v2556_v15 = vpack.c.bf16 %v1989_v10, %v1989_v10  ;;  %v7440_v18 = vld [vmem:[%s9885_s3 + $0x20c] ss:$16 sps:$4 sm:$0xff]   ;;  %v1991_v10 = vmax.f32 %v8953_v29, 0.0  ;;  %v7467_v29 = vld [vmem:[%s9885_s3 + $0x2a0] ss:$16 sps:$4 sm:$0xff]  }
 0x1ee   :  { %v1933_v41 = vadd.f32 %v7039_v27, %v6975_v37  ;;  %v7042_v56 = vadd.f32 %v7041_v35, %v7040_v13  ;;  %v7434_v37 = vld [vmem:[%s9885_s3 + $0x1ec] ss:$16 sps:$4 sm:$0xff]   ;;  %v7438_v27 = vld [vmem:[%s9885_s3 + $0x208] ss:$16 sps:$4 sm:$0xff]  }
 0x1ef   :  { %2660 = vmatpush1.bf16.msra.mxu0 %v7407_v38  ;;  %2701 = vmatpush1.bf16.msra.mxu1 %v7410_v6  ;;  %v7432_v6 = vld [vmem:[%s9885_s3 + $0x1e8] ss:$16 sps:$4 sm:$0xff]  }
 0x1f0   :  { %v1959_v17 = vmax.f32 %v8865_v31, %v1933_v41  ;;  %v1936_v21 = vadd.f32 %v7042_v56, %v6978_v59  ;;  %2661 = vmatprep.subr.bf16.mxu0 %v7415_v7  ;;  %2702 = vmatprep.subr.bf16.mxu1 %v7418_v46  ;;  %v6979_v33 = vpop.f32.mrb[124].mxu0  ;;  %v2652_v31 = vsel %vm2107_vm2, %v6086_v22, 0  ;;  %v6104_v7 = vld [vmem:[%s9885_s3 + $0x220] sm:$0x11]  ;;  %v6121_v46 = vcombine.high %v6105_v25, %v6105_v25  ;;  %v7456_v22 = vld [vmem:[%s9885_s3 + $0x25c] ss:$16 sps:$4 sm:$0xff]  }
 0x1f1   :  { %v6980_v42 = vpop.f32.mrb[125].mxu0  ;;  %v6118_v13 = vcombine.low %v6104_v7, %v6104_v7  ;;  %v6119_v59 = vcombine.high %v6104_v7, %v6104_v7  ;;  %v1990_v41 = vmax.f32 %v8947_v62, 0.0  ;;  %v2839_v56 = vsel %vm2107_vm2, %v6120_v50, 0  ;;  %v7445_v62 = vld [vmem:[%s9885_s3 + $0x230] ss:$16 sps:$4 sm:$0xff]  }
 0x1f2   :  { %v9087_v55 = vadd.f32 %v8890_v63, %v1959_v17  ;;  %v1960_v51 = vmax.f32 %v8870_v49, %v1936_v21  ;;  %v7043_v45 = vpop.f32.mrb[124].mxu1  ;;  %v6981_v4 = vadd.f32 %v6980_v42, %v6979_v33  ;;  %v6982_v48 = vpop.f32.mrb[126].mxu0  ;;  %v7425_v49 = vld [vmem:[%s9885_s3 + $0x1c4] ss:$16 sps:$4 sm:$0xff]   ;;  %v7454_v17 = vld [vmem:[%s9885_s3 + $0x258] ss:$16 sps:$4 sm:$0xff]  }
 0x1f3   :  { %2662 = vmatpush1.bf16.msra.mxu0 %v7413_v52  ;;  %2703 = vmatpush1.bf16.msra.mxu1 %v7416_v23  ;;  %v7044_v3 = vpop.f32.mrb[125].mxu1  ;;  %v6983_v54 = vpop.f32.mrb[127].mxu0  ;;  %v2833_v35 = vsel %vm2107_vm2, %v6118_v13, 0  ;;  %v7450_v52 = vld [vmem:[%s9885_s3 + $0x23c] ss:$16 sps:$4 sm:$0xff]   ;;  %v1992_v7 = vmax.f32 %v8977_v11, 0.0 }
 0x1f4   :  { %v9093_v43 = vadd.f32 %v8890_v63, %v1960_v51  ;;  %v7045_v47 = vadd.f32 %v7044_v3, %v7043_v45  ;;  %v7046_v14 = vpop.f32.mrb[126].mxu1  ;;  %v6984_v28 = vadd.f32 %v6983_v54, %v6982_v48  ;;  %6088 = vmatprep.subr.msk.bf16.mxu0 %vm2107_vm2, %v6085_v1  ;;  %6090 = vmatprep.subr.msk.bf16.mxu1 %vm2107_vm2, %v6087_v0  ;;  %v7447_v1 = vld [vmem:[%s9885_s3 + $0x234] ss:$16 sps:$4 sm:$0xff]   ;;  %v7448_v23 = vld [vmem:[%s9885_s3 + $0x238] ss:$16 sps:$4 sm:$0xff]  }
 0x1f5   :  { %v7047_v12 = vpop.f32.mrb[127].mxu1  ;;  %v2743_v0 = vpack.c.bf16 %v1990_v41, %v1990_v41  ;;  %v7459_v21 = vld [vmem:[%s9885_s3 + $0x274] ss:$16 sps:$4 sm:$0xff]   ;;  %v7462_v33 = vld [vmem:[%s9885_s3 + $0x27c] ss:$16 sps:$4 sm:$0xff]  }
 0x1f6   :  { %v1941_v16 = vadd.f32 %v7045_v47, %v6981_v4  ;;  %v7048_v26 = vadd.f32 %v7047_v12, %v7046_v14  ;;  %v6138_v42 = vld [vmem:[%s9885_s3 + $0x290] sm:$0x11]  ;;  %v6139_v51 = vld [vmem:[%s9885_s3 + $0x298] sm:$0x11] }
 0x1f7   :  { %2664 = vmatpush1.bf16.msra.mxu0 %v2646_v9  ;;  %2705 = vmatpush1.bf16.msra.mxu1 %v2652_v31  ;;  %v7457_v45 = vld [vmem:[%s9885_s3 + $0x270] ss:$16 sps:$4 sm:$0xff]   ;;  %v7460_v4 = vld [vmem:[%s9885_s3 + $0x278] ss:$16 sps:$4 sm:$0xff]   ;;  %v6152_v48 = vcombine.low %v6138_v42, %v6138_v42  ;;  %v6153_v3 = vcombine.high %v6138_v42, %v6138_v42  ;;  %v6155_v54 = vcombine.high %v6139_v51, %v6139_v51  ;;  %v7469_v14 = vld [vmem:[%s9885_s3 + $0x2a4] ss:$16 sps:$4 sm:$0xff]  }
 0x1f8   :  { %v1961_v53 = vmax.f32 %v8875_v57, %v1941_v16  ;;  %v1944_v36 = vadd.f32 %v7048_v26, %v6984_v28  ;;  %2844 = vmatprep.subr.bf16.mxu0 %v7425_v49  ;;  %2885 = vmatprep.subr.bf16.mxu1 %v7428_v58  ;;  %v7429_v57 = vld [vmem:[%s9885_s3 + $0x1e0] ss:$16 sps:$4 sm:$0xff]   ;;  %v6154_v9 = vcombine.low %v6139_v51, %v6139_v51  ;;  %v7472_v28 = vld [vmem:[%s9885_s3 + $0x2ac] ss:$16 sps:$4 sm:$0xff]   ;;  %v7470_v49 = vld [vmem:[%s9885_s3 + $0x2a8] ss:$16 sps:$4 sm:$0xff]  }
 0x1f9   :  { %v3020_v31 = vsel %vm2107_vm2, %v6152_v48, 0  ;;  %v2930_v58 = vpack.c.bf16 %v1991_v10, %v1991_v10  ;;  %v7475_v12 = vld [vmem:[%s9885_s3 + $0x2c4] ss:$16 sps:$4 sm:$0xff]   ;;  %v7478_v16 = vld [vmem:[%s9885_s3 + $0x2cc] ss:$16 sps:$4 sm:$0xff]  }
 0x1fa   :  { %v9117_v60 = vadd.f32 %v8890_v63, %v1961_v53  ;;  %v1962_v38 = vmax.f32 %v8880_v20, %v1944_v36  ;;  %6089 = vmatmul.mubr.msk.bf16.vlgmr.msra.gmra.mrb[140].mxu0 %vm2103_vm3, %v2556_v15  ;;  %6091 = vmatmul.mubr.msk.bf16.vlgmr.msra.gmra.mrb[140].mxu1 %vm2103_vm3, %v2556_v15  ;;  %v7437_v20 = vld [vmem:[%s9885_s3 + $0x204] ss:$16 sps:$4 sm:$0xff]   ;;  %v3026_v47 = vsel %vm2107_vm2, %v6154_v9, 0  ;;  %v7473_v26 = vld [vmem:[%s9885_s3 + $0x2c0] ss:$16 sps:$4 sm:$0xff]  }
 0x1fb   :  { %2845 = vmatpush1.bf16.msra.mxu0 %v7423_v30  ;;  %2886 = vmatpush1.bf16.msra.mxu1 %v7426_v61  ;;  %v7476_v30 = vld [vmem:[%s9885_s3 + $0x2c8] ss:$16 sps:$4 sm:$0xff]   ;;  %v7481_v61 = vld [vmem:[%s9885_s3 + $0x2e4] ss:$16 sps:$4 sm:$0xff]   ;;  %v7484_v15 = vld [vmem:[%s9885_s3 + $0x2ec] ss:$16 sps:$4 sm:$0xff]  }
 0x1fc   :  { %v9129_v40 = vadd.f32 %v8890_v63, %v1962_v38  ;;  %2846 = vmatprep.subr.bf16.mxu0 %v7431_v39  ;;  %2887 = vmatprep.subr.bf16.mxu1 %v7434_v37  ;;  %v7435_v63 = vld [vmem:[%s9885_s3 + $0x200] ss:$16 sps:$4 sm:$0xff]   ;;  %v6173_v36 = vld [vmem:[%s9885_s3 + $0x308] sm:$0x11]  ;;  %v7513_v51 = vld [vmem:[%s9885_s3 + $0x384] ss:$16 sps:$4 sm:$0xff]  }
 0x1fd   :  { %2876 = vmatprep.mubr.bf16.mxu0 %v9898_v44  ;;  %2917 = vmatprep.mubr.bf16.mxu1 %v9898_v44  ;;  %v6172_v53 = vld [vmem:[%s9885_s3 + $0x300] sm:$0x11]  ;;  %v7482_v37 = vld [vmem:[%s9885_s3 + $0x2e8] ss:$16 sps:$4 sm:$0xff]   ;;  %v7500_v50 = vld [vmem:[%s9885_s3 + $0x33c] ss:$16 sps:$4 sm:$0xff]  }
 0x1fe   :  { %v7479_v39 = vld [vmem:[%s9885_s3 + $0x2e0] ss:$16 sps:$4 sm:$0xff]   ;;  %v6186_v38 = vcombine.low %v6172_v53, %v6172_v53  ;;  %v7492_v13 = vld [vmem:[%s9885_s3 + $0x318] ss:$16 sps:$4 sm:$0xff]   ;;  %v7525_v10 = vld [vmem:[%s9885_s3 + $0x3c4] ss:$16 sps:$4 sm:$0xff]  }
 0x1ff   :  { %2847 = vmatpush1.bf16.msra.mxu0 %v7429_v57  ;;  %2888 = vmatpush1.bf16.msra.mxu1 %v7432_v6  ;;  %v6187_v57 = vcombine.high %v6172_v53, %v6172_v53  ;;  %v6189_v6 = vcombine.high %v6173_v36, %v6173_v36  ;;  %v7489_v11 = vld [vmem:[%s9885_s3 + $0x310] ss:$16 sps:$4 sm:$0xff]   ;;  %v7498_v41 = vld [vmem:[%s9885_s3 + $0x338] ss:$16 sps:$4 sm:$0xff]   ;;  %v7535_v53 = vld [vmem:[%s9885_s3 + $0x3f4] ss:$16 sps:$4 sm:$0xff]  }
 0x200   :  { %2848 = vmatprep.subr.bf16.mxu0 %v7437_v20  ;;  %2889 = vmatprep.subr.bf16.mxu1 %v7440_v18  ;;  %v6188_v20 = vcombine.low %v6173_v36, %v6173_v36  ;;  %v3207_v18 = vsel %vm2107_vm2, %v6186_v38, 0  ;;  %v7517_v9 = vld [vmem:[%s9885_s3 + $0x3a0] ss:$16 sps:$4 sm:$0xff]   ;;  %v7538_v36 = vld [vmem:[%s9885_s3 + $0x3fc] ss:$16 sps:$4 sm:$0xff]  }
 0x201   :  { %v7541_v38 = vld [vmem:[%s9885_s3 + $0x414] ss:$16 sps:$4 sm:$0xff]  }
 0x202   :  { %v3213_v25 = vsel %vm2107_vm2, %v6188_v20, 0  ;;  %v7542_v20 = vld [vmem:[%s9885_s3 + $0x418] ss:$16 sps:$4 sm:$0xff]  }
 0x203   :  { %2849 = vmatpush1.bf16.msra.mxu0 %v7435_v63  ;;  %2890 = vmatpush1.bf16.msra.mxu1 %v7438_v27  ;;  %v7491_v63 = vld [vmem:[%s9885_s3 + $0x314] ss:$16 sps:$4 sm:$0xff]   ;;  %v7494_v27 = vld [vmem:[%s9885_s3 + $0x31c] ss:$16 sps:$4 sm:$0xff]  }
 0x204   :  { %6122 = vmatprep.subr.msk.bf16.mxu0 %vm2107_vm2, %v6119_v59  ;;  %6124 = vmatprep.subr.msk.bf16.mxu1 %vm2107_vm2, %v6121_v46  ;;  %v3117_v59 = vpack.c.bf16 %v1992_v7, %v1992_v7  ;;  %v7497_v46 = vld [vmem:[%s9885_s3 + $0x334] ss:$16 sps:$4 sm:$0xff]   ;;  %v7550_v7 = vld [vmem:[%s9885_s3 + $0x43c] ss:$16 sps:$4 sm:$0xff]  }
 0x207   :  { %2851 = vmatpush1.bf16.msra.mxu0 %v2833_v35  ;;  %2892 = vmatpush1.bf16.msra.mxu1 %v2839_v56  ;;  %v7495_v35 = vld [vmem:[%s9885_s3 + $0x330] ss:$16 sps:$4 sm:$0xff]   ;;  %v7503_v56 = vld [vmem:[%s9885_s3 + $0x354] ss:$16 sps:$4 sm:$0xff]  }
 0x208   :  { %3031 = vmatprep.subr.bf16.mxu0 %v7447_v1  ;;  %3072 = vmatprep.subr.bf16.mxu1 %v7450_v52  ;;  %v7506_v1 = vld [vmem:[%s9885_s3 + $0x35c] ss:$16 sps:$4 sm:$0xff]   ;;  %v6206_v52 = vld [vmem:[%s9885_s3 + $0x370] sm:$0x11] }
 0x20a   :  { %6123 = vmatmul.mubr.msk.bf16.vlgmr.msra.gmra.mrb[144].mxu0 %vm2103_vm3, %v2743_v0  ;;  %6125 = vmatmul.mubr.msk.bf16.vlgmr.msra.gmra.mrb[144].mxu1 %vm2103_vm3, %v2743_v0  ;;  %v7504_v0 = vld [vmem:[%s9885_s3 + $0x358] ss:$16 sps:$4 sm:$0xff]  }
 0x20b   :  { %3032 = vmatpush1.bf16.msra.mxu0 %v7445_v62  ;;  %3073 = vmatpush1.bf16.msra.mxu1 %v7448_v23  ;;  %v6207_v62 = vld [vmem:[%s9885_s3 + $0x378] sm:$0x11]  ;;  %v7501_v23 = vld [vmem:[%s9885_s3 + $0x350] ss:$16 sps:$4 sm:$0xff]  }
 0x20c   :  { %3033 = vmatprep.subr.bf16.mxu0 %v7453_v5  ;;  %3074 = vmatprep.subr.bf16.mxu1 %v7456_v22  ;;  %v6220_v5 = vcombine.low %v6206_v52, %v6206_v52  ;;  %v6221_v22 = vcombine.high %v6206_v52, %v6206_v52  ;;  %v7560_v52 = vld [vmem:[%s9885_s3 + $0x46c] ss:$16 sps:$4 sm:$0xff]  }
 0x20d   :  { %3063 = vmatprep.mubr.bf16.mxu0 %v9898_v44  ;;  %3104 = vmatprep.mubr.bf16.mxu1 %v9898_v44 }
 0x20f   :  { %3034 = vmatpush1.bf16.msra.mxu0 %v7451_v19  ;;  %3075 = vmatpush1.bf16.msra.mxu1 %v7454_v17  ;;  %v6223_v19 = vcombine.high %v6207_v62, %v6207_v62  ;;  %v6222_v17 = vcombine.low %v6207_v62, %v6207_v62  ;;  %v7558_v62 = vld [vmem:[%s9885_s3 + $0x468] ss:$16 sps:$4 sm:$0xff]  }
 0x210   :  { %3035 = vmatprep.subr.bf16.mxu0 %v7459_v21  ;;  %3076 = vmatprep.subr.bf16.mxu1 %v7462_v33  ;;  %v3394_v21 = vsel %vm2107_vm2, %v6220_v5, 0  ;;  %v1993_v33 = vmax.f32 %v8995_v24, 0.0  ;;  %v7511_v24 = vld [vmem:[%s9885_s3 + $0x380] ss:$16 sps:$4 sm:$0xff]   ;;  %v7566_v5 = vld [vmem:[%s9885_s3 + $0x48c] ss:$16 sps:$4 sm:$0xff]  }
 0x211   :  { %v3400_v42 = vsel %vm2107_vm2, %v6222_v17, 0  ;;  %v7569_v17 = vld [vmem:[%s9885_s3 + $0x4a4] ss:$16 sps:$4 sm:$0xff]  }
 0x212   :  { %v3304_v48 = vpack.c.bf16 %v1993_v33, %v1993_v33  ;;  %v6308_v33 = vld [vmem:[%s9885_s3 + $0x4c0] sm:$0x11] }
 0x213   :  { %3036 = vmatpush1.bf16.msra.mxu0 %v7457_v45  ;;  %3077 = vmatpush1.bf16.msra.mxu1 %v7460_v4  ;;  %v7516_v45 = vld [vmem:[%s9885_s3 + $0x38c] ss:$16 sps:$4 sm:$0xff]   ;;  %v7514_v4 = vld [vmem:[%s9885_s3 + $0x388] ss:$16 sps:$4 sm:$0xff]  }
 0x214   :  { %6156 = vmatprep.subr.msk.bf16.mxu0 %vm2107_vm2, %v6153_v3  ;;  %6158 = vmatprep.subr.msk.bf16.mxu1 %vm2107_vm2, %v6155_v54  ;;  %v7519_v3 = vld [vmem:[%s9885_s3 + $0x3a4] ss:$16 sps:$4 sm:$0xff]   ;;  %v7522_v54 = vld [vmem:[%s9885_s3 + $0x3ac] ss:$16 sps:$4 sm:$0xff]  }
 0x217   :  { %3038 = vmatpush1.bf16.msra.mxu0 %v3020_v31  ;;  %3079 = vmatpush1.bf16.msra.mxu1 %v3026_v47  ;;  %v7520_v31 = vld [vmem:[%s9885_s3 + $0x3a8] ss:$16 sps:$4 sm:$0xff]   ;;  %v7528_v47 = vld [vmem:[%s9885_s3 + $0x3cc] ss:$16 sps:$4 sm:$0xff]  }
 0x218   :  { %3218 = vmatprep.subr.bf16.mxu0 %v7469_v14  ;;  %3259 = vmatprep.subr.bf16.mxu1 %v7472_v28  ;;  %v6240_v14 = vld [vmem:[%s9885_s3 + $0x3e0] sm:$0x11]  ;;  %v6241_v28 = vld [vmem:[%s9885_s3 + $0x3e8] sm:$0x11] }
 0x21a   :  { %6157 = vmatmul.mubr.msk.bf16.vlgmr.msra.gmra.mrb[148].mxu0 %vm2103_vm3, %v2930_v58  ;;  %6159 = vmatmul.mubr.msk.bf16.vlgmr.msra.gmra.mrb[148].mxu1 %vm2103_vm3, %v2930_v58  ;;  %v6254_v58 = vcombine.low %v6240_v14, %v6240_v14 }
 0x21b   :  { %3219 = vmatpush1.bf16.msra.mxu0 %v7467_v29  ;;  %3260 = vmatpush1.bf16.msra.mxu1 %v7470_v49  ;;  %v7523_v29 = vld [vmem:[%s9885_s3 + $0x3c0] ss:$16 sps:$4 sm:$0xff]   ;;  %v7526_v49 = vld [vmem:[%s9885_s3 + $0x3c8] ss:$16 sps:$4 sm:$0xff]  }
 0x21c   :  { %3220 = vmatprep.subr.bf16.mxu0 %v7475_v12  ;;  %3261 = vmatprep.subr.bf16.mxu1 %v7478_v16  ;;  %v6255_v12 = vcombine.high %v6240_v14, %v6240_v14  ;;  %v6257_v16 = vcombine.high %v6241_v28, %v6241_v28  ;;  %v7580_v14 = vld [vmem:[%s9885_s3 + $0x4d8] ss:$16 sps:$4 sm:$0xff]  }
 0x21d   :  { %3250 = vmatprep.mubr.bf16.mxu0 %v9898_v44  ;;  %3291 = vmatprep.mubr.bf16.mxu1 %v9898_v44 }
 0x21f   :  { %3221 = vmatpush1.bf16.msra.mxu0 %v7473_v26  ;;  %3262 = vmatpush1.bf16.msra.mxu1 %v7476_v30  ;;  %v6256_v26 = vcombine.low %v6241_v28, %v6241_v28  ;;  %v3581_v30 = vsel %vm2107_vm2, %v6254_v58, 0  ;;  %v7583_v58 = vld [vmem:[%s9885_s3 + $0x4f0] ss:$16 sps:$4 sm:$0xff]  }
 0x220   :  { %3222 = vmatprep.subr.bf16.mxu0 %v7481_v61  ;;  %3263 = vmatprep.subr.bf16.mxu1 %v7484_v15  ;;  %v1994_v61 = vmax.f32 %v9017_v34, 0.0  ;;  %v7533_v34 = vld [vmem:[%s9885_s3 + $0x3f0] ss:$16 sps:$4 sm:$0xff]  }
 0x221   :  { %v3587_v15 = vsel %vm2107_vm2, %v6256_v26, 0  ;;  %v7594_v26 = vld [vmem:[%s9885_s3 + $0x51c] ss:$16 sps:$4 sm:$0xff]  }
 0x223   :  { %3223 = vmatpush1.bf16.msra.mxu0 %v7479_v39  ;;  %3264 = vmatpush1.bf16.msra.mxu1 %v7482_v37  ;;  %v7536_v39 = vld [vmem:[%s9885_s3 + $0x3f8] ss:$16 sps:$4 sm:$0xff]   ;;  %v3491_v37 = vpack.c.bf16 %v1994_v61, %v1994_v61 }
 0x224   :  { %6190 = vmatprep.subr.msk.bf16.mxu0 %vm2107_vm2, %v6187_v57  ;;  %6192 = vmatprep.subr.msk.bf16.mxu1 %vm2107_vm2, %v6189_v6  ;;  %v7544_v57 = vld [vmem:[%s9885_s3 + $0x41c] ss:$16 sps:$4 sm:$0xff]   ;;  %v7539_v6 = vld [vmem:[%s9885_s3 + $0x410] ss:$16 sps:$4 sm:$0xff]  }
 0x225   :  { %v6343_v61 = vld [vmem:[%s9885_s3 + $0x538] sm:$0x11] }
 0x227   :  { %3225 = vmatpush1.bf16.msra.mxu0 %v3207_v18  ;;  %3266 = vmatpush1.bf16.msra.mxu1 %v3213_v25  ;;  %v7547_v18 = vld [vmem:[%s9885_s3 + $0x434] ss:$16 sps:$4 sm:$0xff]  }
 0x228   :  { %3405 = vmatprep.subr.bf16.mxu0 %v7491_v63  ;;  %3446 = vmatprep.subr.bf16.mxu1 %v7494_v27  ;;  %v6274_v25 = vld [vmem:[%s9885_s3 + $0x450] sm:$0x11]  ;;  %v6275_v63 = vld [vmem:[%s9885_s3 + $0x458] sm:$0x11] }
 0x229   :  { %v7545_v27 = vld [vmem:[%s9885_s3 + $0x430] ss:$16 sps:$4 sm:$0xff]  }
 0x22a   :  { %6191 = vmatmul.mubr.msk.bf16.vlgmr.msra.gmra.mrb[152].mxu0 %vm2103_vm3, %v3117_v59  ;;  %6193 = vmatmul.mubr.msk.bf16.vlgmr.msra.gmra.mrb[152].mxu1 %vm2103_vm3, %v3117_v59  ;;  %v6289_v59 = vcombine.high %v6274_v25, %v6274_v25 }
 0x22b   :  { %3406 = vmatpush1.bf16.msra.mxu0 %v7489_v11  ;;  %3447 = vmatpush1.bf16.msra.mxu1 %v7492_v13  ;;  %v7548_v11 = vld [vmem:[%s9885_s3 + $0x438] ss:$16 sps:$4 sm:$0xff]   ;;  %v6288_v13 = vcombine.low %v6274_v25, %v6274_v25 }
 0x22c   :  { %3407 = vmatprep.subr.bf16.mxu0 %v7497_v46  ;;  %3448 = vmatprep.subr.bf16.mxu1 %v7500_v50  ;;  %v6291_v46 = vcombine.high %v6275_v63, %v6275_v63  ;;  %v6290_v50 = vcombine.low %v6275_v63, %v6275_v63  ;;  %v7607_v63 = vld [vmem:[%s9885_s3 + $0x564] ss:$16 sps:$4 sm:$0xff]  }
 0x22d   :  { %3437 = vmatprep.mubr.bf16.mxu0 %v9898_v44  ;;  %3478 = vmatprep.mubr.bf16.mxu1 %v9898_v44 }
 0x22f   :  { %3408 = vmatpush1.bf16.msra.mxu0 %v7495_v35  ;;  %3449 = vmatpush1.bf16.msra.mxu1 %v7498_v41  ;;  %v3768_v35 = vsel %vm2107_vm2, %v6288_v13, 0  ;;  %v1995_v41 = vmax.f32 %v9023_v32, 0.0  ;;  %v7555_v32 = vld [vmem:[%s9885_s3 + $0x460] ss:$16 sps:$4 sm:$0xff]   ;;  %v7608_v13 = vld [vmem:[%s9885_s3 + $0x568] ss:$16 sps:$4 sm:$0xff]  }
 0x230   :  { %3409 = vmatprep.subr.bf16.mxu0 %v7503_v56  ;;  %3450 = vmatprep.subr.bf16.mxu1 %v7506_v1  ;;  %v3774_v56 = vsel %vm2107_vm2, %v6290_v50, 0  ;;  %v7557_v1 = vld [vmem:[%s9885_s3 + $0x464] ss:$16 sps:$4 sm:$0xff]  }
 0x231   :  { %v6376_v50 = vld [vmem:[%s9885_s3 + $0x5a0] sm:$0x11] }
 0x233   :  { %3410 = vmatpush1.bf16.msra.mxu0 %v7501_v23  ;;  %3451 = vmatpush1.bf16.msra.mxu1 %v7504_v0  ;;  %v3678_v23 = vpack.c.bf16 %v1995_v41, %v1995_v41  ;;  %v7563_v0 = vld [vmem:[%s9885_s3 + $0x484] ss:$16 sps:$4 sm:$0xff]   ;;  %v7611_v41 = vld [vmem:[%s9885_s3 + $0x580] ss:$16 sps:$4 sm:$0xff]  }
 0x234   :  { %6224 = vmatprep.subr.msk.bf16.mxu0 %vm2107_vm2, %v6221_v22  ;;  %6226 = vmatprep.subr.msk.bf16.mxu1 %vm2107_vm2, %v6223_v19  ;;  %v7561_v22 = vld [vmem:[%s9885_s3 + $0x480] ss:$16 sps:$4 sm:$0xff]   ;;  %v7564_v19 = vld [vmem:[%s9885_s3 + $0x488] ss:$16 sps:$4 sm:$0xff]  }
 0x237   :  { %3412 = vmatpush1.bf16.msra.mxu0 %v3394_v21  ;;  %3453 = vmatpush1.bf16.msra.mxu1 %v3400_v42  ;;  %v7572_v21 = vld [vmem:[%s9885_s3 + $0x4ac] ss:$16 sps:$4 sm:$0xff]  }
 0x238   :  { %3592 = vmatprep.subr.bf16.mxu0 %v7513_v51  ;;  %3633 = vmatprep.subr.bf16.mxu1 %v7516_v45  ;;  %v6309_v42 = vld [vmem:[%s9885_s3 + $0x4c8] sm:$0x11]  ;;  %v7567_v51 = vld [vmem:[%s9885_s3 + $0x4a0] ss:$16 sps:$4 sm:$0xff]  }
 0x239   :  { %v7570_v45 = vld [vmem:[%s9885_s3 + $0x4a8] ss:$16 sps:$4 sm:$0xff]  }
 0x23a   :  { %6225 = vmatmul.mubr.msk.bf16.vlgmr.msra.gmra.mrb[156].mxu0 %vm2103_vm3, %v3304_v48  ;;  %6227 = vmatmul.mubr.msk.bf16.vlgmr.msra.gmra.mrb[156].mxu1 %vm2103_vm3, %v3304_v48  ;;  %v6325_v48 = vcombine.high %v6309_v42, %v6309_v42 }
 0x23b   :  { %3593 = vmatpush1.bf16.msra.mxu0 %v7511_v24  ;;  %3634 = vmatpush1.bf16.msra.mxu1 %v7514_v4  ;;  %v6322_v24 = vcombine.low %v6308_v33, %v6308_v33  ;;  %v6323_v4 = vcombine.high %v6308_v33, %v6308_v33  ;;  %v7629_v33 = vld [vmem:[%s9885_s3 + $0x5d4] ss:$16 sps:$4 sm:$0xff]  }
 0x23c   :  { %3594 = vmatprep.subr.bf16.mxu0 %v7519_v3  ;;  %3635 = vmatprep.subr.bf16.mxu1 %v7522_v54  ;;  %v6324_v3 = vcombine.low %v6309_v42, %v6309_v42  ;;  %v7632_v42 = vld [vmem:[%s9885_s3 + $0x5dc] ss:$16 sps:$4 sm:$0xff]  }
 0x23d   :  { %3624 = vmatprep.mubr.bf16.mxu0 %v9898_v44  ;;  %3665 = vmatprep.mubr.bf16.mxu1 %v9898_v44  ;;  %v3955_v54 = vsel %vm2107_vm2, %v6322_v24, 0  ;;  %v7635_v24 = vld [vmem:[%s9885_s3 + $0x5f4] ss:$16 sps:$4 sm:$0xff]  }
 0x23f   :  { %3595 = vmatpush1.bf16.msra.mxu0 %v7517_v9  ;;  %3636 = vmatpush1.bf16.msra.mxu1 %v7520_v31  ;;  %v1996_v9 = vmax.f32 %v9047_v2, 0.0  ;;  %v3961_v31 = vsel %vm2107_vm2, %v6324_v3, 0  ;;  %v7577_v2 = vld [vmem:[%s9885_s3 + $0x4d0] ss:$16 sps:$4 sm:$0xff]   ;;  %v6411_v3 = vld [vmem:[%s9885_s3 + $0x618] sm:$0x11] }
 0x240   :  { %3596 = vmatprep.subr.bf16.mxu0 %v7525_v10  ;;  %3637 = vmatprep.subr.bf16.mxu1 %v7528_v47  ;;  %v7579_v10 = vld [vmem:[%s9885_s3 + $0x4d4] ss:$16 sps:$4 sm:$0xff]   ;;  %v7582_v47 = vld [vmem:[%s9885_s3 + $0x4dc] ss:$16 sps:$4 sm:$0xff]  }
 0x241   :  { %v3865_v28 = vpack.c.bf16 %v1996_v9, %v1996_v9  ;;  %v7636_v9 = vld [vmem:[%s9885_s3 + $0x5f8] ss:$16 sps:$4 sm:$0xff]  }
 0x243   :  { %3597 = vmatpush1.bf16.msra.mxu0 %v7523_v29  ;;  %3638 = vmatpush1.bf16.msra.mxu1 %v7526_v49  ;;  %v7585_v29 = vld [vmem:[%s9885_s3 + $0x4f4] ss:$16 sps:$4 sm:$0xff]   ;;  %v7588_v49 = vld [vmem:[%s9885_s3 + $0x4fc] ss:$16 sps:$4 sm:$0xff]  }
 0x244   :  { %6258 = vmatprep.subr.msk.bf16.mxu0 %vm2107_vm2, %v6255_v12  ;;  %6260 = vmatprep.subr.msk.bf16.mxu1 %vm2107_vm2, %v6257_v16  ;;  %v7586_v12 = vld [vmem:[%s9885_s3 + $0x4f8] ss:$16 sps:$4 sm:$0xff]   ;;  %v7591_v16 = vld [vmem:[%s9885_s3 + $0x514] ss:$16 sps:$4 sm:$0xff]  }
 0x247   :  { %3599 = vmatpush1.bf16.msra.mxu0 %v3581_v30  ;;  %3640 = vmatpush1.bf16.msra.mxu1 %v3587_v15  ;;  %v6342_v30 = vld [vmem:[%s9885_s3 + $0x530] sm:$0x11] }
 0x248   :  { %3779 = vmatprep.subr.bf16.mxu0 %v7535_v53  ;;  %3820 = vmatprep.subr.bf16.mxu1 %v7538_v36  ;;  %v7589_v15 = vld [vmem:[%s9885_s3 + $0x510] ss:$16 sps:$4 sm:$0xff]   ;;  %v7592_v53 = vld [vmem:[%s9885_s3 + $0x518] ss:$16 sps:$4 sm:$0xff]   ;;  %v6357_v36 = vcombine.high %v6342_v30, %v6342_v30 }
 0x24a   :  { %6259 = vmatmul.mubr.msk.bf16.vlgmr.msra.gmra.mrb[160].mxu0 %vm2103_vm3, %v3491_v37  ;;  %6261 = vmatmul.mubr.msk.bf16.vlgmr.msra.gmra.mrb[160].mxu1 %vm2103_vm3, %v3491_v37  ;;  %v6358_v37 = vcombine.low %v6343_v61, %v6343_v61 }
 0x24b   :  { %3780 = vmatpush1.bf16.msra.mxu0 %v7533_v34  ;;  %3821 = vmatpush1.bf16.msra.mxu1 %v7536_v39  ;;  %v6359_v34 = vcombine.high %v6343_v61, %v6343_v61  ;;  %v6356_v39 = vcombine.low %v6342_v30, %v6342_v30  ;;  %v7654_v30 = vld [vmem:[%s9885_s3 + $0x64c] ss:$16 sps:$4 sm:$0xff]   ;;  %v7649_v61 = vld [vmem:[%s9885_s3 + $0x640] ss:$16 sps:$4 sm:$0xff]  }
 0x24c   :  { %3781 = vmatprep.subr.bf16.mxu0 %v7541_v38  ;;  %3822 = vmatprep.subr.bf16.mxu1 %v7544_v57  ;;  %v1997_v38 = vmax.f32 %v9065_v8, 0.0  ;;  %v7599_v8 = vld [vmem:[%s9885_s3 + $0x540] ss:$16 sps:$4 sm:$0xff]  }
 0x24d   :  { %3811 = vmatprep.mubr.bf16.mxu0 %v9898_v44  ;;  %3852 = vmatprep.mubr.bf16.mxu1 %v9898_v44  ;;  %v4142_v57 = vsel %vm2107_vm2, %v6356_v39, 0 }
 0x24e   :  { %v4052_v25 = vpack.c.bf16 %v1997_v38, %v1997_v38  ;;  %v6445_v38 = vld [vmem:[%s9885_s3 + $0x688] sm:$0x11] }
 0x24f   :  { %3782 = vmatpush1.bf16.msra.mxu0 %v7539_v6  ;;  %3823 = vmatpush1.bf16.msra.mxu1 %v7542_v20  ;;  %v4148_v6 = vsel %vm2107_vm2, %v6358_v37, 0  ;;  %v7601_v20 = vld [vmem:[%s9885_s3 + $0x544] ss:$16 sps:$4 sm:$0xff]  }
 0x250   :  { %3783 = vmatprep.subr.bf16.mxu0 %v7547_v18  ;;  %3824 = vmatprep.subr.bf16.mxu1 %v7550_v7  ;;  %v7604_v18 = vld [vmem:[%s9885_s3 + $0x54c] ss:$16 sps:$4 sm:$0xff]   ;;  %v7602_v7 = vld [vmem:[%s9885_s3 + $0x548] ss:$16 sps:$4 sm:$0xff]  }
 0x253   :  { %3784 = vmatpush1.bf16.msra.mxu0 %v7545_v27  ;;  %3825 = vmatpush1.bf16.msra.mxu1 %v7548_v11  ;;  %v7610_v27 = vld [vmem:[%s9885_s3 + $0x56c] ss:$16 sps:$4 sm:$0xff]   ;;  %v7605_v11 = vld [vmem:[%s9885_s3 + $0x560] ss:$16 sps:$4 sm:$0xff]  }
 0x254   :  { %6292 = vmatprep.subr.msk.bf16.mxu0 %vm2107_vm2, %v6289_v59  ;;  %6294 = vmatprep.subr.msk.bf16.mxu1 %vm2107_vm2, %v6291_v46  ;;  %v7613_v59 = vld [vmem:[%s9885_s3 + $0x584] ss:$16 sps:$4 sm:$0xff]   ;;  %v7616_v46 = vld [vmem:[%s9885_s3 + $0x58c] ss:$16 sps:$4 sm:$0xff]  }
 0x257   :  { %3786 = vmatpush1.bf16.msra.mxu0 %v3768_v35  ;;  %3827 = vmatpush1.bf16.msra.mxu1 %v3774_v56  ;;  %v6377_v35 = vld [vmem:[%s9885_s3 + $0x5a8] sm:$0x11] }
 0x258   :  { %3966 = vmatprep.subr.bf16.mxu0 %v7557_v1  ;;  %4007 = vmatprep.subr.bf16.mxu1 %v7560_v52  ;;  %v7614_v56 = vld [vmem:[%s9885_s3 + $0x588] ss:$16 sps:$4 sm:$0xff]   ;;  %v6391_v1 = vcombine.high %v6376_v50, %v6376_v50  ;;  %v6393_v52 = vcombine.high %v6377_v35, %v6377_v35 }
 0x25a   :  { %6293 = vmatmul.mubr.msk.bf16.vlgmr.msra.gmra.mrb[164].mxu0 %vm2103_vm3, %v3678_v23  ;;  %6295 = vmatmul.mubr.msk.bf16.vlgmr.msra.gmra.mrb[164].mxu1 %vm2103_vm3, %v3678_v23  ;;  %v1998_v23 = vmax.f32 %v9087_v55, 0.0  ;;  %v7621_v55 = vld [vmem:[%s9885_s3 + $0x5b0] ss:$16 sps:$4 sm:$0xff]  }
 0x25b   :  { %3967 = vmatpush1.bf16.msra.mxu0 %v7555_v32  ;;  %4008 = vmatpush1.bf16.msra.mxu1 %v7558_v62  ;;  %v6390_v32 = vcombine.low %v6376_v50, %v6376_v50  ;;  %v6392_v62 = vcombine.low %v6377_v35, %v6377_v35 }
 0x25c   :  { %3968 = vmatprep.subr.bf16.mxu0 %v7563_v0  ;;  %4009 = vmatprep.subr.bf16.mxu1 %v7566_v5 }
 0x25d   :  { %3998 = vmatprep.mubr.bf16.mxu0 %v9898_v44  ;;  %4039 = vmatprep.mubr.bf16.mxu1 %v9898_v44  ;;  %v4329_v0 = vsel %vm2107_vm2, %v6390_v32, 0  ;;  %v4335_v5 = vsel %vm2107_vm2, %v6392_v62, 0  ;;  %v7673_v32 = vld [vmem:[%s9885_s3 + $0x6b4] ss:$16 sps:$4 sm:$0xff]   ;;  %v7676_v62 = vld [vmem:[%s9885_s3 + $0x6bc] ss:$16 sps:$4 sm:$0xff]  }
 0x25f   :  { %3969 = vmatpush1.bf16.msra.mxu0 %v7561_v22  ;;  %4010 = vmatpush1.bf16.msra.mxu1 %v7564_v19  ;;  %v7623_v22 = vld [vmem:[%s9885_s3 + $0x5b4] ss:$16 sps:$4 sm:$0xff]   ;;  %v7626_v19 = vld [vmem:[%s9885_s3 + $0x5bc] ss:$16 sps:$4 sm:$0xff]  }
 0x260   :  { %3970 = vmatprep.subr.bf16.mxu0 %v7569_v17  ;;  %4011 = vmatprep.subr.bf16.mxu1 %v7572_v21  ;;  %v7624_v17 = vld [vmem:[%s9885_s3 + $0x5b8] ss:$16 sps:$4 sm:$0xff]   ;;  %v4239_v21 = vpack.c.bf16 %v1998_v23, %v1998_v23  ;;  %v7671_v23 = vld [vmem:[%s9885_s3 + $0x6b0] ss:$16 sps:$4 sm:$0xff]  }
 0x263   :  { %3971 = vmatpush1.bf16.msra.mxu0 %v7567_v51  ;;  %4012 = vmatpush1.bf16.msra.mxu1 %v7570_v45  ;;  %v7627_v51 = vld [vmem:[%s9885_s3 + $0x5d0] ss:$16 sps:$4 sm:$0xff]   ;;  %v7630_v45 = vld [vmem:[%s9885_s3 + $0x5d8] ss:$16 sps:$4 sm:$0xff]  }
 0x264   :  { %6326 = vmatprep.subr.msk.bf16.mxu0 %vm2107_vm2, %v6323_v4  ;;  %6328 = vmatprep.subr.msk.bf16.mxu1 %vm2107_vm2, %v6325_v48  ;;  %v7638_v4 = vld [vmem:[%s9885_s3 + $0x5fc] ss:$16 sps:$4 sm:$0xff]   ;;  %v6410_v48 = vld [vmem:[%s9885_s3 + $0x610] sm:$0x11] }
 0x267   :  { %3973 = vmatpush1.bf16.msra.mxu0 %v3955_v54  ;;  %4014 = vmatpush1.bf16.msra.mxu1 %v3961_v31  ;;  %v7633_v54 = vld [vmem:[%s9885_s3 + $0x5f0] ss:$16 sps:$4 sm:$0xff]   ;;  %v6425_v31 = vcombine.high %v6410_v48, %v6410_v48 }
 0x268   :  { %4153 = vmatprep.subr.bf16.mxu0 %v7579_v10  ;;  %4194 = vmatprep.subr.bf16.mxu1 %v7582_v47  ;;  %v6427_v10 = vcombine.high %v6411_v3, %v6411_v3  ;;  %v6424_v47 = vcombine.low %v6410_v48, %v6410_v48 }
 0x26a   :  { %6327 = vmatmul.mubr.msk.bf16.vlgmr.msra.gmra.mrb[168].mxu0 %vm2103_vm3, %v3865_v28  ;;  %6329 = vmatmul.mubr.msk.bf16.vlgmr.msra.gmra.mrb[168].mxu1 %vm2103_vm3, %v3865_v28  ;;  %v4516_v28 = vsel %vm2107_vm2, %v6424_v47, 0 }
 0x26b   :  { %4154 = vmatpush1.bf16.msra.mxu0 %v7577_v2  ;;  %4195 = vmatpush1.bf16.msra.mxu1 %v7580_v14  ;;  %v6426_v2 = vcombine.low %v6411_v3, %v6411_v3  ;;  %v1999_v14 = vmax.f32 %v9093_v43, 0.0  ;;  %v7643_v43 = vld [vmem:[%s9885_s3 + $0x620] ss:$16 sps:$4 sm:$0xff]  }
 0x26c   :  { %4155 = vmatprep.subr.bf16.mxu0 %v7585_v29  ;;  %4196 = vmatprep.subr.bf16.mxu1 %v7588_v49  ;;  %v7645_v49 = vld [vmem:[%s9885_s3 + $0x624] ss:$16 sps:$4 sm:$0xff]  }
 0x26d   :  { %4185 = vmatprep.mubr.bf16.mxu0 %v9898_v44  ;;  %4226 = vmatprep.mubr.bf16.mxu1 %v9898_v44  ;;  %v4522_v29 = vsel %vm2107_vm2, %v6426_v2, 0 }
 0x26f   :  { %4156 = vmatpush1.bf16.msra.mxu0 %v7583_v58  ;;  %4197 = vmatpush1.bf16.msra.mxu1 %v7586_v12  ;;  %v7648_v58 = vld [vmem:[%s9885_s3 + $0x62c] ss:$16 sps:$4 sm:$0xff]   ;;  %v7646_v12 = vld [vmem:[%s9885_s3 + $0x628] ss:$16 sps:$4 sm:$0xff]  }
 0x270   :  { %4157 = vmatprep.subr.bf16.mxu0 %v7591_v16  ;;  %4198 = vmatprep.subr.bf16.mxu1 %v7594_v26  ;;  %v4426_v16 = vpack.c.bf16 %v1999_v14, %v1999_v14  ;;  %v7651_v26 = vld [vmem:[%s9885_s3 + $0x644] ss:$16 sps:$4 sm:$0xff]  }
 0x273   :  { %4158 = vmatpush1.bf16.msra.mxu0 %v7589_v15  ;;  %4199 = vmatpush1.bf16.msra.mxu1 %v7592_v53  ;;  %v7652_v15 = vld [vmem:[%s9885_s3 + $0x648] ss:$16 sps:$4 sm:$0xff]   ;;  %v7657_v53 = vld [vmem:[%s9885_s3 + $0x664] ss:$16 sps:$4 sm:$0xff]  }
 0x274   :  { %6360 = vmatprep.subr.msk.bf16.mxu0 %vm2107_vm2, %v6357_v36  ;;  %6362 = vmatprep.subr.msk.bf16.mxu1 %vm2107_vm2, %v6359_v34  ;;  %v7660_v36 = vld [vmem:[%s9885_s3 + $0x66c] ss:$16 sps:$4 sm:$0xff]   ;;  %v6444_v34 = vld [vmem:[%s9885_s3 + $0x680] sm:$0x11] }
 0x277   :  { %4160 = vmatpush1.bf16.msra.mxu0 %v4142_v57  ;;  %4201 = vmatpush1.bf16.msra.mxu1 %v4148_v6 }
 0x278   :  { %4340 = vmatprep.subr.bf16.mxu0 %v7601_v20  ;;  %4381 = vmatprep.subr.bf16.mxu1 %v7604_v18 }
 0x27a   :  { %6361 = vmatmul.mubr.msk.bf16.vlgmr.msra.gmra.mrb[172].mxu0 %vm2103_vm3, %v4052_v25  ;;  %6363 = vmatmul.mubr.msk.bf16.vlgmr.msra.gmra.mrb[172].mxu1 %vm2103_vm3, %v4052_v25  ;;  %v6459_v25 = vcombine.high %v6444_v34, %v6444_v34 }
 0x27b   :  { %4341 = vmatpush1.bf16.msra.mxu0 %v7599_v8  ;;  %4382 = vmatpush1.bf16.msra.mxu1 %v7602_v7  ;;  %v7655_v8 = vld [vmem:[%s9885_s3 + $0x660] ss:$16 sps:$4 sm:$0xff]   ;;  %v7658_v7 = vld [vmem:[%s9885_s3 + $0x668] ss:$16 sps:$4 sm:$0xff]  }
 0x27c   :  { %4342 = vmatprep.subr.bf16.mxu0 %v7607_v63  ;;  %4383 = vmatprep.subr.bf16.mxu1 %v7610_v27 }
 0x27d   :  { %4372 = vmatprep.mubr.bf16.mxu0 %v9898_v44  ;;  %4413 = vmatprep.mubr.bf16.mxu1 %v9898_v44 }
 0x27f   :  { %4343 = vmatpush1.bf16.msra.mxu0 %v7605_v11  ;;  %4384 = vmatpush1.bf16.msra.mxu1 %v7608_v13  ;;  %v6461_v11 = vcombine.high %v6445_v38, %v6445_v38  ;;  %v6458_v13 = vcombine.low %v6444_v34, %v6444_v34 }
 0x280   :  { %4344 = vmatprep.subr.bf16.mxu0 %v7613_v59  ;;  %4385 = vmatprep.subr.bf16.mxu1 %v7616_v46  ;;  %v6460_v59 = vcombine.low %v6445_v38, %v6445_v38  ;;  %v2000_v46 = vmax.f32 %v9117_v60, 0.0  ;;  %v7665_v60 = vld [vmem:[%s9885_s3 + $0x690] ss:$16 sps:$4 sm:$0xff]  }
 0x281   :  { %v4703_v50 = vsel %vm2107_vm2, %v6458_v13, 0 }
 0x282   :  { %v4709_v35 = vsel %vm2107_vm2, %v6460_v59, 0 }
 0x283   :  { %4345 = vmatpush1.bf16.msra.mxu0 %v7611_v41  ;;  %4386 = vmatpush1.bf16.msra.mxu1 %v7614_v56  ;;  %v7667_v41 = vld [vmem:[%s9885_s3 + $0x694] ss:$16 sps:$4 sm:$0xff]   ;;  %v7670_v56 = vld [vmem:[%s9885_s3 + $0x69c] ss:$16 sps:$4 sm:$0xff]  }
 0x284   :  { %6394 = vmatprep.subr.msk.bf16.mxu0 %vm2107_vm2, %v6391_v1  ;;  %6396 = vmatprep.subr.msk.bf16.mxu1 %vm2107_vm2, %v6393_v52  ;;  %v7668_v1 = vld [vmem:[%s9885_s3 + $0x698] ss:$16 sps:$4 sm:$0xff]   ;;  %v4613_v52 = vpack.c.bf16 %v2000_v46, %v2000_v46 }
 0x287   :  { %4347 = vmatpush1.bf16.msra.mxu0 %v4329_v0  ;;  %4388 = vmatpush1.bf16.msra.mxu1 %v4335_v5  ;;  %v7674_v0 = vld [vmem:[%s9885_s3 + $0x6b8] ss:$16 sps:$4 sm:$0xff]   ;;  %v7679_v5 = vld [vmem:[%s9885_s3 + $0x6d4] ss:$16 sps:$4 sm:$0xff]  }
 0x288   :  { %4527 = vmatprep.subr.bf16.mxu0 %v7623_v22  ;;  %4568 = vmatprep.subr.bf16.mxu1 %v7626_v19  ;;  %v7682_v22 = vld [vmem:[%s9885_s3 + $0x6dc] ss:$16 sps:$4 sm:$0xff]   ;;  %v6478_v19 = vld [vmem:[%s9885_s3 + $0x6f0] sm:$0x11] }
 0x289   :  { %v6492_v2 = vcombine.low %v6478_v19, %v6478_v19 }
 0x28a   :  { %6395 = vmatmul.mubr.msk.bf16.vlgmr.msra.gmra.mrb[176].mxu0 %vm2103_vm3, %v4239_v21  ;;  %6397 = vmatmul.mubr.msk.bf16.vlgmr.msra.gmra.mrb[176].mxu1 %vm2103_vm3, %v4239_v21  ;;  %v6479_v21 = vld [vmem:[%s9885_s3 + $0x6f8] sm:$0x11] }
 0x28b   :  { %4528 = vmatpush1.bf16.msra.mxu0 %v7621_v55  ;;  %4569 = vmatpush1.bf16.msra.mxu1 %v7624_v17  ;;  %v6495_v47 = vcombine.high %v6479_v21, %v6479_v21  ;;  %v6494_v14 = vcombine.low %v6479_v21, %v6479_v21 }
 0x28c   :  { %4529 = vmatprep.subr.bf16.mxu0 %v7629_v33  ;;  %4570 = vmatprep.subr.bf16.mxu1 %v7632_v42 }
 0x28d   :  { %4559 = vmatprep.mubr.bf16.mxu0 %v9898_v44  ;;  %4600 = vmatprep.mubr.bf16.mxu1 %v9898_v44 }
 0x28f   :  { %4530 = vmatpush1.bf16.msra.mxu0 %v7627_v51  ;;  %4571 = vmatpush1.bf16.msra.mxu1 %v7630_v45 }
 0x290   :  { %4531 = vmatprep.subr.bf16.mxu0 %v7635_v24  ;;  %4572 = vmatprep.subr.bf16.mxu1 %v7638_v4 }
 0x293   :  { %4532 = vmatpush1.bf16.msra.mxu0 %v7633_v54  ;;  %4573 = vmatpush1.bf16.msra.mxu1 %v7636_v9  ;;  %v7677_v54 = vld [vmem:[%s9885_s3 + $0x6d0] ss:$16 sps:$4 sm:$0xff]   ;;  %v7680_v9 = vld [vmem:[%s9885_s3 + $0x6d8] ss:$16 sps:$4 sm:$0xff]  }
 0x294   :  { %6428 = vmatprep.subr.msk.bf16.mxu0 %vm2107_vm2, %v6425_v31  ;;  %6430 = vmatprep.subr.msk.bf16.mxu1 %vm2107_vm2, %v6427_v10  ;;  %v6493_v31 = vcombine.high %v6478_v19, %v6478_v19 }
 0x297   :  { %4534 = vmatpush1.bf16.msra.mxu0 %v4516_v28  ;;  %4575 = vmatpush1.bf16.msra.mxu1 %v4522_v29  ;;  %v2001_v28 = vmax.f32 %v9129_v40, 0.0  ;;  %v4890_v29 = vsel %vm2107_vm2, %v6492_v2, 0  ;;  %v7695_v2 = vld [vmem:[%s9887_s5 + $0xd0] sm:$0xff]  }
 0x298   :  { %4714 = vmatprep.subr.bf16.mxu0 %v7645_v49  ;;  %4755 = vmatprep.subr.bf16.mxu1 %v7648_v58  ;;  %v4896_v49 = vsel %vm2107_vm2, %v6494_v14, 0 }
 0x299   :  { %v4800_v58 = vpack.c.bf16 %v2001_v28, %v2001_v28 }
 0x29a   :  { %6429 = vmatmul.mubr.msk.bf16.vlgmr.msra.gmra.mrb[180].mxu0 %vm2103_vm3, %v4426_v16  ;;  %6431 = vmatmul.mubr.msk.bf16.vlgmr.msra.gmra.mrb[180].mxu1 %vm2103_vm3, %v4426_v16 }
 0x29b   :  { %4715 = vmatpush1.bf16.msra.mxu0 %v7643_v43  ;;  %4756 = vmatpush1.bf16.msra.mxu1 %v7646_v12 }
 0x29c   :  { %4716 = vmatprep.subr.bf16.mxu0 %v7651_v26  ;;  %4757 = vmatprep.subr.bf16.mxu1 %v7654_v30 }
 0x29d   :  { %v2154_v39 = vpop.f32.mrb[128].mxu0  ;;  %v2195_v37 = vpop.f32.mrb[128].mxu1  ;;  %4746 = vmatprep.mubr.bf16.mxu0 %v9898_v44  ;;  %4787 = vmatprep.mubr.bf16.mxu1 %v9898_v44 }
 0x29e   :  { %v2156_v57 = vpop.f32.mrb[129].mxu0  ;;  %v2197_v6 = vpop.f32.mrb[129].mxu1 }
 0x29f   :  { %4717 = vmatpush1.bf16.msra.mxu0 %v7649_v61  ;;  %4758 = vmatpush1.bf16.msra.mxu1 %v7652_v15  ;;  %v2158_v20 = vpop.f32.mrb[130].mxu0  ;;  %v2199_v18 = vpop.f32.mrb[130].mxu1 }
 0x2a0   :  { %v2159_v63 = vpop.f32.mrb[131].mxu0  ;;  %v2200_v27 = vpop.f32.mrb[131].mxu1  ;;  %4718 = vmatprep.subr.bf16.mxu0 %v7657_v53  ;;  %4759 = vmatprep.subr.bf16.mxu1 %v7660_v36 }
 0x2a3   :  { %4719 = vmatpush1.bf16.msra.mxu0 %v7655_v8  ;;  %4760 = vmatpush1.bf16.msra.mxu1 %v7658_v7 }
 0x2a4   :  { %6462 = vmatprep.subr.msk.bf16.mxu0 %vm2107_vm2, %v6459_v25  ;;  %6464 = vmatprep.subr.msk.bf16.mxu1 %vm2107_vm2, %v6461_v11 }
 0x2a7   :  { %4721 = vmatpush1.bf16.msra.mxu0 %v4703_v50  ;;  %4762 = vmatpush1.bf16.msra.mxu1 %v4709_v35 }
 0x2a8   :  { %4901 = vmatprep.subr.bf16.mxu0 %v7667_v41  ;;  %4942 = vmatprep.subr.bf16.mxu1 %v7670_v56 }
 0x2aa   :  { %6463 = vmatmul.mubr.msk.bf16.vlgmr.msra.gmra.mrb[184].mxu0 %vm2103_vm3, %v4613_v52  ;;  %6465 = vmatmul.mubr.msk.bf16.vlgmr.msra.gmra.mrb[184].mxu1 %vm2103_vm3, %v4613_v52 }
 0x2ab   :  { %4902 = vmatpush1.bf16.msra.mxu0 %v7665_v60  ;;  %4943 = vmatpush1.bf16.msra.mxu1 %v7668_v1 }
 0x2ac   :  { %4903 = vmatprep.subr.bf16.mxu0 %v7673_v32  ;;  %4944 = vmatprep.subr.bf16.mxu1 %v7676_v62 }
 0x2ad   :  { %v2321_v55 = vpop.f32.mrb[132].mxu0  ;;  %v2362_v17 = vpop.f32.mrb[132].mxu1  ;;  %4933 = vmatprep.mubr.bf16.mxu0 %v9898_v44  ;;  %4974 = vmatprep.mubr.bf16.mxu1 %v9898_v44 }
 0x2ae   :  { %v2322_v33 = vadd.f32 %v2321_v55, %v2154_v39  ;;  %v2363_v42 = vadd.f32 %v2362_v17, %v2195_v37  ;;  %v2323_v51 = vpop.f32.mrb[133].mxu0  ;;  %v2364_v45 = vpop.f32.mrb[133].mxu1 }
 0x2af   :  { %v2324_v24 = vadd.f32 %v2323_v51, %v2156_v57  ;;  %v2365_v4 = vadd.f32 %v2364_v45, %v2197_v6  ;;  %v2325_v48 = vpop.f32.mrb[134].mxu0  ;;  %v2366_v3 = vpop.f32.mrb[134].mxu1  ;;  %4904 = vmatpush1.bf16.msra.mxu0 %v7671_v23  ;;  %4945 = vmatpush1.bf16.msra.mxu1 %v7674_v0 }
 0x2b0   :  { %v2326_v44 = vpop.f32.mrb[135].mxu0  ;;  %v2367_v10 = vpop.f32.mrb[135].mxu1  ;;  %4905 = vmatprep.subr.bf16.mxu0 %v7679_v5  ;;  %4946 = vmatprep.subr.bf16.mxu1 %v7682_v22  ;;  %v7689_v48 = vld [vmem:[%s9887_s5 + $0x80] sm:$0xff]  }
 0x2b1   :  { %v7690_v3 = vld [vmem:[%s9887_s5] sm:$0xff]   ;;  %v7694_v44 = vld [vmem:[%s9887_s5 + $0x8] sm:$0xff]  }
 0x2b3   :  { %4906 = vmatpush1.bf16.msra.mxu0 %v7677_v54  ;;  %4947 = vmatpush1.bf16.msra.mxu1 %v7680_v9  ;;  %v7691_v54 = vld [vmem:[%s9887_s5 + $0xc8] sm:$0xff]  }
 0x2b4   :  { %6496 = vmatprep.subr.msk.bf16.mxu0 %vm2107_vm2, %v6493_v31  ;;  %6498 = vmatprep.subr.msk.bf16.mxu1 %vm2107_vm2, %v6495_v47  ;;  %v7692_v9 = vld [vmem:[%s9887_s5 + $0x48] sm:$0xff]  }
 0x2b5   :  { %v7693_v31 = vld [vmem:[%s9887_s5 + $0x88] sm:$0xff]  }
 0x2b7   :  { %4908 = vmatpush1.bf16.msra.mxu0 %v4890_v29  ;;  %4949 = vmatpush1.bf16.msra.mxu1 %v4896_v49 }
 0x2ba   :  { %6497 = vmatmul.mubr.msk.bf16.vlgmr.msra.gmra.mrb[188].mxu0 %vm2103_vm3, %v4800_v58  ;;  %6499 = vmatmul.mubr.msk.bf16.vlgmr.msra.gmra.mrb[188].mxu1 %vm2103_vm3, %v4800_v58  ;;  %v7696_v58 = vld [vmem:[%s9887_s5 + $0x50] sm:$0xff]  }
 0x2bd   :  { %v2504_v43 = vpop.f32.mrb[136].mxu0  ;;  %v2545_v12 = vpop.f32.mrb[136].mxu1 }
 0x2be   :  { %v2552_v16 = vadd.f32 %v2504_v43, %v2322_v33  ;;  %v2554_v26 = vadd.f32 %v2545_v12, %v2363_v42  ;;  %v2506_v40 = vpop.f32.mrb[137].mxu0  ;;  %v2547_v30 = vpop.f32.mrb[137].mxu1  ;;  %v7697_v43 = vld [vmem:[%s9887_s5 + $0x90] sm:$0xff]  }
 0x2bf   :  { %v2553_v61 = vadd.f32 %v2506_v40, %v2324_v24  ;;  %v2555_v15 = vadd.f32 %v2547_v30, %v2365_v4  ;;  %v2508_v53 = vpop.f32.mrb[138].mxu0  ;;  %v2549_v36 = vpop.f32.mrb[138].mxu1  ;;  %v7687_v24 = vld [vmem:[%s9887_s5 + $0xc0] sm:$0xff]   ;;  %v7698_v30 = vld [vmem:[%s9887_s5 + $0x10] sm:$0xff]  }
 0x2c0   :  { %v2509_v34 = vpop.f32.mrb[139].mxu0  ;;  %v2550_v39 = vpop.f32.mrb[139].mxu1  ;;  %v7688_v4 = vld [vmem:[%s9887_s5 + $0x40] sm:$0xff]   ;;  %7071 = vmatprep.subr.bf16.mxu1 %v7687_v24  ;;  %v7699_v53 = vld [vmem:[%s9887_s5 + $0xd8] sm:$0xff]  }
 0x2c1   :  { %7049 = vmatprep.subr.bf16.mxu0 %v7688_v4  ;;  %7072 = vmatpush3.bf16.msra.mxu1 %v7689_v48  ;;  %v7700_v36 = vld [vmem:[%s9887_s5 + $0x58] sm:$0xff]  }
 0x2c2   :  { %7050 = vmatpush3.bf16.msra.mxu0 %v7690_v3  ;;  %7073 = vmatprep.subr.bf16.mxu1 %v7691_v54  ;;  %v7701_v34 = vld [vmem:[%s9887_s5 + $0x98] sm:$0xff]  }
 0x2c3   :  { %7051 = vmatprep.subr.bf16.mxu0 %v7692_v9  ;;  %v7702_v39 = vld [vmem:[%s9887_s5 + $0x18] sm:$0xff]  }
 0x2c5   :  { %7074 = vmatpush3.bf16.msra.mxu1 %v7693_v31 }
 0x2c6   :  { %7052 = vmatpush3.bf16.msra.mxu0 %v7694_v44  ;;  %7075 = vmatprep.subr.bf16.mxu1 %v7695_v2 }
 0x2c7   :  { %7053 = vmatprep.subr.bf16.mxu0 %v7696_v58 }
 0x2c9   :  { %7076 = vmatpush3.bf16.msra.mxu1 %v7697_v43 }
 0x2ca   :  { %7054 = vmatpush3.bf16.msra.mxu0 %v7698_v30  ;;  %7077 = vmatprep.subr.bf16.mxu1 %v7699_v53 }
 0x2cb   :  { %7055 = vmatprep.subr.bf16.mxu0 %v7700_v36 }
 0x2cd   :  { %v2691_v37 = vpop.f32.mrb[140].mxu0  ;;  %v2732_v38 = vpop.f32.mrb[140].mxu1  ;;  %7078 = vmatpush3.bf16.msra.mxu1 %v7701_v34 }
 0x2ce   :  { %v2739_v57 = vadd.f32 %v2691_v37, %v2552_v16  ;;  %v2741_v6 = vadd.f32 %v2732_v38, %v2554_v26  ;;  %v2693_v20 = vpop.f32.mrb[141].mxu0  ;;  %v2734_v18 = vpop.f32.mrb[141].mxu1  ;;  %v7703_v37 = vld [vmem:[%s9887_s5 + $0xe0] sm:$0xff]   ;;  %7056 = vmatpush3.bf16.msra.mxu0 %v7702_v39 }
 0x2cf   :  { %v2740_v8 = vadd.f32 %v2693_v20, %v2553_v61  ;;  %v2742_v7 = vadd.f32 %v2734_v18, %v2555_v15  ;;  %v2695_v25 = vpop.f32.mrb[142].mxu0  ;;  %v2736_v63 = vpop.f32.mrb[142].mxu1  ;;  %v7704_v38 = vld [vmem:[%s9887_s5 + $0x60] sm:$0xff]   ;;  %7079 = vmatprep.subr.bf16.mxu1 %v7703_v37  ;;  %v7707_v20 = vld [vmem:[%s9887_s5 + $0xe8] sm:$0xff]  }
 0x2d0   :  { %v2696_v27 = vpop.f32.mrb[143].mxu0  ;;  %v2737_v11 = vpop.f32.mrb[143].mxu1  ;;  %7057 = vmatprep.subr.bf16.mxu0 %v7704_v38  ;;  %v7708_v18 = vld [vmem:[%s9887_s5 + $0x68] sm:$0xff]  }
 0x2dd   :  { %v2878_v13 = vpop.f32.mrb[144].mxu0  ;;  %v2919_v59 = vpop.f32.mrb[144].mxu1 }
 0x2de   :  { %v2926_v46 = vadd.f32 %v2878_v13, %v2739_v57  ;;  %v2928_v50 = vadd.f32 %v2919_v59, %v2741_v6  ;;  %v2880_v35 = vpop.f32.mrb[145].mxu0  ;;  %v2921_v41 = vpop.f32.mrb[145].mxu1  ;;  %v7705_v57 = vld [vmem:[%s9887_s5 + $0xa0] sm:$0xff]  }
 0x2df   :  { %v2927_v56 = vadd.f32 %v2880_v35, %v2740_v8  ;;  %v2929_v60 = vadd.f32 %v2921_v41, %v2742_v7  ;;  %v2882_v1 = vpop.f32.mrb[146].mxu0  ;;  %v2923_v52 = vpop.f32.mrb[146].mxu1  ;;  %v7706_v6 = vld [vmem:[%s9887_s5 + $0x20] sm:$0xff]   ;;  %7080 = vmatpush3.bf16.msra.mxu1 %v7705_v57  ;;  %v7709_v8 = vld [vmem:[%s9887_s5 + $0xa8] sm:$0xff]   ;;  %v7713_v35 = vld [vmem:[%s9887_s5 + $0xb0] sm:$0xff]  }
 0x2e0   :  { %v2883_v32 = vpop.f32.mrb[147].mxu0  ;;  %v2924_v62 = vpop.f32.mrb[147].mxu1  ;;  %7058 = vmatpush3.bf16.msra.mxu0 %v7706_v6  ;;  %7081 = vmatprep.subr.bf16.mxu1 %v7707_v20  ;;  %v7710_v7 = vld [vmem:[%s9887_s5 + $0x28] sm:$0xff]   ;;  %v7714_v52 = vld [vmem:[%s9887_s5 + $0x30] sm:$0xff]  }
 0x2e1   :  { %7059 = vmatprep.subr.bf16.mxu0 %v7708_v18 }
 0x2e3   :  { %7082 = vmatpush3.bf16.msra.mxu1 %v7709_v8 }
 0x2e4   :  { %7060 = vmatpush3.bf16.msra.mxu0 %v7710_v7 }
 0x2ed   :  { %v3065_v23 = vpop.f32.mrb[148].mxu0  ;;  %v3106_v0 = vpop.f32.mrb[148].mxu1 }
 0x2ee   :  { %v3113_v5 = vadd.f32 %v3065_v23, %v2926_v46  ;;  %v3115_v22 = vadd.f32 %v3106_v0, %v2928_v50  ;;  %v3067_v19 = vpop.f32.mrb[149].mxu0  ;;  %v3108_v55 = vpop.f32.mrb[149].mxu1  ;;  %v7711_v46 = vld [vmem:[%s9887_s5 + $0xf0] sm:$0xff]   ;;  %v7715_v23 = vld [vmem:[%s9887_s5 + $0xf8] ss:$0 sps:$4 sm:$0x33]  }
 0x2ef   :  { %v3114_v17 = vadd.f32 %v3067_v19, %v2927_v56  ;;  %v3116_v21 = vadd.f32 %v3108_v55, %v2929_v60  ;;  %v3069_v33 = vpop.f32.mrb[150].mxu0  ;;  %v3110_v42 = vpop.f32.mrb[150].mxu1  ;;  %v7712_v50 = vld [vmem:[%s9887_s5 + $0x70] sm:$0xff]   ;;  %7083 = vmatprep.subr.bf16.mxu1 %v7711_v46  ;;  %v7716_v0 = vld [vmem:[%s9887_s5 + $0x78] sm:$0xff]  }
 0x2f0   :  { %v3070_v51 = vpop.f32.mrb[151].mxu0  ;;  %v3111_v45 = vpop.f32.mrb[151].mxu1  ;;  %7061 = vmatprep.subr.bf16.mxu0 %v7712_v50  ;;  %7084 = vmatpush3.bf16.msra.mxu1 %v7713_v35 }
 0x2f1   :  { %7062 = vmatpush3.bf16.msra.mxu0 %v7714_v52  ;;  %7104 = vmatprep.subr.msk.bf16.mxu1 %vm508_vm0, %v7715_v23 }
 0x2f2   :  { %7063 = vmatprep.subr.bf16.mxu0 %v7716_v0 }
 0x2fd   :  { %v3252_v10 = vpop.f32.mrb[152].mxu0  ;;  %v3293_v47 = vpop.f32.mrb[152].mxu1 }
 0x2fe   :  { %v3300_v14 = vadd.f32 %v3252_v10, %v3113_v5  ;;  %v3302_v28 = vadd.f32 %v3293_v47, %v3115_v22  ;;  %v3254_v29 = vpop.f32.mrb[153].mxu0  ;;  %v3295_v49 = vpop.f32.mrb[153].mxu1  ;;  %v7717_v5 = vld [vmem:[%s9887_s5 + $0xb8] sm:$0xff]  }
 0x2ff   :  { %v3301_v12 = vadd.f32 %v3254_v29, %v3114_v17  ;;  %v3303_v16 = vadd.f32 %v3295_v49, %v3116_v21  ;;  %v3256_v26 = vpop.f32.mrb[154].mxu0  ;;  %v3297_v40 = vpop.f32.mrb[154].mxu1  ;;  %v7718_v22 = vld [vmem:[%s9887_s5 + $0x38] sm:$0xff]   ;;  %7086 = vmatpush3.bf16.msra.mxu1 %v7717_v5 }
 0x300   :  { %v3257_v61 = vpop.f32.mrb[155].mxu0  ;;  %v3298_v15 = vpop.f32.mrb[155].mxu1  ;;  %7064 = vmatpush3.bf16.msra.mxu0 %v7718_v22 }
 0x30d   :  { %v3439_v25 = vpop.f32.mrb[156].mxu0  ;;  %v3480_v63 = vpop.f32.mrb[156].mxu1 }
 0x30e   :  { %v3487_v27 = vadd.f32 %v3439_v25, %v3300_v14  ;;  %v3489_v11 = vadd.f32 %v3480_v63, %v3302_v28  ;;  %v3441_v13 = vpop.f32.mrb[157].mxu0  ;;  %v3482_v59 = vpop.f32.mrb[157].mxu1 }
 0x30f   :  { %v3488_v41 = vadd.f32 %v3441_v13, %v3301_v12  ;;  %v3490_v56 = vadd.f32 %v3482_v59, %v3303_v16  ;;  %v3443_v60 = vpop.f32.mrb[158].mxu0  ;;  %v3484_v1 = vpop.f32.mrb[158].mxu1 }
 0x310   :  { %v3444_v32 = vpop.f32.mrb[159].mxu0  ;;  %v3485_v62 = vpop.f32.mrb[159].mxu1 }
 0x31d   :  { %v3626_v19 = vpop.f32.mrb[160].mxu0  ;;  %v3667_v55 = vpop.f32.mrb[160].mxu1 }
 0x31e   :  { %v3674_v17 = vadd.f32 %v3626_v19, %v3487_v27  ;;  %v3676_v21 = vadd.f32 %v3667_v55, %v3489_v11  ;;  %v3628_v33 = vpop.f32.mrb[161].mxu0  ;;  %v3669_v42 = vpop.f32.mrb[161].mxu1 }
 0x31f   :  { %v3675_v51 = vadd.f32 %v3628_v33, %v3488_v41  ;;  %v3677_v45 = vadd.f32 %v3669_v42, %v3490_v56  ;;  %v3630_v24 = vpop.f32.mrb[162].mxu0  ;;  %v3671_v4 = vpop.f32.mrb[162].mxu1 }
 0x320   :  { %v3631_v48 = vpop.f32.mrb[163].mxu0  ;;  %v3672_v3 = vpop.f32.mrb[163].mxu1 }
 0x32d   :  { %v3813_v54 = vpop.f32.mrb[164].mxu0  ;;  %v3854_v9 = vpop.f32.mrb[164].mxu1 }
 0x32e   :  { %v3861_v31 = vadd.f32 %v3813_v54, %v3674_v17  ;;  %v3863_v44 = vadd.f32 %v3854_v9, %v3676_v21  ;;  %v3815_v10 = vpop.f32.mrb[165].mxu0  ;;  %v3856_v47 = vpop.f32.mrb[165].mxu1 }
 0x32f   :  { %v3862_v2 = vadd.f32 %v3815_v10, %v3675_v51  ;;  %v3864_v14 = vadd.f32 %v3856_v47, %v3677_v45  ;;  %v3817_v28 = vpop.f32.mrb[166].mxu0  ;;  %v3858_v29 = vpop.f32.mrb[166].mxu1 }
 0x330   :  { %v3818_v49 = vpop.f32.mrb[167].mxu0  ;;  %v3859_v58 = vpop.f32.mrb[167].mxu1  ;;  %v4989_v28 = vlaneseq }
 0x332   :  { %v9816_v29 = vshrl.u32 %v4989_v28, 7 }
 0x334   :  { %v9819_v49 = vsub.s32 0, %v9816_v29  ;;  %v4999_v58 = vsub.s32 2, %v9816_v29 }
 0x33d   :  { %v4000_v43 = vpop.f32.mrb[168].mxu0  ;;  %v4041_v12 = vpop.f32.mrb[168].mxu1 }
 0x33e   :  { %v4048_v16 = vadd.f32 %v4000_v43, %v3861_v31  ;;  %v4050_v26 = vadd.f32 %v4041_v12, %v3863_v44  ;;  %v4002_v40 = vpop.f32.mrb[169].mxu0  ;;  %v4043_v30 = vpop.f32.mrb[169].mxu1  ;;  %v4987_v43 = vld [vmem:[%s9886_s4] sm:$0xf]  ;;  %v4995_v12 = vsub.s32 1, %v9816_v29 }
 0x33f   :  { %v4049_v61 = vadd.f32 %v4002_v40, %v3862_v2  ;;  %v4051_v15 = vadd.f32 %v4043_v30, %v3864_v14  ;;  %v4004_v53 = vpop.f32.mrb[170].mxu0  ;;  %v4045_v36 = vpop.f32.mrb[170].mxu1  ;;  %v5000_v40 = vrot.slane %v4987_v43, %v4999_v58 }
 0x340   :  { %v4005_v34 = vpop.f32.mrb[171].mxu0  ;;  %v4046_v39 = vpop.f32.mrb[171].mxu1 }
 0x34d   :  { %v4187_v37 = vpop.f32.mrb[172].mxu0  ;;  %v4228_v38 = vpop.f32.mrb[172].mxu1 }
 0x34e   :  { %v4235_v57 = vadd.f32 %v4187_v37, %v4048_v16  ;;  %v4237_v6 = vadd.f32 %v4228_v38, %v4050_v26  ;;  %v4189_v20 = vpop.f32.mrb[173].mxu0  ;;  %v4230_v18 = vpop.f32.mrb[173].mxu1  ;;  %v5003_v16 = vsub.s32 3, %v9816_v29  ;;  %v4992_v26 = vrot.slane %v4987_v43, %v9819_v49 }
 0x34f   :  { %v4236_v8 = vadd.f32 %v4189_v20, %v4049_v61  ;;  %v4238_v7 = vadd.f32 %v4230_v18, %v4051_v15  ;;  %v4191_v25 = vpop.f32.mrb[174].mxu0  ;;  %v4232_v63 = vpop.f32.mrb[174].mxu1  ;;  %v4996_v15 = vrot.slane %v4987_v43, %v4995_v12 }
 0x350   :  { %v4192_v27 = vpop.f32.mrb[175].mxu0  ;;  %v4233_v11 = vpop.f32.mrb[175].mxu1  ;;  %v5004_v53 = vrot.slane %v4987_v43, %v5003_v16 }
 0x35d   :  { %v4374_v13 = vpop.f32.mrb[176].mxu0  ;;  %v4415_v59 = vpop.f32.mrb[176].mxu1 }
 0x35e   :  { %v4422_v46 = vadd.f32 %v4374_v13, %v4235_v57  ;;  %v4424_v50 = vadd.f32 %v4415_v59, %v4237_v6  ;;  %v4376_v35 = vpop.f32.mrb[177].mxu0  ;;  %v4417_v41 = vpop.f32.mrb[177].mxu1 }
 0x35f   :  { %v4423_v56 = vadd.f32 %v4376_v35, %v4236_v8  ;;  %v4425_v60 = vadd.f32 %v4417_v41, %v4238_v7  ;;  %v4378_v1 = vpop.f32.mrb[178].mxu0  ;;  %v4419_v52 = vpop.f32.mrb[178].mxu1 }
 0x360   :  { %v4379_v32 = vpop.f32.mrb[179].mxu0  ;;  %v4420_v62 = vpop.f32.mrb[179].mxu1  ;;  %v5368_v1 = vld [vmem:[#allocation2] sm:$0x1] }
 0x361   :  { %5371 = vperm.xlu0 %7110, %v5368_v1   ;;  %v6500_v62 = vld [vmem:[%s9888_s6] ss:$0 sm:$0xff] }
 0x36d   :  { %v4561_v23 = vpop.f32.mrb[180].mxu0  ;;  %v4602_v0 = vpop.f32.mrb[180].mxu1 }
 0x36e   :  { %v4609_v5 = vadd.f32 %v4561_v23, %v4422_v46  ;;  %v4611_v22 = vadd.f32 %v4602_v0, %v4424_v50  ;;  %v4563_v19 = vpop.f32.mrb[181].mxu0  ;;  %v4604_v55 = vpop.f32.mrb[181].mxu1 }
 0x36f   :  { %v4610_v17 = vadd.f32 %v4563_v19, %v4423_v56  ;;  %v4612_v21 = vadd.f32 %v4604_v55, %v4425_v60  ;;  %v4565_v33 = vpop.f32.mrb[182].mxu0  ;;  %v4606_v42 = vpop.f32.mrb[182].mxu1  ;;  %v7808_v60 = vmov 0.0  }
 0x370   :  { %v4566_v51 = vpop.f32.mrb[183].mxu0  ;;  %v4607_v45 = vpop.f32.mrb[183].mxu1  ;;  %7095 = vmatprep.subr.mxu0 %v7808_v60 }
 0x371   :  { %v5367_v45 = vld [vmem:[%s9889_s7] sm:$0x1] }
 0x37d   :  { %v4748_v24 = vpop.f32.mrb[184].mxu0  ;;  %v4789_v4 = vpop.f32.mrb[184].mxu1 }
 0x37e   :  { %v4796_v48 = vadd.f32 %v4748_v24, %v4609_v5  ;;  %v4798_v3 = vadd.f32 %v4789_v4, %v4611_v22  ;;  %v4750_v54 = vpop.f32.mrb[185].mxu0  ;;  %v4791_v9 = vpop.f32.mrb[185].mxu1 }
 0x37f   :  { %v4797_v31 = vadd.f32 %v4750_v54, %v4610_v17  ;;  %v4799_v44 = vadd.f32 %v4791_v9, %v4612_v21  ;;  %v4752_v10 = vpop.f32.mrb[186].mxu0  ;;  %v4793_v47 = vpop.f32.mrb[186].mxu1 }
 0x380   :  { %v4753_v2 = vpop.f32.mrb[187].mxu0  ;;  %v4794_v14 = vpop.f32.mrb[187].mxu1 }
 0x38d   :  { %v4935_v30 = vpop.f32.mrb[188].mxu0  ;;  %v4976_v61 = vpop.f32.mrb[188].mxu1 }
 0x38e   :  { %v4983_v36 = vadd.f32 %v4935_v30, %v4796_v48  ;;  %v4985_v34 = vadd.f32 %v4976_v61, %v4798_v3  ;;  %v4937_v39 = vpop.f32.mrb[189].mxu0  ;;  %v4978_v37 = vpop.f32.mrb[189].mxu1 }
 0x38f   :  { %v4984_v38 = vadd.f32 %v4937_v39, %v4797_v31  ;;  %v4986_v57 = vadd.f32 %v4978_v37, %v4799_v44  ;;  %v4939_v6 = vpop.f32.mrb[190].mxu0  ;;  %v4980_v20 = vpop.f32.mrb[190].mxu1 }
 0x390   :  { %v5009_v18 = vadd.f32 %v4992_v26, %v4983_v36  ;;  %v5011_v8 = vadd.f32 %v5000_v40, %v4985_v34  ;;  %v4940_v7 = vpop.f32.mrb[191].mxu0  ;;  %v4981_v25 = vpop.f32.mrb[191].mxu1  ;;  %v5606_v26 = vld [vmem:[%s9891_s9] sm:$0xf]  ;;  %s7810_s9 = smov [#allocation6]  }
 0x391   :  { %v5010_v63 = vadd.f32 %v4996_v15, %v4984_v38  ;;  %v5012_v27 = vadd.f32 %v5004_v53, %v4986_v57  ;;  %v5611_v40 = vrot.slane %v5606_v26, %v9819_v49  ;;  %v5619_v30 = vrot.slane %v5606_v26, %v4999_v58  ;;  %s5669_s0 = sshll.u32 %s7810_s9, 4  ;;  %s5670_s0 = int_to_ptr.vmem [resolvable:$true] %s5669_s0 }
 0x392   :  { %v5013_v11 = vmax.f32 %v5009_v18, 0.0  ;;  %v5015_v13 = vmax.f32 %v5011_v8, 0.0  ;;  %v5615_v61 = vrot.slane %v5606_v26, %v4995_v12  ;;  %v5623_v36 = vrot.slane %v5606_v26, %v5003_v16  ;;  %s7759_s29 = scalar_lea.vmem %s5670_s0, 16  ;;  %s7763_s10 = scalar_lea.vmem %s5670_s0, 32 }
 0x393   :  { %v5014_v59 = vmax.f32 %v5010_v63, 0.0  ;;  %v5016_v46 = vmax.f32 %v5012_v27, 0.0  ;;  %p7760_p0 = scmp.ne.s32.totalorder %s5670_s0, %s7759_s29  ;;  %p7764_p1 = scmp.lt.s32.totalorder %s5670_s0, %s5670_s0 }
 0x394   :  { %v5017_v41 = vpack.c.bf16 %v5013_v11, %v5013_v11  ;;  %v5019_v56 = vpack.c.bf16 %v5015_v13, %v5015_v13  ;;  %p7765_p2 = scmp.lt.s32.totalorder %s7763_s10, %s7759_s29 }
 0x395   :  { %v5020_v50 = vpack.c.bf16 %v5016_v46, %v5016_v46  ;;  %5464 = vmatprep.subr.mxu1 %v5014_v59  ;;  %v5018_v35 = vpack.c.bf16 %v5014_v59, %v5014_v59 }
 0x396   :  { %p7766_p3 = por %p7765_p2, %p7764_p1 }
 0x397   :  { %5318 = vmatprep.mubr.bf16.mxu0 %v5018_v35  ;;  %6533 = vmatprep.mubr.msk.bf16.mxu1 %vm483_vm1, %v5020_v50 }
 0x398   :  { %5319 = vmatmul.mubr.bf16.vlgmr.msra.gmra.mrb[192].mxu0 %v5017_v41  ;;  %5359 = vmatmul.mubr.bf16.vlgmr.msra.gmra.mrb[192].mxu1 %v5019_v56  ;;  %p7767_p4 = pnand %p7766_p3, %p7760_p0 }
 0x399   :  { %5465 = vmatpush1.msra.mxu1 %v5013_v11  ;;  %5528 = vmatprep.mubr.f32.mxu1 %v7808_v60 }
 0x39a   :  { %7097 = vmatprep.mubr.msk.f32.mxu0 %vm7809_vm4, %v7808_v60 }
 0x3e0   :  { %v5372_v24 = vpop.permute.xlu0 %5371 }
 0x3e1   :  { %v5377_v4 = vrot.slane %v5372_v24, %v9819_v49 }
 0x46b   :  { %v7065_v52 = vpop.f32.mrb[192].mxu0  ;;  %v7087_v32 = vpop.f32.mrb[192].mxu1 }
 0x46c   :  { %v7066_v23 = vpop.f32.mrb[193].mxu0  ;;  %v7088_v0 = vpop.f32.mrb[193].mxu1 }
 0x46d   :  { %v7067_v5 = vadd.f32 %v7066_v23, %v7065_v52  ;;  %v7089_v22 = vadd.f32 %v7088_v0, %v7087_v32  ;;  %v7068_v19 = vpop.f32.mrb[194].mxu0  ;;  %v7090_v55 = vpop.f32.mrb[194].mxu1 }
 0x46e   :  { %v7069_v17 = vpop.f32.mrb[195].mxu0  ;;  %v7091_v21 = vpop.f32.mrb[195].mxu1 }
 0x46f   :  { %v5321_v33 = vadd.f32 %v7067_v5, %v6500_v62 }
 0x471   :  { %v5361_v42 = vadd.f32 %v7089_v22, %v5321_v33 }
 0x473   :  { %7719 = vtanh.f32 %v5361_v42 }
 0x47d   :  { %v7720_v51 = vpop.eup %7719 }
 0x47e   :  { %7096 = vmatpush3.xpose.msra.mxu0 %v7720_v51 }
 0x47f   :  { %5535 = vmatprep.subr.mxu0 %v5016_v46 }
 0x481   :  { %7098 = vmatmul.mubr.f32.vlgmr.msra.gmra.mrb[196].mxu0 %v5367_v45 }
 0x482   :  { %5536 = vmatpush1.msra.mxu0 %v5015_v13  ;;  %5599 = vmatprep.mubr.f32.mxu0 %v7808_v60 }
 0x554   :  { %v5444_v48 = vpop.f32.mrb[196].mxu0 }
 0x555   :  { %v5445_v3 = vadd.f32 %v5444_v48, %v5377_v4  ;;  %v7099_v54 = vpop.f32.mrb[197].mxu0 }
 0x557   :  { %v5449_v9 = vsel %vm5448_vm5, %v5445_v3, -inf }
 0x558   :  { %5450 = vmax.xlane.f32.xlu0 %v5449_v9 }
 0x5e5   :  { %v5451_v31 = vpop.xlane.xlu0 %5450 }
 0x5e6   :  { %v5452_v44 = vsub.f32 %v5445_v3, %v5451_v31 }
 0x5e8   :  { %v5453_v10 = vmul.f32 1.442695, %v5452_v44 }
 0x5ea   :  { %7721 = vpow2.f32 %v5453_v10 }
 0x5f4   :  { %v7722_v47 = vpop.eup %7721 }
 0x5f5   :  { %v5455_v2 = vsel %vm5448_vm5, %v7722_v47, 0.0 }
 0x5f6   :  { %5456 = vadd.xlane.f32.xlu1 %v5455_v2 }
 0x683   :  { %v5457_v14 = vpop.xlane.xlu1 %5456 }
 0x684   :  { %7723 = vrcp.f32 %v5457_v14 }
 0x68e   :  { %v7724_v28 = vpop.eup %7723 }
 0x68f   :  { %v5459_v43 = vmul.f32 %v7724_v28, %v7722_v47 }
 0x691   :  { %5652 = vst.msk [vmem:[#allocation6] sm:$0x1] %vm5448_vm5, %v5459_v43  ;;  %6534 = vmatmul.mubr.msk.f32.vlgmr.msra.gmra.mrb[196].mxu1 %vm5460_vm6, %v5459_v43  ;;  %6535 = vmatmul.mubr.msk.f32.vlgmr.msra.gmra.mrb[198].mxu0 %vm5460_vm6, %v5459_v43 }
 0x764   :  { %v5530_v15 = vpop.f32.mrb[196].mxu1  ;;  %v5601_v53 = vpop.f32.mrb[198].mxu0 }
 0x765   :  { %v5628_v34 = vmul.f32 %v5611_v40, %v5530_v15  ;;  %v5532_v39 = vpop.f32.mrb[197].mxu1  ;;  %v5603_v37 = vpop.f32.mrb[199].mxu0  ;;  %v5630_v38 = vmul.f32 %v5619_v30, %v5601_v53 }
 0x766   :  { %v5629_v57 = vmul.f32 %v5615_v61, %v5532_v39  ;;  %v5631_v20 = vmul.f32 %v5623_v36, %v5603_v37 }
 0x767   :  { %v5632_v6 = vsel %vm2107_vm2, %v5628_v34, 0.0  ;;  %v5635_v58 = vsel %vm2107_vm2, %v5630_v38, 0.0 }
 0x768   :  { %v5633_v49 = vsel %vm2107_vm2, %v5629_v57, 0.0  ;;  %v5638_v8 = vsel %vm5637_vm7, %v5631_v20, 0.0 }
 0x769   :  { %v5634_v18 = vadd.f32 %v5633_v49, %v5632_v6 }
 0x76b   :  { %v5636_v12 = vadd.f32 %v5635_v58, %v5634_v18 }
 0x76d   :  { %v5639_v7 = vadd.f32 %v5638_v8, %v5636_v12 }
 0x76f   :  { %5640 = vadd.xlane.f32.xlu1 %v5639_v7 }
 0x770   :  { %7770 = shalt.err (!%p7767_p4)
}
 0x771   :  { %s7771_s13 = scalar_lea.hbm %s9893_s12, 16 }
 0x772   :  { %p7772_p5 = scmp.ne.s32.totalorder %s9893_s12, %s7771_s13  ;;  %p7775_p6 = scmp.lt.u32.totalorder %s7771_s13, %s9893_s12 }
 0x774   :  { %p7777_p7 = pnand %p7775_p6, %p7772_p5 }
 0x776   :  { %7780 = shalt.err (!%p7777_p7)
}
 0x777   :  { %5672 = dma.vmem_to_hbm [thread:$0]  %s5670_s0, 16, %s9893_s12, [#allocation7]   ;;  %v5642_v29 = vld [vmem:[#allocation3] sm:$0x1]  ;;  %vm5650_vm8 = vcmask 0  }
 0x778   :  { %s7811_s19 = smov [#allocation4]  }
 0x779   :  { %s5659_s20 = sshll.u32 %s7811_s19, 4  ;;  %s5660_s20 = int_to_ptr.vmem [resolvable:$true] %s5659_s20 }
 0x77a   :  { %s7781_s21 = scalar_lea.vmem %s5660_s20, 16  ;;  %s7785_s22 = scalar_lea.vmem %s5660_s20, 32 }
 0x77b   :  { %p7782_p8 = scmp.ne.s32.totalorder %s5660_s20, %s7781_s21  ;;  %p7786_p9 = scmp.lt.s32.totalorder %s5660_s20, %s5660_s20 }
 0x77c   :  { %p7787_p10 = scmp.lt.s32.totalorder %s7785_s22, %s7781_s21 }
 0x77e   :  { %p7788_p11 = por %p7787_p10, %p7786_p9 }
 0x780   :  { %p7789_p12 = pnand %p7788_p11, %p7782_p8 }
 0x7fc   :  { %v5641_v16 = vpop.xlane.xlu1 %5640 }
 0x7fd   :  { %v5643_v25 = vadd.f32 %v5642_v29, %v5641_v16 }
 0x7ff   :  { %v6536_v63 = vmul.f32 -1.442695, %v5643_v25 }
 0x801   :  { %7725 = vpow2.f32 %v6536_v63 }
 0x80b   :  { %v7726_v27 = vpop.eup %7725 }
 0x80c   :  { %v5647_v11 = vadd.f32 1.0, %v7726_v27 }
 0x80e   :  { %7727 = vrcp.f32 %v5647_v11 }
 0x818   :  { %v7728_v13 = vpop.eup %7727 }
 0x819   :  { %5651 = vst.msk [vmem:[#allocation4] sm:$0x1] %vm5650_vm8, %v7728_v13 }
 0x81a   :  { %7792 = shalt.err (!%p7789_p12)
}
 0x81b   :  { %s7793_s24 = scalar_lea.hbm %s9892_s11, 16 }
 0x81c   :  { %p7794_p13 = scmp.ne.s32.totalorder %s9892_s11, %s7793_s24  ;;  %p7797_p0 = scmp.lt.u32.totalorder %s7793_s24, %s9892_s11 }
 0x81e   :  { %p7799_p1 = pnand %p7797_p0, %p7794_p13 }
 0x820   :  { %7802 = shalt.err (!%p7799_p1)
}
 0x821   :  { %5662 = dma.vmem_to_hbm [thread:$0]  %s5660_s20, 16, %s9892_s11, [#allocation5]  }
 0x822   :  { %7803 = dma.done.wait [#allocation5], 16  }
 0x823   :  { %7804 = vsyncadd [#allocation5], 4294967280 }
 0x824   :  { %7805 = dma.done.wait [#allocation7], 16  }
 0x825   :  { %7806 = vsyncadd [#allocation7], 4294967280 }
 0x826   :  { %5679 = vsyncpa [#allocation5], 1 }
 0x827   :  { %5680 = vsyncpa [#allocation7], 1 }

</bundles_post_ra>
